<compile_context>
chip_gen: v7x
topology: tpu7x:2x2x1
jax: 0.10.0
libtpu: 0.0.40
codegen_flags: <defaults>
</compile_context>

<pallas_src>
import functools

import jax
import jax.numpy as jnp
import numpy as np
from jax.experimental import pallas as pl
from jax.experimental.pallas import tpu as pltpu

LEAKY_SLOPE = 0.01   # nn.LeakyReLU default
BN_EPS = 1e-5        # nn.BatchNorm3d default
HIDDEN = 1024        # hard-coded in the module


def _round_up(x, m):
    return ((x + m - 1) // m) * m


def _pick_tk(K):
    """K is always a multiple of 256 (channel-padded).  Single step when K <= 2048."""
    if K <= 2048:
        return K
    for c in (2048, 1024, 512, 256):
        if K % c == 0:
            return c
    return 256


def _choose_row_col_tiles(M, Np):
    """Row tile (mult of 16 for bf16 packing, up to 512) and lane tile; make sure the
    conv GEMM grid has >= 2 parallel blocks so both v7x TensorCores get work."""
    tm = min(512, _round_up(M, 16))
    tn = 256 if Np % 256 == 0 else 128
    nI = _round_up(M, tm) // tm
    nJ = Np // tn
    if nI * nJ < 2:
        if Np // 128 >= 2:
            tn = 128
        elif tm >= 32:
            tm = max(16, _round_up(tm // 2, 16))
    Mp = _round_up(M, tm)
    return tm, tn, Mp


# ---------------------------------------------------------------------------
# Pallas kernels
# ---------------------------------------------------------------------------

def _conv_epilogue(y, i, tm, n_valid_rows, y_ref, psum_ref, psq_ref):
    """Store bf16 activation tile + per-channel masked partial BN statistics."""
    y_ref[...] = y.astype(y_ref.dtype)
    rows = jax.lax.broadcasted_iota(jnp.int32, y.shape, 0)
    valid = rows < (n_valid_rows - i * tm)
    ym = jnp.where(valid, y, 0.0)
    s = jnp.sum(ym, axis=0, keepdims=True)
    sq = jnp.sum(ym * ym, axis=0, keepdims=True)
    # Stats block is 8 sublanes tall; replicate the row (finalize reads row 0 only).
    psum_ref[...] = jnp.broadcast_to(s, psum_ref.shape)
    psq_ref[...] = jnp.broadcast_to(sq, psq_ref.shape)


def _conv_gemm_k1_kernel(a_ref, b_ref, bias_ref, y_ref, psum_ref, psq_ref,
                         *, n_valid_rows, tm):
    """Single-K-step conv GEMM: no accumulator scratch / zero-fill round trip."""
    i = pl.program_id(0)
    y = jnp.dot(a_ref[...], b_ref[...], preferred_element_type=jnp.float32) + bias_ref[...]
    y = jnp.where(y >= 0, y, LEAKY_SLOPE * y)
    _conv_epilogue(y, i, tm, n_valid_rows, y_ref, psum_ref, psq_ref)


def _conv_gemm_kernel(a_ref, b_ref, bias_ref, y_ref, psum_ref, psq_ref, acc_ref,
                      *, n_valid_rows, tm, n_k):
    """Multi-K-step conv GEMM with fp32 accumulator.  All program_id calls are at the
    top level of the kernel body (required by the interpret/CPU fallback path)."""
    i = pl.program_id(0)
    k = pl.program_id(2)

    @pl.when(k == 0)
    def _():
        acc_ref[...] = jnp.zeros_like(acc_ref)

    acc_ref[...] += jnp.dot(a_ref[...], b_ref[...], preferred_element_type=jnp.float32)

    @pl.when(k == n_k - 1)
    def _():
        y = acc_ref[...] + bias_ref[...]
        y = jnp.where(y >= 0, y, LEAKY_SLOPE * y)
        _conv_epilogue(y, i, tm, n_valid_rows, y_ref, psum_ref, psq_ref)


def _bn_apply_kernel(y_ref, scale_ref, shift_ref, o_ref):
    """Apply precomputed BN scale/shift to one row tile (pure mem-bound pass)."""
    y = y_ref[...].astype(jnp.float32)
    o_ref[...] = (y * scale_ref[...] + shift_ref[...]).astype(o_ref.dtype)


def _mlp_kernel(x_ref, w1_ref, b1_ref, w2_ref, b2_ref, o_ref, h_ref, *, n_k):
    """Fused Linear -> LeakyReLU -> Linear.  The first matmul's K dim is split over the
    grid so W1 streaming overlaps compute; the hidden activation stays in VMEM."""
    k = pl.program_id(0)

    @pl.when(k == 0)
    def _():
        h_ref[...] = jnp.zeros_like(h_ref)

    h_ref[...] += jnp.dot(x_ref[...], w1_ref[...], preferred_element_type=jnp.float32)

    @pl.when(k == n_k - 1)
    def _():
        h = h_ref[...] + b1_ref[...]
        h = jnp.where(h >= 0, h, LEAKY_SLOPE * h)
        o = jnp.dot(h.astype(jnp.bfloat16), w2_ref[...],
                    preferred_element_type=jnp.float32) + b2_ref[...]
        o_ref[...] = o


# ---------------------------------------------------------------------------
# JAX glue (im2col / parameter prep / per-layer wrappers)
# ---------------------------------------------------------------------------

def im2col_3d(x, ksize=4, stride=2, pad=2):
    """x: [B, Z, Y, X, C] -> rows [B*Zo*Yo*Xo, ksize^3 * Cp] (K order: kz,ky,kx,cin).
    Channels are padded to a multiple of 4 so K is already a multiple of 256 and the
    patch slab never needs a K-axis pad copy."""
    B, Z, Y, X, C = x.shape
    Cp = _round_up(C, 4)
    xp = jnp.pad(x, ((0, 0), (pad, pad), (pad, pad), (pad, pad), (0, Cp - C)))
    Zo = (Z + 2 * pad - ksize) // stride + 1
    Yo = (Y + 2 * pad - ksize) // stride + 1
    Xo = (X + 2 * pad - ksize) // stride + 1
    cols = []
    for kz in range(ksize):
        for ky in range(ksize):
            for kx in range(ksize):
                sl = xp[:, kz:kz + stride * Zo:stride,
                           ky:ky + stride * Yo:stride,
                           kx:kx + stride * Xo:stride, :]
                cols.append(sl)
    patches = jnp.stack(cols, axis=4)                     # [B,Zo,Yo,Xo,k^3,Cp]
    return patches.reshape(B * Zo * Yo * Xo, ksize ** 3 * Cp), (Zo, Yo, Xo)


def _prep_conv_layer(W, b, gamma, beta):
    """Pad + cast conv params once (bf16 weights, fp32 bias/affine), lane aligned and
    with the per-tap channel padding matching im2col_3d."""
    Cout, Cin = W.shape[0], W.shape[1]
    Cp = _round_up(Cin, 4)
    K = 64 * Cp                                            # multiple of 256
    Np = _round_up(Cout, 128)
    Wp = jnp.pad(W, ((0, 0), (0, Cp - Cin), (0, 0), (0, 0), (0, 0)))
    Wm = jnp.transpose(Wp, (2, 3, 4, 1, 0)).reshape(K, Cout)   # (kz,ky,kx,cin) x cout
    Wm = jnp.pad(Wm, ((0, 0), (0, Np - Cout))).astype(jnp.bfloat16)
    bp = jnp.pad(b.reshape(1, -1), ((0, 0), (0, Np - Cout))).astype(jnp.float32)
    gp = jnp.pad(gamma.reshape(1, -1), ((0, 0), (0, Np - Cout))).astype(jnp.float32)
    btp = jnp.pad(beta.reshape(1, -1), ((0, 0), (0, Np - Cout))).astype(jnp.float32)
    return dict(Wm=Wm, b=bp, g=gp, bt=btp, K=K, tk=_pick_tk(K), Cout=Cout, Np=Np)


def _prep_mlp(W1, b1, W2, b2):
    Dh = W1.shape[1]
    pred_dim = W2.shape[0]
    Dhp = _round_up(Dh, 128)
    Np2 = _round_up(pred_dim, 128)
    # K tile for streaming W1: largest multiple of 128 <= 1024 that divides Dhp.
    tkd = Dhp
    if Dhp > 1024:
        tkd = 128
        for c in range(1024, 127, -128):
            if Dhp % c == 0:
                tkd = c
                break
    W1p = jnp.pad(W1.T, ((0, Dhp - Dh), (0, 0))).astype(jnp.bfloat16)       # (Dhp, H)
    b1p = b1.reshape(1, -1).astype(jnp.float32)                             # (1, H)
    W2p = jnp.pad(W2.T, ((0, 0), (0, Np2 - pred_dim))).astype(jnp.bfloat16)  # (H, Np2)
    b2p = jnp.pad(b2.reshape(1, -1), ((0, 0), (0, Np2 - pred_dim))).astype(jnp.float32)
    return dict(W1=W1p, b1=b1p, W2=W2p, b2=b2p,
                Dh=Dh, Dhp=Dhp, tkd=tkd, H=HIDDEN, Np2=Np2, pred_dim=pred_dim)


def prepare_params(params):
    return {"convs": [_prep_conv_layer(*c) for c in params["convs"]],
            "mlp": _prep_mlp(params["W1"], params["b1"], params["W2"], params["b2"])}


def conv_block(x, cp):
    """One Bottle3D block: Conv3d(k4,s2,p2) -> LeakyReLU -> BatchNorm3d (batch stats)."""
    B = x.shape[0]
    patches, (Zo, Yo, Xo) = im2col_3d(x)                   # bf16, (M, K)
    M, K = patches.shape
    Np, Cout, tk = cp["Np"], cp["Cout"], cp["tk"]
    nK = K // tk
    tm, tn, Mp = _choose_row_col_tiles(M, Np)
    nI, nJ = Mp // tm, Np // tn

    a = patches if Mp == M else jnp.pad(patches, ((0, Mp - M), (0, 0)))

    out_shape = (jax.ShapeDtypeStruct((Mp, Np), jnp.bfloat16),
                 jax.ShapeDtypeStruct((8 * nI, Np), jnp.float32),
                 jax.ShapeDtypeStruct((8 * nI, Np), jnp.float32))

    if nK == 1:
        y, psum, psq = pl.pallas_call(
            functools.partial(_conv_gemm_k1_kernel, n_valid_rows=M, tm=tm),
            out_shape=out_shape,
            grid=(nI, nJ),
            in_specs=[pl.BlockSpec((tm, K), lambda i, j: (i, 0)),
                      pl.BlockSpec((K, tn), lambda i, j: (0, j)),
                      pl.BlockSpec((1, tn), lambda i, j: (0, j))],
            out_specs=[pl.BlockSpec((tm, tn), lambda i, j: (i, j)),
                       pl.BlockSpec((8, tn), lambda i, j: (i, j)),
                       pl.BlockSpec((8, tn), lambda i, j: (i, j))],
            compiler_params=pltpu.CompilerParams(
                dimension_semantics=("parallel", "parallel")),
        )(a, cp["Wm"], cp["b"])
    else:
        y, psum, psq = pl.pallas_call(
            functools.partial(_conv_gemm_kernel, n_valid_rows=M, tm=tm, n_k=nK),
            out_shape=out_shape,
            grid=(nI, nJ, nK),
            in_specs=[pl.BlockSpec((tm, tk), lambda i, j, k: (i, k)),
                      pl.BlockSpec((tk, tn), lambda i, j, k: (k, j)),
                      pl.BlockSpec((1, tn), lambda i, j, k: (0, j))],
            out_specs=[pl.BlockSpec((tm, tn), lambda i, j, k: (i, j)),
                       pl.BlockSpec((8, tn), lambda i, j, k: (i, j)),
                       pl.BlockSpec((8, tn), lambda i, j, k: (i, j))],
            scratch_shapes=[pltpu.VMEM((tm, tn), jnp.float32)],
            compiler_params=pltpu.CompilerParams(
                dimension_semantics=("parallel", "parallel", "arbitrary")),
        )(a, cp["Wm"], cp["b"])

    # Finalize BN statistics ONCE on the tiny partials (fp32), fold gamma/beta.
    total_sum = psum.reshape(nI, 8, Np)[:, 0, :].sum(axis=0)
    total_sq = psq.reshape(nI, 8, Np)[:, 0, :].sum(axis=0)
    mean = total_sum / M
    var = jnp.maximum(total_sq / M - mean * mean, 0.0)
    scale = (cp["g"][0] * jax.lax.rsqrt(var + BN_EPS)).reshape(1, Np)
    shift = (cp["bt"][0] - mean * scale[0]).reshape(1, Np)

    ybn = pl.pallas_call(
        _bn_apply_kernel,
        out_shape=jax.ShapeDtypeStruct((Mp, Np), jnp.bfloat16),
        grid=(nI,),
        in_specs=[pl.BlockSpec((tm, Np), lambda i: (i, 0)),
                  pl.BlockSpec((1, Np), lambda i: (0, 0)),
                  pl.BlockSpec((1, Np), lambda i: (0, 0))],
        out_specs=pl.BlockSpec((tm, Np), lambda i: (i, 0)),
        compiler_params=pltpu.CompilerParams(dimension_semantics=("parallel",)),
    )(y, scale, shift)

    # TODO(synk): when Cout < Np this lane-sub-slice + reshape relayouts the activation;
    # fold it into a fused (direct-conv) im2col of the next layer.
    return ybn[:M, :Cout].reshape(B, Zo, Yo, Xo, Cout)


def mlp_head(flat, cam_pos, cam_quats, mp):
    B = flat.shape[0]
    h0 = jnp.concatenate([flat.astype(jnp.float32),
                          cam_pos.astype(jnp.float32),
                          cam_quats.astype(jnp.float32)], axis=1)
    Dh, Dhp, tkd, H, Np2 = mp["Dh"], mp["Dhp"], mp["tkd"], mp["H"], mp["Np2"]
    Bp = _round_up(B, 16)                                  # bf16 sublane packing
    x = jnp.pad(h0, ((0, Bp - B), (0, Dhp - Dh))).astype(jnp.bfloat16)
    nk = Dhp // tkd

    out = pl.pallas_call(
        functools.partial(_mlp_kernel, n_k=nk),
        out_shape=jax.ShapeDtypeStruct((Bp, Np2), jnp.float32),
        grid=(nk,),
        in_specs=[pl.BlockSpec((Bp, tkd), lambda k: (0, k)),
                  pl.BlockSpec((tkd, H), lambda k: (k, 0)),
                  pl.BlockSpec((1, H), lambda k: (0, 0)),
                  pl.BlockSpec((H, Np2), lambda k: (0, 0)),
                  pl.BlockSpec((1, Np2), lambda k: (0, 0))],
        out_specs=pl.BlockSpec((Bp, Np2), lambda k: (0, 0)),
        scratch_shapes=[pltpu.VMEM((Bp, H), jnp.float32)],
        compiler_params=pltpu.CompilerParams(dimension_semantics=("arbitrary",)),
    )(x, mp["W1"], mp["b1"], mp["W2"], mp["b2"])
    return out[:B, :mp["pred_dim"]]


def bottle3d_forward(feat_ncdhw, cam_pos, cam_quats, prepared):
    # feat_ncdhw: [B, C, Z, Y, X] (PyTorch layout) -> channels-last bf16
    x = jnp.transpose(feat_ncdhw, (0, 2, 3, 4, 1)).astype(jnp.bfloat16)
    for cp in prepared["convs"]:
        x = conv_block(x, cp)
    B = x.shape[0]
    # match PyTorch feat.reshape(B, -1) of an NCDHW tensor
    flat = jnp.transpose(x, (0, 4, 1, 2, 3)).reshape(B, -1)
    return mlp_head(flat, cam_pos, cam_quats, prepared["mlp"])


# Pure-JAX fp32 reference (numerical sanity check of the semantics)
def reference_forward(feat_ncdhw, cam_pos, cam_quats, params):
    x = feat_ncdhw
    for (W, b, g, bt) in params["convs"]:
        x = jax.lax.conv_general_dilated(
            x, W, window_strides=(2, 2, 2),
            padding=((2, 2), (2, 2), (2, 2)),
            dimension_numbers=("NCDHW", "OIDHW", "NCDHW"))
        x = x + b.reshape(1, -1, 1, 1, 1)
        x = jnp.where(x >= 0, x, LEAKY_SLOPE * x)
        mean = jnp.mean(x, axis=(0, 2, 3, 4), keepdims=True)
        var = jnp.mean((x - mean) ** 2, axis=(0, 2, 3, 4), keepdims=True)
        x = ((x - mean) * jax.lax.rsqrt(var + BN_EPS)
             * g.reshape(1, -1, 1, 1, 1) + bt.reshape(1, -1, 1, 1, 1))
    B = x.shape[0]
    h = jnp.concatenate([x.reshape(B, -1), cam_pos, cam_quats], axis=1)
    h = h @ params["W1"].T + params["b1"]
    h = jnp.where(h >= 0, h, LEAKY_SLOPE * h)
    return h @ params["W2"].T + params["b2"]


if __name__ == "__main__":
    B, IN_C, S = 2, 4, 16          # spatial 16 -> 9 -> 5 -> 3 -> 2 (matches 2*2*2 flatten)
    CHANS = 24                     # small synthetic chans; exercises single-K and multi-K
    PRED_DIM = 8
    out_chans = [CHANS, 2 * CHANS, 4 * CHANS, 8 * CHANS]

    key = jax.random.PRNGKey(0)
    ki = iter(jax.random.split(key, 32))

    convs = []
    in_dim = IN_C
    for oc in out_chans:
        W = 0.05 * jax.random.normal(next(ki), (oc, in_dim, 4, 4, 4), jnp.float32)
        b = 0.01 * jax.random.normal(next(ki), (oc,), jnp.float32)
        g = jnp.ones((oc,), jnp.float32)    # BatchNorm3d init: weight=1
        bt = jnp.zeros((oc,), jnp.float32)  # BatchNorm3d init: bias=0
        convs.append((W, b, g, bt))
        in_dim = oc

    lin_in = out_chans[-1] * 2 * 2 * 2 + 7
    W1 = 0.05 * jax.random.normal(next(ki), (HIDDEN, lin_in), jnp.float32)
    b1 = 0.01 * jax.random.normal(next(ki), (HIDDEN,), jnp.float32)
    W2 = 0.05 * jax.random.normal(next(ki), (PRED_DIM, HIDDEN), jnp.float32)
    b2 = 0.01 * jax.random.normal(next(ki), (PRED_DIM,), jnp.float32)
    params = {"convs": convs, "W1": W1, "b1": b1, "W2": W2, "b2": b2}

    feat = jax.random.normal(next(ki), (B, IN_C, S, S, S), jnp.float32)
    cam_pos = jax.random.normal(next(ki), (B, 3), jnp.float32)
    cam_quats = jax.random.normal(next(ki), (B, 4), jnp.float32)

    prepared = prepare_params(params)   # weights padded/cast once, outside the forward
    fwd = jax.jit(lambda f, cp_, cq_: bottle3d_forward(f, cp_, cq_, prepared))

    out = jax.block_until_ready(fwd(feat, cam_pos, cam_quats))
    assert out.shape == (B, PRED_DIM)

    ref = jax.block_until_ready(reference_forward(feat, cam_pos, cam_quats, params))
    # bf16 activation/weight pipeline vs fp32 reference over 4 conv layers + MLP.
    np.testing.assert_allclose(np.asarray(out), np.asarray(ref), rtol=5e-2, atol=1e-1)

    print("KERNEL_OK")
</pallas_src>

<mosaic_0001>
module attributes {stable_mosaic.version = 11 : i64} {
  func.func @_conv_gemm_k1_kernel(%arg0: i32, %arg1: i32, %arg2: memref<512x256xbf16, #tpu.memory_space<vmem>>, %arg3: memref<256x128xbf16, #tpu.memory_space<vmem>>, %arg4: memref<1x128xf32, #tpu.memory_space<vmem>>, %arg5: memref<512x128xbf16, #tpu.memory_space<vmem>>, %arg6: memref<8x128xf32, #tpu.memory_space<vmem>>, %arg7: memref<8x128xf32, #tpu.memory_space<vmem>>) attributes {dimension_semantics = [#tpu.dimension_semantics<parallel>, #tpu.dimension_semantics<parallel>], iteration_bounds = array<i64: 3, 1>, scalar_prefetch = 0 : i64, scratch_operands = 0 : i64, tpu.core_type = #tpu.core_type<tc>, window_params = [{transform_indices = @transform_0, window_bounds = array<i64: 512, 256>}, {transform_indices = @transform_1, window_bounds = array<i64: 256, 128>}, {transform_indices = @transform_2, window_bounds = array<i64: 1, 128>}, {transform_indices = @transform_3, window_bounds = array<i64: 512, 128>}, {transform_indices = @transform_4, window_bounds = array<i64: 8, 128>}, {transform_indices = @transform_5, window_bounds = array<i64: 8, 128>}]} {
    %c0 = arith.constant 0 : index
    %c0_0 = arith.constant 0 : index
    %0 = vector.load %arg2[%c0, %c0_0] : memref<512x256xbf16, #tpu.memory_space<vmem>>, vector<512x256xbf16>
    %c0_1 = arith.constant 0 : index
    %c0_2 = arith.constant 0 : index
    %1 = vector.load %arg3[%c0_1, %c0_2] : memref<256x128xbf16, #tpu.memory_space<vmem>>, vector<256x128xbf16>
    %cst = arith.constant dense<0.000000e+00> : vector<512x128xf32>
    %2 = tpu.matmul %0, %1, %cst {dimension_numbers = #tpu.dot_dimension_numbers<[1], [0], [0], [1], [0, 0, 1, 1], [], []>} : vector<512x256xbf16>, vector<256x128xbf16>, vector<512x128xf32> -> vector<512x128xf32>
    %c0_3 = arith.constant 0 : index
    %c0_4 = arith.constant 0 : index
    %3 = vector.load %arg4[%c0_3, %c0_4] : memref<1x128xf32, #tpu.memory_space<vmem>>, vector<1x128xf32>
    %4 = vector.broadcast %3 : vector<1x128xf32> to vector<512x128xf32>
    %5 = arith.addf %2, %4 : vector<512x128xf32>
    %cst_5 = arith.constant 0.000000e+00 : f32
    %6 = vector.broadcast %cst_5 : f32 to vector<512x128xf32>
    %7 = arith.cmpf oge, %5, %6 : vector<512x128xf32>
    %cst_6 = arith.constant 0.00999999977 : f32
    %8 = vector.broadcast %cst_6 : f32 to vector<512x128xf32>
    %9 = arith.mulf %8, %5 : vector<512x128xf32>
    %10 = arith.select %7, %5, %9 : vector<512x128xi1>, vector<512x128xf32>
    %11 = arith.truncf %10 : vector<512x128xf32> to vector<512x128xbf16>
    %c0_7 = arith.constant 0 : index
    %c0_8 = arith.constant 0 : index
    %12 = vector.load %arg5[%c0_7, %c0_8] : memref<512x128xbf16, #tpu.memory_space<vmem>>, vector<512x128xbf16>
    tpu.vector_store %arg5[%c0_7, %c0_8], %11 {strides = array<i32>} : memref<512x128xbf16, #tpu.memory_space<vmem>>, vector<512x128xbf16>,
    %13 = tpu.iota {dimensions = array<i32: 0>} : vector<512x128xi32>
    %c512_i32 = arith.constant 512 : i32
    %14 = arith.muli %arg0, %c512_i32 : i32
    %c1458_i32 = arith.constant 1458 : i32
    %15 = arith.subi %c1458_i32, %14 : i32
    %16 = vector.broadcast %15 : i32 to vector<512x128xi32>
    %17 = arith.cmpi slt, %13, %16 : vector<512x128xi32>
    %cst_9 = arith.constant 0.000000e+00 : f32
    %18 = vector.broadcast %cst_9 : f32 to vector<512x128xf32>
    %19 = arith.select %17, %10, %18 : vector<512x128xi1>, vector<512x128xf32>
    %cst_10 = arith.constant dense<0.000000e+00> : vector<128xf32>
    %20 = vector.multi_reduction <add>, %19, %cst_10 [0] : vector<512x128xf32> to vector<128xf32>
    %21 = vector.shape_cast %20 : vector<128xf32> to vector<1x128xf32>
    %22 = arith.mulf %19, %19 : vector<512x128xf32>
    %cst_11 = arith.constant dense<0.000000e+00> : vector<128xf32>
    %23 = vector.multi_reduction <add>, %22, %cst_11 [0] : vector<512x128xf32> to vector<128xf32>
    %24 = vector.shape_cast %23 : vector<128xf32> to vector<1x128xf32>
    %25 = vector.shape_cast %21 : vector<1x128xf32> to vector<1x128xf32>
    %26 = vector.broadcast %25 : vector<1x128xf32> to vector<8x128xf32>
    %c0_12 = arith.constant 0 : index
    %c0_13 = arith.constant 0 : index
    %27 = vector.load %arg6[%c0_12, %c0_13] : memref<8x128xf32, #tpu.memory_space<vmem>>, vector<8x128xf32>
    tpu.vector_store %arg6[%c0_12, %c0_13], %26 {strides = array<i32>} : memref<8x128xf32, #tpu.memory_space<vmem>>, vector<8x128xf32>,
    %28 = vector.shape_cast %24 : vector<1x128xf32> to vector<1x128xf32>
    %29 = vector.broadcast %28 : vector<1x128xf32> to vector<8x128xf32>
    %c0_14 = arith.constant 0 : index
    %c0_15 = arith.constant 0 : index
    %30 = vector.load %arg7[%c0_14, %c0_15] : memref<8x128xf32, #tpu.memory_space<vmem>>, vector<8x128xf32>
    tpu.vector_store %arg7[%c0_14, %c0_15], %29 {strides = array<i32>} : memref<8x128xf32, #tpu.memory_space<vmem>>, vector<8x128xf32>,
    return
  }
  func.func @transform_0(%arg0: i32, %arg1: i32) -> (i32, i32) {
    %c0_i32 = arith.constant 0 : i32
    %c0_i32_0 = arith.constant 0 : i32
    return %arg0, %c0_i32 : i32, i32
  }
  func.func @transform_1(%arg0: i32, %arg1: i32) -> (i32, i32) {
    %c0_i32 = arith.constant 0 : i32
    %c0_i32_0 = arith.constant 0 : i32
    return %c0_i32, %arg1 : i32, i32
  }
  func.func @transform_2(%arg0: i32, %arg1: i32) -> (i32, i32) {
    %c0_i32 = arith.constant 0 : i32
    %c0_i32_0 = arith.constant 0 : i32
    return %c0_i32, %arg1 : i32, i32
  }
  func.func @transform_3(%arg0: i32, %arg1: i32) -> (i32, i32) {
    %c0_i32 = arith.constant 0 : i32
    return %arg0, %arg1 : i32, i32
  }
  func.func @transform_4(%arg0: i32, %arg1: i32) -> (i32, i32) {
    %c0_i32 = arith.constant 0 : i32
    return %arg0, %arg1 : i32, i32
  }
  func.func @transform_5(%arg0: i32, %arg1: i32) -> (i32, i32) {
    %c0_i32 = arith.constant 0 : i32
    return %arg0, %arg1 : i32, i32
  }
}

module attributes {stable_mosaic.version = 11 : i64} {
  func.func @_bn_apply_kernel(%arg0: i32, %arg1: memref<512x128xbf16, #tpu.memory_space<vmem>>, %arg2: memref<1x128xf32, #tpu.memory_space<vmem>>, %arg3: memref<1x128xf32, #tpu.memory_space<vmem>>, %arg4: memref<512x128xbf16, #tpu.memory_space<vmem>>) attributes {dimension_semantics = [#tpu.dimension_semantics<parallel>], iteration_bounds = array<i64: 3>, scalar_prefetch = 0 : i64, scratch_operands = 0 : i64, tpu.core_type = #tpu.core_type<tc>, window_params = [{transform_indices = @transform_0, window_bounds = array<i64: 512, 128>}, {pipeline_mode = #tpu.pipeline_mode<synchronous>, transform_indices = @transform_1, window_bounds = array<i64: 1, 128>}, {pipeline_mode = #tpu.pipeline_mode<synchronous>, transform_indices = @transform_2, window_bounds = array<i64: 1, 128>}, {transform_indices = @transform_3, window_bounds = array<i64: 512, 128>}]} {
    %c0 = arith.constant 0 : index
    %c0_0 = arith.constant 0 : index
    %0 = vector.load %arg1[%c0, %c0_0] : memref<512x128xbf16, #tpu.memory_space<vmem>>, vector<512x128xbf16>
    %1 = arith.extf %0 : vector<512x128xbf16> to vector<512x128xf32>
    %c0_1 = arith.constant 0 : index
    %c0_2 = arith.constant 0 : index
    %2 = vector.load %arg2[%c0_1, %c0_2] : memref<1x128xf32, #tpu.memory_space<vmem>>, vector<1x128xf32>
    %3 = vector.broadcast %2 : vector<1x128xf32> to vector<512x128xf32>
    %4 = arith.mulf %1, %3 : vector<512x128xf32>
    %c0_3 = arith.constant 0 : index
    %c0_4 = arith.constant 0 : index
    %5 = vector.load %arg3[%c0_3, %c0_4] : memref<1x128xf32, #tpu.memory_space<vmem>>, vector<1x128xf32>
    %6 = vector.broadcast %5 : vector<1x128xf32> to vector<512x128xf32>
    %7 = arith.addf %4, %6 : vector<512x128xf32>
    %8 = arith.truncf %7 : vector<512x128xf32> to vector<512x128xbf16>
    %c0_5 = arith.constant 0 : index
    %c0_6 = arith.constant 0 : index
    %9 = vector.load %arg4[%c0_5, %c0_6] : memref<512x128xbf16, #tpu.memory_space<vmem>>, vector<512x128xbf16>
    tpu.vector_store %arg4[%c0_5, %c0_6], %8 {strides = array<i32>} : memref<512x128xbf16, #tpu.memory_space<vmem>>, vector<512x128xbf16>,
    return
  }
  func.func @transform_0(%arg0: i32) -> (i32, i32) {
    %c0_i32 = arith.constant 0 : i32
    %c0_i32_0 = arith.constant 0 : i32
    return %arg0, %c0_i32 : i32, i32
  }
  func.func @transform_1(%arg0: i32) -> (i32, i32) {
    %c0_i32 = arith.constant 0 : i32
    %c0_i32_0 = arith.constant 0 : i32
    %c0_i32_1 = arith.constant 0 : i32
    return %c0_i32, %c0_i32_0 : i32, i32
  }
  func.func @transform_2(%arg0: i32) -> (i32, i32) {
    %c0_i32 = arith.constant 0 : i32
    %c0_i32_0 = arith.constant 0 : i32
    %c0_i32_1 = arith.constant 0 : i32
    return %c0_i32, %c0_i32_0 : i32, i32
  }
  func.func @transform_3(%arg0: i32) -> (i32, i32) {
    %c0_i32 = arith.constant 0 : i32
    %c0_i32_0 = arith.constant 0 : i32
    return %arg0, %c0_i32 : i32, i32
  }
}

module attributes {stable_mosaic.version = 11 : i64} {
  func.func @_conv_gemm_k1_kernel(%arg0: i32, %arg1: i32, %arg2: memref<128x1536xbf16, #tpu.memory_space<vmem>>, %arg3: memref<1536x128xbf16, #tpu.memory_space<vmem>>, %arg4: memref<1x128xf32, #tpu.memory_space<vmem>>, %arg5: memref<128x128xbf16, #tpu.memory_space<vmem>>, %arg6: memref<8x128xf32, #tpu.memory_space<vmem>>, %arg7: memref<8x128xf32, #tpu.memory_space<vmem>>) attributes {dimension_semantics = [#tpu.dimension_semantics<parallel>, #tpu.dimension_semantics<parallel>], iteration_bounds = array<i64: 2, 1>, scalar_prefetch = 0 : i64, scratch_operands = 0 : i64, tpu.core_type = #tpu.core_type<tc>, window_params = [{transform_indices = @transform_0, window_bounds = array<i64: 128, 1536>}, {transform_indices = @transform_1, window_bounds = array<i64: 1536, 128>}, {transform_indices = @transform_2, window_bounds = array<i64: 1, 128>}, {transform_indices = @transform_3, window_bounds = array<i64: 128, 128>}, {transform_indices = @transform_4, window_bounds = array<i64: 8, 128>}, {transform_indices = @transform_5, window_bounds = array<i64: 8, 128>}]} {
    %c0 = arith.constant 0 : index
    %c0_0 = arith.constant 0 : index
    %0 = vector.load %arg2[%c0, %c0_0] : memref<128x1536xbf16, #tpu.memory_space<vmem>>, vector<128x1536xbf16>
    %c0_1 = arith.constant 0 : index
    %c0_2 = arith.constant 0 : index
    %1 = vector.load %arg3[%c0_1, %c0_2] : memref<1536x128xbf16, #tpu.memory_space<vmem>>, vector<1536x128xbf16>
    %cst = arith.constant dense<0.000000e+00> : vector<128x128xf32>
    %2 = tpu.matmul %0, %1, %cst {dimension_numbers = #tpu.dot_dimension_numbers<[1], [0], [0], [1], [0, 0, 1, 1], [], []>} : vector<128x1536xbf16>, vector<1536x128xbf16>, vector<128x128xf32> -> vector<128x128xf32>
    %c0_3 = arith.constant 0 : index
    %c0_4 = arith.constant 0 : index
    %3 = vector.load %arg4[%c0_3, %c0_4] : memref<1x128xf32, #tpu.memory_space<vmem>>, vector<1x128xf32>
    %4 = vector.broadcast %3 : vector<1x128xf32> to vector<128x128xf32>
    %5 = arith.addf %2, %4 : vector<128x128xf32>
    %cst_5 = arith.constant 0.000000e+00 : f32
    %6 = vector.broadcast %cst_5 : f32 to vector<128x128xf32>
    %7 = arith.cmpf oge, %5, %6 : vector<128x128xf32>
    %cst_6 = arith.constant 0.00999999977 : f32
    %8 = vector.broadcast %cst_6 : f32 to vector<128x128xf32>
    %9 = arith.mulf %8, %5 : vector<128x128xf32>
    %10 = arith.select %7, %5, %9 : vector<128x128xi1>, vector<128x128xf32>
    %11 = arith.truncf %10 : vector<128x128xf32> to vector<128x128xbf16>
    %c0_7 = arith.constant 0 : index
    %c0_8 = arith.constant 0 : index
    %12 = vector.load %arg5[%c0_7, %c0_8] : memref<128x128xbf16, #tpu.memory_space<vmem>>, vector<128x128xbf16>
    tpu.vector_store %arg5[%c0_7, %c0_8], %11 {strides = array<i32>} : memref<128x128xbf16, #tpu.memory_space<vmem>>, vector<128x128xbf16>,
    %13 = tpu.iota {dimensions = array<i32: 0>} : vector<128x128xi32>
    %c128_i32 = arith.constant 128 : i32
    %14 = arith.muli %arg0, %c128_i32 : i32
    %c250_i32 = arith.constant 250 : i32
    %15 = arith.subi %c250_i32, %14 : i32
    %16 = vector.broadcast %15 : i32 to vector<128x128xi32>
    %17 = arith.cmpi slt, %13, %16 : vector<128x128xi32>
    %cst_9 = arith.constant 0.000000e+00 : f32
    %18 = vector.broadcast %cst_9 : f32 to vector<128x128xf32>
    %19 = arith.select %17, %10, %18 : vector<128x128xi1>, vector<128x128xf32>
    %cst_10 = arith.constant dense<0.000000e+00> : vector<128xf32>
    %20 = vector.multi_reduction <add>, %19, %cst_10 [0] : vector<128x128xf32> to vector<128xf32>
    %21 = vector.shape_cast %20 : vector<128xf32> to vector<1x128xf32>
    %22 = arith.mulf %19, %19 : vector<128x128xf32>
    %cst_11 = arith.constant dense<0.000000e+00> : vector<128xf32>
    %23 = vector.multi_reduction <add>, %22, %cst_11 [0] : vector<128x128xf32> to vector<128xf32>
    %24 = vector.shape_cast %23 : vector<128xf32> to vector<1x128xf32>
    %25 = vector.shape_cast %21 : vector<1x128xf32> to vector<1x128xf32>
    %26 = vector.broadcast %25 : vector<1x128xf32> to vector<8x128xf32>
    %c0_12 = arith.constant 0 : index
    %c0_13 = arith.constant 0 : index
    %27 = vector.load %arg6[%c0_12, %c0_13] : memref<8x128xf32, #tpu.memory_space<vmem>>, vector<8x128xf32>
    tpu.vector_store %arg6[%c0_12, %c0_13], %26 {strides = array<i32>} : memref<8x128xf32, #tpu.memory_space<vmem>>, vector<8x128xf32>,
    %28 = vector.shape_cast %24 : vector<1x128xf32> to vector<1x128xf32>
    %29 = vector.broadcast %28 : vector<1x128xf32> to vector<8x128xf32>
    %c0_14 = arith.constant 0 : index
    %c0_15 = arith.constant 0 : index
    %30 = vector.load %arg7[%c0_14, %c0_15] : memref<8x128xf32, #tpu.memory_space<vmem>>, vector<8x128xf32>
    tpu.vector_store %arg7[%c0_14, %c0_15], %29 {strides = array<i32>} : memref<8x128xf32, #tpu.memory_space<vmem>>, vector<8x128xf32>,
    return
  }
  func.func @transform_0(%arg0: i32, %arg1: i32) -> (i32, i32) {
    %c0_i32 = arith.constant 0 : i32
    %c0_i32_0 = arith.constant 0 : i32
    return %arg0, %c0_i32 : i32, i32
  }
  func.func @transform_1(%arg0: i32, %arg1: i32) -> (i32, i32) {
    %c0_i32 = arith.constant 0 : i32
    %c0_i32_0 = arith.constant 0 : i32
    return %c0_i32, %arg1 : i32, i32
  }
  func.func @transform_2(%arg0: i32, %arg1: i32) -> (i32, i32) {
    %c0_i32 = arith.constant 0 : i32
    %c0_i32_0 = arith.constant 0 : i32
    return %c0_i32, %arg1 : i32, i32
  }
  func.func @transform_3(%arg0: i32, %arg1: i32) -> (i32, i32) {
    %c0_i32 = arith.constant 0 : i32
    return %arg0, %arg1 : i32, i32
  }
  func.func @transform_4(%arg0: i32, %arg1: i32) -> (i32, i32) {
    %c0_i32 = arith.constant 0 : i32
    return %arg0, %arg1 : i32, i32
  }
  func.func @transform_5(%arg0: i32, %arg1: i32) -> (i32, i32) {
    %c0_i32 = arith.constant 0 : i32
    return %arg0, %arg1 : i32, i32
  }
}

module attributes {stable_mosaic.version = 11 : i64} {
  func.func @_bn_apply_kernel(%arg0: i32, %arg1: memref<128x128xbf16, #tpu.memory_space<vmem>>, %arg2: memref<1x128xf32, #tpu.memory_space<vmem>>, %arg3: memref<1x128xf32, #tpu.memory_space<vmem>>, %arg4: memref<128x128xbf16, #tpu.memory_space<vmem>>) attributes {dimension_semantics = [#tpu.dimension_semantics<parallel>], iteration_bounds = array<i64: 2>, scalar_prefetch = 0 : i64, scratch_operands = 0 : i64, tpu.core_type = #tpu.core_type<tc>, window_params = [{transform_indices = @transform_0, window_bounds = array<i64: 128, 128>}, {pipeline_mode = #tpu.pipeline_mode<synchronous>, transform_indices = @transform_1, window_bounds = array<i64: 1, 128>}, {pipeline_mode = #tpu.pipeline_mode<synchronous>, transform_indices = @transform_2, window_bounds = array<i64: 1, 128>}, {transform_indices = @transform_3, window_bounds = array<i64: 128, 128>}]} {
    %c0 = arith.constant 0 : index
    %c0_0 = arith.constant 0 : index
    %0 = vector.load %arg1[%c0, %c0_0] : memref<128x128xbf16, #tpu.memory_space<vmem>>, vector<128x128xbf16>
    %1 = arith.extf %0 : vector<128x128xbf16> to vector<128x128xf32>
    %c0_1 = arith.constant 0 : index
    %c0_2 = arith.constant 0 : index
    %2 = vector.load %arg2[%c0_1, %c0_2] : memref<1x128xf32, #tpu.memory_space<vmem>>, vector<1x128xf32>
    %3 = vector.broadcast %2 : vector<1x128xf32> to vector<128x128xf32>
    %4 = arith.mulf %1, %3 : vector<128x128xf32>
    %c0_3 = arith.constant 0 : index
    %c0_4 = arith.constant 0 : index
    %5 = vector.load %arg3[%c0_3, %c0_4] : memref<1x128xf32, #tpu.memory_space<vmem>>, vector<1x128xf32>
    %6 = vector.broadcast %5 : vector<1x128xf32> to vector<128x128xf32>
    %7 = arith.addf %4, %6 : vector<128x128xf32>
    %8 = arith.truncf %7 : vector<128x128xf32> to vector<128x128xbf16>
    %c0_5 = arith.constant 0 : index
    %c0_6 = arith.constant 0 : index
    %9 = vector.load %arg4[%c0_5, %c0_6] : memref<128x128xbf16, #tpu.memory_space<vmem>>, vector<128x128xbf16>
    tpu.vector_store %arg4[%c0_5, %c0_6], %8 {strides = array<i32>} : memref<128x128xbf16, #tpu.memory_space<vmem>>, vector<128x128xbf16>,
    return
  }
  func.func @transform_0(%arg0: i32) -> (i32, i32) {
    %c0_i32 = arith.constant 0 : i32
    %c0_i32_0 = arith.constant 0 : i32
    return %arg0, %c0_i32 : i32, i32
  }
  func.func @transform_1(%arg0: i32) -> (i32, i32) {
    %c0_i32 = arith.constant 0 : i32
    %c0_i32_0 = arith.constant 0 : i32
    %c0_i32_1 = arith.constant 0 : i32
    return %c0_i32, %c0_i32_0 : i32, i32
  }
  func.func @transform_2(%arg0: i32) -> (i32, i32) {
    %c0_i32 = arith.constant 0 : i32
    %c0_i32_0 = arith.constant 0 : i32
    %c0_i32_1 = arith.constant 0 : i32
    return %c0_i32, %c0_i32_0 : i32, i32
  }
  func.func @transform_3(%arg0: i32) -> (i32, i32) {
    %c0_i32 = arith.constant 0 : i32
    %c0_i32_0 = arith.constant 0 : i32
    return %arg0, %c0_i32 : i32, i32
  }
}

module attributes {stable_mosaic.version = 11 : i64} {
  func.func @_conv_gemm_kernel(%arg0: i32, %arg1: i32, %arg2: i32, %arg3: memref<32x1024xbf16, #tpu.memory_space<vmem>>, %arg4: memref<1024x128xbf16, #tpu.memory_space<vmem>>, %arg5: memref<1x128xf32, #tpu.memory_space<vmem>>, %arg6: memref<32x128xbf16, #tpu.memory_space<vmem>>, %arg7: memref<8x128xf32, #tpu.memory_space<vmem>>, %arg8: memref<8x128xf32, #tpu.memory_space<vmem>>, %arg9: memref<32x128xf32, #tpu.memory_space<vmem>>) attributes {dimension_semantics = [#tpu.dimension_semantics<parallel>, #tpu.dimension_semantics<parallel>, #tpu.dimension_semantics<arbitrary>], iteration_bounds = array<i64: 2, 1, 3>, scalar_prefetch = 0 : i64, scratch_operands = 1 : i64, tpu.core_type = #tpu.core_type<tc>, window_params = [{transform_indices = @transform_0, window_bounds = array<i64: 32, 1024>}, {transform_indices = @transform_1, window_bounds = array<i64: 1024, 128>}, {transform_indices = @transform_2, window_bounds = array<i64: 1, 128>}, {transform_indices = @transform_3, window_bounds = array<i64: 32, 128>}, {transform_indices = @transform_4, window_bounds = array<i64: 8, 128>}, {transform_indices = @transform_5, window_bounds = array<i64: 8, 128>}]} {
    %c0_i32 = arith.constant 0 : i32
    %0 = arith.cmpi eq, %arg2, %c0_i32 : i32
    %1 = arith.extui %0 : i1 to i32
    %c0_i32_0 = arith.constant 0 : i32
    %2 = arith.cmpi ne, %1, %c0_i32_0 : i32
    scf.if %2 {
      %cst_9 = arith.constant 0.000000e+00 : f32
      %12 = vector.broadcast %cst_9 : f32 to vector<32x128xf32>
      %c0_10 = arith.constant 0 : index
      %c0_11 = arith.constant 0 : index
      %13 = vector.load %arg9[%c0_10, %c0_11] : memref<32x128xf32, #tpu.memory_space<vmem>>, vector<32x128xf32>
      tpu.vector_store %arg9[%c0_10, %c0_11], %12 {strides = array<i32>} : memref<32x128xf32, #tpu.memory_space<vmem>>, vector<32x128xf32>,
    } else {
    }
    %c0 = arith.constant 0 : index
    %c0_1 = arith.constant 0 : index
    %3 = vector.load %arg9[%c0, %c0_1] : memref<32x128xf32, #tpu.memory_space<vmem>>, vector<32x128xf32>
    %c0_2 = arith.constant 0 : index
    %c0_3 = arith.constant 0 : index
    %4 = vector.load %arg3[%c0_2, %c0_3] : memref<32x1024xbf16, #tpu.memory_space<vmem>>, vector<32x1024xbf16>
    %c0_4 = arith.constant 0 : index
    %c0_5 = arith.constant 0 : index
    %5 = vector.load %arg4[%c0_4, %c0_5] : memref<1024x128xbf16, #tpu.memory_space<vmem>>, vector<1024x128xbf16>
    %cst = arith.constant dense<0.000000e+00> : vector<32x128xf32>
    %6 = tpu.matmul %4, %5, %cst {dimension_numbers = #tpu.dot_dimension_numbers<[1], [0], [0], [1], [0, 0, 1, 1], [], []>} : vector<32x1024xbf16>, vector<1024x128xbf16>, vector<32x128xf32> -> vector<32x128xf32>
    %7 = arith.addf %3, %6 : vector<32x128xf32>
    %c0_6 = arith.constant 0 : index
    %c0_7 = arith.constant 0 : index
    %8 = vector.load %arg9[%c0_6, %c0_7] : memref<32x128xf32, #tpu.memory_space<vmem>>, vector<32x128xf32>
    tpu.vector_store %arg9[%c0_6, %c0_7], %7 {strides = array<i32>} : memref<32x128xf32, #tpu.memory_space<vmem>>, vector<32x128xf32>,
    %c2_i32 = arith.constant 2 : i32
    %9 = arith.cmpi eq, %arg2, %c2_i32 : i32
    %10 = arith.extui %9 : i1 to i32
    %c0_i32_8 = arith.constant 0 : i32
    %11 = arith.cmpi ne, %10, %c0_i32_8 : i32
    scf.if %11 {
      %c0_9 = arith.constant 0 : index
      %c0_10 = arith.constant 0 : index
      %12 = vector.load %arg9[%c0_9, %c0_10] : memref<32x128xf32, #tpu.memory_space<vmem>>, vector<32x128xf32>
      %c0_11 = arith.constant 0 : index
      %c0_12 = arith.constant 0 : index
      %13 = vector.load %arg5[%c0_11, %c0_12] : memref<1x128xf32, #tpu.memory_space<vmem>>, vector<1x128xf32>
      %14 = vector.broadcast %13 : vector<1x128xf32> to vector<32x128xf32>
      %15 = arith.addf %12, %14 : vector<32x128xf32>
      %cst_13 = arith.constant 0.000000e+00 : f32
      %16 = vector.broadcast %cst_13 : f32 to vector<32x128xf32>
      %17 = arith.cmpf oge, %15, %16 : vector<32x128xf32>
      %cst_14 = arith.constant 0.00999999977 : f32
      %18 = vector.broadcast %cst_14 : f32 to vector<32x128xf32>
      %19 = arith.mulf %18, %15 : vector<32x128xf32>
      %20 = arith.select %17, %15, %19 : vector<32x128xi1>, vector<32x128xf32>
      %21 = arith.truncf %20 : vector<32x128xf32> to vector<32x128xbf16>
      %c0_15 = arith.constant 0 : index
      %c0_16 = arith.constant 0 : index
      %22 = vector.load %arg6[%c0_15, %c0_16] : memref<32x128xbf16, #tpu.memory_space<vmem>>, vector<32x128xbf16>
      tpu.vector_store %arg6[%c0_15, %c0_16], %21 {strides = array<i32>} : memref<32x128xbf16, #tpu.memory_space<vmem>>, vector<32x128xbf16>,
      %23 = tpu.iota {dimensions = array<i32: 0>} : vector<32x128xi32>
      %c32_i32 = arith.constant 32 : i32
      %24 = arith.muli %arg0, %c32_i32 : i32
      %c54_i32 = arith.constant 54 : i32
      %25 = arith.subi %c54_i32, %24 : i32
      %26 = vector.broadcast %25 : i32 to vector<32x128xi32>
      %27 = arith.cmpi slt, %23, %26 : vector<32x128xi32>
      %cst_17 = arith.constant 0.000000e+00 : f32
      %28 = vector.broadcast %cst_17 : f32 to vector<32x128xf32>
      %29 = arith.select %27, %20, %28 : vector<32x128xi1>, vector<32x128xf32>
      %cst_18 = arith.constant dense<0.000000e+00> : vector<128xf32>
      %30 = vector.multi_reduction <add>, %29, %cst_18 [0] : vector<32x128xf32> to vector<128xf32>
      %31 = vector.shape_cast %30 : vector<128xf32> to vector<1x128xf32>
      %32 = arith.mulf %29, %29 : vector<32x128xf32>
      %cst_19 = arith.constant dense<0.000000e+00> : vector<128xf32>
      %33 = vector.multi_reduction <add>, %32, %cst_19 [0] : vector<32x128xf32> to vector<128xf32>
      %34 = vector.shape_cast %33 : vector<128xf32> to vector<1x128xf32>
      %35 = vector.shape_cast %31 : vector<1x128xf32> to vector<1x128xf32>
      %36 = vector.broadcast %35 : vector<1x128xf32> to vector<8x128xf32>
      %c0_20 = arith.constant 0 : index
      %c0_21 = arith.constant 0 : index
      %37 = vector.load %arg7[%c0_20, %c0_21] : memref<8x128xf32, #tpu.memory_space<vmem>>, vector<8x128xf32>
      tpu.vector_store %arg7[%c0_20, %c0_21], %36 {strides = array<i32>} : memref<8x128xf32, #tpu.memory_space<vmem>>, vector<8x128xf32>,
      %38 = vector.shape_cast %34 : vector<1x128xf32> to vector<1x128xf32>
      %39 = vector.broadcast %38 : vector<1x128xf32> to vector<8x128xf32>
      %c0_22 = arith.constant 0 : index
      %c0_23 = arith.constant 0 : index
      %40 = vector.load %arg8[%c0_22, %c0_23] : memref<8x128xf32, #tpu.memory_space<vmem>>, vector<8x128xf32>
      tpu.vector_store %arg8[%c0_22, %c0_23], %39 {strides = array<i32>} : memref<8x128xf32, #tpu.memory_space<vmem>>, vector<8x128xf32>,
    } else {
    }
    return
  }
  func.func @transform_0(%arg0: i32, %arg1: i32, %arg2: i32) -> (i32, i32) {
    %c0_i32 = arith.constant 0 : i32
    return %arg0, %arg2 : i32, i32
  }
  func.func @transform_1(%arg0: i32, %arg1: i32, %arg2: i32) -> (i32, i32) {
    %c0_i32 = arith.constant 0 : i32
    return %arg2, %arg1 : i32, i32
  }
  func.func @transform_2(%arg0: i32, %arg1: i32, %arg2: i32) -> (i32, i32) {
    %c0_i32 = arith.constant 0 : i32
    %c0_i32_0 = arith.constant 0 : i32
    return %c0_i32, %arg1 : i32, i32
  }
  func.func @transform_3(%arg0: i32, %arg1: i32, %arg2: i32) -> (i32, i32) {
    %c0_i32 = arith.constant 0 : i32
    return %arg0, %arg1 : i32, i32
  }
  func.func @transform_4(%arg0: i32, %arg1: i32, %arg2: i32) -> (i32, i32) {
    %c0_i32 = arith.constant 0 : i32
    return %arg0, %arg1 : i32, i32
  }
  func.func @transform_5(%arg0: i32, %arg1: i32, %arg2: i32) -> (i32, i32) {
    %c0_i32 = arith.constant 0 : i32
    return %arg0, %arg1 : i32, i32
  }
}

module attributes {stable_mosaic.version = 11 : i64} {
  func.func @_bn_apply_kernel(%arg0: i32, %arg1: memref<32x128xbf16, #tpu.memory_space<vmem>>, %arg2: memref<1x128xf32, #tpu.memory_space<vmem>>, %arg3: memref<1x128xf32, #tpu.memory_space<vmem>>, %arg4: memref<32x128xbf16, #tpu.memory_space<vmem>>) attributes {dimension_semantics = [#tpu.dimension_semantics<parallel>], iteration_bounds = array<i64: 2>, scalar_prefetch = 0 : i64, scratch_operands = 0 : i64, tpu.core_type = #tpu.core_type<tc>, window_params = [{transform_indices = @transform_0, window_bounds = array<i64: 32, 128>}, {pipeline_mode = #tpu.pipeline_mode<synchronous>, transform_indices = @transform_1, window_bounds = array<i64: 1, 128>}, {pipeline_mode = #tpu.pipeline_mode<synchronous>, transform_indices = @transform_2, window_bounds = array<i64: 1, 128>}, {transform_indices = @transform_3, window_bounds = array<i64: 32, 128>}]} {
    %c0 = arith.constant 0 : index
    %c0_0 = arith.constant 0 : index
    %0 = vector.load %arg1[%c0, %c0_0] : memref<32x128xbf16, #tpu.memory_space<vmem>>, vector<32x128xbf16>
    %1 = arith.extf %0 : vector<32x128xbf16> to vector<32x128xf32>
    %c0_1 = arith.constant 0 : index
    %c0_2 = arith.constant 0 : index
    %2 = vector.load %arg2[%c0_1, %c0_2] : memref<1x128xf32, #tpu.memory_space<vmem>>, vector<1x128xf32>
    %3 = vector.broadcast %2 : vector<1x128xf32> to vector<32x128xf32>
    %4 = arith.mulf %1, %3 : vector<32x128xf32>
    %c0_3 = arith.constant 0 : index
    %c0_4 = arith.constant 0 : index
    %5 = vector.load %arg3[%c0_3, %c0_4] : memref<1x128xf32, #tpu.memory_space<vmem>>, vector<1x128xf32>
    %6 = vector.broadcast %5 : vector<1x128xf32> to vector<32x128xf32>
    %7 = arith.addf %4, %6 : vector<32x128xf32>
    %8 = arith.truncf %7 : vector<32x128xf32> to vector<32x128xbf16>
    %c0_5 = arith.constant 0 : index
    %c0_6 = arith.constant 0 : index
    %9 = vector.load %arg4[%c0_5, %c0_6] : memref<32x128xbf16, #tpu.memory_space<vmem>>, vector<32x128xbf16>
    tpu.vector_store %arg4[%c0_5, %c0_6], %8 {strides = array<i32>} : memref<32x128xbf16, #tpu.memory_space<vmem>>, vector<32x128xbf16>,
    return
  }
  func.func @transform_0(%arg0: i32) -> (i32, i32) {
    %c0_i32 = arith.constant 0 : i32
    %c0_i32_0 = arith.constant 0 : i32
    return %arg0, %c0_i32 : i32, i32
  }
  func.func @transform_1(%arg0: i32) -> (i32, i32) {
    %c0_i32 = arith.constant 0 : i32
    %c0_i32_0 = arith.constant 0 : i32
    %c0_i32_1 = arith.constant 0 : i32
    return %c0_i32, %c0_i32_0 : i32, i32
  }
  func.func @transform_2(%arg0: i32) -> (i32, i32) {
    %c0_i32 = arith.constant 0 : i32
    %c0_i32_0 = arith.constant 0 : i32
    %c0_i32_1 = arith.constant 0 : i32
    return %c0_i32, %c0_i32_0 : i32, i32
  }
  func.func @transform_3(%arg0: i32) -> (i32, i32) {
    %c0_i32 = arith.constant 0 : i32
    %c0_i32_0 = arith.constant 0 : i32
    return %arg0, %c0_i32 : i32, i32
  }
}

module attributes {stable_mosaic.version = 11 : i64} {
  func.func @_conv_gemm_kernel(%arg0: i32, %arg1: i32, %arg2: i32, %arg3: memref<16x2048xbf16, #tpu.memory_space<vmem>>, %arg4: memref<2048x128xbf16, #tpu.memory_space<vmem>>, %arg5: memref<1x128xf32, #tpu.memory_space<vmem>>, %arg6: memref<16x128xbf16, #tpu.memory_space<vmem>>, %arg7: memref<8x128xf32, #tpu.memory_space<vmem>>, %arg8: memref<8x128xf32, #tpu.memory_space<vmem>>, %arg9: memref<16x128xf32, #tpu.memory_space<vmem>>) attributes {dimension_semantics = [#tpu.dimension_semantics<parallel>, #tpu.dimension_semantics<parallel>, #tpu.dimension_semantics<arbitrary>], iteration_bounds = array<i64: 1, 2, 3>, scalar_prefetch = 0 : i64, scratch_operands = 1 : i64, tpu.core_type = #tpu.core_type<tc>, window_params = [{transform_indices = @transform_0, window_bounds = array<i64: 16, 2048>}, {transform_indices = @transform_1, window_bounds = array<i64: 2048, 128>}, {transform_indices = @transform_2, window_bounds = array<i64: 1, 128>}, {transform_indices = @transform_3, window_bounds = array<i64: 16, 128>}, {transform_indices = @transform_4, window_bounds = array<i64: 8, 128>}, {transform_indices = @transform_5, window_bounds = array<i64: 8, 128>}]} {
    %c0_i32 = arith.constant 0 : i32
    %0 = arith.cmpi eq, %arg2, %c0_i32 : i32
    %1 = arith.extui %0 : i1 to i32
    %c0_i32_0 = arith.constant 0 : i32
    %2 = arith.cmpi ne, %1, %c0_i32_0 : i32
    scf.if %2 {
      %cst_9 = arith.constant 0.000000e+00 : f32
      %12 = vector.broadcast %cst_9 : f32 to vector<16x128xf32>
      %c0_10 = arith.constant 0 : index
      %c0_11 = arith.constant 0 : index
      %13 = vector.load %arg9[%c0_10, %c0_11] : memref<16x128xf32, #tpu.memory_space<vmem>>, vector<16x128xf32>
      tpu.vector_store %arg9[%c0_10, %c0_11], %12 {strides = array<i32>} : memref<16x128xf32, #tpu.memory_space<vmem>>, vector<16x128xf32>,
    } else {
    }
    %c0 = arith.constant 0 : index
    %c0_1 = arith.constant 0 : index
    %3 = vector.load %arg9[%c0, %c0_1] : memref<16x128xf32, #tpu.memory_space<vmem>>, vector<16x128xf32>
    %c0_2 = arith.constant 0 : index
    %c0_3 = arith.constant 0 : index
    %4 = vector.load %arg3[%c0_2, %c0_3] : memref<16x2048xbf16, #tpu.memory_space<vmem>>, vector<16x2048xbf16>
    %c0_4 = arith.constant 0 : index
    %c0_5 = arith.constant 0 : index
    %5 = vector.load %arg4[%c0_4, %c0_5] : memref<2048x128xbf16, #tpu.memory_space<vmem>>, vector<2048x128xbf16>
    %cst = arith.constant dense<0.000000e+00> : vector<16x128xf32>
    %6 = tpu.matmul %4, %5, %cst {dimension_numbers = #tpu.dot_dimension_numbers<[1], [0], [0], [1], [0, 0, 1, 1], [], []>} : vector<16x2048xbf16>, vector<2048x128xbf16>, vector<16x128xf32> -> vector<16x128xf32>
    %7 = arith.addf %3, %6 : vector<16x128xf32>
    %c0_6 = arith.constant 0 : index
    %c0_7 = arith.constant 0 : index
    %8 = vector.load %arg9[%c0_6, %c0_7] : memref<16x128xf32, #tpu.memory_space<vmem>>, vector<16x128xf32>
    tpu.vector_store %arg9[%c0_6, %c0_7], %7 {strides = array<i32>} : memref<16x128xf32, #tpu.memory_space<vmem>>, vector<16x128xf32>,
    %c2_i32 = arith.constant 2 : i32
    %9 = arith.cmpi eq, %arg2, %c2_i32 : i32
    %10 = arith.extui %9 : i1 to i32
    %c0_i32_8 = arith.constant 0 : i32
    %11 = arith.cmpi ne, %10, %c0_i32_8 : i32
    scf.if %11 {
      %c0_9 = arith.constant 0 : index
      %c0_10 = arith.constant 0 : index
      %12 = vector.load %arg9[%c0_9, %c0_10] : memref<16x128xf32, #tpu.memory_space<vmem>>, vector<16x128xf32>
      %c0_11 = arith.constant 0 : index
      %c0_12 = arith.constant 0 : index
      %13 = vector.load %arg5[%c0_11, %c0_12] : memref<1x128xf32, #tpu.memory_space<vmem>>, vector<1x128xf32>
      %14 = vector.broadcast %13 : vector<1x128xf32> to vector<16x128xf32>
      %15 = arith.addf %12, %14 : vector<16x128xf32>
      %cst_13 = arith.constant 0.000000e+00 : f32
      %16 = vector.broadcast %cst_13 : f32 to vector<16x128xf32>
      %17 = arith.cmpf oge, %15, %16 : vector<16x128xf32>
      %cst_14 = arith.constant 0.00999999977 : f32
      %18 = vector.broadcast %cst_14 : f32 to vector<16x128xf32>
      %19 = arith.mulf %18, %15 : vector<16x128xf32>
      %20 = arith.select %17, %15, %19 : vector<16x128xi1>, vector<16x128xf32>
      %21 = arith.truncf %20 : vector<16x128xf32> to vector<16x128xbf16>
      %c0_15 = arith.constant 0 : index
      %c0_16 = arith.constant 0 : index
      %22 = vector.load %arg6[%c0_15, %c0_16] : memref<16x128xbf16, #tpu.memory_space<vmem>>, vector<16x128xbf16>
      tpu.vector_store %arg6[%c0_15, %c0_16], %21 {strides = array<i32>} : memref<16x128xbf16, #tpu.memory_space<vmem>>, vector<16x128xbf16>,
      %23 = tpu.iota {dimensions = array<i32: 0>} : vector<16x128xi32>
      %c16_i32 = arith.constant 16 : i32
      %24 = arith.muli %arg0, %c16_i32 : i32
      %c16_i32_17 = arith.constant 16 : i32
      %25 = arith.subi %c16_i32_17, %24 : i32
      %26 = vector.broadcast %25 : i32 to vector<16x128xi32>
      %27 = arith.cmpi slt, %23, %26 : vector<16x128xi32>
      %cst_18 = arith.constant 0.000000e+00 : f32
      %28 = vector.broadcast %cst_18 : f32 to vector<16x128xf32>
      %29 = arith.select %27, %20, %28 : vector<16x128xi1>, vector<16x128xf32>
      %cst_19 = arith.constant dense<0.000000e+00> : vector<128xf32>
      %30 = vector.multi_reduction <add>, %29, %cst_19 [0] : vector<16x128xf32> to vector<128xf32>
      %31 = vector.shape_cast %30 : vector<128xf32> to vector<1x128xf32>
      %32 = arith.mulf %29, %29 : vector<16x128xf32>
      %cst_20 = arith.constant dense<0.000000e+00> : vector<128xf32>
      %33 = vector.multi_reduction <add>, %32, %cst_20 [0] : vector<16x128xf32> to vector<128xf32>
      %34 = vector.shape_cast %33 : vector<128xf32> to vector<1x128xf32>
      %35 = vector.shape_cast %31 : vector<1x128xf32> to vector<1x128xf32>
      %36 = vector.broadcast %35 : vector<1x128xf32> to vector<8x128xf32>
      %c0_21 = arith.constant 0 : index
      %c0_22 = arith.constant 0 : index
      %37 = vector.load %arg7[%c0_21, %c0_22] : memref<8x128xf32, #tpu.memory_space<vmem>>, vector<8x128xf32>
      tpu.vector_store %arg7[%c0_21, %c0_22], %36 {strides = array<i32>} : memref<8x128xf32, #tpu.memory_space<vmem>>, vector<8x128xf32>,
      %38 = vector.shape_cast %34 : vector<1x128xf32> to vector<1x128xf32>
      %39 = vector.broadcast %38 : vector<1x128xf32> to vector<8x128xf32>
      %c0_23 = arith.constant 0 : index
      %c0_24 = arith.constant 0 : index
      %40 = vector.load %arg8[%c0_23, %c0_24] : memref<8x128xf32, #tpu.memory_space<vmem>>, vector<8x128xf32>
      tpu.vector_store %arg8[%c0_23, %c0_24], %39 {strides = array<i32>} : memref<8x128xf32, #tpu.memory_space<vmem>>, vector<8x128xf32>,
    } else {
    }
    return
  }
  func.func @transform_0(%arg0: i32, %arg1: i32, %arg2: i32) -> (i32, i32) {
    %c0_i32 = arith.constant 0 : i32
    return %arg0, %arg2 : i32, i32
  }
  func.func @transform_1(%arg0: i32, %arg1: i32, %arg2: i32) -> (i32, i32) {
    %c0_i32 = arith.constant 0 : i32
    return %arg2, %arg1 : i32, i32
  }
  func.func @transform_2(%arg0: i32, %arg1: i32, %arg2: i32) -> (i32, i32) {
    %c0_i32 = arith.constant 0 : i32
    %c0_i32_0 = arith.constant 0 : i32
    return %c0_i32, %arg1 : i32, i32
  }
  func.func @transform_3(%arg0: i32, %arg1: i32, %arg2: i32) -> (i32, i32) {
    %c0_i32 = arith.constant 0 : i32
    return %arg0, %arg1 : i32, i32
  }
  func.func @transform_4(%arg0: i32, %arg1: i32, %arg2: i32) -> (i32, i32) {
    %c0_i32 = arith.constant 0 : i32
    return %arg0, %arg1 : i32, i32
  }
  func.func @transform_5(%arg0: i32, %arg1: i32, %arg2: i32) -> (i32, i32) {
    %c0_i32 = arith.constant 0 : i32
    return %arg0, %arg1 : i32, i32
  }
}

module attributes {stable_mosaic.version = 11 : i64} {
  func.func @_bn_apply_kernel(%arg0: i32, %arg1: memref<16x256xbf16, #tpu.memory_space<vmem>>, %arg2: memref<1x256xf32, #tpu.memory_space<vmem>>, %arg3: memref<1x256xf32, #tpu.memory_space<vmem>>, %arg4: memref<16x256xbf16, #tpu.memory_space<vmem>>) attributes {dimension_semantics = [#tpu.dimension_semantics<parallel>], iteration_bounds = array<i64: 1>, scalar_prefetch = 0 : i64, scratch_operands = 0 : i64, tpu.core_type = #tpu.core_type<tc>, window_params = [{transform_indices = @transform_0, window_bounds = array<i64: 16, 256>}, {pipeline_mode = #tpu.pipeline_mode<synchronous>, transform_indices = @transform_1, window_bounds = array<i64: 1, 256>}, {pipeline_mode = #tpu.pipeline_mode<synchronous>, transform_indices = @transform_2, window_bounds = array<i64: 1, 256>}, {transform_indices = @transform_3, window_bounds = array<i64: 16, 256>}]} {
    %c0 = arith.constant 0 : index
    %c0_0 = arith.constant 0 : index
    %0 = vector.load %arg1[%c0, %c0_0] : memref<16x256xbf16, #tpu.memory_space<vmem>>, vector<16x256xbf16>
    %1 = arith.extf %0 : vector<16x256xbf16> to vector<16x256xf32>
    %c0_1 = arith.constant 0 : index
    %c0_2 = arith.constant 0 : index
    %2 = vector.load %arg2[%c0_1, %c0_2] : memref<1x256xf32, #tpu.memory_space<vmem>>, vector<1x256xf32>
    %3 = vector.broadcast %2 : vector<1x256xf32> to vector<16x256xf32>
    %4 = arith.mulf %1, %3 : vector<16x256xf32>
    %c0_3 = arith.constant 0 : index
    %c0_4 = arith.constant 0 : index
    %5 = vector.load %arg3[%c0_3, %c0_4] : memref<1x256xf32, #tpu.memory_space<vmem>>, vector<1x256xf32>
    %6 = vector.broadcast %5 : vector<1x256xf32> to vector<16x256xf32>
    %7 = arith.addf %4, %6 : vector<16x256xf32>
    %8 = arith.truncf %7 : vector<16x256xf32> to vector<16x256xbf16>
    %c0_5 = arith.constant 0 : index
    %c0_6 = arith.constant 0 : index
    %9 = vector.load %arg4[%c0_5, %c0_6] : memref<16x256xbf16, #tpu.memory_space<vmem>>, vector<16x256xbf16>
    tpu.vector_store %arg4[%c0_5, %c0_6], %8 {strides = array<i32>} : memref<16x256xbf16, #tpu.memory_space<vmem>>, vector<16x256xbf16>,
    return
  }
  func.func @transform_0(%arg0: i32) -> (i32, i32) {
    %c0_i32 = arith.constant 0 : i32
    %c0_i32_0 = arith.constant 0 : i32
    return %arg0, %c0_i32 : i32, i32
  }
  func.func @transform_1(%arg0: i32) -> (i32, i32) {
    %c0_i32 = arith.constant 0 : i32
    %c0_i32_0 = arith.constant 0 : i32
    %c0_i32_1 = arith.constant 0 : i32
    return %c0_i32, %c0_i32_0 : i32, i32
  }
  func.func @transform_2(%arg0: i32) -> (i32, i32) {
    %c0_i32 = arith.constant 0 : i32
    %c0_i32_0 = arith.constant 0 : i32
    %c0_i32_1 = arith.constant 0 : i32
    return %c0_i32, %c0_i32_0 : i32, i32
  }
  func.func @transform_3(%arg0: i32) -> (i32, i32) {
    %c0_i32 = arith.constant 0 : i32
    %c0_i32_0 = arith.constant 0 : i32
    return %arg0, %c0_i32 : i32, i32
  }
}

module attributes {stable_mosaic.version = 11 : i64} {
  func.func @_mlp_kernel(%arg0: i32, %arg1: memref<16x128xbf16, #tpu.memory_space<vmem>>, %arg2: memref<128x1024xbf16, #tpu.memory_space<vmem>>, %arg3: memref<1x1024xf32, #tpu.memory_space<vmem>>, %arg4: memref<1024x128xbf16, #tpu.memory_space<vmem>>, %arg5: memref<1x128xf32, #tpu.memory_space<vmem>>, %arg6: memref<16x128xf32, #tpu.memory_space<vmem>>, %arg7: memref<16x1024xf32, #tpu.memory_space<vmem>>) attributes {dimension_semantics = [#tpu.dimension_semantics<arbitrary>], iteration_bounds = array<i64: 13>, scalar_prefetch = 0 : i64, scratch_operands = 1 : i64, tpu.core_type = #tpu.core_type<tc>, window_params = [{transform_indices = @transform_0, window_bounds = array<i64: 16, 128>}, {transform_indices = @transform_1, window_bounds = array<i64: 128, 1024>}, {pipeline_mode = #tpu.pipeline_mode<synchronous>, transform_indices = @transform_2, window_bounds = array<i64: 1, 1024>}, {pipeline_mode = #tpu.pipeline_mode<synchronous>, transform_indices = @transform_3, window_bounds = array<i64: 1024, 128>}, {pipeline_mode = #tpu.pipeline_mode<synchronous>, transform_indices = @transform_4, window_bounds = array<i64: 1, 128>}, {pipeline_mode = #tpu.pipeline_mode<synchronous>, transform_indices = @transform_5, window_bounds = array<i64: 16, 128>}]} {
    %c0_i32 = arith.constant 0 : i32
    %0 = arith.cmpi eq, %arg0, %c0_i32 : i32
    %1 = arith.extui %0 : i1 to i32
    %c0_i32_0 = arith.constant 0 : i32
    %2 = arith.cmpi ne, %1, %c0_i32_0 : i32
    scf.if %2 {
      %cst_9 = arith.constant 0.000000e+00 : f32
      %12 = vector.broadcast %cst_9 : f32 to vector<16x1024xf32>
      %c0_10 = arith.constant 0 : index
      %c0_11 = arith.constant 0 : index
      %13 = vector.load %arg7[%c0_10, %c0_11] : memref<16x1024xf32, #tpu.memory_space<vmem>>, vector<16x1024xf32>
      tpu.vector_store %arg7[%c0_10, %c0_11], %12 {strides = array<i32>} : memref<16x1024xf32, #tpu.memory_space<vmem>>, vector<16x1024xf32>,
    } else {
    }
    %c0 = arith.constant 0 : index
    %c0_1 = arith.constant 0 : index
    %3 = vector.load %arg7[%c0, %c0_1] : memref<16x1024xf32, #tpu.memory_space<vmem>>, vector<16x1024xf32>
    %c0_2 = arith.constant 0 : index
    %c0_3 = arith.constant 0 : index
    %4 = vector.load %arg1[%c0_2, %c0_3] : memref<16x128xbf16, #tpu.memory_space<vmem>>, vector<16x128xbf16>
    %c0_4 = arith.constant 0 : index
    %c0_5 = arith.constant 0 : index
    %5 = vector.load %arg2[%c0_4, %c0_5] : memref<128x1024xbf16, #tpu.memory_space<vmem>>, vector<128x1024xbf16>
    %cst = arith.constant dense<0.000000e+00> : vector<16x1024xf32>
    %6 = tpu.matmul %4, %5, %cst {dimension_numbers = #tpu.dot_dimension_numbers<[1], [0], [0], [1], [0, 0, 1, 1], [], []>} : vector<16x128xbf16>, vector<128x1024xbf16>, vector<16x1024xf32> -> vector<16x1024xf32>
    %7 = arith.addf %3, %6 : vector<16x1024xf32>
    %c0_6 = arith.constant 0 : index
    %c0_7 = arith.constant 0 : index
    %8 = vector.load %arg7[%c0_6, %c0_7] : memref<16x1024xf32, #tpu.memory_space<vmem>>, vector<16x1024xf32>
    tpu.vector_store %arg7[%c0_6, %c0_7], %7 {strides = array<i32>} : memref<16x1024xf32, #tpu.memory_space<vmem>>, vector<16x1024xf32>,
    %c12_i32 = arith.constant 12 : i32
    %9 = arith.cmpi eq, %arg0, %c12_i32 : i32
    %10 = arith.extui %9 : i1 to i32
    %c0_i32_8 = arith.constant 0 : i32
    %11 = arith.cmpi ne, %10, %c0_i32_8 : i32
    scf.if %11 {
      %c0_9 = arith.constant 0 : index
      %c0_10 = arith.constant 0 : index
      %12 = vector.load %arg7[%c0_9, %c0_10] : memref<16x1024xf32, #tpu.memory_space<vmem>>, vector<16x1024xf32>
      %c0_11 = arith.constant 0 : index
      %c0_12 = arith.constant 0 : index
      %13 = vector.load %arg3[%c0_11, %c0_12] : memref<1x1024xf32, #tpu.memory_space<vmem>>, vector<1x1024xf32>
      %14 = vector.broadcast %13 : vector<1x1024xf32> to vector<16x1024xf32>
      %15 = arith.addf %12, %14 : vector<16x1024xf32>
      %cst_13 = arith.constant 0.000000e+00 : f32
      %16 = vector.broadcast %cst_13 : f32 to vector<16x1024xf32>
      %17 = arith.cmpf oge, %15, %16 : vector<16x1024xf32>
      %cst_14 = arith.constant 0.00999999977 : f32
      %18 = vector.broadcast %cst_14 : f32 to vector<16x1024xf32>
      %19 = arith.mulf %18, %15 : vector<16x1024xf32>
      %20 = arith.select %17, %15, %19 : vector<16x1024xi1>, vector<16x1024xf32>
      %21 = arith.truncf %20 : vector<16x1024xf32> to vector<16x1024xbf16>
      %c0_15 = arith.constant 0 : index
      %c0_16 = arith.constant 0 : index
      %22 = vector.load %arg4[%c0_15, %c0_16] : memref<1024x128xbf16, #tpu.memory_space<vmem>>, vector<1024x128xbf16>
      %cst_17 = arith.constant dense<0.000000e+00> : vector<16x128xf32>
      %23 = tpu.matmul %21, %22, %cst_17 {dimension_numbers = #tpu.dot_dimension_numbers<[1], [0], [0], [1], [0, 0, 1, 1], [], []>} : vector<16x1024xbf16>, vector<1024x128xbf16>, vector<16x128xf32> -> vector<16x128xf32>
      %c0_18 = arith.constant 0 : index
      %c0_19 = arith.constant 0 : index
      %24 = vector.load %arg5[%c0_18, %c0_19] : memref<1x128xf32, #tpu.memory_space<vmem>>, vector<1x128xf32>
      %25 = vector.broadcast %24 : vector<1x128xf32> to vector<16x128xf32>
      %26 = arith.addf %23, %25 : vector<16x128xf32>
      %c0_20 = arith.constant 0 : index
      %c0_21 = arith.constant 0 : index
      %27 = vector.load %arg6[%c0_20, %c0_21] : memref<16x128xf32, #tpu.memory_space<vmem>>, vector<16x128xf32>
      tpu.vector_store %arg6[%c0_20, %c0_21], %26 {strides = array<i32>} : memref<16x128xf32, #tpu.memory_space<vmem>>, vector<16x128xf32>,
    } else {
    }
    return
  }
  func.func @transform_0(%arg0: i32) -> (i32, i32) {
    %c0_i32 = arith.constant 0 : i32
    %c0_i32_0 = arith.constant 0 : i32
    return %c0_i32, %arg0 : i32, i32
  }
  func.func @transform_1(%arg0: i32) -> (i32, i32) {
    %c0_i32 = arith.constant 0 : i32
    %c0_i32_0 = arith.constant 0 : i32
    return %arg0, %c0_i32 : i32, i32
  }
  func.func @transform_2(%arg0: i32) -> (i32, i32) {
    %c0_i32 = arith.constant 0 : i32
    %c0_i32_0 = arith.constant 0 : i32
    %c0_i32_1 = arith.constant 0 : i32
    return %c0_i32, %c0_i32_0 : i32, i32
  }
  func.func @transform_3(%arg0: i32) -> (i32, i32) {
    %c0_i32 = arith.constant 0 : i32
    %c0_i32_0 = arith.constant 0 : i32
    %c0_i32_1 = arith.constant 0 : i32
    return %c0_i32, %c0_i32_0 : i32, i32
  }
  func.func @transform_4(%arg0: i32) -> (i32, i32) {
    %c0_i32 = arith.constant 0 : i32
    %c0_i32_0 = arith.constant 0 : i32
    %c0_i32_1 = arith.constant 0 : i32
    return %c0_i32, %c0_i32_0 : i32, i32
  }
  func.func @transform_5(%arg0: i32) -> (i32, i32) {
    %c0_i32 = arith.constant 0 : i32
    %c0_i32_0 = arith.constant 0 : i32
    %c0_i32_1 = arith.constant 0 : i32
    return %c0_i32, %c0_i32_0 : i32, i32
  }
}

</mosaic_0001>

<bundles_post_ra>
// kernel: _lambda_.10
= control target key start
LH: loop header
LB: loop body
LE: loop exit
PB: predicated region body
PF: predicated region fallthrough
CT: control target
= control target key end

     0   :  { %s1347_s12 = smov 0   ;;  %s1577_s0 = inlined_call_operand.vmem [shape: bf16[1536,128], index: 0, kind: input, shape index: {}]   ;;  %s1578_s1 = inlined_call_operand.vmem [shape: f32[1,128], index: 1, kind: input, shape index: {}]   ;;  %s1579_s2 = inlined_call_operand.vmem [shape: f32[1,128], index: 2, kind: input, shape index: {}]   ;;  %s1580_s3 = inlined_call_operand.vmem [shape: bf16[1536,128], index: 3, kind: output, shape index: {}]  }
   0x1 LB: > { %s820_s13 = sadd.s32 4294967295, %s1325_s12   ;;  %p824_p0 = scmp.ge.s32.totalorder %s1325_s12, 1  ;;  %s1325_s12 = sphi %s1347_s12, %s13_s12  }
   0x2   : > { %p138_p1 = scmp.lt.s32.totalorder %s1325_s12, 4 }
   0x4   : > { %p139_p2 = pnand %p824_p0, %p138_p1 }
   0x5   : > { %s825_s14 = sshll.u32 (!%p139_p2), %s820_s13, 6  ;;  %v1368_v0 = vld [vmem:[%s1578_s1] ss:$0 sm:$0xff] (!%p139_p2) }
   0x6   : > { %142 = sbr.rel (%p139_p2) target bundleno = 78 (0x4e), region = 32  ;;  %p163_p3 = scmp.lt.s32.totalorder (!%p139_p2), %s825_s14, 191  ;;  %v1377_v9 = vld [vmem:[%s1579_s2] ss:$0 sm:$0xff] (!%p139_p2) }
   0xd   : > { %s1582_s14 = smov (!%p163_p3, %s825_s14), 191 }
   0xe   : > { %s826_s15 = sshll.u32 %s1582_s14, 2 }
   0xf   : > { %s1363_s18 = scalar_lea.vmem %s1577_s0, %s826_s15  ;;  %s1398_s25 = scalar_lea.vmem %s1580_s3, %s826_s15 }
  0x10   : > { %v962_v1 = vld [vmem:[%s1363_s18] sm:$0xff]   ;;  %v1249_v2 = vld [vmem:[%s1363_s18 + $0x8] sm:$0xff]   ;;  %v1250_v3 = vld [vmem:[%s1363_s18 + $0x10] sm:$0xff]  }
  0x11   : > { %v963_v4 = vunpack.c.l.bf16 %v962_v1  ;;  %v964_v5 = vunpack.c.h.bf16 %v962_v1  ;;  %v967_v6 = vunpack.c.l.bf16 %v1249_v2  ;;  %v968_v7 = vunpack.c.h.bf16 %v1249_v2  ;;  %v1251_v8 = vld [vmem:[%s1363_s18 + $0x18] sm:$0xff]   ;;  %v1252_v22 = vld [vmem:[%s1363_s18 + $0x20] sm:$0xff]   ;;  %v1253_v27 = vld [vmem:[%s1363_s18 + $0x28] sm:$0xff]  }
  0x12   : > { %v971_v10 = vunpack.c.l.bf16 %v1250_v3  ;;  %v972_v11 = vunpack.c.h.bf16 %v1250_v3  ;;  %v975_v12 = vunpack.c.l.bf16 %v1251_v8  ;;  %v976_v13 = vunpack.c.h.bf16 %v1251_v8  ;;  %v1254_v32 = vld [vmem:[%s1363_s18 + $0x30] sm:$0xff]   ;;  %v1255_v37 = vld [vmem:[%s1363_s18 + $0x38] sm:$0xff]   ;;  %v1256_v50 = vld [vmem:[%s1363_s18 + $0x40] sm:$0xff]  }
  0x13   : > { %v309_v14 = vmul.f32 %v963_v4, %v1368_v0  ;;  %v310_v15 = vmul.f32 %v964_v5, %v1368_v0  ;;  %v311_v16 = vmul.f32 %v967_v6, %v1368_v0  ;;  %v312_v17 = vmul.f32 %v968_v7, %v1368_v0  ;;  %v1257_v59 = vld [vmem:[%s1363_s18 + $0x48] sm:$0xff]   ;;  %v1258_v1 = vld [vmem:[%s1363_s18 + $0x50] sm:$0xff]   ;;  %v1259_v6 = vld [vmem:[%s1363_s18 + $0x58] sm:$0xff]  }
  0x14   : > { %v313_v18 = vmul.f32 %v971_v10, %v1368_v0  ;;  %v314_v19 = vmul.f32 %v972_v11, %v1368_v0  ;;  %v315_v20 = vmul.f32 %v975_v12, %v1368_v0  ;;  %v316_v21 = vmul.f32 %v976_v13, %v1368_v0 }
  0x15   : > { %v380_v23 = vadd.f32 %v1377_v9, %v309_v14  ;;  %v381_v24 = vadd.f32 %v1377_v9, %v310_v15  ;;  %v382_v25 = vadd.f32 %v1377_v9, %v311_v16  ;;  %v383_v26 = vadd.f32 %v1377_v9, %v312_v17  ;;  %v1260_v16 = vld [vmem:[%s1363_s18 + $0x60] sm:$0xff]  }
  0x16   : > { %v384_v28 = vadd.f32 %v1377_v9, %v313_v18  ;;  %v385_v29 = vadd.f32 %v1377_v9, %v314_v19  ;;  %v386_v30 = vadd.f32 %v1377_v9, %v315_v20  ;;  %v387_v31 = vadd.f32 %v1377_v9, %v316_v21 }
  0x17   : > { %v1092_v33 = vpack.c.bf16 %v381_v24, %v380_v23  ;;  %v1097_v34 = vpack.c.bf16 %v383_v26, %v382_v25  ;;  %v979_v35 = vunpack.c.l.bf16 %v1252_v22  ;;  %v980_v36 = vunpack.c.h.bf16 %v1252_v22 }
  0x18   : > { %v1102_v38 = vpack.c.bf16 %v385_v29, %v384_v28  ;;  %v1107_v39 = vpack.c.bf16 %v387_v31, %v386_v30  ;;  %v983_v40 = vunpack.c.l.bf16 %v1253_v27  ;;  %v984_v41 = vunpack.c.h.bf16 %v1253_v27  ;;  %v1261_v29 = vld [vmem:[%s1363_s18 + $0x68] sm:$0xff]  }
  0x19   : > { %1093 = vst [vmem:[%s1398_s25] sm:$0xff] %v1092_v33   ;;  %1280 = vst [vmem:[%s1398_s25 + $0x8] sm:$0xff] %v1097_v34   ;;  %v317_v42 = vmul.f32 %v979_v35, %v1368_v0  ;;  %v318_v43 = vmul.f32 %v980_v36, %v1368_v0  ;;  %v987_v44 = vunpack.c.l.bf16 %v1254_v32  ;;  %v988_v45 = vunpack.c.h.bf16 %v1254_v32  ;;  %v1262_v34 = vld [vmem:[%s1363_s18 + $0x70] sm:$0xff]  }
  0x1a   : > { %1281 = vst [vmem:[%s1398_s25 + $0x10] sm:$0xff] %v1102_v38   ;;  %1282 = vst [vmem:[%s1398_s25 + $0x18] sm:$0xff] %v1107_v39   ;;  %v319_v46 = vmul.f32 %v983_v40, %v1368_v0  ;;  %v320_v47 = vmul.f32 %v984_v41, %v1368_v0  ;;  %v991_v48 = vunpack.c.l.bf16 %v1255_v37  ;;  %v992_v49 = vunpack.c.h.bf16 %v1255_v37  ;;  %v1263_v39 = vld [vmem:[%s1363_s18 + $0x78] sm:$0xff]  }
  0x1b   : > { %v388_v51 = vadd.f32 %v1377_v9, %v317_v42  ;;  %v389_v52 = vadd.f32 %v1377_v9, %v318_v43  ;;  %v321_v53 = vmul.f32 %v987_v44, %v1368_v0  ;;  %v322_v54 = vmul.f32 %v988_v45, %v1368_v0 }
  0x1c   : > { %v390_v55 = vadd.f32 %v1377_v9, %v319_v46  ;;  %v391_v56 = vadd.f32 %v1377_v9, %v320_v47  ;;  %v323_v57 = vmul.f32 %v991_v48, %v1368_v0  ;;  %v324_v58 = vmul.f32 %v992_v49, %v1368_v0  ;;  %v1264_v48 = vld [vmem:[%s1363_s18 + $0x80] sm:$0xff]  }
  0x1d   : > { %v1112_v60 = vpack.c.bf16 %v389_v52, %v388_v51  ;;  %v392_v61 = vadd.f32 %v1377_v9, %v321_v53  ;;  %v393_v62 = vadd.f32 %v1377_v9, %v322_v54  ;;  %v995_v63 = vunpack.c.l.bf16 %v1256_v50 }
  0x1e   : > { %v1117_v2 = vpack.c.bf16 %v391_v56, %v390_v55  ;;  %v394_v3 = vadd.f32 %v1377_v9, %v323_v57  ;;  %v395_v4 = vadd.f32 %v1377_v9, %v324_v58  ;;  %v996_v5 = vunpack.c.h.bf16 %v1256_v50 }
  0x1f   : > { %1283 = vst [vmem:[%s1398_s25 + $0x20] sm:$0xff] %v1112_v60   ;;  %v1122_v7 = vpack.c.bf16 %v393_v62, %v392_v61  ;;  %v325_v8 = vmul.f32 %v995_v63, %v1368_v0  ;;  %v999_v10 = vunpack.c.l.bf16 %v1257_v59  ;;  %v1000_v11 = vunpack.c.h.bf16 %v1257_v59  ;;  %v1265_v61 = vld [vmem:[%s1363_s18 + $0x88] sm:$0xff]  }
  0x20   : > { %1284 = vst [vmem:[%s1398_s25 + $0x28] sm:$0xff] %v1117_v2   ;;  %v1127_v12 = vpack.c.bf16 %v395_v4, %v394_v3  ;;  %v326_v13 = vmul.f32 %v996_v5, %v1368_v0  ;;  %v1003_v14 = vunpack.c.l.bf16 %v1258_v1  ;;  %v1004_v15 = vunpack.c.h.bf16 %v1258_v1  ;;  %v1266_v3 = vld [vmem:[%s1363_s18 + $0x90] sm:$0xff]  }
  0x21   : > { %1285 = vst [vmem:[%s1398_s25 + $0x30] sm:$0xff] %v1122_v7   ;;  %v396_v17 = vadd.f32 %v1377_v9, %v325_v8  ;;  %v327_v18 = vmul.f32 %v999_v10, %v1368_v0  ;;  %v328_v19 = vmul.f32 %v1000_v11, %v1368_v0  ;;  %v1007_v20 = vunpack.c.l.bf16 %v1259_v6  ;;  %v1267_v8 = vld [vmem:[%s1363_s18 + $0x98] sm:$0xff]  }
  0x22   : > { %1286 = vst [vmem:[%s1398_s25 + $0x38] sm:$0xff] %v1127_v12   ;;  %v397_v21 = vadd.f32 %v1377_v9, %v326_v13  ;;  %v329_v22 = vmul.f32 %v1003_v14, %v1368_v0  ;;  %v330_v23 = vmul.f32 %v1004_v15, %v1368_v0  ;;  %v1008_v24 = vunpack.c.h.bf16 %v1259_v6 }
  0x23   : > { %v398_v25 = vadd.f32 %v1377_v9, %v327_v18  ;;  %v399_v26 = vadd.f32 %v1377_v9, %v328_v19  ;;  %v331_v27 = vmul.f32 %v1007_v20, %v1368_v0  ;;  %v1011_v28 = vunpack.c.l.bf16 %v1260_v16  ;;  %v1268_v18 = vld [vmem:[%s1363_s18 + $0xa0] sm:$0xff]  }
  0x24   : > { %v1132_v30 = vpack.c.bf16 %v397_v21, %v396_v17  ;;  %v400_v31 = vadd.f32 %v1377_v9, %v329_v22  ;;  %v401_v32 = vadd.f32 %v1377_v9, %v330_v23  ;;  %v332_v33 = vmul.f32 %v1008_v24, %v1368_v0 }
  0x25   : > { %v1137_v35 = vpack.c.bf16 %v399_v26, %v398_v25  ;;  %v402_v36 = vadd.f32 %v1377_v9, %v331_v27  ;;  %v1012_v37 = vunpack.c.h.bf16 %v1260_v16  ;;  %v333_v38 = vmul.f32 %v1011_v28, %v1368_v0 }
  0x26   : > { %1287 = vst [vmem:[%s1398_s25 + $0x40] sm:$0xff] %v1132_v30   ;;  %v1142_v40 = vpack.c.bf16 %v401_v32, %v400_v31  ;;  %v403_v41 = vadd.f32 %v1377_v9, %v332_v33  ;;  %v1015_v42 = vunpack.c.l.bf16 %v1261_v29  ;;  %v1016_v43 = vunpack.c.h.bf16 %v1261_v29  ;;  %v1269_v31 = vld [vmem:[%s1363_s18 + $0xa8] sm:$0xff]  }
  0x27   : > { %1288 = vst [vmem:[%s1398_s25 + $0x48] sm:$0xff] %v1137_v35   ;;  %v334_v44 = vmul.f32 %v1012_v37, %v1368_v0  ;;  %v404_v45 = vadd.f32 %v1377_v9, %v333_v38  ;;  %v1019_v46 = vunpack.c.l.bf16 %v1262_v34  ;;  %v1020_v47 = vunpack.c.h.bf16 %v1262_v34 }
  0x28   : > { %1289 = vst [vmem:[%s1398_s25 + $0x50] sm:$0xff] %v1142_v40   ;;  %v1147_v49 = vpack.c.bf16 %v403_v41, %v402_v36  ;;  %v335_v50 = vmul.f32 %v1015_v42, %v1368_v0  ;;  %v336_v51 = vmul.f32 %v1016_v43, %v1368_v0  ;;  %v1023_v52 = vunpack.c.l.bf16 %v1263_v39  ;;  %v1270_v36 = vld [vmem:[%s1363_s18 + $0xb0] sm:$0xff]   ;;  %v1271_v41 = vld [vmem:[%s1363_s18 + $0xb8] sm:$0xff]  }
  0x29   : > { %v405_v53 = vadd.f32 %v1377_v9, %v334_v44  ;;  %v337_v54 = vmul.f32 %v1019_v46, %v1368_v0  ;;  %v338_v55 = vmul.f32 %v1020_v47, %v1368_v0  ;;  %v1024_v56 = vunpack.c.h.bf16 %v1263_v39 }
  0x2a   : > { %1290 = vst [vmem:[%s1398_s25 + $0x58] sm:$0xff] %v1147_v49   ;;  %v406_v57 = vadd.f32 %v1377_v9, %v335_v50  ;;  %v407_v58 = vadd.f32 %v1377_v9, %v336_v51  ;;  %v339_v59 = vmul.f32 %v1023_v52, %v1368_v0  ;;  %v1027_v60 = vunpack.c.l.bf16 %v1264_v48  ;;  %v1272_v50 = vld [vmem:[%s1363_s18 + $0xc0] sm:$0xff]  }
  0x2b   : > { %v1152_v62 = vpack.c.bf16 %v405_v53, %v404_v45  ;;  %v408_v63 = vadd.f32 %v1377_v9, %v337_v54  ;;  %v409_v1 = vadd.f32 %v1377_v9, %v338_v55  ;;  %v340_v2 = vmul.f32 %v1024_v56, %v1368_v0 }
  0x2c   : > { %v1157_v4 = vpack.c.bf16 %v407_v58, %v406_v57  ;;  %v410_v5 = vadd.f32 %v1377_v9, %v339_v59  ;;  %v1028_v6 = vunpack.c.h.bf16 %v1264_v48  ;;  %v341_v7 = vmul.f32 %v1027_v60, %v1368_v0 }
  0x2d   : > { %1291 = vst [vmem:[%s1398_s25 + $0x60] sm:$0xff] %v1152_v62   ;;  %v1162_v10 = vpack.c.bf16 %v409_v1, %v408_v63  ;;  %v411_v11 = vadd.f32 %v1377_v9, %v340_v2  ;;  %v1031_v12 = vunpack.c.l.bf16 %v1265_v61  ;;  %v1032_v13 = vunpack.c.h.bf16 %v1265_v61  ;;  %v1273_v63 = vld [vmem:[%s1363_s18 + $0xc8] sm:$0xff]  }
  0x2e   : > { %1292 = vst [vmem:[%s1398_s25 + $0x68] sm:$0xff] %v1157_v4   ;;  %v342_v14 = vmul.f32 %v1028_v6, %v1368_v0  ;;  %v412_v15 = vadd.f32 %v1377_v9, %v341_v7  ;;  %v1035_v16 = vunpack.c.l.bf16 %v1266_v3  ;;  %v1036_v17 = vunpack.c.h.bf16 %v1266_v3 }
  0x2f   : > { %1293 = vst [vmem:[%s1398_s25 + $0x70] sm:$0xff] %v1162_v10   ;;  %v1167_v19 = vpack.c.bf16 %v411_v11, %v410_v5  ;;  %v343_v20 = vmul.f32 %v1031_v12, %v1368_v0  ;;  %v344_v21 = vmul.f32 %v1032_v13, %v1368_v0  ;;  %v1039_v22 = vunpack.c.l.bf16 %v1267_v8  ;;  %v1274_v5 = vld [vmem:[%s1363_s18 + $0xd0] sm:$0xff]   ;;  %v1275_v11 = vld [vmem:[%s1363_s18 + $0xd8] sm:$0xff]  }
  0x30   : > { %v413_v23 = vadd.f32 %v1377_v9, %v342_v14  ;;  %v345_v24 = vmul.f32 %v1035_v16, %v1368_v0  ;;  %v346_v25 = vmul.f32 %v1036_v17, %v1368_v0  ;;  %v1040_v26 = vunpack.c.h.bf16 %v1267_v8 }
  0x31   : > { %1294 = vst [vmem:[%s1398_s25 + $0x78] sm:$0xff] %v1167_v19   ;;  %v414_v27 = vadd.f32 %v1377_v9, %v343_v20  ;;  %v415_v28 = vadd.f32 %v1377_v9, %v344_v21  ;;  %v347_v29 = vmul.f32 %v1039_v22, %v1368_v0  ;;  %v1043_v30 = vunpack.c.l.bf16 %v1268_v18  ;;  %v1276_v20 = vld [vmem:[%s1363_s18 + $0xe0] sm:$0xff]  }
  0x32   : > { %v1172_v32 = vpack.c.bf16 %v413_v23, %v412_v15  ;;  %v416_v33 = vadd.f32 %v1377_v9, %v345_v24  ;;  %v417_v34 = vadd.f32 %v1377_v9, %v346_v25  ;;  %v348_v35 = vmul.f32 %v1040_v26, %v1368_v0 }
  0x33   : > { %v1177_v37 = vpack.c.bf16 %v415_v28, %v414_v27  ;;  %v418_v38 = vadd.f32 %v1377_v9, %v347_v29  ;;  %v1044_v39 = vunpack.c.h.bf16 %v1268_v18  ;;  %v349_v40 = vmul.f32 %v1043_v30, %v1368_v0 }
  0x34   : > { %1295 = vst [vmem:[%s1398_s25 + $0x80] sm:$0xff] %v1172_v32   ;;  %v1182_v42 = vpack.c.bf16 %v417_v34, %v416_v33  ;;  %v419_v43 = vadd.f32 %v1377_v9, %v348_v35  ;;  %v1047_v44 = vunpack.c.l.bf16 %v1269_v31  ;;  %v1048_v45 = vunpack.c.h.bf16 %v1269_v31  ;;  %v1277_v33 = vld [vmem:[%s1363_s18 + $0xe8] sm:$0xff]  }
  0x35   : > { %1296 = vst [vmem:[%s1398_s25 + $0x88] sm:$0xff] %v1177_v37   ;;  %v350_v46 = vmul.f32 %v1044_v39, %v1368_v0  ;;  %v420_v47 = vadd.f32 %v1377_v9, %v349_v40  ;;  %v1051_v48 = vunpack.c.l.bf16 %v1270_v36  ;;  %v1052_v49 = vunpack.c.h.bf16 %v1270_v36 }
  0x36   : > { %1297 = vst [vmem:[%s1398_s25 + $0x90] sm:$0xff] %v1182_v42   ;;  %v1187_v51 = vpack.c.bf16 %v419_v43, %v418_v38  ;;  %v351_v52 = vmul.f32 %v1047_v44, %v1368_v0  ;;  %v352_v53 = vmul.f32 %v1048_v45, %v1368_v0  ;;  %v1055_v54 = vunpack.c.l.bf16 %v1271_v41  ;;  %v1278_v38 = vld [vmem:[%s1363_s18 + $0xf0] sm:$0xff]   ;;  %v1279_v43 = vld [vmem:[%s1363_s18 + $0xf8] sm:$0xff]  }
  0x37   : > { %v421_v55 = vadd.f32 %v1377_v9, %v350_v46  ;;  %v353_v56 = vmul.f32 %v1051_v48, %v1368_v0  ;;  %v354_v57 = vmul.f32 %v1052_v49, %v1368_v0  ;;  %v1056_v58 = vunpack.c.h.bf16 %v1271_v41 }
  0x38   : > { %1298 = vst [vmem:[%s1398_s25 + $0x98] sm:$0xff] %v1187_v51   ;;  %v422_v59 = vadd.f32 %v1377_v9, %v351_v52  ;;  %v423_v60 = vadd.f32 %v1377_v9, %v352_v53  ;;  %v355_v61 = vmul.f32 %v1055_v54, %v1368_v0  ;;  %v1059_v62 = vunpack.c.l.bf16 %v1272_v50 }
  0x39   : > { %v1192_v1 = vpack.c.bf16 %v421_v55, %v420_v47  ;;  %v424_v2 = vadd.f32 %v1377_v9, %v353_v56  ;;  %v425_v3 = vadd.f32 %v1377_v9, %v354_v57  ;;  %v356_v4 = vmul.f32 %v1056_v58, %v1368_v0 }
  0x3a   : > { %v1197_v6 = vpack.c.bf16 %v423_v60, %v422_v59  ;;  %v426_v7 = vadd.f32 %v1377_v9, %v355_v61  ;;  %v1060_v8 = vunpack.c.h.bf16 %v1272_v50  ;;  %v357_v10 = vmul.f32 %v1059_v62, %v1368_v0 }
  0x3b   : > { %1299 = vst [vmem:[%s1398_s25 + $0xa0] sm:$0xff] %v1192_v1   ;;  %v1202_v12 = vpack.c.bf16 %v425_v3, %v424_v2  ;;  %v427_v13 = vadd.f32 %v1377_v9, %v356_v4  ;;  %v1063_v14 = vunpack.c.l.bf16 %v1273_v63  ;;  %v1064_v15 = vunpack.c.h.bf16 %v1273_v63 }
  0x3c   : > { %1300 = vst [vmem:[%s1398_s25 + $0xa8] sm:$0xff] %v1197_v6   ;;  %v358_v16 = vmul.f32 %v1060_v8, %v1368_v0  ;;  %v428_v17 = vadd.f32 %v1377_v9, %v357_v10  ;;  %v1067_v18 = vunpack.c.l.bf16 %v1274_v5  ;;  %v1068_v19 = vunpack.c.h.bf16 %v1274_v5 }
  0x3d   : > { %1301 = vst [vmem:[%s1398_s25 + $0xb0] sm:$0xff] %v1202_v12   ;;  %v1207_v21 = vpack.c.bf16 %v427_v13, %v426_v7  ;;  %v359_v22 = vmul.f32 %v1063_v14, %v1368_v0  ;;  %v360_v23 = vmul.f32 %v1064_v15, %v1368_v0  ;;  %v1071_v24 = vunpack.c.l.bf16 %v1275_v11 }
  0x3e   : > { %v429_v25 = vadd.f32 %v1377_v9, %v358_v16  ;;  %v361_v26 = vmul.f32 %v1067_v18, %v1368_v0  ;;  %v362_v27 = vmul.f32 %v1068_v19, %v1368_v0  ;;  %v1072_v28 = vunpack.c.h.bf16 %v1275_v11 }
  0x3f   : > { %1302 = vst [vmem:[%s1398_s25 + $0xb8] sm:$0xff] %v1207_v21   ;;  %v430_v29 = vadd.f32 %v1377_v9, %v359_v22  ;;  %v431_v30 = vadd.f32 %v1377_v9, %v360_v23  ;;  %v363_v31 = vmul.f32 %v1071_v24, %v1368_v0  ;;  %v1075_v32 = vunpack.c.l.bf16 %v1276_v20 }
  0x40   : > { %v1212_v34 = vpack.c.bf16 %v429_v25, %v428_v17  ;;  %v432_v35 = vadd.f32 %v1377_v9, %v361_v26  ;;  %v433_v36 = vadd.f32 %v1377_v9, %v362_v27  ;;  %v364_v37 = vmul.f32 %v1072_v28, %v1368_v0 }
  0x41   : > { %v1217_v39 = vpack.c.bf16 %v431_v30, %v430_v29  ;;  %v434_v40 = vadd.f32 %v1377_v9, %v363_v31  ;;  %v1076_v41 = vunpack.c.h.bf16 %v1276_v20  ;;  %v365_v42 = vmul.f32 %v1075_v32, %v1368_v0 }
  0x42   : > { %1303 = vst [vmem:[%s1398_s25 + $0xc0] sm:$0xff] %v1212_v34   ;;  %v1222_v44 = vpack.c.bf16 %v433_v36, %v432_v35  ;;  %v435_v45 = vadd.f32 %v1377_v9, %v364_v37  ;;  %v1079_v46 = vunpack.c.l.bf16 %v1277_v33  ;;  %v1080_v47 = vunpack.c.h.bf16 %v1277_v33 }
  0x43   : > { %1304 = vst [vmem:[%s1398_s25 + $0xc8] sm:$0xff] %v1217_v39   ;;  %v366_v48 = vmul.f32 %v1076_v41, %v1368_v0  ;;  %v436_v49 = vadd.f32 %v1377_v9, %v365_v42  ;;  %v1083_v50 = vunpack.c.l.bf16 %v1278_v38  ;;  %v1084_v51 = vunpack.c.h.bf16 %v1278_v38 }
  0x44   : > { %1305 = vst [vmem:[%s1398_s25 + $0xd0] sm:$0xff] %v1222_v44   ;;  %v1227_v52 = vpack.c.bf16 %v435_v45, %v434_v40  ;;  %v367_v53 = vmul.f32 %v1079_v46, %v1368_v0  ;;  %v368_v54 = vmul.f32 %v1080_v47, %v1368_v0  ;;  %v1087_v55 = vunpack.c.l.bf16 %v1279_v43 }
  0x45   : > { %v437_v56 = vadd.f32 %v1377_v9, %v366_v48  ;;  %v369_v57 = vmul.f32 %v1083_v50, %v1368_v0  ;;  %v370_v58 = vmul.f32 %v1084_v51, %v1368_v0  ;;  %v1088_v59 = vunpack.c.h.bf16 %v1279_v43 }
  0x46   : > { %1306 = vst [vmem:[%s1398_s25 + $0xd8] sm:$0xff] %v1227_v52   ;;  %v438_v60 = vadd.f32 %v1377_v9, %v367_v53  ;;  %v439_v61 = vadd.f32 %v1377_v9, %v368_v54  ;;  %v371_v62 = vmul.f32 %v1087_v55, %v1368_v0 }
  0x47   : > { %v1232_v63 = vpack.c.bf16 %v437_v56, %v436_v49  ;;  %v440_v1 = vadd.f32 %v1377_v9, %v369_v57  ;;  %v441_v2 = vadd.f32 %v1377_v9, %v370_v58  ;;  %v372_v3 = vmul.f32 %v1088_v59, %v1368_v0 }
  0x48   : > { %v1237_v4 = vpack.c.bf16 %v439_v61, %v438_v60  ;;  %v442_v5 = vadd.f32 %v1377_v9, %v371_v62 }
  0x49   : > { %1307 = vst [vmem:[%s1398_s25 + $0xe0] sm:$0xff] %v1232_v63   ;;  %v1242_v6 = vpack.c.bf16 %v441_v2, %v440_v1  ;;  %v443_v7 = vadd.f32 %v1377_v9, %v372_v3 }
  0x4a   : > { %1308 = vst [vmem:[%s1398_s25 + $0xe8] sm:$0xff] %v1237_v4  }
  0x4b   : > { %1309 = vst [vmem:[%s1398_s25 + $0xf0] sm:$0xff] %v1242_v6   ;;  %v1247_v8 = vpack.c.bf16 %v443_v7, %v442_v5 }
  0x4d   : > { %1310 = vst [vmem:[%s1398_s25 + $0xf8] sm:$0xff] %v1247_v8  }
  0x4e PF: > { %s13_s12 = sadd.s32 1, %s1325_s12  }
  0x4f   : > { %p10_p4 = scmp.ge.s32.totalorder %s13_s12, 5  }
  0x51   :  { %12 = sbr.rel (!%p10_p4) target bundleno = 1 (0x1), region = 62 }

// kernel: _lambda_.9
= control target key start
LH: loop header
LB: loop body
LE: loop exit
PB: predicated region body
PF: predicated region fallthrough
CT: control target
= control target key end

     0   :  { %s2867_s18 = smov 0   ;;  %s2869_s19 = smov 0   ;;  %s3484_s0 = inlined_call_operand.vmem [shape: bf16[1536,256], index: 0, kind: input, shape index: {}]   ;;  %s3485_s1 = inlined_call_operand.vmem [shape: bf16[256,128], index: 1, kind: input, shape index: {}]   ;;  %s3486_s2 = inlined_call_operand.vmem [shape: f32[1,128], index: 2, kind: input, shape index: {}]   ;;  %s3487_s3 = inlined_call_operand.vmem [shape: bf16[1536,128], index: 3, kind: output, shape index: {0}]   ;;  %s3488_s4 = inlined_call_operand.vmem [shape: f32[24,128], index: 4, kind: output, shape index: {1}]   ;;  %s3489_s5 = inlined_call_operand.vmem [shape: f32[24,128], index: 5, kind: output, shape index: {2}]  }
   0x1   :  { %s2871_s20 = smov 0  }
   0x2 LB: > { %s28_s21 = sadd.s32 1, %s2830_s19  ;;  %p2230_p0 = scmp.ge.s32.totalorder %s2834_s20, 1  ;;  %s2834_s20 = sphi %s2871_s20, %s16_s20   ;;  %s2830_s19 = sphi %s2869_s19, %s3491_s19   ;;  %s2826_s18 = sphi %s2867_s18, %s3490_s18  }
   0x3   : > { %p30_p1 = scmp.ge.s32.totalorder %s28_s21, 3  ;;  %p229_p2 = scmp.lt.s32.totalorder %s2834_s20, 4 }
   0x5   : > { %s3493_s21 = smov (%p30_p1, %s28_s21), 0  ;;  %p230_p3 = pnand %p2230_p0, %p229_p2 }
   0x6   : > { %v2699_v0 = vld [vmem:[%s3485_s1] sm:$0xff] (!%p230_p3)   ;;  %v2836_v1 = vmov (!%p230_p3), 0   ;;  %s2231_s24 = sshll.u32 (!%p230_p3), %s2826_s18, 6  ;;  %v2700_v2 = vld [vmem:[%s3485_s1 + $0x8] sm:$0xff] (!%p230_p3)   ;;  %v2701_v3 = vld [vmem:[%s3485_s1 + $0x10] sm:$0xff] (!%p230_p3)   ;;  %s2383_s15 = sshll.u32 (!%p230_p3), %s2826_s18, 9 }
   0x7   : > { %233 = sbr.rel (%p230_p3) target bundleno = 492 (0x1ec), region = 32  ;;  %839 = vmatprep.subr.bf16.mxu0 (!%p230_p3), %v2836_v1  ;;  %2642 = vmatprep.subr.bf16.mxu1 (!%p230_p3), %v2836_v1  ;;  %p283_p4 = scmp.lt.s32.totalorder (!%p230_p3), %s2231_s24, 191  ;;  %v2702_v4 = vld [vmem:[%s3485_s1 + $0x18] sm:$0xff] (!%p230_p3)   ;;  %v2703_v5 = vld [vmem:[%s3485_s1 + $0x20] sm:$0xff] (!%p230_p3)   ;;  %v2704_v7 = vld [vmem:[%s3485_s1 + $0x28] sm:$0xff] (!%p230_p3)  }
   0x8   : > { %840 = vmatpush1.bf16.msra.mxu0 (!%p230_p3), %v2699_v0  ;;  %2658 = vmatpush1.bf16.msra.mxu1 (!%p230_p3), %v2699_v0  ;;  %v2705_v8 = vld [vmem:[%s3485_s1 + $0x30] sm:$0xff] (!%p230_p3)   ;;  %v2706_v9 = vld [vmem:[%s3485_s1 + $0x38] sm:$0xff] (!%p230_p3)   ;;  %v2707_v11 = vld [vmem:[%s3485_s1 + $0x40] sm:$0xff] (!%p230_p3)   ;;  %s1706_s16 = ssub.s32 (!%p230_p3), 1458, %s2383_s15  ;;  %p305_p5 = scmp.lt.s32.totalorder (!%p230_p3), %s2826_s18, 2 }
   0x9   : > { %841 = vmatprep.subr.bf16.mxu0 (!%p230_p3), %v2836_v1  ;;  %2643 = vmatprep.subr.bf16.mxu1 (!%p230_p3), %v2836_v1  ;;  %v2708_v12 = vld [vmem:[%s3485_s1 + $0x48] sm:$0xff] (!%p230_p3)   ;;  %v2709_v13 = vld [vmem:[%s3485_s1 + $0x50] sm:$0xff] (!%p230_p3)   ;;  %v2710_v14 = vld [vmem:[%s3485_s1 + $0x58] sm:$0xff] (!%p230_p3)  }
   0xa   : > { %v2711_v15 = vld [vmem:[%s3485_s1 + $0x60] sm:$0xff] (!%p230_p3)   ;;  %v2712_v16 = vld [vmem:[%s3485_s1 + $0x68] sm:$0xff] (!%p230_p3)   ;;  %v2713_v17 = vld [vmem:[%s3485_s1 + $0x70] sm:$0xff] (!%p230_p3)  }
   0xb   : > { %v2714_v18 = vld [vmem:[%s3485_s1 + $0x78] sm:$0xff] (!%p230_p3)  }
   0xc   : > { %842 = vmatpush1.bf16.msra.mxu0 (!%p230_p3), %v2700_v2  ;;  %2659 = vmatpush1.bf16.msra.mxu1 (!%p230_p3), %v2700_v2 }
   0xd   : > { %843 = vmatprep.subr.bf16.mxu0 (!%p230_p3), %v2836_v1  ;;  %2644 = vmatprep.subr.bf16.mxu1 (!%p230_p3), %v2836_v1 }
   0xe   : > { %s3495_s24 = smov (!%p283_p4, %s2231_s24), 191  ;;  %s3497_s18 = smov (!%p305_p5, %s2826_s18), 2 }
   0xf   : > { %s2386_s6 = sshll.u32 %s3495_s24, 3  ;;  %s2236_s28 = sshll.u32 %s3497_s18, 3 }
  0x10   : > { %844 = vmatpush1.bf16.msra.mxu0 %v2701_v3  ;;  %2660 = vmatpush1.bf16.msra.mxu1 %v2701_v3  ;;  %s2917_s11 = scalar_lea.vmem %s3484_s0, %s2386_s6  ;;  %s311_s6 = scalar_lea.vmem %s3488_s4, %s2236_s28 }
  0x11   : > { %845 = vmatprep.subr.bf16.mxu0 %v2836_v1  ;;  %2645 = vmatprep.subr.bf16.mxu1 %v2836_v1  ;;  %v2717_v6 = vld [vmem:[%s2917_s11 + $0x4] ss:$8 sps:$4 sm:$0xff]   ;;  %v2715_v19 = vld [vmem:[%s2917_s11] ss:$8 sps:$4 sm:$0xff]   ;;  %v2718_v21 = vld [vmem:[%s2917_s11 + $0x14] ss:$8 sps:$4 sm:$0xff]   ;;  %s318_s9 = scalar_lea.vmem %s3489_s5, %s2236_s28 }
  0x12   : > { %871 = vmatprep.mubr.bf16.mxu0 %v2717_v6  ;;  %v2741_v10 = vld [vmem:[%s2917_s11 + $0x104] ss:$8 sps:$4 sm:$0xff]   ;;  %v2739_v20 = vld [vmem:[%s2917_s11 + $0x100] ss:$8 sps:$4 sm:$0xff]   ;;  %v2745_v22 = vld [vmem:[%s2917_s11 + $0x114] ss:$8 sps:$4 sm:$0xff]  }
  0x13   : > { %999 = vmatprep.mubr.bf16.mxu1 %v2741_v10  ;;  %v2720_v23 = vld [vmem:[%s2917_s11 + $0x10] ss:$8 sps:$4 sm:$0xff]   ;;  %v2721_v25 = vld [vmem:[%s2917_s11 + $0x24] ss:$8 sps:$4 sm:$0xff]   ;;  %v2723_v27 = vld [vmem:[%s2917_s11 + $0x20] ss:$8 sps:$4 sm:$0xff]  }
  0x14   : > { %846 = vmatpush1.bf16.msra.mxu0 %v2702_v4  ;;  %2661 = vmatpush1.bf16.msra.mxu1 %v2702_v4  ;;  %v2747_v24 = vld [vmem:[%s2917_s11 + $0x110] ss:$8 sps:$4 sm:$0xff]   ;;  %v2751_v26 = vld [vmem:[%s2917_s11 + $0x124] ss:$8 sps:$4 sm:$0xff]   ;;  %v2753_v28 = vld [vmem:[%s2917_s11 + $0x120] ss:$8 sps:$4 sm:$0xff]  }
  0x15   : > { %847 = vmatprep.subr.bf16.mxu0 %v2836_v1  ;;  %2646 = vmatprep.subr.bf16.mxu1 %v2836_v1  ;;  %v2724_v29 = vld [vmem:[%s2917_s11 + $0x34] ss:$8 sps:$4 sm:$0xff]   ;;  %v2726_v31 = vld [vmem:[%s2917_s11 + $0x30] ss:$8 sps:$4 sm:$0xff]   ;;  %v2727_v33 = vld [vmem:[%s2917_s11 + $0x44] ss:$8 sps:$4 sm:$0xff]  }
  0x16   : > { %v2757_v30 = vld [vmem:[%s2917_s11 + $0x134] ss:$8 sps:$4 sm:$0xff]   ;;  %v2759_v32 = vld [vmem:[%s2917_s11 + $0x130] ss:$8 sps:$4 sm:$0xff]   ;;  %v2763_v34 = vld [vmem:[%s2917_s11 + $0x144] ss:$8 sps:$4 sm:$0xff]  }
  0x17   : > { %v2729_v35 = vld [vmem:[%s2917_s11 + $0x40] ss:$8 sps:$4 sm:$0xff]   ;;  %v2730_v37 = vld [vmem:[%s2917_s11 + $0x54] ss:$8 sps:$4 sm:$0xff]   ;;  %v2732_v39 = vld [vmem:[%s2917_s11 + $0x50] ss:$8 sps:$4 sm:$0xff]  }
  0x18   : > { %848 = vmatpush1.bf16.msra.mxu0 %v2703_v5  ;;  %2662 = vmatpush1.bf16.msra.mxu1 %v2703_v5  ;;  %v2765_v36 = vld [vmem:[%s2917_s11 + $0x140] ss:$8 sps:$4 sm:$0xff]   ;;  %v2769_v38 = vld [vmem:[%s2917_s11 + $0x154] ss:$8 sps:$4 sm:$0xff]   ;;  %v2771_v40 = vld [vmem:[%s2917_s11 + $0x150] ss:$8 sps:$4 sm:$0xff]  }
  0x19   : > { %849 = vmatprep.subr.bf16.mxu0 %v2836_v1  ;;  %2647 = vmatprep.subr.bf16.mxu1 %v2836_v1  ;;  %v2733_v41 = vld [vmem:[%s2917_s11 + $0x64] ss:$8 sps:$4 sm:$0xff]   ;;  %v2735_v43 = vld [vmem:[%s2917_s11 + $0x60] ss:$8 sps:$4 sm:$0xff]   ;;  %v2736_v45 = vld [vmem:[%s2917_s11 + $0x74] ss:$8 sps:$4 sm:$0xff]  }
  0x1a   : > { %v2775_v42 = vld [vmem:[%s2917_s11 + $0x164] ss:$8 sps:$4 sm:$0xff]   ;;  %v2777_v44 = vld [vmem:[%s2917_s11 + $0x160] ss:$8 sps:$4 sm:$0xff]   ;;  %v2781_v46 = vld [vmem:[%s2917_s11 + $0x174] ss:$8 sps:$4 sm:$0xff]  }
  0x1b   : > { %v2738_v47 = vld [vmem:[%s2917_s11 + $0x70] ss:$8 sps:$4 sm:$0xff]   ;;  %v2742_v49 = vld [vmem:[%s2917_s11 + $0x84] ss:$8 sps:$4 sm:$0xff]   ;;  %v2744_v51 = vld [vmem:[%s2917_s11 + $0x80] ss:$8 sps:$4 sm:$0xff]  }
  0x1c   : > { %850 = vmatpush1.bf16.msra.mxu0 %v2704_v7  ;;  %2663 = vmatpush1.bf16.msra.mxu1 %v2704_v7  ;;  %v2783_v48 = vld [vmem:[%s2917_s11 + $0x170] ss:$8 sps:$4 sm:$0xff]   ;;  %v2787_v50 = vld [vmem:[%s2917_s11 + $0x184] ss:$8 sps:$4 sm:$0xff]   ;;  %v2789_v52 = vld [vmem:[%s2917_s11 + $0x180] ss:$8 sps:$4 sm:$0xff]  }
  0x1d   : > { %851 = vmatprep.subr.bf16.mxu0 %v2836_v1  ;;  %2648 = vmatprep.subr.bf16.mxu1 %v2836_v1  ;;  %v2748_v53 = vld [vmem:[%s2917_s11 + $0x94] ss:$8 sps:$4 sm:$0xff]   ;;  %v2750_v55 = vld [vmem:[%s2917_s11 + $0x90] ss:$8 sps:$4 sm:$0xff]   ;;  %v2754_v57 = vld [vmem:[%s2917_s11 + $0xa4] ss:$8 sps:$4 sm:$0xff]  }
  0x1e   : > { %v2790_v54 = vld [vmem:[%s2917_s11 + $0x194] ss:$8 sps:$4 sm:$0xff]   ;;  %v2792_v56 = vld [vmem:[%s2917_s11 + $0x190] ss:$8 sps:$4 sm:$0xff]   ;;  %v2793_v58 = vld [vmem:[%s2917_s11 + $0x1a4] ss:$8 sps:$4 sm:$0xff]  }
  0x1f   : > { %v2756_v59 = vld [vmem:[%s2917_s11 + $0xa0] ss:$8 sps:$4 sm:$0xff]   ;;  %v2760_v61 = vld [vmem:[%s2917_s11 + $0xb4] ss:$8 sps:$4 sm:$0xff]   ;;  %v2762_v63 = vld [vmem:[%s2917_s11 + $0xb0] ss:$8 sps:$4 sm:$0xff]  }
  0x20   : > { %852 = vmatpush1.bf16.msra.mxu0 %v2705_v8  ;;  %2664 = vmatpush1.bf16.msra.mxu1 %v2705_v8  ;;  %v2795_v60 = vld [vmem:[%s2917_s11 + $0x1a0] ss:$8 sps:$4 sm:$0xff]   ;;  %v2796_v62 = vld [vmem:[%s2917_s11 + $0x1b4] ss:$8 sps:$4 sm:$0xff]   ;;  %v2798_v0 = vld [vmem:[%s2917_s11 + $0x1b0] ss:$8 sps:$4 sm:$0xff]  }
  0x21   : > { %853 = vmatprep.subr.bf16.mxu0 %v2836_v1  ;;  %2649 = vmatprep.subr.bf16.mxu1 %v2836_v1  ;;  %v2799_v2 = vld [vmem:[%s2917_s11 + $0x1c4] ss:$8 sps:$4 sm:$0xff]   ;;  %v2768_v3 = vld [vmem:[%s2917_s11 + $0xc0] ss:$8 sps:$4 sm:$0xff]   ;;  %v2772_v5 = vld [vmem:[%s2917_s11 + $0xd4] ss:$8 sps:$4 sm:$0xff]  }
  0x22   : > { %v2801_v4 = vld [vmem:[%s2917_s11 + $0x1c0] ss:$8 sps:$4 sm:$0xff]   ;;  %v2802_v6 = vld [vmem:[%s2917_s11 + $0x1d4] ss:$8 sps:$4 sm:$0xff]   ;;  %v2774_v7 = vld [vmem:[%s2917_s11 + $0xd0] ss:$8 sps:$4 sm:$0xff]  }
  0x23   : > { %v2804_v8 = vld [vmem:[%s2917_s11 + $0x1d0] ss:$8 sps:$4 sm:$0xff]   ;;  %v2805_v10 = vld [vmem:[%s2917_s11 + $0x1e4] ss:$8 sps:$4 sm:$0xff]  }
  0x24   : > { %854 = vmatpush1.bf16.msra.mxu0 %v2706_v9  ;;  %2665 = vmatpush1.bf16.msra.mxu1 %v2706_v9  ;;  %v2778_v9 = vld [vmem:[%s2917_s11 + $0xe4] ss:$8 sps:$4 sm:$0xff]  }
  0x25   : > { %855 = vmatprep.subr.bf16.mxu0 %v2836_v1  ;;  %2650 = vmatprep.subr.bf16.mxu1 %v2836_v1 }
  0x28   : > { %856 = vmatpush1.bf16.msra.mxu0 %v2707_v11  ;;  %2666 = vmatpush1.bf16.msra.mxu1 %v2707_v11  ;;  %v2780_v11 = vld [vmem:[%s2917_s11 + $0xe0] ss:$8 sps:$4 sm:$0xff]  }
  0x29   : > { %857 = vmatprep.subr.bf16.mxu0 %v2836_v1  ;;  %2651 = vmatprep.subr.bf16.mxu1 %v2836_v1 }
  0x2c   : > { %858 = vmatpush1.bf16.msra.mxu0 %v2708_v12  ;;  %2667 = vmatpush1.bf16.msra.mxu1 %v2708_v12  ;;  %v2807_v12 = vld [vmem:[%s2917_s11 + $0x1e0] ss:$8 sps:$4 sm:$0xff]  }
  0x2d   : > { %859 = vmatprep.subr.bf16.mxu0 %v2836_v1  ;;  %2652 = vmatprep.subr.bf16.mxu1 %v2836_v1 }
  0x30   : > { %860 = vmatpush1.bf16.msra.mxu0 %v2709_v13  ;;  %2668 = vmatpush1.bf16.msra.mxu1 %v2709_v13  ;;  %v2784_v13 = vld [vmem:[%s2917_s11 + $0xf4] ss:$8 sps:$4 sm:$0xff]  }
  0x31   : > { %861 = vmatprep.subr.bf16.mxu0 %v2836_v1  ;;  %2653 = vmatprep.subr.bf16.mxu1 %v2836_v1 }
  0x34   : > { %862 = vmatpush1.bf16.msra.mxu0 %v2710_v14  ;;  %2669 = vmatpush1.bf16.msra.mxu1 %v2710_v14  ;;  %v2808_v14 = vld [vmem:[%s2917_s11 + $0x1f4] ss:$8 sps:$4 sm:$0xff]  }
  0x35   : > { %863 = vmatprep.subr.bf16.mxu0 %v2836_v1  ;;  %2654 = vmatprep.subr.bf16.mxu1 %v2836_v1 }
  0x38   : > { %864 = vmatpush1.bf16.msra.mxu0 %v2711_v15  ;;  %2670 = vmatpush1.bf16.msra.mxu1 %v2711_v15  ;;  %v2786_v15 = vld [vmem:[%s2917_s11 + $0xf0] ss:$8 sps:$4 sm:$0xff]  }
  0x39   : > { %865 = vmatprep.subr.bf16.mxu0 %v2836_v1  ;;  %2655 = vmatprep.subr.bf16.mxu1 %v2836_v1 }
  0x3c   : > { %866 = vmatpush1.bf16.msra.mxu0 %v2712_v16  ;;  %2671 = vmatpush1.bf16.msra.mxu1 %v2712_v16  ;;  %v2810_v16 = vld [vmem:[%s2917_s11 + $0x1f0] ss:$8 sps:$4 sm:$0xff]  }
  0x3d   : > { %867 = vmatprep.subr.bf16.mxu0 %v2836_v1  ;;  %2656 = vmatprep.subr.bf16.mxu1 %v2836_v1 }
  0x40   : > { %868 = vmatpush1.bf16.msra.mxu0 %v2713_v17  ;;  %2672 = vmatpush1.bf16.msra.mxu1 %v2713_v17  ;;  %v1640_v17 = vlaneseq }
  0x41   : > { %869 = vmatprep.subr.bf16.mxu0 %v2836_v1  ;;  %2657 = vmatprep.subr.bf16.mxu1 %v2836_v1  ;;  %v2766_v1 = vld [vmem:[%s2917_s11 + $0xc4] ss:$8 sps:$4 sm:$0xff]   ;;  %s2235_s11 = sshll.u32 %s3495_s24, 2 }
  0x42   : > { %s3068_s25 = scalar_lea.vmem %s3487_s3, %s2235_s11 }
  0x44   : > { %870 = vmatpush1.bf16.msra.mxu0 %v2714_v18  ;;  %2673 = vmatpush1.bf16.msra.mxu1 %v2714_v18  ;;  %v3041_v18 = vshrl.u32 %v1640_v17, 7 }
  0x47   : > { %872 = vmatmul.mubr.bf16.vlgmr.msra.gmra.mrb[0].mxu0 %v2715_v19  ;;  %1000 = vmatmul.mubr.bf16.vlgmr.msra.gmra.mrb[0].mxu1 %v2739_v20  ;;  %v3046_v19 = vld [vmem:[%s3486_s2] ss:$0 sm:$0xff]  ;;  %v3048_v20 = vstv %s1706_s16 }
  0x48   : > { %879 = vmatprep.mubr.bf16.mxu0 %v2718_v21  ;;  %1007 = vmatprep.mubr.bf16.mxu1 %v2745_v22  ;;  %v1642_v22 = vadd.s32 8, %v3041_v18  ;;  %vm1708_vm0 = vcmp.lt.s32.totalorder %v3041_v18, %v3048_v20 }
  0x4a   : > { %vm1709_vm3 = vcmp.lt.s32.totalorder %v1642_v22, %v3048_v20 }
  0x4f   : > { %880 = vmatmul.mubr.bf16.gmra.mrb[4].mxu0 %v2720_v23  ;;  %1008 = vmatmul.mubr.bf16.gmra.mrb[4].mxu1 %v2747_v24 }
  0x50   : > { %887 = vmatprep.mubr.bf16.mxu0 %v2721_v25  ;;  %1015 = vmatprep.mubr.bf16.mxu1 %v2751_v26 }
  0x57   : > { %888 = vmatmul.mubr.bf16.gmra.mrb[8].mxu0 %v2723_v27  ;;  %1016 = vmatmul.mubr.bf16.gmra.mrb[8].mxu1 %v2753_v28 }
  0x58   : > { %895 = vmatprep.mubr.bf16.mxu0 %v2724_v29  ;;  %1023 = vmatprep.mubr.bf16.mxu1 %v2757_v30 }
  0x5f   : > { %896 = vmatmul.mubr.bf16.gmra.mrb[12].mxu0 %v2726_v31  ;;  %1024 = vmatmul.mubr.bf16.gmra.mrb[12].mxu1 %v2759_v32 }
  0x60   : > { %903 = vmatprep.mubr.bf16.mxu0 %v2727_v33  ;;  %1031 = vmatprep.mubr.bf16.mxu1 %v2763_v34 }
  0x67   : > { %904 = vmatmul.mubr.bf16.gmra.mrb[16].mxu0 %v2729_v35  ;;  %1032 = vmatmul.mubr.bf16.gmra.mrb[16].mxu1 %v2765_v36 }
  0x68   : > { %911 = vmatprep.mubr.bf16.mxu0 %v2730_v37  ;;  %1039 = vmatprep.mubr.bf16.mxu1 %v2769_v38  ;;  %v1643_v38 = vadd.s32 16, %v3041_v18 }
  0x6a   : > { %vm1710_vm6 = vcmp.lt.s32.totalorder %v1643_v38, %v3048_v20 }
  0x6f   : > { %912 = vmatmul.mubr.bf16.gmra.mrb[20].mxu0 %v2732_v39  ;;  %1040 = vmatmul.mubr.bf16.gmra.mrb[20].mxu1 %v2771_v40 }
  0x70   : > { %919 = vmatprep.mubr.bf16.mxu0 %v2733_v41  ;;  %1047 = vmatprep.mubr.bf16.mxu1 %v2775_v42 }
  0x77   : > { %920 = vmatmul.mubr.bf16.gmra.mrb[24].mxu0 %v2735_v43  ;;  %1048 = vmatmul.mubr.bf16.gmra.mrb[24].mxu1 %v2777_v44  ;;  %v1644_v43 = vadd.s32 24, %v3041_v18 }
  0x78   : > { %927 = vmatprep.mubr.bf16.mxu0 %v2736_v45  ;;  %1055 = vmatprep.mubr.bf16.mxu1 %v2781_v46 }
  0x79   : > { %vm1711_vm10 = vcmp.lt.s32.totalorder %v1644_v43, %v3048_v20 }
  0x7f   : > { %928 = vmatmul.mubr.bf16.gmra.mrb[28].mxu0 %v2738_v47  ;;  %1056 = vmatmul.mubr.bf16.gmra.mrb[28].mxu1 %v2783_v48 }
  0x80   : > { %935 = vmatprep.mubr.bf16.mxu0 %v2742_v49  ;;  %1063 = vmatprep.mubr.bf16.mxu1 %v2787_v50 }
  0x87   : > { %936 = vmatmul.mubr.bf16.gmra.mrb[32].mxu0 %v2744_v51  ;;  %1064 = vmatmul.mubr.bf16.gmra.mrb[32].mxu1 %v2789_v52 }
  0x88   : > { %943 = vmatprep.mubr.bf16.mxu0 %v2748_v53  ;;  %1071 = vmatprep.mubr.bf16.mxu1 %v2790_v54 }
  0x8f   : > { %944 = vmatmul.mubr.bf16.gmra.mrb[36].mxu0 %v2750_v55  ;;  %1072 = vmatmul.mubr.bf16.gmra.mrb[36].mxu1 %v2792_v56 }
  0x90   : > { %951 = vmatprep.mubr.bf16.mxu0 %v2754_v57  ;;  %1079 = vmatprep.mubr.bf16.mxu1 %v2793_v58 }
  0x97   : > { %952 = vmatmul.mubr.bf16.gmra.mrb[40].mxu0 %v2756_v59  ;;  %1080 = vmatmul.mubr.bf16.gmra.mrb[40].mxu1 %v2795_v60 }
  0x98   : > { %959 = vmatprep.mubr.bf16.mxu0 %v2760_v61  ;;  %1087 = vmatprep.mubr.bf16.mxu1 %v2796_v62 }
  0x9f   : > { %960 = vmatmul.mubr.bf16.gmra.mrb[44].mxu0 %v2762_v63  ;;  %1088 = vmatmul.mubr.bf16.gmra.mrb[44].mxu1 %v2798_v0 }
  0xa0   : > { %967 = vmatprep.mubr.bf16.mxu0 %v2766_v1  ;;  %1095 = vmatprep.mubr.bf16.mxu1 %v2799_v2 }
  0xa7   : > { %968 = vmatmul.mubr.bf16.gmra.mrb[48].mxu0 %v2768_v3  ;;  %1096 = vmatmul.mubr.bf16.gmra.mrb[48].mxu1 %v2801_v4 }
  0xa8   : > { %975 = vmatprep.mubr.bf16.mxu0 %v2772_v5  ;;  %1103 = vmatprep.mubr.bf16.mxu1 %v2802_v6  ;;  %v1645_v5 = vadd.s32 32, %v3041_v18 }
  0xaa   : > { %vm1712_vm12 = vcmp.lt.s32.totalorder %v1645_v5, %v3048_v20 }
  0xaf   : > { %976 = vmatmul.mubr.bf16.gmra.mrb[52].mxu0 %v2774_v7  ;;  %1104 = vmatmul.mubr.bf16.gmra.mrb[52].mxu1 %v2804_v8 }
  0xb0   : > { %983 = vmatprep.mubr.bf16.mxu0 %v2778_v9  ;;  %1111 = vmatprep.mubr.bf16.mxu1 %v2805_v10 }
  0xb7   : > { %984 = vmatmul.mubr.bf16.gmra.mrb[56].mxu0 %v2780_v11  ;;  %1112 = vmatmul.mubr.bf16.gmra.mrb[56].mxu1 %v2807_v12 }
  0xb8   : > { %991 = vmatprep.mubr.bf16.mxu0 %v2784_v13  ;;  %1119 = vmatprep.mubr.bf16.mxu1 %v2808_v14  ;;  %v1646_v14 = vadd.s32 40, %v3041_v18 }
  0xbf   : > { %992 = vmatmul.mubr.bf16.gmra.mrb[60].mxu0 %v2786_v15  ;;  %1120 = vmatmul.mubr.bf16.gmra.mrb[60].mxu1 %v2810_v16 }
 0x11a   : > { %v873_v21 = vpop.f32.mrb[0].mxu0  ;;  %v1001_v23 = vpop.f32.mrb[0].mxu1 }
 0x11b   : > { %v874_v24 = vadd.f32 %v3046_v19, %v873_v21  ;;  %v875_v25 = vpop.f32.mrb[1].mxu0  ;;  %v1002_v26 = vadd.f32 %v3046_v19, %v1001_v23  ;;  %v1003_v27 = vpop.f32.mrb[1].mxu1 }
 0x11c   : > { %v876_v28 = vpop.f32.mrb[2].mxu0  ;;  %v1004_v29 = vpop.f32.mrb[2].mxu1 }
 0x11d   : > { %vm1128_vm1 = vcmp.ge.f32.partialorder %v874_v24, 0.0  ;;  %v1192_v30 = vmul.f32 0.01, %v874_v24  ;;  %v877_v31 = vadd.f32 %v3046_v19, %v876_v28  ;;  %v878_v32 = vpop.f32.mrb[3].mxu0  ;;  %vm1160_vm2 = vcmp.ge.f32.partialorder %v1002_v26, 0.0  ;;  %v1006_v33 = vpop.f32.mrb[3].mxu1 }
 0x11e   : > { %v1224_v34 = vmul.f32 0.01, %v1002_v26  ;;  %v1005_v35 = vadd.f32 %v3046_v19, %v1004_v29 }
 0x11f   : > { %v1256_v36 = vsel %vm1128_vm1, %v874_v24, %v1192_v30  ;;  %vm1129_vm4 = vcmp.ge.f32.partialorder %v877_v31, 0.0  ;;  %v1193_v37 = vmul.f32 0.01, %v877_v31 }
 0x120   : > { %v1772_v39 = vsel %vm1708_vm0, %v1256_v36, 0.0  ;;  %v3063_v40 = vsel %vm1160_vm2, %v1002_v26, %v1224_v34  ;;  %vm1161_vm5 = vcmp.ge.f32.partialorder %v1005_v35, 0.0  ;;  %v1225_v41 = vmul.f32 0.01, %v1005_v35 }
 0x121   : > { %v1257_v42 = vsel %vm1129_vm4, %v877_v31, %v1193_v37  ;;  %v1905_v44 = vmul.f32 %v1772_v39, %v1772_v39  ;;  %vm1713_vm0 = vcmp.lt.s32.totalorder %v1646_v14, %v3048_v20 }
 0x122   : > { %v2454_v45 = vpack.c.bf16 %v1257_v42, %v1256_v36  ;;  %v1773_v46 = vsel %vm1709_vm3, %v1257_v42, 0.0  ;;  %v881_v47 = vpop.f32.mrb[4].mxu0  ;;  %v3073_v48 = vsel %vm1161_vm5, %v1005_v35, %v1225_v41  ;;  %v1009_v49 = vpop.f32.mrb[4].mxu1  ;;  %v1647_v41 = vadd.s32 48, %v3041_v18 }
 0x123   : > { %v1836_v50 = vadd.f32 %v1773_v46, %v1772_v39  ;;  %v1906_v51 = vmul.f32 %v1773_v46, %v1773_v46  ;;  %v882_v52 = vadd.f32 %v3046_v19, %v881_v47  ;;  %v883_v53 = vpop.f32.mrb[5].mxu0  ;;  %v2534_v54 = vpack.c.bf16 %v3073_v48, %v3063_v40  ;;  %v1011_v55 = vpop.f32.mrb[5].mxu1 }
 0x124   : > { %2455 = vst [vmem:[%s3068_s25] sm:$0xff] %v2454_v45   ;;  %v884_v56 = vpop.f32.mrb[6].mxu0  ;;  %v1010_v57 = vadd.f32 %v3046_v19, %v1009_v49  ;;  %v1012_v58 = vpop.f32.mrb[6].mxu1  ;;  %vm1714_vm2 = vcmp.lt.s32.totalorder %v1647_v41, %v3048_v20 }
 0x125   : > { %v1969_v59 = vadd.f32 %v1906_v51, %v1905_v44  ;;  %vm1130_vm7 = vcmp.ge.f32.partialorder %v882_v52, 0.0  ;;  %v1194_v60 = vmul.f32 0.01, %v882_v52  ;;  %v885_v61 = vadd.f32 %v3046_v19, %v884_v56  ;;  %v886_v62 = vpop.f32.mrb[7].mxu0  ;;  %2626 = vst [vmem:[%s3068_s25 + $0x80] sm:$0xff] %v2534_v54   ;;  %v1014_v63 = vpop.f32.mrb[7].mxu1 }
 0x126   : > { %vm1162_vm8 = vcmp.ge.f32.partialorder %v1010_v57, 0.0  ;;  %v1226_v0 = vmul.f32 0.01, %v1010_v57  ;;  %v1013_v1 = vadd.f32 %v3046_v19, %v1012_v58  ;;  %v1648_v51 = vadd.s32 56, %v3041_v18 }
 0x127   : > { %v1258_v2 = vsel %vm1130_vm7, %v882_v52, %v1194_v60  ;;  %vm1131_vm9 = vcmp.ge.f32.partialorder %v885_v61, 0.0  ;;  %v1195_v3 = vmul.f32 0.01, %v885_v61 }
 0x128   : > { %v1774_v4 = vsel %vm1710_vm6, %v1258_v2, 0.0  ;;  %vm1163_vm11 = vcmp.ge.f32.partialorder %v1013_v1, 0.0  ;;  %v1227_v6 = vmul.f32 0.01, %v1013_v1  ;;  %v3088_v10 = vsel %vm1162_vm8, %v1010_v57, %v1226_v0 }
 0x129   : > { %v1837_v7 = vadd.f32 %v1836_v50, %v1774_v4  ;;  %v1907_v8 = vmul.f32 %v1774_v4, %v1774_v4  ;;  %v1259_v9 = vsel %vm1131_vm9, %v885_v61, %v1195_v3  ;;  %vm1715_vm6 = vcmp.lt.s32.totalorder %v1648_v51, %v3048_v20 }
 0x12a   : > { %v2459_v11 = vpack.c.bf16 %v1259_v9, %v1258_v2  ;;  %v1775_v12 = vsel %vm1711_vm10, %v1259_v9, 0.0  ;;  %v889_v13 = vpop.f32.mrb[8].mxu0  ;;  %v3091_v15 = vsel %vm1163_vm11, %v1013_v1, %v1227_v6  ;;  %v1017_v16 = vpop.f32.mrb[8].mxu1 }
 0x12b   : > { %v1970_v17 = vadd.f32 %v1969_v59, %v1907_v8  ;;  %v1838_v21 = vadd.f32 %v1837_v7, %v1775_v12  ;;  %v1908_v22 = vmul.f32 %v1775_v12, %v1775_v12  ;;  %v890_v23 = vadd.f32 %v3046_v19, %v889_v13  ;;  %v891_v24 = vpop.f32.mrb[9].mxu0  ;;  %v1019_v25 = vpop.f32.mrb[9].mxu1 }
 0x12c   : > { %2611 = vst [vmem:[%s3068_s25 + $0x8] sm:$0xff] %v2459_v11   ;;  %v892_v26 = vpop.f32.mrb[10].mxu0  ;;  %v2539_v27 = vpack.c.bf16 %v3091_v15, %v3088_v10  ;;  %v1018_v28 = vadd.f32 %v3046_v19, %v1017_v16  ;;  %v1020_v29 = vpop.f32.mrb[10].mxu1  ;;  %v1649_v11 = vadd.s32 64, %v3041_v18  ;;  %v1650_v24 = vadd.s32 72, %v3041_v18 }
 0x12d   : > { %v1971_v30 = vadd.f32 %v1970_v17, %v1908_v22  ;;  %vm1132_vm13 = vcmp.ge.f32.partialorder %v890_v23, 0.0  ;;  %v1196_v31 = vmul.f32 0.01, %v890_v23  ;;  %v893_v32 = vadd.f32 %v3046_v19, %v892_v26  ;;  %v894_v33 = vpop.f32.mrb[11].mxu0  ;;  %v1022_v34 = vpop.f32.mrb[11].mxu1 }
 0x12e   : > { %2627 = vst [vmem:[%s3068_s25 + $0x88] sm:$0xff] %v2539_v27   ;;  %vm1164_vm14 = vcmp.ge.f32.partialorder %v1018_v28, 0.0  ;;  %v1228_v35 = vmul.f32 0.01, %v1018_v28  ;;  %v1021_v36 = vadd.f32 %v3046_v19, %v1020_v29  ;;  %vm1716_vm8 = vcmp.lt.s32.totalorder %v1649_v11, %v3048_v20 }
 0x12f   : > { %v1260_v37 = vsel %vm1132_vm13, %v890_v23, %v1196_v31  ;;  %vm1133_vm15 = vcmp.ge.f32.partialorder %v893_v32, 0.0  ;;  %v1197_v38 = vmul.f32 0.01, %v893_v32 }
 0x130   : > { %v1776_v39 = vsel %vm1712_vm12, %v1260_v37, 0.0  ;;  %vm1165_vm1 = vcmp.ge.f32.partialorder %v1021_v36, 0.0  ;;  %v1229_v42 = vmul.f32 0.01, %v1021_v36  ;;  %v3106_v46 = vsel %vm1164_vm14, %v1018_v28, %v1228_v35 }
 0x131   : > { %v1839_v43 = vadd.f32 %v1838_v21, %v1776_v39  ;;  %v1909_v44 = vmul.f32 %v1776_v39, %v1776_v39  ;;  %v1261_v45 = vsel %vm1133_vm15, %v893_v32, %v1197_v38  ;;  %vm1717_vm12 = vcmp.lt.s32.totalorder %v1650_v24, %v3048_v20 }
 0x132   : > { %v2464_v47 = vpack.c.bf16 %v1261_v45, %v1260_v37  ;;  %v1777_v49 = vsel %vm1713_vm0, %v1261_v45, 0.0  ;;  %v897_v50 = vpop.f32.mrb[12].mxu0  ;;  %v3109_v52 = vsel %vm1165_vm1, %v1021_v36, %v1229_v42  ;;  %v1025_v53 = vpop.f32.mrb[12].mxu1 }
 0x133   : > { %v1972_v54 = vadd.f32 %v1971_v30, %v1909_v44  ;;  %v1840_v55 = vadd.f32 %v1839_v43, %v1777_v49  ;;  %v1910_v56 = vmul.f32 %v1777_v49, %v1777_v49  ;;  %v898_v57 = vadd.f32 %v3046_v19, %v897_v50  ;;  %v899_v58 = vpop.f32.mrb[13].mxu0  ;;  %v1027_v59 = vpop.f32.mrb[13].mxu1 }
 0x134   : > { %2612 = vst [vmem:[%s3068_s25 + $0x10] sm:$0xff] %v2464_v47   ;;  %v900_v60 = vpop.f32.mrb[14].mxu0  ;;  %v2544_v61 = vpack.c.bf16 %v3109_v52, %v3106_v46  ;;  %v1026_v62 = vadd.f32 %v3046_v19, %v1025_v53  ;;  %v1028_v63 = vpop.f32.mrb[14].mxu1  ;;  %v1651_v50 = vadd.s32 80, %v3041_v18 }
 0x135   : > { %v1973_v0 = vadd.f32 %v1972_v54, %v1910_v56  ;;  %vm1134_vm3 = vcmp.ge.f32.partialorder %v898_v57, 0.0  ;;  %v1198_v1 = vmul.f32 0.01, %v898_v57  ;;  %v901_v2 = vadd.f32 %v3046_v19, %v900_v60  ;;  %v902_v3 = vpop.f32.mrb[15].mxu0  ;;  %v1030_v4 = vpop.f32.mrb[15].mxu1 }
 0x136   : > { %2628 = vst [vmem:[%s3068_s25 + $0x90] sm:$0xff] %v2544_v61   ;;  %vm1166_vm4 = vcmp.ge.f32.partialorder %v1026_v62, 0.0  ;;  %v1230_v5 = vmul.f32 0.01, %v1026_v62  ;;  %v1029_v6 = vadd.f32 %v3046_v19, %v1028_v63  ;;  %v1652_v60 = vadd.s32 88, %v3041_v18 }
 0x137   : > { %v1262_v7 = vsel %vm1134_vm3, %v898_v57, %v1198_v1  ;;  %vm1135_vm5 = vcmp.ge.f32.partialorder %v901_v2, 0.0  ;;  %v1199_v8 = vmul.f32 0.01, %v901_v2  ;;  %vm1718_vm14 = vcmp.lt.s32.totalorder %v1651_v50, %v3048_v20 }
 0x138   : > { %v1778_v9 = vsel %vm1714_vm2, %v1262_v7, 0.0  ;;  %vm1167_vm7 = vcmp.ge.f32.partialorder %v1029_v6, 0.0  ;;  %v1231_v12 = vmul.f32 0.01, %v1029_v6  ;;  %v3124_v17 = vsel %vm1166_vm4, %v1026_v62, %v1230_v5 }
 0x139   : > { %v1841_v13 = vadd.f32 %v1840_v55, %v1778_v9  ;;  %v1911_v14 = vmul.f32 %v1778_v9, %v1778_v9  ;;  %v1263_v16 = vsel %vm1135_vm5, %v901_v2, %v1199_v8  ;;  %vm1719_vm2 = vcmp.lt.s32.totalorder %v1652_v60, %v3048_v20 }
 0x13a   : > { %v2469_v21 = vpack.c.bf16 %v1263_v16, %v1262_v7  ;;  %v1779_v22 = vsel %vm1715_vm6, %v1263_v16, 0.0  ;;  %v905_v23 = vpop.f32.mrb[16].mxu0  ;;  %v3127_v25 = vsel %vm1167_vm7, %v1029_v6, %v1231_v12  ;;  %v1033_v26 = vpop.f32.mrb[16].mxu1 }
 0x13b   : > { %v1974_v27 = vadd.f32 %v1973_v0, %v1911_v14  ;;  %v1842_v28 = vadd.f32 %v1841_v13, %v1779_v22  ;;  %v1912_v29 = vmul.f32 %v1779_v22, %v1779_v22  ;;  %v906_v30 = vadd.f32 %v3046_v19, %v905_v23  ;;  %v907_v31 = vpop.f32.mrb[17].mxu0  ;;  %v1035_v32 = vpop.f32.mrb[17].mxu1 }
 0x13c   : > { %2613 = vst [vmem:[%s3068_s25 + $0x18] sm:$0xff] %v2469_v21   ;;  %v908_v33 = vpop.f32.mrb[18].mxu0  ;;  %v2549_v34 = vpack.c.bf16 %v3127_v25, %v3124_v17  ;;  %v1034_v35 = vadd.f32 %v3046_v19, %v1033_v26  ;;  %v1036_v36 = vpop.f32.mrb[18].mxu1  ;;  %v1653_v26 = vadd.s32 96, %v3041_v18 }
 0x13d   : > { %v1975_v37 = vadd.f32 %v1974_v27, %v1912_v29  ;;  %vm1136_vm9 = vcmp.ge.f32.partialorder %v906_v30, 0.0  ;;  %v1200_v38 = vmul.f32 0.01, %v906_v30  ;;  %v909_v39 = vadd.f32 %v3046_v19, %v908_v33  ;;  %v910_v41 = vpop.f32.mrb[19].mxu0  ;;  %v1038_v42 = vpop.f32.mrb[19].mxu1 }
 0x13e   : > { %2629 = vst [vmem:[%s3068_s25 + $0x98] sm:$0xff] %v2549_v34   ;;  %vm1168_vm10 = vcmp.ge.f32.partialorder %v1034_v35, 0.0  ;;  %v1232_v43 = vmul.f32 0.01, %v1034_v35  ;;  %v1037_v44 = vadd.f32 %v3046_v19, %v1036_v36  ;;  %vm1720_vm4 = vcmp.lt.s32.totalorder %v1653_v26, %v3048_v20 }
 0x13f   : > { %v1264_v45 = vsel %vm1136_vm9, %v906_v30, %v1200_v38  ;;  %vm1137_vm11 = vcmp.ge.f32.partialorder %v909_v39, 0.0  ;;  %v1201_v47 = vmul.f32 0.01, %v909_v39 }
 0x140   : > { %v1780_v49 = vsel %vm1716_vm8, %v1264_v45, 0.0  ;;  %vm1169_vm13 = vcmp.ge.f32.partialorder %v1037_v44, 0.0  ;;  %v1233_v51 = vmul.f32 0.01, %v1037_v44  ;;  %v3142_v56 = vsel %vm1168_vm10, %v1034_v35, %v1232_v43 }
 0x141   : > { %v1843_v53 = vadd.f32 %v1842_v28, %v1780_v49  ;;  %v1913_v54 = vmul.f32 %v1780_v49, %v1780_v49  ;;  %v1265_v55 = vsel %vm1137_vm11, %v909_v39, %v1201_v47  ;;  %v1654_v35 = vadd.s32 104, %v3041_v18 }
 0x142   : > { %v2474_v57 = vpack.c.bf16 %v1265_v55, %v1264_v45  ;;  %v1781_v58 = vsel %vm1717_vm12, %v1265_v55, 0.0  ;;  %v913_v59 = vpop.f32.mrb[20].mxu0  ;;  %v3145_v61 = vsel %vm1169_vm13, %v1037_v44, %v1233_v51  ;;  %v1041_v62 = vpop.f32.mrb[20].mxu1 }
 0x143   : > { %v1976_v63 = vadd.f32 %v1975_v37, %v1913_v54  ;;  %v1844_v0 = vadd.f32 %v1843_v53, %v1781_v58  ;;  %v1914_v1 = vmul.f32 %v1781_v58, %v1781_v58  ;;  %v914_v2 = vadd.f32 %v3046_v19, %v913_v59  ;;  %v915_v3 = vpop.f32.mrb[21].mxu0  ;;  %v1043_v4 = vpop.f32.mrb[21].mxu1 }
 0x144   : > { %2614 = vst [vmem:[%s3068_s25 + $0x20] sm:$0xff] %v2474_v57   ;;  %v916_v5 = vpop.f32.mrb[22].mxu0  ;;  %v2554_v6 = vpack.c.bf16 %v3145_v61, %v3142_v56  ;;  %v1042_v7 = vadd.f32 %v3046_v19, %v1041_v62  ;;  %v1044_v8 = vpop.f32.mrb[22].mxu1  ;;  %vm1721_vm8 = vcmp.lt.s32.totalorder %v1654_v35, %v3048_v20 }
 0x145   : > { %v1977_v9 = vadd.f32 %v1976_v63, %v1914_v1  ;;  %vm1138_vm15 = vcmp.ge.f32.partialorder %v914_v2, 0.0  ;;  %v1202_v11 = vmul.f32 0.01, %v914_v2  ;;  %v917_v12 = vadd.f32 %v3046_v19, %v916_v5  ;;  %v918_v13 = vpop.f32.mrb[23].mxu0  ;;  %v1046_v14 = vpop.f32.mrb[23].mxu1 }
 0x146   : > { %2630 = vst [vmem:[%s3068_s25 + $0xa0] sm:$0xff] %v2554_v6   ;;  %vm1170_vm0 = vcmp.ge.f32.partialorder %v1042_v7, 0.0  ;;  %v1234_v16 = vmul.f32 0.01, %v1042_v7  ;;  %v1045_v21 = vadd.f32 %v3046_v19, %v1044_v8 }
 0x147   : > { %v1266_v22 = vsel %vm1138_vm15, %v914_v2, %v1202_v11  ;;  %vm1139_vm1 = vcmp.ge.f32.partialorder %v917_v12, 0.0  ;;  %v1203_v23 = vmul.f32 0.01, %v917_v12 }
 0x148   : > { %v1782_v24 = vsel %vm1718_vm14, %v1266_v22, 0.0  ;;  %vm1171_vm3 = vcmp.ge.f32.partialorder %v1045_v21, 0.0  ;;  %v1235_v27 = vmul.f32 0.01, %v1045_v21  ;;  %v3160_v31 = vsel %vm1170_vm0, %v1042_v7, %v1234_v16 }
 0x149   : > { %v1845_v28 = vadd.f32 %v1844_v0, %v1782_v24  ;;  %v1915_v29 = vmul.f32 %v1782_v24, %v1782_v24  ;;  %v1267_v30 = vsel %vm1139_vm1, %v917_v12, %v1203_v23  ;;  %v1655_v0 = vadd.s32 112, %v3041_v18 }
 0x14a   : > { %v2479_v32 = vpack.c.bf16 %v1267_v30, %v1266_v22  ;;  %v1783_v33 = vsel %vm1719_vm2, %v1267_v30, 0.0  ;;  %v921_v34 = vpop.f32.mrb[24].mxu0  ;;  %v3163_v36 = vsel %vm1171_vm3, %v1045_v21, %v1235_v27  ;;  %v1049_v37 = vpop.f32.mrb[24].mxu1 }
 0x14b   : > { %v1978_v38 = vadd.f32 %v1977_v9, %v1915_v29  ;;  %v1846_v39 = vadd.f32 %v1845_v28, %v1783_v33  ;;  %v1916_v41 = vmul.f32 %v1783_v33, %v1783_v33  ;;  %v922_v42 = vadd.f32 %v3046_v19, %v921_v34  ;;  %v923_v43 = vpop.f32.mrb[25].mxu0  ;;  %v1051_v44 = vpop.f32.mrb[25].mxu1 }
 0x14c   : > { %2615 = vst [vmem:[%s3068_s25 + $0x28] sm:$0xff] %v2479_v32   ;;  %v924_v45 = vpop.f32.mrb[26].mxu0  ;;  %v2559_v47 = vpack.c.bf16 %v3163_v36, %v3160_v31  ;;  %v1050_v49 = vadd.f32 %v3046_v19, %v1049_v37  ;;  %v1052_v50 = vpop.f32.mrb[26].mxu1  ;;  %v1656_v9 = vadd.s32 120, %v3041_v18  ;;  %vm1722_vm10 = vcmp.lt.s32.totalorder %v1655_v0, %v3048_v20 }
 0x14d   : > { %v1979_v51 = vadd.f32 %v1978_v38, %v1916_v41  ;;  %vm1140_vm5 = vcmp.ge.f32.partialorder %v922_v42, 0.0  ;;  %v1204_v53 = vmul.f32 0.01, %v922_v42  ;;  %v925_v54 = vadd.f32 %v3046_v19, %v924_v45  ;;  %v926_v55 = vpop.f32.mrb[27].mxu0  ;;  %v1054_v57 = vpop.f32.mrb[27].mxu1 }
 0x14e   : > { %2631 = vst [vmem:[%s3068_s25 + $0xa8] sm:$0xff] %v2559_v47   ;;  %vm1172_vm6 = vcmp.ge.f32.partialorder %v1050_v49, 0.0  ;;  %v1236_v58 = vmul.f32 0.01, %v1050_v49  ;;  %v1053_v59 = vadd.f32 %v3046_v19, %v1052_v50  ;;  %vm1723_vm14 = vcmp.lt.s32.totalorder %v1656_v9, %v3048_v20 }
 0x14f   : > { %v1268_v60 = vsel %vm1140_vm5, %v922_v42, %v1204_v53  ;;  %vm1141_vm7 = vcmp.ge.f32.partialorder %v925_v54, 0.0  ;;  %v1205_v62 = vmul.f32 0.01, %v925_v54  ;;  %v1657_v42 = vadd.s32 128, %v3041_v18 }
 0x150   : > { %v1784_v63 = vsel %vm1720_vm4, %v1268_v60, 0.0  ;;  %vm1173_vm9 = vcmp.ge.f32.partialorder %v1053_v59, 0.0  ;;  %v1237_v1 = vmul.f32 0.01, %v1053_v59  ;;  %v3178_v5 = vsel %vm1172_vm6, %v1050_v49, %v1236_v58 }
 0x151   : > { %v1847_v2 = vadd.f32 %v1846_v39, %v1784_v63  ;;  %v1917_v3 = vmul.f32 %v1784_v63, %v1784_v63  ;;  %v1269_v4 = vsel %vm1141_vm7, %v925_v54, %v1205_v62  ;;  %v1658_v54 = vadd.s32 136, %v3041_v18 }
 0x152   : > { %v2484_v6 = vpack.c.bf16 %v1269_v4, %v1268_v60  ;;  %v1785_v7 = vsel %vm1721_vm8, %v1269_v4, 0.0  ;;  %v929_v8 = vpop.f32.mrb[28].mxu0  ;;  %v3181_v11 = vsel %vm1173_vm9, %v1053_v59, %v1237_v1  ;;  %v1057_v12 = vpop.f32.mrb[28].mxu1  ;;  %vm1724_vm0 = vcmp.lt.s32.totalorder %v1657_v42, %v3048_v20 }
 0x153   : > { %v1980_v13 = vadd.f32 %v1979_v51, %v1917_v3  ;;  %v1848_v14 = vadd.f32 %v1847_v2, %v1785_v7  ;;  %v1918_v16 = vmul.f32 %v1785_v7, %v1785_v7  ;;  %v930_v21 = vadd.f32 %v3046_v19, %v929_v8  ;;  %v931_v22 = vpop.f32.mrb[29].mxu0  ;;  %v1059_v23 = vpop.f32.mrb[29].mxu1 }
 0x154   : > { %2616 = vst [vmem:[%s3068_s25 + $0x30] sm:$0xff] %v2484_v6   ;;  %v932_v24 = vpop.f32.mrb[30].mxu0  ;;  %v2564_v26 = vpack.c.bf16 %v3181_v11, %v3178_v5  ;;  %v1058_v27 = vadd.f32 %v3046_v19, %v1057_v12  ;;  %v1060_v28 = vpop.f32.mrb[30].mxu1  ;;  %vm1725_vm4 = vcmp.lt.s32.totalorder %v1658_v54, %v3048_v20  ;;  %v1659_v23 = vadd.s32 144, %v3041_v18 }
 0x155   : > { %v1981_v29 = vadd.f32 %v1980_v13, %v1918_v16  ;;  %vm1142_vm11 = vcmp.ge.f32.partialorder %v930_v21, 0.0  ;;  %v1206_v30 = vmul.f32 0.01, %v930_v21  ;;  %v933_v32 = vadd.f32 %v3046_v19, %v932_v24  ;;  %v934_v33 = vpop.f32.mrb[31].mxu0  ;;  %v1062_v34 = vpop.f32.mrb[31].mxu1 }
 0x156   : > { %2632 = vst [vmem:[%s3068_s25 + $0xb0] sm:$0xff] %v2564_v26   ;;  %vm1174_vm12 = vcmp.ge.f32.partialorder %v1058_v27, 0.0  ;;  %v1238_v35 = vmul.f32 0.01, %v1058_v27  ;;  %v1061_v37 = vadd.f32 %v3046_v19, %v1060_v28  ;;  %v1660_v34 = vadd.s32 152, %v3041_v18 }
 0x157   : > { %v1270_v38 = vsel %vm1142_vm11, %v930_v21, %v1206_v30  ;;  %vm1143_vm13 = vcmp.ge.f32.partialorder %v933_v32, 0.0  ;;  %v1207_v39 = vmul.f32 0.01, %v933_v32  ;;  %vm1726_vm6 = vcmp.lt.s32.totalorder %v1659_v23, %v3048_v20 }
 0x158   : > { %v1786_v41 = vsel %vm1722_vm10, %v1270_v38, 0.0  ;;  %vm1175_vm15 = vcmp.ge.f32.partialorder %v1061_v37, 0.0  ;;  %v1239_v43 = vmul.f32 0.01, %v1061_v37  ;;  %v3196_v49 = vsel %vm1174_vm12, %v1058_v27, %v1238_v35 }
 0x159   : > { %v1849_v44 = vadd.f32 %v1848_v14, %v1786_v41  ;;  %v1919_v45 = vmul.f32 %v1786_v41, %v1786_v41  ;;  %v1271_v47 = vsel %vm1143_vm13, %v933_v32, %v1207_v39  ;;  %vm1727_vm10 = vcmp.lt.s32.totalorder %v1660_v34, %v3048_v20 }
 0x15a   : > { %v2489_v50 = vpack.c.bf16 %v1271_v47, %v1270_v38  ;;  %v1787_v51 = vsel %vm1723_vm14, %v1271_v47, 0.0  ;;  %v937_v53 = vpop.f32.mrb[32].mxu0  ;;  %v3199_v55 = vsel %vm1175_vm15, %v1061_v37, %v1239_v43  ;;  %v1065_v57 = vpop.f32.mrb[32].mxu1 }
 0x15b   : > { %v1982_v58 = vadd.f32 %v1981_v29, %v1919_v45  ;;  %v1850_v59 = vadd.f32 %v1849_v44, %v1787_v51  ;;  %v1920_v60 = vmul.f32 %v1787_v51, %v1787_v51  ;;  %v938_v62 = vadd.f32 %v3046_v19, %v937_v53  ;;  %v939_v63 = vpop.f32.mrb[33].mxu0  ;;  %v1067_v0 = vpop.f32.mrb[33].mxu1 }
 0x15c   : > { %2617 = vst [vmem:[%s3068_s25 + $0x38] sm:$0xff] %v2489_v50   ;;  %v940_v1 = vpop.f32.mrb[34].mxu0  ;;  %v2569_v2 = vpack.c.bf16 %v3199_v55, %v3196_v49  ;;  %v1066_v3 = vadd.f32 %v3046_v19, %v1065_v57  ;;  %v1068_v4 = vpop.f32.mrb[34].mxu1 }
 0x15d   : > { %v1983_v6 = vadd.f32 %v1982_v58, %v1920_v60  ;;  %vm1144_vm1 = vcmp.ge.f32.partialorder %v938_v62, 0.0  ;;  %v1208_v7 = vmul.f32 0.01, %v938_v62  ;;  %v941_v8 = vadd.f32 %v3046_v19, %v940_v1  ;;  %v942_v9 = vpop.f32.mrb[35].mxu0  ;;  %v1070_v12 = vpop.f32.mrb[35].mxu1 }
 0x15e   : > { %2633 = vst [vmem:[%s3068_s25 + $0xb8] sm:$0xff] %v2569_v2   ;;  %vm1176_vm2 = vcmp.ge.f32.partialorder %v1066_v3, 0.0  ;;  %v1240_v13 = vmul.f32 0.01, %v1066_v3  ;;  %v1069_v14 = vadd.f32 %v3046_v19, %v1068_v4  ;;  %v1661_v2 = vadd.s32 160, %v3041_v18 }
 0x15f   : > { %v1272_v16 = vsel %vm1144_vm1, %v938_v62, %v1208_v7  ;;  %vm1145_vm3 = vcmp.ge.f32.partialorder %v941_v8, 0.0  ;;  %v1209_v21 = vmul.f32 0.01, %v941_v8 }
 0x160   : > { %v1788_v22 = vsel %vm1724_vm0, %v1272_v16, 0.0  ;;  %vm1177_vm5 = vcmp.ge.f32.partialorder %v1069_v14, 0.0  ;;  %v1241_v24 = vmul.f32 0.01, %v1069_v14  ;;  %v3214_v29 = vsel %vm1176_vm2, %v1066_v3, %v1240_v13 }
 0x161   : > { %v1851_v26 = vadd.f32 %v1850_v59, %v1788_v22  ;;  %v1921_v27 = vmul.f32 %v1788_v22, %v1788_v22  ;;  %v1273_v28 = vsel %vm1145_vm3, %v941_v8, %v1209_v21  ;;  %vm1728_vm12 = vcmp.lt.s32.totalorder %v1661_v2, %v3048_v20 }
 0x162   : > { %v2494_v30 = vpack.c.bf16 %v1273_v28, %v1272_v16  ;;  %v1789_v32 = vsel %vm1725_vm4, %v1273_v28, 0.0  ;;  %v945_v33 = vpop.f32.mrb[36].mxu0  ;;  %v3217_v35 = vsel %vm1177_vm5, %v1069_v14, %v1241_v24  ;;  %v1073_v37 = vpop.f32.mrb[36].mxu1  ;;  %v1662_v14 = vadd.s32 168, %v3041_v18 }
 0x163   : > { %v1984_v38 = vadd.f32 %v1983_v6, %v1921_v27  ;;  %v1852_v39 = vadd.f32 %v1851_v26, %v1789_v32  ;;  %v1922_v41 = vmul.f32 %v1789_v32, %v1789_v32  ;;  %v946_v42 = vadd.f32 %v3046_v19, %v945_v33  ;;  %v947_v43 = vpop.f32.mrb[37].mxu0  ;;  %v1075_v44 = vpop.f32.mrb[37].mxu1 }
 0x164   : > { %2618 = vst [vmem:[%s3068_s25 + $0x40] sm:$0xff] %v2494_v30   ;;  %v948_v45 = vpop.f32.mrb[38].mxu0  ;;  %v2574_v47 = vpack.c.bf16 %v3217_v35, %v3214_v29  ;;  %v1074_v50 = vadd.f32 %v3046_v19, %v1073_v37  ;;  %v1076_v51 = vpop.f32.mrb[38].mxu1  ;;  %vm1729_vm0 = vcmp.lt.s32.totalorder %v1662_v14, %v3048_v20 }
 0x165   : > { %v1985_v53 = vadd.f32 %v1984_v38, %v1922_v41  ;;  %vm1146_vm7 = vcmp.ge.f32.partialorder %v946_v42, 0.0  ;;  %v1210_v54 = vmul.f32 0.01, %v946_v42  ;;  %v949_v57 = vadd.f32 %v3046_v19, %v948_v45  ;;  %v950_v58 = vpop.f32.mrb[39].mxu0  ;;  %v1078_v59 = vpop.f32.mrb[39].mxu1 }
 0x166   : > { %2634 = vst [vmem:[%s3068_s25 + $0xc0] sm:$0xff] %v2574_v47   ;;  %vm1178_vm8 = vcmp.ge.f32.partialorder %v1074_v50, 0.0  ;;  %v1242_v60 = vmul.f32 0.01, %v1074_v50  ;;  %v1077_v62 = vadd.f32 %v3046_v19, %v1076_v51  ;;  %v1663_v51 = vadd.s32 176, %v3041_v18 }
 0x167   : > { %v1274_v63 = vsel %vm1146_vm7, %v946_v42, %v1210_v54  ;;  %vm1147_vm9 = vcmp.ge.f32.partialorder %v949_v57, 0.0  ;;  %v1211_v0 = vmul.f32 0.01, %v949_v57 }
 0x168   : > { %v1790_v1 = vsel %vm1726_vm6, %v1274_v63, 0.0  ;;  %vm1179_vm11 = vcmp.ge.f32.partialorder %v1077_v62, 0.0  ;;  %v1243_v3 = vmul.f32 0.01, %v1077_v62  ;;  %v3232_v8 = vsel %vm1178_vm8, %v1074_v50, %v1242_v60 }
 0x169   : > { %v1853_v4 = vadd.f32 %v1852_v39, %v1790_v1  ;;  %v1923_v6 = vmul.f32 %v1790_v1, %v1790_v1  ;;  %v1275_v7 = vsel %vm1147_vm9, %v949_v57, %v1211_v0  ;;  %v1664_v0 = vadd.s32 184, %v3041_v18 }
 0x16a   : > { %v2499_v9 = vpack.c.bf16 %v1275_v7, %v1274_v63  ;;  %v1791_v12 = vsel %vm1727_vm10, %v1275_v7, 0.0  ;;  %v953_v13 = vpop.f32.mrb[40].mxu0  ;;  %v3235_v16 = vsel %vm1179_vm11, %v1077_v62, %v1243_v3  ;;  %v1081_v21 = vpop.f32.mrb[40].mxu1  ;;  %vm1730_vm2 = vcmp.lt.s32.totalorder %v1663_v51, %v3048_v20 }
 0x16b   : > { %v1986_v22 = vadd.f32 %v1985_v53, %v1923_v6  ;;  %v1854_v23 = vadd.f32 %v1853_v4, %v1791_v12  ;;  %v1924_v24 = vmul.f32 %v1791_v12, %v1791_v12  ;;  %v954_v26 = vadd.f32 %v3046_v19, %v953_v13  ;;  %v955_v27 = vpop.f32.mrb[41].mxu0  ;;  %v1083_v28 = vpop.f32.mrb[41].mxu1 }
 0x16c   : > { %2619 = vst [vmem:[%s3068_s25 + $0x48] sm:$0xff] %v2499_v9   ;;  %v956_v30 = vpop.f32.mrb[42].mxu0  ;;  %v2579_v32 = vpack.c.bf16 %v3235_v16, %v3232_v8  ;;  %v1082_v33 = vadd.f32 %v3046_v19, %v1081_v21  ;;  %v1084_v34 = vpop.f32.mrb[42].mxu1  ;;  %vm1731_vm6 = vcmp.lt.s32.totalorder %v1664_v0, %v3048_v20 }
 0x16d   : > { %v1987_v37 = vadd.f32 %v1986_v22, %v1924_v24  ;;  %vm1148_vm13 = vcmp.ge.f32.partialorder %v954_v26, 0.0  ;;  %v1212_v38 = vmul.f32 0.01, %v954_v26  ;;  %v957_v39 = vadd.f32 %v3046_v19, %v956_v30  ;;  %v958_v41 = vpop.f32.mrb[43].mxu0  ;;  %v1086_v42 = vpop.f32.mrb[43].mxu1 }
 0x16e   : > { %2635 = vst [vmem:[%s3068_s25 + $0xc8] sm:$0xff] %v2579_v32   ;;  %vm1180_vm14 = vcmp.ge.f32.partialorder %v1082_v33, 0.0  ;;  %v1244_v43 = vmul.f32 0.01, %v1082_v33  ;;  %v1085_v44 = vadd.f32 %v3046_v19, %v1084_v34 }
 0x16f   : > { %v1276_v45 = vsel %vm1148_vm13, %v954_v26, %v1212_v38  ;;  %vm1149_vm15 = vcmp.ge.f32.partialorder %v957_v39, 0.0  ;;  %v1213_v47 = vmul.f32 0.01, %v957_v39  ;;  %v1665_v38 = vadd.s32 192, %v3041_v18 }
 0x170   : > { %v1792_v50 = vsel %vm1728_vm12, %v1276_v45, 0.0  ;;  %vm1181_vm1 = vcmp.ge.f32.partialorder %v1085_v44, 0.0  ;;  %v1245_v53 = vmul.f32 0.01, %v1085_v44  ;;  %v3250_v59 = vsel %vm1180_vm14, %v1082_v33, %v1244_v43 }
 0x171   : > { %v1855_v54 = vadd.f32 %v1854_v23, %v1792_v50  ;;  %v1925_v57 = vmul.f32 %v1792_v50, %v1792_v50  ;;  %v1277_v58 = vsel %vm1149_vm15, %v957_v39, %v1213_v47  ;;  %vm1732_vm8 = vcmp.lt.s32.totalorder %v1665_v38, %v3048_v20 }
 0x172   : > { %v2504_v60 = vpack.c.bf16 %v1277_v58, %v1276_v45  ;;  %v1793_v62 = vsel %vm1729_vm0, %v1277_v58, 0.0  ;;  %v961_v63 = vpop.f32.mrb[44].mxu0  ;;  %v3253_v1 = vsel %vm1181_vm1, %v1085_v44, %v1245_v53  ;;  %v1089_v3 = vpop.f32.mrb[44].mxu1  ;;  %v1666_v53 = vadd.s32 200, %v3041_v18 }
 0x173   : > { %v1988_v2 = vadd.f32 %v1987_v37, %v1925_v57  ;;  %v1856_v4 = vadd.f32 %v1855_v54, %v1793_v62  ;;  %v1926_v6 = vmul.f32 %v1793_v62, %v1793_v62  ;;  %v962_v7 = vadd.f32 %v3046_v19, %v961_v63  ;;  %v963_v9 = vpop.f32.mrb[45].mxu0  ;;  %v1091_v12 = vpop.f32.mrb[45].mxu1 }
 0x174   : > { %2620 = vst [vmem:[%s3068_s25 + $0x50] sm:$0xff] %v2504_v60   ;;  %v964_v13 = vpop.f32.mrb[46].mxu0  ;;  %v2584_v14 = vpack.c.bf16 %v3253_v1, %v3250_v59  ;;  %v1090_v21 = vadd.f32 %v3046_v19, %v1089_v3  ;;  %v1092_v22 = vpop.f32.mrb[46].mxu1  ;;  %vm1733_vm12 = vcmp.lt.s32.totalorder %v1666_v53, %v3048_v20 }
 0x175   : > { %v1989_v23 = vadd.f32 %v1988_v2, %v1926_v6  ;;  %vm1150_vm3 = vcmp.ge.f32.partialorder %v962_v7, 0.0  ;;  %v1214_v24 = vmul.f32 0.01, %v962_v7  ;;  %v965_v26 = vadd.f32 %v3046_v19, %v964_v13  ;;  %v966_v27 = vpop.f32.mrb[47].mxu0  ;;  %v1094_v28 = vpop.f32.mrb[47].mxu1 }
 0x176   : > { %2636 = vst [vmem:[%s3068_s25 + $0xd0] sm:$0xff] %v2584_v14   ;;  %vm1182_vm4 = vcmp.ge.f32.partialorder %v1090_v21, 0.0  ;;  %v1246_v30 = vmul.f32 0.01, %v1090_v21  ;;  %v1093_v32 = vadd.f32 %v3046_v19, %v1092_v22  ;;  %v1667_v27 = vadd.s32 208, %v3041_v18 }
 0x177   : > { %v1278_v33 = vsel %vm1150_vm3, %v962_v7, %v1214_v24  ;;  %vm1151_vm5 = vcmp.ge.f32.partialorder %v965_v26, 0.0  ;;  %v1215_v34 = vmul.f32 0.01, %v965_v26 }
 0x178   : > { %v1794_v37 = vsel %vm1730_vm2, %v1278_v33, 0.0  ;;  %vm1183_vm7 = vcmp.ge.f32.partialorder %v1093_v32, 0.0  ;;  %v1247_v39 = vmul.f32 0.01, %v1093_v32  ;;  %v3268_v44 = vsel %vm1182_vm4, %v1090_v21, %v1246_v30 }
 0x179   : > { %v1857_v41 = vadd.f32 %v1856_v4, %v1794_v37  ;;  %v1927_v42 = vmul.f32 %v1794_v37, %v1794_v37  ;;  %v1279_v43 = vsel %vm1151_vm5, %v965_v26, %v1215_v34  ;;  %vm1734_vm14 = vcmp.lt.s32.totalorder %v1667_v27, %v3048_v20 }
 0x17a   : > { %v2509_v45 = vpack.c.bf16 %v1279_v43, %v1278_v33  ;;  %v1795_v47 = vsel %vm1731_vm6, %v1279_v43, 0.0  ;;  %v969_v50 = vpop.f32.mrb[48].mxu0  ;;  %v3271_v54 = vsel %vm1183_vm7, %v1093_v32, %v1247_v39  ;;  %v1097_v57 = vpop.f32.mrb[48].mxu1 }
 0x17b   : > { %v1990_v51 = vadd.f32 %v1989_v23, %v1927_v42  ;;  %v1858_v58 = vadd.f32 %v1857_v41, %v1795_v47  ;;  %v1928_v60 = vmul.f32 %v1795_v47, %v1795_v47  ;;  %v970_v62 = vadd.f32 %v3046_v19, %v969_v50  ;;  %v971_v63 = vpop.f32.mrb[49].mxu0  ;;  %v1099_v0 = vpop.f32.mrb[49].mxu1  ;;  %v3294_v50 = vld [vmem:[%s3486_s2] ss:$0 sm:$0xff] }
 0x17c   : > { %2621 = vst [vmem:[%s3068_s25 + $0x58] sm:$0xff] %v2509_v45   ;;  %v972_v3 = vpop.f32.mrb[50].mxu0  ;;  %v2589_v2 = vpack.c.bf16 %v3271_v54, %v3268_v44  ;;  %v1098_v4 = vadd.f32 %v3046_v19, %v1097_v57  ;;  %v1100_v6 = vpop.f32.mrb[50].mxu1  ;;  %v1668_v41 = vadd.s32 216, %v3041_v18 }
 0x17d   : > { %v1991_v7 = vadd.f32 %v1990_v51, %v1928_v60  ;;  %vm1152_vm9 = vcmp.ge.f32.partialorder %v970_v62, 0.0  ;;  %v1216_v9 = vmul.f32 0.01, %v970_v62  ;;  %v973_v12 = vadd.f32 %v3046_v19, %v972_v3  ;;  %v974_v13 = vpop.f32.mrb[51].mxu0  ;;  %v1102_v14 = vpop.f32.mrb[51].mxu1 }
 0x17e   : > { %2637 = vst [vmem:[%s3068_s25 + $0xd8] sm:$0xff] %v2589_v2   ;;  %vm1184_vm10 = vcmp.ge.f32.partialorder %v1098_v4, 0.0  ;;  %v1248_v21 = vmul.f32 0.01, %v1098_v4  ;;  %v1101_v22 = vadd.f32 %v3046_v19, %v1100_v6  ;;  %vm1735_vm2 = vcmp.lt.s32.totalorder %v1668_v41, %v3048_v20 }
 0x17f   : > { %v1280_v23 = vsel %vm1152_vm9, %v970_v62, %v1216_v9  ;;  %vm1153_vm11 = vcmp.ge.f32.partialorder %v973_v12, 0.0  ;;  %v1217_v24 = vmul.f32 0.01, %v973_v12 }
 0x180   : > { %v1796_v26 = vsel %vm1732_vm8, %v1280_v23, 0.0  ;;  %vm1185_vm13 = vcmp.ge.f32.partialorder %v1101_v22, 0.0  ;;  %v1249_v28 = vmul.f32 0.01, %v1101_v22  ;;  %v3286_v34 = vsel %vm1184_vm10, %v1098_v4, %v1248_v21 }
 0x181   : > { %v1859_v30 = vadd.f32 %v1858_v58, %v1796_v26  ;;  %v1929_v32 = vmul.f32 %v1796_v26, %v1796_v26  ;;  %v1281_v33 = vsel %vm1153_vm11, %v973_v12, %v1217_v24 }
 0x182   : > { %v2514_v37 = vpack.c.bf16 %v1281_v33, %v1280_v23  ;;  %v1797_v19 = vsel %vm1733_vm12, %v1281_v33, 0.0  ;;  %v977_v39 = vpop.f32.mrb[52].mxu0  ;;  %v3289_v42 = vsel %vm1185_vm13, %v1101_v22, %v1249_v28  ;;  %v1105_v43 = vpop.f32.mrb[52].mxu1  ;;  %v1669_v22 = vadd.s32 224, %v3041_v18 }
 0x183   : > { %v1992_v38 = vadd.f32 %v1991_v7, %v1929_v32  ;;  %v1860_v45 = vadd.f32 %v1859_v30, %v1797_v19  ;;  %v1930_v47 = vmul.f32 %v1797_v19, %v1797_v19  ;;  %v978_v53 = vadd.f32 %v3294_v50, %v977_v39  ;;  %v979_v57 = vpop.f32.mrb[53].mxu0  ;;  %v1107_v51 = vpop.f32.mrb[53].mxu1 }
 0x184   : > { %2622 = vst [vmem:[%s3068_s25 + $0x60] sm:$0xff] %v2514_v37   ;;  %v980_v58 = vpop.f32.mrb[54].mxu0  ;;  %v2594_v60 = vpack.c.bf16 %v3289_v42, %v3286_v34  ;;  %v1106_v62 = vadd.f32 %v3294_v50, %v1105_v43  ;;  %v1108_v63 = vpop.f32.mrb[54].mxu1  ;;  %v3304_v7 = vadd.s32 256, %v3041_v18  ;;  %v1670_v19 = vadd.s32 232, %v3041_v18 }
 0x185   : > { %v1993_v0 = vadd.f32 %v1992_v38, %v1930_v47  ;;  %vm1154_vm15 = vcmp.ge.f32.partialorder %v978_v53, 0.0  ;;  %v1218_v3 = vmul.f32 0.01, %v978_v53  ;;  %v981_v2 = vadd.f32 %v3294_v50, %v980_v58  ;;  %v982_v4 = vpop.f32.mrb[55].mxu0  ;;  %v1110_v6 = vpop.f32.mrb[55].mxu1 }
 0x186   : > { %2638 = vst [vmem:[%s3068_s25 + $0xe0] sm:$0xff] %v2594_v60   ;;  %vm1186_vm0 = vcmp.ge.f32.partialorder %v1106_v62, 0.0  ;;  %v1250_v9 = vmul.f32 0.01, %v1106_v62  ;;  %v1109_v12 = vadd.f32 %v3294_v50, %v1108_v63  ;;  %v3319_v57 = vadd.s32 264, %v3041_v18 }
 0x187   : > { %v1282_v13 = vsel %vm1154_vm15, %v978_v53, %v1218_v3  ;;  %vm1155_vm1 = vcmp.ge.f32.partialorder %v981_v2, 0.0  ;;  %v1219_v14 = vmul.f32 0.01, %v981_v2  ;;  %vm1736_vm4 = vcmp.lt.s32.totalorder %v1669_v22, %v3048_v20 }
 0x188   : > { %v1798_v21 = vsel %vm1734_vm14, %v1282_v13, 0.0  ;;  %vm1187_vm3 = vcmp.ge.f32.partialorder %v1109_v12, 0.0  ;;  %v1251_v23 = vmul.f32 0.01, %v1109_v12  ;;  %v3312_v30 = vsel %vm1186_vm0, %v1106_v62, %v1250_v9 }
 0x189   : > { %v1861_v24 = vadd.f32 %v1860_v45, %v1798_v21  ;;  %v1931_v26 = vmul.f32 %v1798_v21, %v1798_v21  ;;  %v1283_v28 = vsel %vm1155_vm1, %v981_v2, %v1219_v14  ;;  %v3328_v6 = vadd.s32 272, %v3041_v18 }
 0x18a   : > { %v2519_v32 = vpack.c.bf16 %v1283_v28, %v1282_v13  ;;  %v1799_v33 = vsel %vm1735_vm2, %v1283_v28, 0.0  ;;  %v985_v37 = vpop.f32.mrb[56].mxu0  ;;  %v3315_v39 = vsel %vm1187_vm3, %v1109_v12, %v1251_v23  ;;  %v1113_v41 = vpop.f32.mrb[56].mxu1  ;;  %vm1740_vm7 = vcmp.lt.s32.totalorder %v3304_v7, %v3048_v20 }
 0x18b   : > { %v1994_v27 = vadd.f32 %v1993_v0, %v1931_v26  ;;  %v1862_v43 = vadd.f32 %v1861_v24, %v1799_v33  ;;  %v1932_v38 = vmul.f32 %v1799_v33, %v1799_v33  ;;  %v986_v47 = vadd.f32 %v3294_v50, %v985_v37  ;;  %v987_v53 = vpop.f32.mrb[57].mxu0  ;;  %v1115_v45 = vpop.f32.mrb[57].mxu1 }
 0x18c   : > { %2623 = vst [vmem:[%s3068_s25 + $0x68] sm:$0xff] %v2519_v32   ;;  %v988_v51 = vpop.f32.mrb[58].mxu0  ;;  %v2599_v58 = vpack.c.bf16 %v3315_v39, %v3312_v30  ;;  %v1114_v60 = vadd.f32 %v3294_v50, %v1113_v41  ;;  %v1116_v62 = vpop.f32.mrb[58].mxu1  ;;  %vm1737_vm9 = vcmp.lt.s32.totalorder %v1670_v19, %v3048_v20  ;;  %v1671_v23 = vadd.s32 240, %v3041_v18 }
 0x18d   : > { %v1995_v63 = vadd.f32 %v1994_v27, %v1932_v38  ;;  %vm1156_vm5 = vcmp.ge.f32.partialorder %v986_v47, 0.0  ;;  %v1220_v0 = vmul.f32 0.01, %v986_v47  ;;  %v989_v3 = vadd.f32 %v3294_v50, %v988_v51  ;;  %v990_v2 = vpop.f32.mrb[59].mxu0  ;;  %v1118_v4 = vpop.f32.mrb[59].mxu1 }
 0x18e   : > { %2639 = vst [vmem:[%s3068_s25 + $0xe8] sm:$0xff] %v2599_v58   ;;  %vm1188_vm6 = vcmp.ge.f32.partialorder %v1114_v60, 0.0  ;;  %v1252_v9 = vmul.f32 0.01, %v1114_v60  ;;  %v1117_v12 = vadd.f32 %v3294_v50, %v1116_v62  ;;  %vm1741_vm11 = vcmp.lt.s32.totalorder %v3319_v57, %v3048_v20 }
 0x18f   : > { %v1284_v13 = vsel %vm1156_vm5, %v986_v47, %v1220_v0  ;;  %vm1157_vm8 = vcmp.ge.f32.partialorder %v989_v3, 0.0  ;;  %v1221_v14 = vmul.f32 0.01, %v989_v3  ;;  %v1672_v22 = vadd.s32 248, %v3041_v18 }
 0x190   : > { %v1800_v21 = vsel %vm1736_vm4, %v1284_v13, 0.0  ;;  %vm1189_vm10 = vcmp.ge.f32.partialorder %v1117_v12, 0.0  ;;  %v1253_v24 = vmul.f32 0.01, %v1117_v12  ;;  %v3341_v33 = vsel %vm1188_vm6, %v1114_v60, %v1252_v9 }
 0x191   : > { %v1863_v26 = vadd.f32 %v1862_v43, %v1800_v21  ;;  %v1933_v28 = vmul.f32 %v1800_v21, %v1800_v21  ;;  %v1285_v32 = vsel %vm1157_vm8, %v989_v3, %v1221_v14  ;;  %v1676_v62 = vadd.s32 280, %v3041_v18 }
 0x192   : > { %v2524_v37 = vpack.c.bf16 %v1285_v32, %v1284_v13  ;;  %v1801_v41 = vsel %vm1737_vm9, %v1285_v32, 0.0  ;;  %v993_v19 = vpop.f32.mrb[60].mxu0  ;;  %v3344_v27 = vsel %vm1189_vm10, %v1117_v12, %v1253_v24  ;;  %v1121_v38 = vpop.f32.mrb[60].mxu1  ;;  %vm1738_vm12 = vcmp.lt.s32.totalorder %v1671_v23, %v3048_v20 }
 0x193   : > { %v1996_v47 = vadd.f32 %v1995_v63, %v1933_v28  ;;  %v1864_v53 = vadd.f32 %v1863_v26, %v1801_v41  ;;  %v1934_v45 = vmul.f32 %v1801_v41, %v1801_v41  ;;  %v994_v51 = vadd.f32 %v3294_v50, %v993_v19  ;;  %v995_v43 = vpop.f32.mrb[61].mxu0  ;;  %v1123_v58 = vpop.f32.mrb[61].mxu1 }
 0x194   : > { %2624 = vst [vmem:[%s3068_s25 + $0x70] sm:$0xff] %v2524_v37   ;;  %v996_v60 = vpop.f32.mrb[62].mxu0  ;;  %v2604_v0 = vpack.c.bf16 %v3344_v27, %v3341_v33  ;;  %v1122_v3 = vadd.f32 %v3294_v50, %v1121_v38  ;;  %v1124_v2 = vpop.f32.mrb[62].mxu1  ;;  %vm1742_vm14 = vcmp.lt.s32.totalorder %v3328_v6, %v3048_v20  ;;  %vm1739_vm1 = vcmp.lt.s32.totalorder %v1672_v22, %v3048_v20 }
 0x195   : > { %v1997_v63 = vadd.f32 %v1996_v47, %v1934_v45  ;;  %vm1158_vm13 = vcmp.ge.f32.partialorder %v994_v51, 0.0  ;;  %v1222_v4 = vmul.f32 0.01, %v994_v51  ;;  %v997_v9 = vadd.f32 %v3294_v50, %v996_v60  ;;  %v998_v12 = vpop.f32.mrb[63].mxu0  ;;  %v1126_v13 = vpop.f32.mrb[63].mxu1 }
 0x196   : > { %2640 = vst [vmem:[%s3068_s25 + $0xf0] sm:$0xff] %v2604_v0   ;;  %vm1190_vm15 = vcmp.ge.f32.partialorder %v1122_v3, 0.0  ;;  %v1254_v14 = vmul.f32 0.01, %v1122_v3  ;;  %v1125_v21 = vadd.f32 %v3294_v50, %v1124_v2  ;;  %v1677_v41 = vadd.s32 288, %v3041_v18 }
 0x197   : > { %v1286_v24 = vsel %vm1158_vm13, %v994_v51, %v1222_v4  ;;  %vm1159_vm0 = vcmp.ge.f32.partialorder %v997_v9, 0.0  ;;  %v1223_v26 = vmul.f32 0.01, %v997_v9  ;;  %v1804_v50 = vsel %vm1740_vm7, %v3063_v40, 0.0 }
 0x198   : > { %v1802_v28 = vsel %vm1738_vm12, %v1286_v24, 0.0  ;;  %v3361_v32 = vsel %vm1190_vm15, %v1122_v3, %v1254_v14  ;;  %vm1191_vm2 = vcmp.ge.f32.partialorder %v1125_v21, 0.0  ;;  %v1255_v37 = vmul.f32 0.01, %v1125_v21 }
 0x199   : > { %v1865_v19 = vadd.f32 %v1864_v53, %v1802_v28  ;;  %v1935_v38 = vmul.f32 %v1802_v28, %v1802_v28  ;;  %v1287_v47 = vsel %vm1159_vm0, %v997_v9, %v1223_v26  ;;  %v1805_v53 = vsel %vm1741_vm11, %v3073_v48, 0.0 }
 0x19a   : > { %v2529_v22 = vpack.c.bf16 %v1287_v47, %v1286_v24  ;;  %v1803_v45 = vsel %vm1739_vm1, %v1287_v47, 0.0  ;;  %v3368_v23 = vsel %vm1191_vm2, %v1125_v21, %v1255_v37  ;;  %v1678_v0 = vadd.s32 296, %v3041_v18 }
 0x19b   : > { %v1998_v51 = vadd.f32 %v1997_v63, %v1935_v38  ;;  %v1866_v43 = vadd.f32 %v1865_v19, %v1803_v45  ;;  %v1936_v58 = vmul.f32 %v1803_v45, %v1803_v45  ;;  %v2609_v60 = vpack.c.bf16 %v3368_v23, %v3361_v32 }
 0x19c   : > { %2625 = vst [vmem:[%s3068_s25 + $0x78] sm:$0xff] %v2529_v22   ;;  %v1937_v7 = vmul.f32 %v1804_v50, %v1804_v50  ;;  %vm1743_vm3 = vcmp.lt.s32.totalorder %v1676_v62, %v3048_v20  ;;  %v1806_v2 = vsel %vm1742_vm14, %v3088_v10, 0.0  ;;  %vm1744_vm4 = vcmp.lt.s32.totalorder %v1677_v41, %v3048_v20 }
 0x19d   : > { %v1867_v40 = vadd.f32 %v1866_v43, %v1804_v50  ;;  %v1999_v3 = vadd.f32 %v1998_v51, %v1936_v58  ;;  %2641 = vst [vmem:[%s3068_s25 + $0xf8] sm:$0xff] %v2609_v60   ;;  %v1938_v63 = vmul.f32 %v1805_v53, %v1805_v53  ;;  %v1679_v57 = vadd.s32 304, %v3041_v18 }
 0x19e   : > { %v1807_v9 = vsel %vm1743_vm3, %v3091_v15, 0.0  ;;  %vm1745_vm5 = vcmp.lt.s32.totalorder %v1678_v0, %v3048_v20  ;;  %v1939_v62 = vmul.f32 %v1806_v2, %v1806_v2  ;;  %v1680_v12 = vadd.s32 312, %v3041_v18 }
 0x19f   : > { %v1868_v48 = vadd.f32 %v1867_v40, %v1805_v53  ;;  %v2000_v4 = vadd.f32 %v1999_v3, %v1937_v7  ;;  %v1808_v21 = vsel %vm1744_vm4, %v3106_v46, 0.0  ;;  %v1681_v10 = vadd.s32 320, %v3041_v18 }
 0x1a0   : > { %v1940_v6 = vmul.f32 %v1807_v9, %v1807_v9  ;;  %vm1746_vm6 = vcmp.lt.s32.totalorder %v1679_v57, %v3048_v20  ;;  %v1809_v28 = vsel %vm1745_vm5, %v3109_v52, 0.0  ;;  %v1682_v15 = vadd.s32 328, %v3041_v18 }
 0x1a1   : > { %v1869_v13 = vadd.f32 %v1868_v48, %v1806_v2  ;;  %v2001_v14 = vadd.f32 %v2000_v4, %v1938_v63  ;;  %v1941_v37 = vmul.f32 %v1808_v21, %v1808_v21  ;;  %vm1747_vm7 = vcmp.lt.s32.totalorder %v1680_v12, %v3048_v20 }
 0x1a2   : > { %v1810_v38 = vsel %vm1746_vm6, %v3124_v17, 0.0  ;;  %vm1748_vm8 = vcmp.lt.s32.totalorder %v1681_v10, %v3048_v20  ;;  %v1942_v46 = vmul.f32 %v1809_v28, %v1809_v28  ;;  %v1683_v47 = vadd.s32 336, %v3041_v18 }
 0x1a3   : > { %v1870_v24 = vadd.f32 %v1869_v13, %v1807_v9  ;;  %v2002_v26 = vadd.f32 %v2001_v14, %v1939_v62  ;;  %v1811_v45 = vsel %vm1747_vm7, %v3127_v25, 0.0  ;;  %vm1749_vm9 = vcmp.lt.s32.totalorder %v1682_v15, %v3048_v20 }
 0x1a4   : > { %v1943_v52 = vmul.f32 %v1810_v38, %v1810_v38  ;;  %v1684_v51 = vadd.s32 344, %v3041_v18  ;;  %v1812_v60 = vsel %vm1748_vm8, %v3142_v56, 0.0  ;;  %v1685_v17 = vadd.s32 352, %v3041_v18 }
 0x1a5   : > { %v1871_v41 = vadd.f32 %v1870_v24, %v1808_v21  ;;  %v2003_v19 = vadd.f32 %v2002_v26, %v1940_v6  ;;  %v1944_v53 = vmul.f32 %v1811_v45, %v1811_v45  ;;  %vm1750_vm10 = vcmp.lt.s32.totalorder %v1683_v47, %v3048_v20 }
 0x1a6   : > { %v1813_v40 = vsel %vm1749_vm9, %v3145_v61, 0.0  ;;  %v1686_v25 = vadd.s32 360, %v3041_v18  ;;  %v1945_v3 = vmul.f32 %v1812_v60, %v1812_v60  ;;  %vm1751_vm11 = vcmp.lt.s32.totalorder %v1684_v51, %v3048_v20 }
 0x1a7   : > { %v1872_v50 = vadd.f32 %v1871_v41, %v1809_v28  ;;  %v2004_v22 = vadd.f32 %v2003_v19, %v1941_v37  ;;  %v1814_v57 = vsel %vm1750_vm10, %v3160_v31, 0.0  ;;  %vm1752_vm12 = vcmp.lt.s32.totalorder %v1685_v17, %v3048_v20 }
 0x1a8   : > { %v1946_v56 = vmul.f32 %v1813_v40, %v1813_v40  ;;  %v1687_v48 = vadd.s32 368, %v3041_v18  ;;  %v1815_v62 = vsel %vm1751_vm11, %v3163_v36, 0.0  ;;  %vm1753_vm13 = vcmp.lt.s32.totalorder %v1686_v25, %v3048_v20 }
 0x1a9   : > { %v1873_v43 = vadd.f32 %v1872_v50, %v1810_v38  ;;  %v2005_v58 = vadd.f32 %v2004_v22, %v1942_v46  ;;  %v1947_v61 = vmul.f32 %v1814_v57, %v1814_v57  ;;  %v1688_v12 = vadd.s32 376, %v3041_v18 }
 0x1aa   : > { %v1816_v21 = vsel %vm1752_vm12, %v3178_v5, 0.0  ;;  %v1689_v31 = vadd.s32 384, %v3041_v18  ;;  %v1948_v10 = vmul.f32 %v1815_v62, %v1815_v62  ;;  %vm1754_vm14 = vcmp.lt.s32.totalorder %v1687_v48, %v3048_v20 }
 0x1ab   : > { %v1874_v0 = vadd.f32 %v1873_v43, %v1811_v45  ;;  %v2006_v7 = vadd.f32 %v2005_v58, %v1943_v52  ;;  %v1817_v26 = vsel %vm1753_vm13, %v3181_v11, 0.0  ;;  %v1690_v36 = vadd.s32 392, %v3041_v18 }
 0x1ac   : > { %v1949_v28 = vmul.f32 %v1816_v21, %v1816_v21  ;;  %vm1755_vm15 = vcmp.lt.s32.totalorder %v1688_v12, %v3048_v20  ;;  %v1818_v41 = vsel %vm1754_vm14, %v3196_v49, 0.0  ;;  %vm1756_vm0 = vcmp.lt.s32.totalorder %v1689_v31, %v3048_v20 }
 0x1ad   : > { %v2007_v2 = vadd.f32 %v2006_v7, %v1944_v53  ;;  %v1875_v63 = vadd.f32 %v1874_v0, %v1812_v60  ;;  %v1950_v5 = vmul.f32 %v1817_v26, %v1817_v26  ;;  %v1691_v46 = vadd.s32 400, %v3041_v18 }
 0x1ae   : > { %v1819_v47 = vsel %vm1755_vm15, %v3199_v55, 0.0  ;;  %vm1757_vm1 = vcmp.lt.s32.totalorder %v1690_v36, %v3048_v20  ;;  %v1951_v11 = vmul.f32 %v1818_v41, %v1818_v41  ;;  %v1692_v45 = vadd.s32 408, %v3041_v18 }
 0x1af   : > { %v1876_v4 = vadd.f32 %v1875_v63, %v1813_v40  ;;  %v2008_v9 = vadd.f32 %v2007_v2, %v1945_v3  ;;  %v1820_v52 = vsel %vm1756_vm0, %v3214_v29, 0.0  ;;  %v1693_v49 = vadd.s32 416, %v3041_v18 }
 0x1b0   : > { %v1952_v51 = vmul.f32 %v1819_v47, %v1819_v47  ;;  %vm1758_vm2 = vcmp.lt.s32.totalorder %v1691_v46, %v3048_v20  ;;  %v1821_v60 = vsel %vm1757_vm1, %v3217_v35, 0.0  ;;  %v1694_v55 = vadd.s32 424, %v3041_v18 }
 0x1b1   : > { %v1877_v13 = vadd.f32 %v1876_v4, %v1814_v57  ;;  %v2009_v14 = vadd.f32 %v2008_v9, %v1946_v56  ;;  %v1953_v53 = vmul.f32 %v1820_v52, %v1820_v52  ;;  %vm1759_vm3 = vcmp.lt.s32.totalorder %v1692_v45, %v3048_v20 }
 0x1b2   : > { %v1822_v7 = vsel %vm1758_vm2, %v3232_v8, 0.0  ;;  %vm1760_vm4 = vcmp.lt.s32.totalorder %v1693_v49, %v3048_v20  ;;  %v1954_v25 = vmul.f32 %v1821_v60, %v1821_v60  ;;  %v1695_v3 = vadd.s32 432, %v3041_v18 }
 0x1b3   : > { %v1878_v6 = vadd.f32 %v1877_v13, %v1815_v62  ;;  %v2010_v24 = vadd.f32 %v2009_v14, %v1947_v61  ;;  %v1823_v2 = vsel %vm1759_vm3, %v3235_v16, 0.0  ;;  %vm1761_vm5 = vcmp.lt.s32.totalorder %v1694_v55, %v3048_v20 }
 0x1b4   : > { %v1955_v57 = vmul.f32 %v1822_v7, %v1822_v7  ;;  %v1696_v56 = vadd.s32 440, %v3041_v18  ;;  %v1824_v48 = vsel %vm1760_vm4, %v3250_v59, 0.0  ;;  %v1697_v8 = vadd.s32 448, %v3041_v18 }
 0x1b5   : > { %v1879_v15 = vadd.f32 %v1878_v6, %v1816_v21  ;;  %v2011_v37 = vadd.f32 %v2010_v24, %v1948_v10  ;;  %v1956_v62 = vmul.f32 %v1823_v2, %v1823_v2  ;;  %vm1762_vm6 = vcmp.lt.s32.totalorder %v1695_v3, %v3048_v20 }
 0x1b6   : > { %v1825_v61 = vsel %vm1761_vm5, %v3253_v1, 0.0  ;;  %v1698_v16 = vadd.s32 456, %v3041_v18  ;;  %v1957_v14 = vmul.f32 %v1824_v48, %v1824_v48  ;;  %vm1763_vm7 = vcmp.lt.s32.totalorder %v1696_v56, %v3048_v20 }
 0x1b7   : > { %v1880_v19 = vadd.f32 %v1879_v15, %v1817_v26  ;;  %v2012_v38 = vadd.f32 %v2011_v37, %v1949_v28  ;;  %v1826_v21 = vsel %vm1762_vm6, %v3268_v44, 0.0  ;;  %vm1764_vm8 = vcmp.lt.s32.totalorder %v1697_v8, %v3048_v20 }
 0x1b8   : > { %v1958_v10 = vmul.f32 %v1825_v61, %v1825_v61  ;;  %v1699_v6 = vadd.s32 464, %v3041_v18  ;;  %v1827_v24 = vsel %vm1763_vm7, %v3271_v54, 0.0  ;;  %vm1765_vm9 = vcmp.lt.s32.totalorder %v1698_v16, %v3048_v20 }
 0x1b9   : > { %v1881_v50 = vadd.f32 %v1880_v19, %v1818_v41  ;;  %v2013_v22 = vadd.f32 %v2012_v38, %v1950_v5  ;;  %v1959_v36 = vmul.f32 %v1826_v21, %v1826_v21  ;;  %v1700_v28 = vadd.s32 472, %v3041_v18 }
 0x1ba   : > { %v1828_v15 = vsel %vm1764_vm8, %v3286_v34, 0.0  ;;  %v1701_v44 = vadd.s32 480, %v3041_v18  ;;  %v1960_v5 = vmul.f32 %v1827_v24, %v1827_v24  ;;  %vm1766_vm10 = vcmp.lt.s32.totalorder %v1699_v6, %v3048_v20 }
 0x1bb   : > { %v1882_v43 = vadd.f32 %v1881_v50, %v1819_v47  ;;  %v2014_v58 = vadd.f32 %v2013_v22, %v1951_v11  ;;  %v1829_v19 = vsel %vm1765_vm9, %v3289_v42, 0.0  ;;  %v1702_v54 = vadd.s32 488, %v3041_v18 }
 0x1bc   : > { %v1961_v47 = vmul.f32 %v1828_v15, %v1828_v15  ;;  %vm1767_vm11 = vcmp.lt.s32.totalorder %v1700_v28, %v3048_v20  ;;  %v1830_v11 = vsel %vm1766_vm10, %v3312_v30, 0.0  ;;  %vm1768_vm12 = vcmp.lt.s32.totalorder %v1701_v44, %v3048_v20 }
 0x1bd   : > { %v1883_v17 = vadd.f32 %v1882_v43, %v1820_v52  ;;  %v2015_v0 = vadd.f32 %v2014_v58, %v1952_v51  ;;  %v1962_v22 = vmul.f32 %v1829_v19, %v1829_v19  ;;  %v1703_v45 = vadd.s32 496, %v3041_v18 }
 0x1be   : > { %v1831_v52 = vsel %vm1767_vm11, %v3315_v39, 0.0  ;;  %vm1769_vm13 = vcmp.lt.s32.totalorder %v1702_v54, %v3048_v20  ;;  %v1963_v51 = vmul.f32 %v1830_v11, %v1830_v11  ;;  %v1704_v43 = vadd.s32 504, %v3041_v18 }
 0x1bf   : > { %v2016_v29 = vadd.f32 %v2015_v0, %v1953_v53  ;;  %v1884_v40 = vadd.f32 %v1883_v17, %v1821_v60  ;;  %v1832_v58 = vsel %vm1768_vm12, %v3341_v33, 0.0  ;;  %v1964_v55 = vmul.f32 %v1831_v52, %v1831_v52 }
 0x1c0   : > { %vm1770_vm14 = vcmp.lt.s32.totalorder %v1703_v45, %v3048_v20  ;;  %v1833_v17 = vsel %vm1769_vm13, %v3344_v27, 0.0  ;;  %v1965_v39 = vmul.f32 %v1832_v58, %v1832_v58  ;;  %vm1771_vm15 = vcmp.lt.s32.totalorder %v1704_v43, %v3048_v20 }
 0x1c1   : > { %v2017_v35 = vadd.f32 %v2016_v29, %v1954_v25  ;;  %v1885_v63 = vadd.f32 %v1884_v40, %v1822_v7  ;;  %v1834_v7 = vsel %vm1770_vm14, %v3361_v32, 0.0  ;;  %v1966_v40 = vmul.f32 %v1833_v17, %v1833_v17 }
 0x1c2   : > { %v1835_v33 = vsel %vm1771_vm15, %v3368_v23, 0.0 }
 0x1c3   : > { %v2018_v4 = vadd.f32 %v2017_v35, %v1955_v57  ;;  %v1886_v9 = vadd.f32 %v1885_v63, %v1823_v2  ;;  %v1967_v2 = vmul.f32 %v1834_v7, %v1834_v7  ;;  %v1968_v27 = vmul.f32 %v1835_v33, %v1835_v33 }
 0x1c5   : > { %v2019_v12 = vadd.f32 %v2018_v4, %v1956_v62  ;;  %v1887_v13 = vadd.f32 %v1886_v9, %v1824_v48 }
 0x1c7   : > { %v2020_v59 = vadd.f32 %v2019_v12, %v1957_v14  ;;  %v1888_v31 = vadd.f32 %v1887_v13, %v1825_v61 }
 0x1c9   : > { %v2021_v1 = vadd.f32 %v2020_v59, %v1958_v10  ;;  %v1889_v26 = vadd.f32 %v1888_v31, %v1826_v21 }
 0x1cb   : > { %v2022_v37 = vadd.f32 %v2021_v1, %v1959_v36  ;;  %v1890_v41 = vadd.f32 %v1889_v26, %v1827_v24 }
 0x1cd   : > { %v2023_v38 = vadd.f32 %v2022_v37, %v1960_v5  ;;  %v1891_v46 = vadd.f32 %v1890_v41, %v1828_v15 }
 0x1cf   : > { %v2024_v34 = vadd.f32 %v2023_v38, %v1961_v47  ;;  %v1892_v50 = vadd.f32 %v1891_v46, %v1829_v19 }
 0x1d1   : > { %v2025_v42 = vadd.f32 %v2024_v34, %v1962_v22  ;;  %v1893_v49 = vadd.f32 %v1892_v50, %v1830_v11 }
 0x1d3   : > { %v2026_v60 = vadd.f32 %v2025_v42, %v1963_v51  ;;  %v1894_v30 = vadd.f32 %v1893_v49, %v1831_v52 }
 0x1d5   : > { %v2027_v53 = vadd.f32 %v2026_v60, %v1964_v55  ;;  %v1895_v0 = vadd.f32 %v1894_v30, %v1832_v58 }
 0x1d7   : > { %v2028_v29 = vadd.f32 %v2027_v53, %v1965_v39  ;;  %v1896_v18 = vadd.f32 %v1895_v0, %v1833_v17 }
 0x1d9   : > { %v2029_v25 = vadd.f32 %v2028_v29, %v1966_v40  ;;  %v1897_v3 = vadd.f32 %v1896_v18, %v1834_v7 }
 0x1db   : > { %v2030_v35 = vadd.f32 %v2029_v25, %v1967_v2  ;;  %v1898_v63 = vadd.f32 %v1897_v3, %v1835_v33 }
 0x1dd   : > { %v1899_v57 = vrot.slane %v1898_v63, 4  ;;  %v2031_v56 = vadd.f32 %v2030_v35, %v1968_v27 }
 0x1df   : > { %v1900_v48 = vadd.f32 %v1899_v57, %v1898_v63  ;;  %v2032_v8 = vrot.slane %v2031_v56, 4 }
 0x1e1   : > { %v1901_v20 = vrot.slane %v1900_v48, 2  ;;  %v2033_v4 = vadd.f32 %v2032_v8, %v2031_v56 }
 0x1e3   : > { %v1902_v32 = vadd.f32 %v1901_v20, %v1900_v48  ;;  %v2034_v9 = vrot.slane %v2033_v4, 2 }
 0x1e5   : > { %v1903_v62 = vrot.slane %v1902_v32, 1  ;;  %v2035_v61 = vadd.f32 %v2034_v9, %v2033_v4 }
 0x1e7   : > { %v1904_v23 = vadd.f32 %v1903_v62, %v1902_v32  ;;  %v2036_v16 = vrot.slane %v2035_v61, 1 }
 0x1e9   : > { %v2037_v12 = vadd.f32 %v2036_v16, %v2035_v61  ;;  %2038 = vst [vmem:[%s311_s6] sm:$0xff] %v1904_v23 }
 0x1eb   : > { %2039 = vst [vmem:[%s318_s9] sm:$0xff] %v2037_v12 }
 0x1ec PF: > { %s16_s20 = sadd.s32 1, %s2834_s20   ;;  %s3490_s18 = smov %s2830_s19 }
 0x1ed   : > { %p13_p6 = scmp.ge.s32.totalorder %s16_s20, 5   ;;  %s3491_s19 = smov %s3493_s21 }
 0x1ef   :  { %15 = sbr.rel (!%p13_p6) target bundleno = 2 (0x2), region = 92 }

// kernel: _lambda_.12
= control target key start
LH: loop header
LB: loop body
LE: loop exit
PB: predicated region body
PF: predicated region fallthrough
CT: control target
= control target key end

     0   :  { %s555_s12 = smov 0   ;;  %s605_s0 = inlined_call_operand.vmem [shape: bf16[256,128], index: 0, kind: input, shape index: {}]   ;;  %s606_s1 = inlined_call_operand.vmem [shape: f32[1,128], index: 1, kind: input, shape index: {}]   ;;  %s607_s2 = inlined_call_operand.vmem [shape: f32[1,128], index: 2, kind: input, shape index: {}]   ;;  %s608_s3 = inlined_call_operand.vmem [shape: bf16[256,128], index: 3, kind: output, shape index: {}]  }
   0x1 LB: > { %s388_s13 = sadd.s32 4294967295, %s533_s12   ;;  %p392_p0 = scmp.ge.s32.totalorder %s533_s12, 1  ;;  %s533_s12 = sphi %s555_s12, %s13_s12  }
   0x2   : > { %p138_p1 = scmp.lt.s32.totalorder %s533_s12, 3 }
   0x4   : > { %p139_p2 = pnand %p392_p0, %p138_p1 }
   0x5   : > { %s393_s14 = sshll.u32 (!%p139_p2), %s388_s13, 4  ;;  %v397_v0 = vld [vmem:[%s606_s1] ss:$0 sm:$0xff] (!%p139_p2) }
   0x6   : > { %142 = sbr.rel (%p139_p2) target bundleno = 35 (0x23), region = 32  ;;  %p163_p3 = scmp.lt.s32.totalorder (!%p139_p2), %s393_s14, 31  ;;  %v398_v9 = vld [vmem:[%s607_s2] ss:$0 sm:$0xff] (!%p139_p2) }
   0xd   : > { %s610_s14 = smov (!%p163_p3, %s393_s14), 31 }
   0xe   : > { %s394_s15 = sshll.u32 %s610_s14, 2 }
   0xf   : > { %s571_s18 = scalar_lea.vmem %s605_s0, %s394_s15  ;;  %s590_s25 = scalar_lea.vmem %s608_s3, %s394_s15 }
  0x10   : > { %v434_v1 = vld [vmem:[%s571_s18] sm:$0xff]   ;;  %v505_v2 = vld [vmem:[%s571_s18 + $0x8] sm:$0xff]   ;;  %v506_v3 = vld [vmem:[%s571_s18 + $0x10] sm:$0xff]  }
  0x11   : > { %v435_v4 = vunpack.c.l.bf16 %v434_v1  ;;  %v436_v5 = vunpack.c.h.bf16 %v434_v1  ;;  %v439_v6 = vunpack.c.l.bf16 %v505_v2  ;;  %v440_v7 = vunpack.c.h.bf16 %v505_v2  ;;  %v507_v8 = vld [vmem:[%s571_s18 + $0x18] sm:$0xff]   ;;  %v508_v22 = vld [vmem:[%s571_s18 + $0x20] sm:$0xff]   ;;  %v509_v27 = vld [vmem:[%s571_s18 + $0x28] sm:$0xff]  }
  0x12   : > { %v443_v10 = vunpack.c.l.bf16 %v506_v3  ;;  %v444_v11 = vunpack.c.h.bf16 %v506_v3  ;;  %v447_v12 = vunpack.c.l.bf16 %v507_v8  ;;  %v448_v13 = vunpack.c.h.bf16 %v507_v8  ;;  %v510_v32 = vld [vmem:[%s571_s18 + $0x30] sm:$0xff]   ;;  %v511_v37 = vld [vmem:[%s571_s18 + $0x38] sm:$0xff]  }
  0x13   : > { %v213_v14 = vmul.f32 %v435_v4, %v397_v0  ;;  %v214_v15 = vmul.f32 %v436_v5, %v397_v0  ;;  %v215_v16 = vmul.f32 %v439_v6, %v397_v0  ;;  %v216_v17 = vmul.f32 %v440_v7, %v397_v0 }
  0x14   : > { %v217_v18 = vmul.f32 %v443_v10, %v397_v0  ;;  %v218_v19 = vmul.f32 %v444_v11, %v397_v0  ;;  %v219_v20 = vmul.f32 %v447_v12, %v397_v0  ;;  %v220_v21 = vmul.f32 %v448_v13, %v397_v0 }
  0x15   : > { %v236_v23 = vadd.f32 %v398_v9, %v213_v14  ;;  %v237_v24 = vadd.f32 %v398_v9, %v214_v15  ;;  %v238_v25 = vadd.f32 %v398_v9, %v215_v16  ;;  %v239_v26 = vadd.f32 %v398_v9, %v216_v17 }
  0x16   : > { %v240_v28 = vadd.f32 %v398_v9, %v217_v18  ;;  %v241_v29 = vadd.f32 %v398_v9, %v218_v19  ;;  %v242_v30 = vadd.f32 %v398_v9, %v219_v20  ;;  %v243_v31 = vadd.f32 %v398_v9, %v220_v21 }
  0x17   : > { %v468_v33 = vpack.c.bf16 %v237_v24, %v236_v23  ;;  %v473_v34 = vpack.c.bf16 %v239_v26, %v238_v25  ;;  %v451_v35 = vunpack.c.l.bf16 %v508_v22  ;;  %v452_v36 = vunpack.c.h.bf16 %v508_v22 }
  0x18   : > { %v478_v38 = vpack.c.bf16 %v241_v29, %v240_v28  ;;  %v483_v39 = vpack.c.bf16 %v243_v31, %v242_v30  ;;  %v455_v40 = vunpack.c.l.bf16 %v509_v27  ;;  %v456_v41 = vunpack.c.h.bf16 %v509_v27 }
  0x19   : > { %469 = vst [vmem:[%s590_s25] sm:$0xff] %v468_v33   ;;  %512 = vst [vmem:[%s590_s25 + $0x8] sm:$0xff] %v473_v34   ;;  %v221_v42 = vmul.f32 %v451_v35, %v397_v0  ;;  %v222_v43 = vmul.f32 %v452_v36, %v397_v0  ;;  %v459_v44 = vunpack.c.l.bf16 %v510_v32  ;;  %v460_v45 = vunpack.c.h.bf16 %v510_v32 }
  0x1a   : > { %513 = vst [vmem:[%s590_s25 + $0x10] sm:$0xff] %v478_v38   ;;  %514 = vst [vmem:[%s590_s25 + $0x18] sm:$0xff] %v483_v39   ;;  %v223_v46 = vmul.f32 %v455_v40, %v397_v0  ;;  %v224_v47 = vmul.f32 %v456_v41, %v397_v0  ;;  %v463_v48 = vunpack.c.l.bf16 %v511_v37  ;;  %v464_v49 = vunpack.c.h.bf16 %v511_v37 }
  0x1b   : > { %v244_v50 = vadd.f32 %v398_v9, %v221_v42  ;;  %v245_v51 = vadd.f32 %v398_v9, %v222_v43  ;;  %v225_v52 = vmul.f32 %v459_v44, %v397_v0  ;;  %v226_v53 = vmul.f32 %v460_v45, %v397_v0 }
  0x1c   : > { %v246_v54 = vadd.f32 %v398_v9, %v223_v46  ;;  %v247_v55 = vadd.f32 %v398_v9, %v224_v47  ;;  %v227_v56 = vmul.f32 %v463_v48, %v397_v0  ;;  %v228_v57 = vmul.f32 %v464_v49, %v397_v0 }
  0x1d   : > { %v488_v58 = vpack.c.bf16 %v245_v51, %v244_v50  ;;  %v248_v59 = vadd.f32 %v398_v9, %v225_v52  ;;  %v249_v60 = vadd.f32 %v398_v9, %v226_v53 }
  0x1e   : > { %v493_v61 = vpack.c.bf16 %v247_v55, %v246_v54  ;;  %v250_v62 = vadd.f32 %v398_v9, %v227_v56  ;;  %v251_v63 = vadd.f32 %v398_v9, %v228_v57 }
  0x1f   : > { %515 = vst [vmem:[%s590_s25 + $0x20] sm:$0xff] %v488_v58   ;;  %v498_v1 = vpack.c.bf16 %v249_v60, %v248_v59 }
  0x20   : > { %516 = vst [vmem:[%s590_s25 + $0x28] sm:$0xff] %v493_v61   ;;  %v503_v2 = vpack.c.bf16 %v251_v63, %v250_v62 }
  0x21   : > { %517 = vst [vmem:[%s590_s25 + $0x30] sm:$0xff] %v498_v1  }
  0x22   : > { %518 = vst [vmem:[%s590_s25 + $0x38] sm:$0xff] %v503_v2  }
  0x23 PF: > { %s13_s12 = sadd.s32 1, %s533_s12  }
  0x24   : > { %p10_p4 = scmp.ge.s32.totalorder %s13_s12, 4  }
  0x26   :  { %12 = sbr.rel (!%p10_p4) target bundleno = 1 (0x1), region = 62 }

// kernel: _lambda_.11
= control target key start
LH: loop header
LB: loop body
LE: loop exit
PB: predicated region body
PF: predicated region fallthrough
CT: control target
= control target key end

     0   :  { %s3668_s18 = smov 0   ;;  %s3670_s19 = smov 0   ;;  %s4280_s0 = inlined_call_operand.vmem [shape: bf16[256,1536], index: 0, kind: input, shape index: {}]   ;;  %s4281_s1 = inlined_call_operand.vmem [shape: bf16[1536,128], index: 1, kind: input, shape index: {}]   ;;  %s4282_s2 = inlined_call_operand.vmem [shape: f32[1,128], index: 2, kind: input, shape index: {}]   ;;  %s4283_s3 = inlined_call_operand.vmem [shape: bf16[256,128], index: 3, kind: output, shape index: {0}]   ;;  %s4284_s4 = inlined_call_operand.vmem [shape: f32[16,128], index: 4, kind: output, shape index: {1}]   ;;  %s4285_s5 = inlined_call_operand.vmem [shape: f32[16,128], index: 5, kind: output, shape index: {2}]  }
   0x1   :  { %s3672_s20 = smov 0  }
   0x2 LB: > { %s28_s21 = sadd.s32 1, %s3632_s19  ;;  %p2683_p0 = scmp.ge.s32.totalorder %s3636_s20, 1  ;;  %s3636_s20 = sphi %s3672_s20, %s16_s20   ;;  %s3632_s19 = sphi %s3670_s19, %s4287_s19   ;;  %s3628_s18 = sphi %s3668_s18, %s4286_s18  }
   0x3   : > { %p30_p1 = scmp.ge.s32.totalorder %s28_s21, 2  ;;  %p229_p2 = scmp.lt.s32.totalorder %s3636_s20, 3 }
   0x5   : > { %s4289_s21 = smov (%p30_p1, %s28_s21), 0  ;;  %p230_p3 = pnand %p2683_p0, %p229_p2 }
   0x6   : > { %v3374_v0 = vld [vmem:[%s4281_s1 + $0x40] sm:$0xff] (!%p230_p3)   ;;  %v3378_v4 = vld [vmem:[%s4281_s1 + $0x48] sm:$0xff] (!%p230_p3)   ;;  %v3382_v8 = vld [vmem:[%s4281_s1 + $0x50] sm:$0xff] (!%p230_p3)   ;;  %s2684_s6 = sshll.u32 (!%p230_p3), %s3628_s18, 4  ;;  %p305_p5 = scmp.lt.s32.totalorder (!%p230_p3), %s3628_s18, 1 }
   0x7   : > { %233 = sbr.rel (%p230_p3) target bundleno = 467 (0x1d3), region = 32  ;;  %v3375_v1 = vld [vmem:[%s4281_s1 + $0xc0] sm:$0xff] (!%p230_p3)   ;;  %2965 = vmatprep.subr.bf16.mxu0 (!%p230_p3), %v3374_v0  ;;  %v3379_v5 = vld [vmem:[%s4281_s1 + $0xc8] sm:$0xff] (!%p230_p3)   ;;  %v3383_v9 = vld [vmem:[%s4281_s1 + $0xd0] sm:$0xff] (!%p230_p3)   ;;  %p283_p4 = scmp.lt.s32.totalorder (!%p230_p3), %s2684_s6, 31 }
   0x8   : > { %v3376_v2 = vld [vmem:[%s4281_s1] sm:$0xff] (!%p230_p3)   ;;  %3029 = vmatprep.subr.bf16.mxu1 (!%p230_p3), %v3375_v1  ;;  %v3380_v6 = vld [vmem:[%s4281_s1 + $0x8] sm:$0xff] (!%p230_p3)   ;;  %v3384_v10 = vld [vmem:[%s4281_s1 + $0x10] sm:$0xff] (!%p230_p3)  }
   0x9   : > { %v3377_v3 = vld [vmem:[%s4281_s1 + $0x80] sm:$0xff] (!%p230_p3)   ;;  %2966 = vmatpush3.bf16.msra.mxu0 (!%p230_p3), %v3376_v2  ;;  %v3381_v7 = vld [vmem:[%s4281_s1 + $0x88] sm:$0xff] (!%p230_p3)   ;;  %v3385_v11 = vld [vmem:[%s4281_s1 + $0x90] sm:$0xff] (!%p230_p3)  }
   0xa   : > { %3030 = vmatpush3.bf16.msra.mxu1 (!%p230_p3), %v3377_v3  ;;  %2967 = vmatprep.subr.bf16.mxu0 (!%p230_p3), %v3378_v4  ;;  %v3386_v12 = vld [vmem:[%s4281_s1 + $0x58] sm:$0xff] (!%p230_p3)   ;;  %v3390_v16 = vld [vmem:[%s4281_s1 + $0x60] sm:$0xff] (!%p230_p3)   ;;  %v3394_v20 = vld [vmem:[%s4281_s1 + $0x68] sm:$0xff] (!%p230_p3)  }
   0xb   : > { %3031 = vmatprep.subr.bf16.mxu1 (!%p230_p3), %v3379_v5  ;;  %v3387_v13 = vld [vmem:[%s4281_s1 + $0xd8] sm:$0xff] (!%p230_p3)   ;;  %v3391_v17 = vld [vmem:[%s4281_s1 + $0xe0] sm:$0xff] (!%p230_p3)   ;;  %v3395_v21 = vld [vmem:[%s4281_s1 + $0xe8] sm:$0xff] (!%p230_p3)  }
   0xc   : > { %v3388_v14 = vld [vmem:[%s4281_s1 + $0x18] sm:$0xff] (!%p230_p3)   ;;  %v3392_v18 = vld [vmem:[%s4281_s1 + $0x20] sm:$0xff] (!%p230_p3)   ;;  %v3396_v22 = vld [vmem:[%s4281_s1 + $0x28] sm:$0xff] (!%p230_p3)  }
   0xd   : > { %2968 = vmatpush3.bf16.msra.mxu0 (!%p230_p3), %v3380_v6  ;;  %v3389_v15 = vld [vmem:[%s4281_s1 + $0x98] sm:$0xff] (!%p230_p3)   ;;  %v3393_v19 = vld [vmem:[%s4281_s1 + $0xa0] sm:$0xff] (!%p230_p3)   ;;  %v3397_v23 = vld [vmem:[%s4281_s1 + $0xa8] sm:$0xff] (!%p230_p3)  }
   0xe   : > { %3032 = vmatpush3.bf16.msra.mxu1 %v3381_v7  ;;  %2969 = vmatprep.subr.bf16.mxu0 %v3382_v8  ;;  %s4291_s6 = smov (!%p283_p4, %s2684_s6), 31  ;;  %v3398_v24 = vld [vmem:[%s4281_s1 + $0x70] sm:$0xff]   ;;  %v3402_v28 = vld [vmem:[%s4281_s1 + $0x78] sm:$0xff]   ;;  %v3412_v36 = vld [vmem:[%s4281_s1 + $0x140] sm:$0xff]  }
   0xf   : > { %3033 = vmatprep.subr.bf16.mxu1 %v3383_v9  ;;  %v3399_v25 = vld [vmem:[%s4281_s1 + $0xf0] sm:$0xff]   ;;  %s3349_s9 = smul.u32 48, %s4291_s6  ;;  %v3403_v29 = vld [vmem:[%s4281_s1 + $0xf8] sm:$0xff]   ;;  %v3413_v37 = vld [vmem:[%s4281_s1 + $0x100] sm:$0xff]   ;;  %s2687_s27 = sshll.u32 %s4291_s6, 2 }
  0x10   : > { %v3400_v26 = vld [vmem:[%s4281_s1 + $0x30] sm:$0xff]   ;;  %v3404_v30 = vld [vmem:[%s4281_s1 + $0x38] sm:$0xff]   ;;  %v3414_v38 = vld [vmem:[%s4281_s1 + $0x1c0] sm:$0xff]   ;;  %s4198_s6 = scalar_lea.vmem %s4283_s3, %s2687_s27 }
  0x11   : > { %2970 = vmatpush3.bf16.msra.mxu0 %v3384_v10  ;;  %v3401_v27 = vld [vmem:[%s4281_s1 + $0xb0] sm:$0xff]   ;;  %s3785_s24 = scalar_lea.vmem %s4280_s0, %s3349_s9  ;;  %v3405_v31 = vld [vmem:[%s4281_s1 + $0xb8] sm:$0xff]   ;;  %v3415_v39 = vld [vmem:[%s4281_s1 + $0x180] sm:$0xff]  }
  0x12   : > { %3034 = vmatpush3.bf16.msra.mxu1 %v3385_v11  ;;  %2971 = vmatprep.subr.bf16.mxu0 %v3386_v12  ;;  %v3406_v32 = vld [vmem:[%s3785_s24] ss:$48 sps:$4 sm:$0xff]   ;;  %v3408_v33 = vld [vmem:[%s3785_s24 + $0x4] ss:$48 sps:$4 sm:$0xff]   ;;  %v3409_v34 = vld [vmem:[%s3785_s24 + $0x8] ss:$48 sps:$4 sm:$0xff]  }
  0x13   : > { %3035 = vmatprep.subr.bf16.mxu1 %v3387_v13  ;;  %v3411_v35 = vld [vmem:[%s3785_s24 + $0xc] ss:$48 sps:$4 sm:$0xff]   ;;  %1703 = vmatprep.mubr.bf16.mxu0 %v3408_v33  ;;  %v3416_v40 = vld [vmem:[%s3785_s24 + $0x64] ss:$48 sps:$4 sm:$0xff]   ;;  %v3420_v42 = vld [vmem:[%s3785_s24 + $0x60] ss:$48 sps:$4 sm:$0xff]  }
  0x14   : > { %1800 = vmatprep.mubr.bf16.mxu1 %v3411_v35  ;;  %v3418_v41 = vld [vmem:[%s3785_s24 + $0x6c] ss:$48 sps:$4 sm:$0xff]   ;;  %v3421_v43 = vld [vmem:[%s3785_s24 + $0x68] ss:$48 sps:$4 sm:$0xff]   ;;  %v3426_v48 = vld [vmem:[%s3785_s24 + $0xc4] ss:$48 sps:$4 sm:$0xff]  }
  0x15   : > { %2972 = vmatpush3.bf16.msra.mxu0 %v3388_v14  ;;  %v3422_v44 = vld [vmem:[%s4281_s1 + $0x148] sm:$0xff]   ;;  %v3430_v50 = vld [vmem:[%s3785_s24 + $0xc0] ss:$48 sps:$4 sm:$0xff]   ;;  %v3436_v56 = vld [vmem:[%s3785_s24 + $0x124] ss:$48 sps:$4 sm:$0xff]  }
  0x16   : > { %3036 = vmatpush3.bf16.msra.mxu1 %v3389_v15  ;;  %2973 = vmatprep.subr.bf16.mxu0 %v3390_v16  ;;  %v3423_v45 = vld [vmem:[%s4281_s1 + $0x108] sm:$0xff]   ;;  %v3432_v52 = vld [vmem:[%s4281_s1 + $0x150] sm:$0xff]   ;;  %v3442_v60 = vld [vmem:[%s4281_s1 + $0x158] sm:$0xff]  }
  0x17   : > { %3037 = vmatprep.subr.bf16.mxu1 %v3391_v17  ;;  %v3424_v46 = vld [vmem:[%s4281_s1 + $0x1c8] sm:$0xff]   ;;  %v3433_v53 = vld [vmem:[%s4281_s1 + $0x110] sm:$0xff]   ;;  %v3443_v61 = vld [vmem:[%s4281_s1 + $0x118] sm:$0xff]  }
  0x18   : > { %v3425_v47 = vld [vmem:[%s4281_s1 + $0x188] sm:$0xff]   ;;  %v3434_v54 = vld [vmem:[%s4281_s1 + $0x1d0] sm:$0xff]   ;;  %v3444_v62 = vld [vmem:[%s4281_s1 + $0x1d8] sm:$0xff]  }
  0x19   : > { %2974 = vmatpush3.bf16.msra.mxu0 %v3392_v18  ;;  %v3428_v49 = vld [vmem:[%s3785_s24 + $0xcc] ss:$48 sps:$4 sm:$0xff]   ;;  %v3431_v51 = vld [vmem:[%s3785_s24 + $0xc8] ss:$48 sps:$4 sm:$0xff]   ;;  %v3435_v55 = vld [vmem:[%s4281_s1 + $0x190] sm:$0xff]  }
  0x1a   : > { %3038 = vmatpush3.bf16.msra.mxu1 %v3393_v19  ;;  %2975 = vmatprep.subr.bf16.mxu0 %v3394_v20  ;;  %v3438_v57 = vld [vmem:[%s3785_s24 + $0x12c] ss:$48 sps:$4 sm:$0xff]   ;;  %v3440_v58 = vld [vmem:[%s3785_s24 + $0x120] ss:$48 sps:$4 sm:$0xff]   ;;  %v3441_v59 = vld [vmem:[%s3785_s24 + $0x128] ss:$48 sps:$4 sm:$0xff]  }
  0x1b   : > { %3039 = vmatprep.subr.bf16.mxu1 %v3395_v21  ;;  %v3445_v63 = vld [vmem:[%s4281_s1 + $0x198] sm:$0xff]   ;;  %v3446_v0 = vld [vmem:[%s3785_s24 + $0x184] ss:$48 sps:$4 sm:$0xff]   ;;  %v3450_v2 = vld [vmem:[%s3785_s24 + $0x180] ss:$48 sps:$4 sm:$0xff]  }
  0x1c   : > { %v3448_v1 = vld [vmem:[%s3785_s24 + $0x18c] ss:$48 sps:$4 sm:$0xff]   ;;  %v3452_v3 = vld [vmem:[%s4281_s1 + $0x160] sm:$0xff]   ;;  %v3451_v4 = vld [vmem:[%s3785_s24 + $0x188] ss:$48 sps:$4 sm:$0xff]  }
  0x1d   : > { %2976 = vmatpush3.bf16.msra.mxu0 %v3396_v22  ;;  %v3453_v5 = vld [vmem:[%s4281_s1 + $0x120] sm:$0xff]   ;;  %v3458_v9 = vld [vmem:[%s3785_s24 + $0x1ec] ss:$48 sps:$4 sm:$0xff]   ;;  %v3461_v15 = vld [vmem:[%s3785_s24 + $0x1e8] ss:$48 sps:$4 sm:$0xff]  }
  0x1e   : > { %3040 = vmatpush3.bf16.msra.mxu1 %v3397_v23  ;;  %2977 = vmatprep.subr.bf16.mxu0 %v3398_v24  ;;  %v3454_v6 = vld [vmem:[%s4281_s1 + $0x1e0] sm:$0xff]   ;;  %v3462_v10 = vld [vmem:[%s4281_s1 + $0x168] sm:$0xff]   ;;  %v3472_v18 = vld [vmem:[%s4281_s1 + $0x170] sm:$0xff]  }
  0x1f   : > { %3041 = vmatprep.subr.bf16.mxu1 %v3399_v25  ;;  %v3455_v7 = vld [vmem:[%s4281_s1 + $0x1a0] sm:$0xff]   ;;  %v3463_v11 = vld [vmem:[%s4281_s1 + $0x128] sm:$0xff]   ;;  %v3473_v19 = vld [vmem:[%s4281_s1 + $0x130] sm:$0xff]  }
  0x20   : > { %v3456_v8 = vld [vmem:[%s3785_s24 + $0x1e4] ss:$48 sps:$4 sm:$0xff]   ;;  %v3460_v12 = vld [vmem:[%s3785_s24 + $0x1e0] ss:$48 sps:$4 sm:$0xff]   ;;  %v3464_v13 = vld [vmem:[%s4281_s1 + $0x1e8] sm:$0xff]  }
  0x21   : > { %2978 = vmatpush3.bf16.msra.mxu0 %v3400_v26  ;;  %v3465_v14 = vld [vmem:[%s4281_s1 + $0x1a8] sm:$0xff]   ;;  %v3466_v16 = vld [vmem:[%s3785_s24 + $0x244] ss:$48 sps:$4 sm:$0xff]   ;;  %v3470_v22 = vld [vmem:[%s3785_s24 + $0x240] ss:$48 sps:$4 sm:$0xff]  }
  0x22   : > { %3042 = vmatpush3.bf16.msra.mxu1 %v3401_v27  ;;  %2979 = vmatprep.subr.bf16.mxu0 %v3402_v28  ;;  %v3468_v17 = vld [vmem:[%s3785_s24 + $0x24c] ss:$48 sps:$4 sm:$0xff]   ;;  %v3474_v20 = vld [vmem:[%s4281_s1 + $0x1f0] sm:$0xff]   ;;  %v3471_v23 = vld [vmem:[%s3785_s24 + $0x248] ss:$48 sps:$4 sm:$0xff]  }
  0x23   : > { %3043 = vmatprep.subr.bf16.mxu1 %v3403_v29  ;;  %v3475_v21 = vld [vmem:[%s4281_s1 + $0x1b0] sm:$0xff]   ;;  %v3478_v25 = vld [vmem:[%s3785_s24 + $0x2ac] ss:$48 sps:$4 sm:$0xff]   ;;  %v3492_v33 = vld [vmem:[%s4281_s1 + $0x240] sm:$0xff]  }
  0x24   : > { %v3476_v24 = vld [vmem:[%s3785_s24 + $0x2a4] ss:$48 sps:$4 sm:$0xff]   ;;  %v3482_v26 = vld [vmem:[%s4281_s1 + $0x178] sm:$0xff]  }
  0x25   : > { %2980 = vmatpush3.bf16.msra.mxu0 %v3404_v30  ;;  %v3483_v27 = vld [vmem:[%s4281_s1 + $0x138] sm:$0xff]   ;;  %v3480_v30 = vld [vmem:[%s3785_s24 + $0x2a0] ss:$48 sps:$4 sm:$0xff]  }
  0x26   : > { %3044 = vmatpush3.bf16.msra.mxu1 %v3405_v31  ;;  %3093 = vmatprep.subr.bf16.mxu0 %v3412_v36  ;;  %v3484_v28 = vld [vmem:[%s4281_s1 + $0x1f8] sm:$0xff]   ;;  %v3494_v35 = vld [vmem:[%s4281_s1 + $0x2c0] sm:$0xff]  }
  0x27   : > { %3157 = vmatprep.subr.bf16.mxu1 %v3414_v38  ;;  %v3485_v29 = vld [vmem:[%s4281_s1 + $0x1b8] sm:$0xff]   ;;  %v3486_v36 = vld [vmem:[%s3785_s24 + $0x10] ss:$48 sps:$4 sm:$0xff]  }
  0x28   : > { %1704 = vmatmul.mubr.bf16.vlgmr.msra.gmra.mrb[0].mxu0 %v3406_v32  ;;  %v3481_v31 = vld [vmem:[%s3785_s24 + $0x2a8] ss:$48 sps:$4 sm:$0xff]   ;;  %v3488_v32 = vld [vmem:[%s3785_s24 + $0x14] ss:$48 sps:$4 sm:$0xff]  }
  0x29   : > { %1801 = vmatmul.mubr.bf16.vlgmr.msra.gmra.mrb[0].mxu1 %v3409_v34  ;;  %3094 = vmatpush3.bf16.msra.mxu0 %v3413_v37  ;;  %v3491_v34 = vld [vmem:[%s3785_s24 + $0x1c] ss:$48 sps:$4 sm:$0xff]   ;;  %v3489_v37 = vld [vmem:[%s3785_s24 + $0x18] ss:$48 sps:$4 sm:$0xff]   ;;  %v3493_v38 = vld [vmem:[%s4281_s1 + $0x200] sm:$0xff]  }
  0x2a   : > { %3158 = vmatpush3.bf16.msra.mxu1 %v3415_v39  ;;  %1711 = vmatprep.mubr.bf16.mxu0 %v3416_v40  ;;  %v3495_v39 = vld [vmem:[%s4281_s1 + $0x280] sm:$0xff]  }
  0x2b   : > { %1808 = vmatprep.mubr.bf16.mxu1 %v3418_v41  ;;  %3095 = vmatprep.subr.bf16.mxu0 %v3422_v44  ;;  %v3496_v40 = vld [vmem:[%s3785_s24 + $0x74] ss:$48 sps:$4 sm:$0xff]   ;;  %v3498_v41 = vld [vmem:[%s3785_s24 + $0x7c] ss:$48 sps:$4 sm:$0xff]  }
  0x2c   : > { %3159 = vmatprep.subr.bf16.mxu1 %v3424_v46  ;;  %v3504_v44 = vld [vmem:[%s4281_s1 + $0x2c8] sm:$0xff]   ;;  %v3500_v46 = vld [vmem:[%s3785_s24 + $0x70] ss:$48 sps:$4 sm:$0xff]  }
  0x2d   : > { %3096 = vmatpush3.bf16.msra.mxu0 %v3423_v45  ;;  %v3505_v45 = vld [vmem:[%s4281_s1 + $0x288] sm:$0xff]  }
  0x2e   : > { %3160 = vmatpush3.bf16.msra.mxu1 %v3425_v47  ;;  %3097 = vmatprep.subr.bf16.mxu0 %v3432_v52  ;;  %v3512_v47 = vld [vmem:[%s4281_s1 + $0x250] sm:$0xff]  }
  0x2f   : > { %3161 = vmatprep.subr.bf16.mxu1 %v3434_v54  ;;  %v3513_v52 = vld [vmem:[%s4281_s1 + $0x210] sm:$0xff]   ;;  %v3522_v54 = vld [vmem:[%s4281_s1 + $0x258] sm:$0xff]  }
  0x30   : > { %1712 = vmatmul.mubr.bf16.gmra.mrb[4].mxu0 %v3420_v42  ;;  %v3502_v42 = vld [vmem:[%s4281_s1 + $0x248] sm:$0xff]  }
  0x31   : > { %1809 = vmatmul.mubr.bf16.gmra.mrb[4].mxu1 %v3421_v43  ;;  %1719 = vmatprep.mubr.bf16.mxu0 %v3426_v48  ;;  %v3503_v43 = vld [vmem:[%s4281_s1 + $0x208] sm:$0xff]  }
  0x32   : > { %1816 = vmatprep.mubr.bf16.mxu1 %v3428_v49  ;;  %3098 = vmatpush3.bf16.msra.mxu0 %v3433_v53  ;;  %v3501_v48 = vld [vmem:[%s3785_s24 + $0x78] ss:$48 sps:$4 sm:$0xff]   ;;  %v3506_v49 = vld [vmem:[%s3785_s24 + $0xd4] ss:$48 sps:$4 sm:$0xff]  }
  0x33   : > { %3162 = vmatpush3.bf16.msra.mxu1 %v3435_v55  ;;  %3099 = vmatprep.subr.bf16.mxu0 %v3442_v60  ;;  %v3515_v53 = vld [vmem:[%s4281_s1 + $0x290] sm:$0xff]   ;;  %v3523_v55 = vld [vmem:[%s4281_s1 + $0x218] sm:$0xff]  }
  0x34   : > { %3163 = vmatprep.subr.bf16.mxu1 %v3444_v62  ;;  %v3516_v60 = vld [vmem:[%s3785_s24 + $0x134] ss:$48 sps:$4 sm:$0xff]  }
  0x35   : > { %v3532_v62 = vld [vmem:[%s4281_s1 + $0x260] sm:$0xff]  }
  0x36   : > { %3100 = vmatpush3.bf16.msra.mxu0 %v3443_v61  ;;  %v3518_v61 = vld [vmem:[%s3785_s24 + $0x13c] ss:$48 sps:$4 sm:$0xff]  }
  0x37   : > { %3164 = vmatpush3.bf16.msra.mxu1 %v3445_v63  ;;  %3101 = vmatprep.subr.bf16.mxu0 %v3452_v3  ;;  %v3533_v63 = vld [vmem:[%s4281_s1 + $0x220] sm:$0xff]   ;;  %v3521_v3 = vld [vmem:[%s3785_s24 + $0x138] ss:$48 sps:$4 sm:$0xff]  }
  0x38   : > { %1720 = vmatmul.mubr.bf16.gmra.mrb[8].mxu0 %v3430_v50  ;;  %3165 = vmatprep.subr.bf16.mxu1 %v3454_v6  ;;  %v3514_v50 = vld [vmem:[%s4281_s1 + $0x2d0] sm:$0xff]   ;;  %v3542_v6 = vld [vmem:[%s4281_s1 + $0x268] sm:$0xff]  }
  0x39   : > { %1817 = vmatmul.mubr.bf16.gmra.mrb[8].mxu1 %v3431_v51  ;;  %1727 = vmatprep.mubr.bf16.mxu0 %v3436_v56  ;;  %v3508_v51 = vld [vmem:[%s3785_s24 + $0xdc] ss:$48 sps:$4 sm:$0xff]   ;;  %v3510_v56 = vld [vmem:[%s3785_s24 + $0xd0] ss:$48 sps:$4 sm:$0xff]  }
  0x3a   : > { %1824 = vmatprep.mubr.bf16.mxu1 %v3438_v57  ;;  %3102 = vmatpush3.bf16.msra.mxu0 %v3453_v5  ;;  %v3524_v57 = vld [vmem:[%s4281_s1 + $0x2d8] sm:$0xff]  }
  0x3b   : > { %3166 = vmatpush3.bf16.msra.mxu1 %v3455_v7  ;;  %3103 = vmatprep.subr.bf16.mxu0 %v3462_v10  ;;  %v3528_v5 = vld [vmem:[%s3785_s24 + $0x19c] ss:$48 sps:$4 sm:$0xff]   ;;  %v3530_v10 = vld [vmem:[%s3785_s24 + $0x190] ss:$48 sps:$4 sm:$0xff]  }
  0x3c   : > { %3167 = vmatprep.subr.bf16.mxu1 %v3464_v13  ;;  %v3543_v7 = vld [vmem:[%s4281_s1 + $0x228] sm:$0xff]  }
  0x3d   : > { %v3538_v13 = vld [vmem:[%s3785_s24 + $0x1fc] ss:$48 sps:$4 sm:$0xff]  }
  0x3e   : > { %3104 = vmatpush3.bf16.msra.mxu0 %v3463_v11  ;;  %v3531_v11 = vld [vmem:[%s3785_s24 + $0x198] ss:$48 sps:$4 sm:$0xff]  }
  0x3f   : > { %3168 = vmatpush3.bf16.msra.mxu1 %v3465_v14  ;;  %3105 = vmatprep.subr.bf16.mxu0 %v3472_v18  ;;  %v3552_v14 = vld [vmem:[%s4281_s1 + $0x270] sm:$0xff]  }
  0x40   : > { %1728 = vmatmul.mubr.bf16.gmra.mrb[12].mxu0 %v3440_v58  ;;  %3169 = vmatprep.subr.bf16.mxu1 %v3474_v20  ;;  %v3525_v58 = vld [vmem:[%s4281_s1 + $0x298] sm:$0xff]   ;;  %v3540_v18 = vld [vmem:[%s3785_s24 + $0x1f0] ss:$48 sps:$4 sm:$0xff]   ;;  %v3546_v20 = vld [vmem:[%s3785_s24 + $0x254] ss:$48 sps:$4 sm:$0xff]  }
  0x41   : > { %1825 = vmatmul.mubr.bf16.gmra.mrb[12].mxu1 %v3441_v59  ;;  %1735 = vmatprep.mubr.bf16.mxu0 %v3446_v0  ;;  %v3511_v59 = vld [vmem:[%s3785_s24 + $0xd8] ss:$48 sps:$4 sm:$0xff]   ;;  %v3534_v0 = vld [vmem:[%s4281_s1 + $0x2e0] sm:$0xff]  }
  0x42   : > { %1832 = vmatprep.mubr.bf16.mxu1 %v3448_v1  ;;  %3106 = vmatpush3.bf16.msra.mxu0 %v3473_v19  ;;  %v3535_v1 = vld [vmem:[%s4281_s1 + $0x2a0] sm:$0xff]   ;;  %v3541_v19 = vld [vmem:[%s3785_s24 + $0x1f8] ss:$48 sps:$4 sm:$0xff]  }
  0x43   : > { %3170 = vmatpush3.bf16.msra.mxu1 %v3475_v21  ;;  %3107 = vmatprep.subr.bf16.mxu0 %v3482_v26  ;;  %v3562_v21 = vld [vmem:[%s4281_s1 + $0x278] sm:$0xff]   ;;  %v3550_v26 = vld [vmem:[%s3785_s24 + $0x250] ss:$48 sps:$4 sm:$0xff]  }
  0x44   : > { %3171 = vmatprep.subr.bf16.mxu1 %v3484_v28  ;;  %v3556_v28 = vld [vmem:[%s3785_s24 + $0x2b4] ss:$48 sps:$4 sm:$0xff]  }
  0x46   : > { %3108 = vmatpush3.bf16.msra.mxu0 %v3483_v27  ;;  %v3551_v27 = vld [vmem:[%s3785_s24 + $0x258] ss:$48 sps:$4 sm:$0xff]  }
  0x47   : > { %3172 = vmatpush3.bf16.msra.mxu1 %v3485_v29  ;;  %3221 = vmatprep.subr.bf16.mxu0 %v3492_v33  ;;  %v3558_v29 = vld [vmem:[%s3785_s24 + $0x2bc] ss:$48 sps:$4 sm:$0xff]  }
  0x48   : > { %1736 = vmatmul.mubr.bf16.gmra.mrb[16].mxu0 %v3450_v2  ;;  %3285 = vmatprep.subr.bf16.mxu1 %v3494_v35  ;;  %v3520_v2 = vld [vmem:[%s3785_s24 + $0x130] ss:$48 sps:$4 sm:$0xff]   ;;  %v3571_v33 = vld [vmem:[%s3785_s24 + $0x2c] ss:$48 sps:$4 sm:$0xff]   ;;  %v3569_v35 = vld [vmem:[%s3785_s24 + $0x28] ss:$48 sps:$4 sm:$0xff]  }
  0x49   : > { %1833 = vmatmul.mubr.bf16.gmra.mrb[16].mxu1 %v3451_v4  ;;  %1743 = vmatprep.mubr.bf16.mxu0 %v3456_v8  ;;  %v3526_v4 = vld [vmem:[%s3785_s24 + $0x194] ss:$48 sps:$4 sm:$0xff]   ;;  %v3544_v8 = vld [vmem:[%s4281_s1 + $0x2e8] sm:$0xff]  }
  0x4a   : > { %1840 = vmatprep.mubr.bf16.mxu1 %v3458_v9  ;;  %v3545_v9 = vld [vmem:[%s4281_s1 + $0x2a8] sm:$0xff]  }
  0x50   : > { %1744 = vmatmul.mubr.bf16.gmra.mrb[20].mxu0 %v3460_v12  ;;  %v3536_v12 = vld [vmem:[%s3785_s24 + $0x1f4] ss:$48 sps:$4 sm:$0xff]  }
  0x51   : > { %1841 = vmatmul.mubr.bf16.gmra.mrb[20].mxu1 %v3461_v15  ;;  %1751 = vmatprep.mubr.bf16.mxu0 %v3466_v16  ;;  %v3553_v15 = vld [vmem:[%s4281_s1 + $0x230] sm:$0xff]  }
  0x52   : > { %1848 = vmatprep.mubr.bf16.mxu1 %v3468_v17  ;;  %v3554_v16 = vld [vmem:[%s4281_s1 + $0x2f0] sm:$0xff]  }
  0x53   : > { %v3555_v17 = vld [vmem:[%s4281_s1 + $0x2b0] sm:$0xff]  }
  0x58   : > { %1752 = vmatmul.mubr.bf16.gmra.mrb[24].mxu0 %v3470_v22  ;;  %v3548_v22 = vld [vmem:[%s3785_s24 + $0x25c] ss:$48 sps:$4 sm:$0xff]  }
  0x59   : > { %1849 = vmatmul.mubr.bf16.gmra.mrb[24].mxu1 %v3471_v23  ;;  %1759 = vmatprep.mubr.bf16.mxu0 %v3476_v24  ;;  %v3563_v23 = vld [vmem:[%s4281_s1 + $0x238] sm:$0xff]  }
  0x5a   : > { %1856 = vmatprep.mubr.bf16.mxu1 %v3478_v25  ;;  %v3564_v24 = vld [vmem:[%s4281_s1 + $0x2f8] sm:$0xff]  }
  0x5b   : > { %v3565_v25 = vld [vmem:[%s4281_s1 + $0x2b8] sm:$0xff]  }
  0x60   : > { %1760 = vmatmul.mubr.bf16.gmra.mrb[28].mxu0 %v3480_v30  ;;  %v3560_v30 = vld [vmem:[%s3785_s24 + $0x2b0] ss:$48 sps:$4 sm:$0xff]  }
  0x61   : > { %1857 = vmatmul.mubr.bf16.gmra.mrb[28].mxu1 %v3481_v31  ;;  %1897 = vmatprep.mubr.bf16.mxu0 %v3488_v32  ;;  %v3561_v31 = vld [vmem:[%s3785_s24 + $0x2b8] ss:$48 sps:$4 sm:$0xff]   ;;  %v3568_v32 = vld [vmem:[%s3785_s24 + $0x24] ss:$48 sps:$4 sm:$0xff]  }
  0x62   : > { %1994 = vmatprep.mubr.bf16.mxu1 %v3491_v34  ;;  %v3566_v34 = vld [vmem:[%s3785_s24 + $0x20] ss:$48 sps:$4 sm:$0xff]  }
  0x68   : > { %1898 = vmatmul.mubr.bf16.vlgmr.msra.gmra.mrb[32].mxu0 %v3486_v36  ;;  %v3572_v36 = vld [vmem:[%s3785_s24 + $0x84] ss:$48 sps:$4 sm:$0xff]  }
  0x69   : > { %1995 = vmatmul.mubr.bf16.vlgmr.msra.gmra.mrb[32].mxu1 %v3489_v37  ;;  %3222 = vmatpush3.bf16.msra.mxu0 %v3493_v38  ;;  %v3574_v37 = vld [vmem:[%s3785_s24 + $0x8c] ss:$48 sps:$4 sm:$0xff]   ;;  %v3576_v38 = vld [vmem:[%s3785_s24 + $0x80] ss:$48 sps:$4 sm:$0xff]  }
  0x6a   : > { %3286 = vmatpush3.bf16.msra.mxu1 %v3495_v39  ;;  %1905 = vmatprep.mubr.bf16.mxu0 %v3496_v40  ;;  %v3577_v39 = vld [vmem:[%s3785_s24 + $0x88] ss:$48 sps:$4 sm:$0xff]   ;;  %v3578_v40 = vld [vmem:[%s3785_s24 + $0xe4] ss:$48 sps:$4 sm:$0xff]  }
  0x6b   : > { %2002 = vmatprep.mubr.bf16.mxu1 %v3498_v41  ;;  %3223 = vmatprep.subr.bf16.mxu0 %v3502_v42  ;;  %v3580_v41 = vld [vmem:[%s3785_s24 + $0xec] ss:$48 sps:$4 sm:$0xff]   ;;  %v3582_v42 = vld [vmem:[%s3785_s24 + $0xe0] ss:$48 sps:$4 sm:$0xff]  }
  0x6c   : > { %3287 = vmatprep.subr.bf16.mxu1 %v3504_v44  ;;  %v3584_v44 = vld [vmem:[%s3785_s24 + $0x144] ss:$48 sps:$4 sm:$0xff]  }
  0x6d   : > { %3224 = vmatpush3.bf16.msra.mxu0 %v3503_v43  ;;  %v3583_v43 = vld [vmem:[%s3785_s24 + $0xe8] ss:$48 sps:$4 sm:$0xff]  }
  0x6e   : > { %3288 = vmatpush3.bf16.msra.mxu1 %v3505_v45  ;;  %3225 = vmatprep.subr.bf16.mxu0 %v3512_v47  ;;  %v3586_v45 = vld [vmem:[%s3785_s24 + $0x14c] ss:$48 sps:$4 sm:$0xff]   ;;  %v3589_v47 = vld [vmem:[%s3785_s24 + $0x148] ss:$48 sps:$4 sm:$0xff]  }
  0x6f   : > { %3289 = vmatprep.subr.bf16.mxu1 %v3514_v50  ;;  %v3594_v50 = vld [vmem:[%s3785_s24 + $0x1a0] ss:$48 sps:$4 sm:$0xff]  }
  0x70   : > { %1906 = vmatmul.mubr.bf16.gmra.mrb[36].mxu0 %v3500_v46  ;;  %v3588_v46 = vld [vmem:[%s3785_s24 + $0x140] ss:$48 sps:$4 sm:$0xff]  }
  0x71   : > { %2003 = vmatmul.mubr.bf16.gmra.mrb[36].mxu1 %v3501_v48  ;;  %1913 = vmatprep.mubr.bf16.mxu0 %v3506_v49  ;;  %v3590_v48 = vld [vmem:[%s3785_s24 + $0x1a4] ss:$48 sps:$4 sm:$0xff]   ;;  %v3592_v49 = vld [vmem:[%s3785_s24 + $0x1ac] ss:$48 sps:$4 sm:$0xff]  }
  0x72   : > { %2010 = vmatprep.mubr.bf16.mxu1 %v3508_v51  ;;  %3226 = vmatpush3.bf16.msra.mxu0 %v3513_v52  ;;  %v3595_v51 = vld [vmem:[%s3785_s24 + $0x1a8] ss:$48 sps:$4 sm:$0xff]   ;;  %v3596_v52 = vld [vmem:[%s3785_s24 + $0x204] ss:$48 sps:$4 sm:$0xff]  }
  0x73   : > { %3290 = vmatpush3.bf16.msra.mxu1 %v3515_v53  ;;  %3227 = vmatprep.subr.bf16.mxu0 %v3522_v54  ;;  %v3598_v53 = vld [vmem:[%s3785_s24 + $0x20c] ss:$48 sps:$4 sm:$0xff]   ;;  %v3600_v54 = vld [vmem:[%s3785_s24 + $0x200] ss:$48 sps:$4 sm:$0xff]  }
  0x74   : > { %3291 = vmatprep.subr.bf16.mxu1 %v3524_v57  ;;  %v3604_v57 = vld [vmem:[%s3785_s24 + $0x26c] ss:$48 sps:$4 sm:$0xff]  }
  0x76   : > { %3228 = vmatpush3.bf16.msra.mxu0 %v3523_v55  ;;  %v3601_v55 = vld [vmem:[%s3785_s24 + $0x208] ss:$48 sps:$4 sm:$0xff]  }
  0x77   : > { %3292 = vmatpush3.bf16.msra.mxu1 %v3525_v58  ;;  %3229 = vmatprep.subr.bf16.mxu0 %v3532_v62  ;;  %v3606_v58 = vld [vmem:[%s3785_s24 + $0x260] ss:$48 sps:$4 sm:$0xff]  }
  0x78   : > { %1914 = vmatmul.mubr.bf16.gmra.mrb[40].mxu0 %v3510_v56  ;;  %3293 = vmatprep.subr.bf16.mxu1 %v3534_v0  ;;  %v3602_v56 = vld [vmem:[%s3785_s24 + $0x264] ss:$48 sps:$4 sm:$0xff]   ;;  %v3612_v62 = vld [vmem:[%s3785_s24 + $0x2c0] ss:$48 sps:$4 sm:$0xff]  }
  0x79   : > { %2011 = vmatmul.mubr.bf16.gmra.mrb[40].mxu1 %v3511_v59  ;;  %1921 = vmatprep.mubr.bf16.mxu0 %v3516_v60  ;;  %v3607_v59 = vld [vmem:[%s3785_s24 + $0x268] ss:$48 sps:$4 sm:$0xff]   ;;  %v3608_v60 = vld [vmem:[%s3785_s24 + $0x2c4] ss:$48 sps:$4 sm:$0xff]  }
  0x7a   : > { %2018 = vmatprep.mubr.bf16.mxu1 %v3518_v61  ;;  %3230 = vmatpush3.bf16.msra.mxu0 %v3533_v63  ;;  %v3610_v61 = vld [vmem:[%s3785_s24 + $0x2cc] ss:$48 sps:$4 sm:$0xff]   ;;  %v3613_v63 = vld [vmem:[%s3785_s24 + $0x2c8] ss:$48 sps:$4 sm:$0xff]   ;;  %s2899_s24 = sshll.u32 %s3628_s18, 7  ;;  %s4293_s18 = smov (!%p305_p5, %s3628_s18), 1 }
  0x7b   : > { %3294 = vmatpush3.bf16.msra.mxu1 %v3535_v1  ;;  %3231 = vmatprep.subr.bf16.mxu0 %v3542_v6  ;;  %s2399_s26 = ssub.s32 250, %s2899_s24  ;;  %s2688_s30 = sshll.u32 %s4293_s18, 3 }
  0x7c   : > { %3295 = vmatprep.subr.bf16.mxu1 %v3544_v8  ;;  %s311_s9 = scalar_lea.vmem %s4284_s4, %s2688_s30  ;;  %s318_s12 = scalar_lea.vmem %s4285_s5, %s2688_s30 }
  0x7e   : > { %3232 = vmatpush3.bf16.msra.mxu0 %v3543_v7 }
  0x7f   : > { %3296 = vmatpush3.bf16.msra.mxu1 %v3545_v9  ;;  %3233 = vmatprep.subr.bf16.mxu0 %v3552_v14 }
  0x80   : > { %1922 = vmatmul.mubr.bf16.gmra.mrb[44].mxu0 %v3520_v2  ;;  %3297 = vmatprep.subr.bf16.mxu1 %v3554_v16  ;;  %v4084_v2 = vld [vmem:[%s4282_s2] ss:$0 sm:$0xff] }
  0x81   : > { %2019 = vmatmul.mubr.bf16.gmra.mrb[44].mxu1 %v3521_v3  ;;  %1929 = vmatprep.mubr.bf16.mxu0 %v3526_v4 }
  0x82   : > { %2026 = vmatprep.mubr.bf16.mxu1 %v3528_v5  ;;  %3234 = vmatpush3.bf16.msra.mxu0 %v3553_v15 }
  0x83   : > { %3298 = vmatpush3.bf16.msra.mxu1 %v3555_v17  ;;  %3235 = vmatprep.subr.bf16.mxu0 %v3562_v21 }
  0x84   : > { %3299 = vmatprep.subr.bf16.mxu1 %v3564_v24 }
  0x86   : > { %3236 = vmatpush3.bf16.msra.mxu0 %v3563_v23 }
  0x87   : > { %3300 = vmatpush3.bf16.msra.mxu1 %v3565_v25 }
  0x88   : > { %1930 = vmatmul.mubr.bf16.gmra.mrb[48].mxu0 %v3530_v10 }
  0x89   : > { %2027 = vmatmul.mubr.bf16.gmra.mrb[48].mxu1 %v3531_v11  ;;  %1937 = vmatprep.mubr.bf16.mxu0 %v3536_v12 }
  0x8a   : > { %2034 = vmatprep.mubr.bf16.mxu1 %v3538_v13 }
  0x90   : > { %1938 = vmatmul.mubr.bf16.gmra.mrb[52].mxu0 %v3540_v18 }
  0x91   : > { %2035 = vmatmul.mubr.bf16.gmra.mrb[52].mxu1 %v3541_v19  ;;  %1945 = vmatprep.mubr.bf16.mxu0 %v3546_v20 }
  0x92   : > { %2042 = vmatprep.mubr.bf16.mxu1 %v3548_v22 }
  0x98   : > { %1946 = vmatmul.mubr.bf16.gmra.mrb[56].mxu0 %v3550_v26 }
  0x99   : > { %2043 = vmatmul.mubr.bf16.gmra.mrb[56].mxu1 %v3551_v27  ;;  %1953 = vmatprep.mubr.bf16.mxu0 %v3556_v28 }
  0x9a   : > { %2050 = vmatprep.mubr.bf16.mxu1 %v3558_v29 }
  0xa0   : > { %1954 = vmatmul.mubr.bf16.gmra.mrb[60].mxu0 %v3560_v30 }
  0xa1   : > { %2051 = vmatmul.mubr.bf16.gmra.mrb[60].mxu1 %v3561_v31  ;;  %2091 = vmatprep.mubr.bf16.mxu0 %v3568_v32 }
  0xa2   : > { %2188 = vmatprep.mubr.bf16.mxu1 %v3571_v33 }
  0xa8   : > { %2092 = vmatmul.mubr.bf16.vlgmr.msra.gmra.mrb[64].mxu0 %v3566_v34 }
  0xa9   : > { %2189 = vmatmul.mubr.bf16.vlgmr.msra.gmra.mrb[64].mxu1 %v3569_v35  ;;  %2099 = vmatprep.mubr.bf16.mxu0 %v3572_v36 }
  0xaa   : > { %2196 = vmatprep.mubr.bf16.mxu1 %v3574_v37 }
  0xb0   : > { %2100 = vmatmul.mubr.bf16.gmra.mrb[68].mxu0 %v3576_v38 }
  0xb1   : > { %2197 = vmatmul.mubr.bf16.gmra.mrb[68].mxu1 %v3577_v39  ;;  %2107 = vmatprep.mubr.bf16.mxu0 %v3578_v40 }
  0xb2   : > { %2204 = vmatprep.mubr.bf16.mxu1 %v3580_v41 }
  0xb8   : > { %2108 = vmatmul.mubr.bf16.gmra.mrb[72].mxu0 %v3582_v42 }
  0xb9   : > { %2205 = vmatmul.mubr.bf16.gmra.mrb[72].mxu1 %v3583_v43  ;;  %2115 = vmatprep.mubr.bf16.mxu0 %v3584_v44 }
  0xba   : > { %2212 = vmatprep.mubr.bf16.mxu1 %v3586_v45 }
  0xc0   : > { %2116 = vmatmul.mubr.bf16.gmra.mrb[76].mxu0 %v3588_v46 }
  0xc1   : > { %2213 = vmatmul.mubr.bf16.gmra.mrb[76].mxu1 %v3589_v47  ;;  %2123 = vmatprep.mubr.bf16.mxu0 %v3590_v48 }
  0xc2   : > { %2220 = vmatprep.mubr.bf16.mxu1 %v3592_v49 }
  0xc8   : > { %2124 = vmatmul.mubr.bf16.gmra.mrb[80].mxu0 %v3594_v50 }
  0xc9   : > { %2221 = vmatmul.mubr.bf16.gmra.mrb[80].mxu1 %v3595_v51  ;;  %2131 = vmatprep.mubr.bf16.mxu0 %v3596_v52 }
  0xca   : > { %2228 = vmatprep.mubr.bf16.mxu1 %v3598_v53 }
  0xd0   : > { %2132 = vmatmul.mubr.bf16.gmra.mrb[84].mxu0 %v3600_v54 }
  0xd1   : > { %2229 = vmatmul.mubr.bf16.gmra.mrb[84].mxu1 %v3601_v55  ;;  %2139 = vmatprep.mubr.bf16.mxu0 %v3602_v56 }
  0xd2   : > { %2236 = vmatprep.mubr.bf16.mxu1 %v3604_v57 }
  0xd8   : > { %2140 = vmatmul.mubr.bf16.gmra.mrb[88].mxu0 %v3606_v58 }
  0xd9   : > { %2237 = vmatmul.mubr.bf16.gmra.mrb[88].mxu1 %v3607_v59  ;;  %2147 = vmatprep.mubr.bf16.mxu0 %v3608_v60 }
  0xda   : > { %2244 = vmatprep.mubr.bf16.mxu1 %v3610_v61 }
  0xe0   : > { %2148 = vmatmul.mubr.bf16.gmra.mrb[92].mxu0 %v3612_v62 }
  0xe1   : > { %2245 = vmatmul.mubr.bf16.gmra.mrb[92].mxu1 %v3613_v63 }
  0xfb   : > { %v2981_v0 = vpop.f32.mrb[0].mxu0 }
  0xfc   : > { %v3045_v1 = vpop.f32.mrb[0].mxu1  ;;  %v2982_v3 = vpop.f32.mrb[1].mxu0 }
  0xfd   : > { %v2983_v4 = vadd.f32 %v2982_v3, %v2981_v0  ;;  %v3046_v5 = vpop.f32.mrb[1].mxu1  ;;  %v2984_v6 = vpop.f32.mrb[2].mxu0 }
  0xfe   : > { %v3047_v7 = vadd.f32 %v3046_v5, %v3045_v1  ;;  %v3048_v8 = vpop.f32.mrb[2].mxu1  ;;  %v2985_v9 = vpop.f32.mrb[3].mxu0 }
  0xff   : > { %v1706_v10 = vadd.f32 %v2983_v4, %v4084_v2  ;;  %v2986_v11 = vadd.f32 %v2985_v9, %v2984_v6  ;;  %v3049_v12 = vpop.f32.mrb[3].mxu1 }
 0x100   : > { %v3050_v13 = vadd.f32 %v3049_v12, %v3048_v8 }
 0x101   : > { %v4087_v14 = vadd.f32 %v3047_v7, %v1706_v10  ;;  %v1709_v15 = vadd.f32 %v2986_v11, %v4084_v2 }
 0x103   : > { %v4090_v16 = vadd.f32 %v3050_v13, %v1709_v15  ;;  %v2987_v17 = vpop.f32.mrb[4].mxu0 }
 0x104   : > { %v3051_v18 = vpop.f32.mrb[4].mxu1  ;;  %v2988_v19 = vpop.f32.mrb[5].mxu0 }
 0x105   : > { %v2989_v20 = vadd.f32 %v2988_v19, %v2987_v17  ;;  %v3052_v21 = vpop.f32.mrb[5].mxu1  ;;  %v2990_v22 = vpop.f32.mrb[6].mxu0 }
 0x106   : > { %v3053_v23 = vadd.f32 %v3052_v21, %v3051_v18  ;;  %v3054_v24 = vpop.f32.mrb[6].mxu1  ;;  %v2991_v25 = vpop.f32.mrb[7].mxu0 }
 0x107   : > { %v1714_v26 = vadd.f32 %v2989_v20, %v4084_v2  ;;  %v2992_v27 = vadd.f32 %v2991_v25, %v2990_v22  ;;  %v3055_v28 = vpop.f32.mrb[7].mxu1 }
 0x108   : > { %v3056_v29 = vadd.f32 %v3055_v28, %v3054_v24 }
 0x109   : > { %v4093_v30 = vadd.f32 %v3053_v23, %v1714_v26  ;;  %v1717_v31 = vadd.f32 %v2992_v27, %v4084_v2 }
 0x10b   : > { %v4096_v32 = vadd.f32 %v3056_v29, %v1717_v31  ;;  %v2993_v33 = vpop.f32.mrb[8].mxu0 }
 0x10c   : > { %v3057_v34 = vpop.f32.mrb[8].mxu1  ;;  %v2994_v35 = vpop.f32.mrb[9].mxu0 }
 0x10d   : > { %v2995_v36 = vadd.f32 %v2994_v35, %v2993_v33  ;;  %v3058_v37 = vpop.f32.mrb[9].mxu1  ;;  %v2996_v38 = vpop.f32.mrb[10].mxu0 }
 0x10e   : > { %v3059_v39 = vadd.f32 %v3058_v37, %v3057_v34  ;;  %v3060_v40 = vpop.f32.mrb[10].mxu1  ;;  %v2997_v41 = vpop.f32.mrb[11].mxu0 }
 0x10f   : > { %v1722_v42 = vadd.f32 %v2995_v36, %v4084_v2  ;;  %v2998_v43 = vadd.f32 %v2997_v41, %v2996_v38  ;;  %v3061_v44 = vpop.f32.mrb[11].mxu1 }
 0x110   : > { %v3062_v45 = vadd.f32 %v3061_v44, %v3060_v40 }
 0x111   : > { %v4099_v46 = vadd.f32 %v3059_v39, %v1722_v42  ;;  %v1725_v47 = vadd.f32 %v2998_v43, %v4084_v2 }
 0x113   : > { %v4102_v48 = vadd.f32 %v3062_v45, %v1725_v47  ;;  %v2999_v49 = vpop.f32.mrb[12].mxu0 }
 0x114   : > { %v3063_v50 = vpop.f32.mrb[12].mxu1  ;;  %v3000_v51 = vpop.f32.mrb[13].mxu0 }
 0x115   : > { %v3001_v52 = vadd.f32 %v3000_v51, %v2999_v49  ;;  %v3064_v53 = vpop.f32.mrb[13].mxu1  ;;  %v3002_v54 = vpop.f32.mrb[14].mxu0 }
 0x116   : > { %v3065_v55 = vadd.f32 %v3064_v53, %v3063_v50  ;;  %v3066_v56 = vpop.f32.mrb[14].mxu1  ;;  %v3003_v57 = vpop.f32.mrb[15].mxu0 }
 0x117   : > { %v1730_v58 = vadd.f32 %v3001_v52, %v4084_v2  ;;  %v3004_v59 = vadd.f32 %v3003_v57, %v3002_v54  ;;  %v3067_v60 = vpop.f32.mrb[15].mxu1 }
 0x118   : > { %v3068_v61 = vadd.f32 %v3067_v60, %v3066_v56 }
 0x119   : > { %v4105_v62 = vadd.f32 %v3065_v55, %v1730_v58  ;;  %v1733_v63 = vadd.f32 %v3004_v59, %v4084_v2 }
 0x11b   : > { %v4108_v0 = vadd.f32 %v3068_v61, %v1733_v63  ;;  %v3005_v1 = vpop.f32.mrb[16].mxu0 }
 0x11c   : > { %v3069_v3 = vpop.f32.mrb[16].mxu1  ;;  %v3006_v4 = vpop.f32.mrb[17].mxu0 }
 0x11d   : > { %v3007_v5 = vadd.f32 %v3006_v4, %v3005_v1  ;;  %v3070_v6 = vpop.f32.mrb[17].mxu1  ;;  %v3008_v7 = vpop.f32.mrb[18].mxu0 }
 0x11e   : > { %v3071_v8 = vadd.f32 %v3070_v6, %v3069_v3  ;;  %v3072_v9 = vpop.f32.mrb[18].mxu1  ;;  %v3009_v10 = vpop.f32.mrb[19].mxu0 }
 0x11f   : > { %v1738_v11 = vadd.f32 %v3007_v5, %v4084_v2  ;;  %v3010_v12 = vadd.f32 %v3009_v10, %v3008_v7  ;;  %v3073_v13 = vpop.f32.mrb[19].mxu1 }
 0x120   : > { %v3074_v15 = vadd.f32 %v3073_v13, %v3072_v9 }
 0x121   : > { %v4111_v17 = vadd.f32 %v3071_v8, %v1738_v11  ;;  %v1741_v18 = vadd.f32 %v3010_v12, %v4084_v2 }
 0x123   : > { %v4114_v19 = vadd.f32 %v3074_v15, %v1741_v18  ;;  %v3011_v20 = vpop.f32.mrb[20].mxu0 }
 0x124   : > { %v3075_v21 = vpop.f32.mrb[20].mxu1  ;;  %v3012_v22 = vpop.f32.mrb[21].mxu0 }
 0x125   : > { %v3013_v23 = vadd.f32 %v3012_v22, %v3011_v20  ;;  %v3076_v24 = vpop.f32.mrb[21].mxu1  ;;  %v3014_v25 = vpop.f32.mrb[22].mxu0 }
 0x126   : > { %v3077_v26 = vadd.f32 %v3076_v24, %v3075_v21  ;;  %v3078_v27 = vpop.f32.mrb[22].mxu1  ;;  %v3015_v28 = vpop.f32.mrb[23].mxu0 }
 0x127   : > { %v1746_v29 = vadd.f32 %v3013_v23, %v4084_v2  ;;  %v3016_v31 = vadd.f32 %v3015_v28, %v3014_v25  ;;  %v3079_v33 = vpop.f32.mrb[23].mxu1 }
 0x128   : > { %v3080_v34 = vadd.f32 %v3079_v33, %v3078_v27 }
 0x129   : > { %v4117_v35 = vadd.f32 %v3077_v26, %v1746_v29  ;;  %v1749_v36 = vadd.f32 %v3016_v31, %v4084_v2 }
 0x12b   : > { %v4120_v37 = vadd.f32 %v3080_v34, %v1749_v36  ;;  %v3017_v38 = vpop.f32.mrb[24].mxu0 }
 0x12c   : > { %v3081_v39 = vpop.f32.mrb[24].mxu1  ;;  %v3018_v40 = vpop.f32.mrb[25].mxu0 }
 0x12d   : > { %v3019_v41 = vadd.f32 %v3018_v40, %v3017_v38  ;;  %v3082_v42 = vpop.f32.mrb[25].mxu1  ;;  %v3020_v43 = vpop.f32.mrb[26].mxu0 }
 0x12e   : > { %v3083_v44 = vadd.f32 %v3082_v42, %v3081_v39  ;;  %v3084_v45 = vpop.f32.mrb[26].mxu1  ;;  %v3021_v47 = vpop.f32.mrb[27].mxu0 }
 0x12f   : > { %v1754_v49 = vadd.f32 %v3019_v41, %v4084_v2  ;;  %v3022_v50 = vadd.f32 %v3021_v47, %v3020_v43  ;;  %v3085_v51 = vpop.f32.mrb[27].mxu1 }
 0x130   : > { %v3086_v52 = vadd.f32 %v3085_v51, %v3084_v45 }
 0x131   : > { %v4123_v53 = vadd.f32 %v3083_v44, %v1754_v49  ;;  %v1757_v54 = vadd.f32 %v3022_v50, %v4084_v2 }
 0x133   : > { %v4126_v55 = vadd.f32 %v3086_v52, %v1757_v54  ;;  %v3023_v56 = vpop.f32.mrb[28].mxu0 }
 0x134   : > { %v3087_v57 = vpop.f32.mrb[28].mxu1  ;;  %v3024_v58 = vpop.f32.mrb[29].mxu0 }
 0x135   : > { %v3025_v59 = vadd.f32 %v3024_v58, %v3023_v56  ;;  %v3088_v60 = vpop.f32.mrb[29].mxu1  ;;  %v3026_v61 = vpop.f32.mrb[30].mxu0 }
 0x136   : > { %v3089_v63 = vadd.f32 %v3088_v60, %v3087_v57  ;;  %v3090_v1 = vpop.f32.mrb[30].mxu1  ;;  %v3027_v3 = vpop.f32.mrb[31].mxu0 }
 0x137   : > { %v1762_v4 = vadd.f32 %v3025_v59, %v4084_v2  ;;  %v3028_v5 = vadd.f32 %v3027_v3, %v3026_v61  ;;  %v3091_v6 = vpop.f32.mrb[31].mxu1 }
 0x138   : > { %v3092_v7 = vadd.f32 %v3091_v6, %v3090_v1 }
 0x139   : > { %v4129_v8 = vadd.f32 %v3089_v63, %v1762_v4  ;;  %v1765_v9 = vadd.f32 %v3028_v5, %v4084_v2 }
 0x13b   : > { %v4132_v10 = vadd.f32 %v3092_v7, %v1765_v9  ;;  %v3109_v11 = vpop.f32.mrb[32].mxu0 }
 0x13c   : > { %v3173_v12 = vpop.f32.mrb[32].mxu1  ;;  %v3110_v13 = vpop.f32.mrb[33].mxu0 }
 0x13d   : > { %v3111_v15 = vadd.f32 %v3110_v13, %v3109_v11  ;;  %v3174_v18 = vpop.f32.mrb[33].mxu1  ;;  %v3112_v20 = vpop.f32.mrb[34].mxu0 }
 0x13e   : > { %v3175_v21 = vadd.f32 %v3174_v18, %v3173_v12  ;;  %v3176_v22 = vpop.f32.mrb[34].mxu1  ;;  %v3113_v23 = vpop.f32.mrb[35].mxu0 }
 0x13f   : > { %v1900_v24 = vadd.f32 %v3111_v15, %v4087_v14  ;;  %v3114_v25 = vadd.f32 %v3113_v23, %v3112_v20  ;;  %v3177_v26 = vpop.f32.mrb[35].mxu1 }
 0x140   : > { %v3178_v27 = vadd.f32 %v3177_v26, %v3176_v22 }
 0x141   : > { %v4135_v28 = vadd.f32 %v3175_v21, %v1900_v24  ;;  %v1903_v2 = vadd.f32 %v3114_v25, %v4090_v16 }
 0x143   : > { %v4138_v29 = vadd.f32 %v3178_v27, %v1903_v2  ;;  %v3115_v31 = vpop.f32.mrb[36].mxu0 }
 0x144   : > { %v3179_v33 = vpop.f32.mrb[36].mxu1  ;;  %v3116_v34 = vpop.f32.mrb[37].mxu0 }
 0x145   : > { %v3117_v36 = vadd.f32 %v3116_v34, %v3115_v31  ;;  %v3180_v38 = vpop.f32.mrb[37].mxu1  ;;  %v3118_v39 = vpop.f32.mrb[38].mxu0 }
 0x146   : > { %v3181_v40 = vadd.f32 %v3180_v38, %v3179_v33  ;;  %v3182_v41 = vpop.f32.mrb[38].mxu1  ;;  %v3119_v42 = vpop.f32.mrb[39].mxu0 }
 0x147   : > { %v1908_v14 = vadd.f32 %v3117_v36, %v4093_v30  ;;  %v3120_v43 = vadd.f32 %v3119_v42, %v3118_v39  ;;  %v3183_v44 = vpop.f32.mrb[39].mxu1 }
 0x148   : > { %v3184_v45 = vadd.f32 %v3183_v44, %v3182_v41 }
 0x149   : > { %v4141_v47 = vadd.f32 %v3181_v40, %v1908_v14  ;;  %v1911_v16 = vadd.f32 %v3120_v43, %v4096_v32 }
 0x14b   : > { %v4144_v49 = vadd.f32 %v3184_v45, %v1911_v16  ;;  %v3121_v50 = vpop.f32.mrb[40].mxu0 }
 0x14c   : > { %v3185_v51 = vpop.f32.mrb[40].mxu1  ;;  %v3122_v52 = vpop.f32.mrb[41].mxu0 }
 0x14d   : > { %v3123_v54 = vadd.f32 %v3122_v52, %v3121_v50  ;;  %v3186_v56 = vpop.f32.mrb[41].mxu1  ;;  %v3124_v57 = vpop.f32.mrb[42].mxu0 }
 0x14e   : > { %v3187_v58 = vadd.f32 %v3186_v56, %v3185_v51  ;;  %v3188_v59 = vpop.f32.mrb[42].mxu1  ;;  %v3125_v60 = vpop.f32.mrb[43].mxu0 }
 0x14f   : > { %v1916_v30 = vadd.f32 %v3123_v54, %v4099_v46  ;;  %v3126_v61 = vadd.f32 %v3125_v60, %v3124_v57  ;;  %v3189_v63 = vpop.f32.mrb[43].mxu1 }
 0x150   : > { %v3190_v1 = vadd.f32 %v3189_v63, %v3188_v59 }
 0x151   : > { %v4147_v3 = vadd.f32 %v3187_v58, %v1916_v30  ;;  %v1919_v32 = vadd.f32 %v3126_v61, %v4102_v48 }
 0x153   : > { %v4150_v4 = vadd.f32 %v3190_v1, %v1919_v32  ;;  %v3127_v5 = vpop.f32.mrb[44].mxu0 }
 0x154   : > { %v3191_v6 = vpop.f32.mrb[44].mxu1  ;;  %v3128_v7 = vpop.f32.mrb[45].mxu0 }
 0x155   : > { %v3129_v9 = vadd.f32 %v3128_v7, %v3127_v5  ;;  %v3192_v11 = vpop.f32.mrb[45].mxu1  ;;  %v3130_v12 = vpop.f32.mrb[46].mxu0 }
 0x156   : > { %v3193_v13 = vadd.f32 %v3192_v11, %v3191_v6  ;;  %v3194_v15 = vpop.f32.mrb[46].mxu1  ;;  %v3131_v18 = vpop.f32.mrb[47].mxu0 }
 0x157   : > { %v1924_v46 = vadd.f32 %v3129_v9, %v4105_v62  ;;  %v3132_v20 = vadd.f32 %v3131_v18, %v3130_v12  ;;  %v3195_v21 = vpop.f32.mrb[47].mxu1 }
 0x158   : > { %v3196_v22 = vadd.f32 %v3195_v21, %v3194_v15 }
 0x159   : > { %v4153_v23 = vadd.f32 %v3193_v13, %v1924_v46  ;;  %v1927_v48 = vadd.f32 %v3132_v20, %v4108_v0 }
 0x15b   : > { %v4156_v24 = vadd.f32 %v3196_v22, %v1927_v48  ;;  %v3133_v25 = vpop.f32.mrb[48].mxu0 }
 0x15c   : > { %v3197_v26 = vpop.f32.mrb[48].mxu1  ;;  %v3134_v27 = vpop.f32.mrb[49].mxu0 }
 0x15d   : > { %v3135_v2 = vadd.f32 %v3134_v27, %v3133_v25  ;;  %v3198_v31 = vpop.f32.mrb[49].mxu1  ;;  %v3136_v33 = vpop.f32.mrb[50].mxu0 }
 0x15e   : > { %v3199_v34 = vadd.f32 %v3198_v31, %v3197_v26  ;;  %v3200_v36 = vpop.f32.mrb[50].mxu1  ;;  %v3137_v38 = vpop.f32.mrb[51].mxu0 }
 0x15f   : > { %v1932_v62 = vadd.f32 %v3135_v2, %v4111_v17  ;;  %v3138_v39 = vadd.f32 %v3137_v38, %v3136_v33  ;;  %v3201_v40 = vpop.f32.mrb[51].mxu1  ;;  %v2381_v38 = vlaneseq }
 0x160   : > { %v3202_v41 = vadd.f32 %v3201_v40, %v3200_v36 }
 0x161   : > { %v4159_v42 = vadd.f32 %v3199_v34, %v1932_v62  ;;  %v1935_v0 = vadd.f32 %v3138_v39, %v4114_v19 }
 0x163   : > { %v4162_v14 = vadd.f32 %v3202_v41, %v1935_v0  ;;  %v3139_v43 = vpop.f32.mrb[52].mxu0 }
 0x164   : > { %v3203_v44 = vpop.f32.mrb[52].mxu1  ;;  %v3140_v45 = vpop.f32.mrb[53].mxu0 }
 0x165   : > { %v3141_v16 = vadd.f32 %v3140_v45, %v3139_v43  ;;  %v3204_v50 = vpop.f32.mrb[53].mxu1  ;;  %v3142_v51 = vpop.f32.mrb[54].mxu0  ;;  %v4183_v43 = vshrl.u32 %v2381_v38, 7 }
 0x166   : > { %v3205_v52 = vadd.f32 %v3204_v50, %v3203_v44  ;;  %v3206_v54 = vpop.f32.mrb[54].mxu1  ;;  %v3143_v56 = vpop.f32.mrb[55].mxu0 }
 0x167   : > { %v1940_v17 = vadd.f32 %v3141_v16, %v4117_v35  ;;  %v3144_v57 = vadd.f32 %v3143_v56, %v3142_v51  ;;  %v3207_v58 = vpop.f32.mrb[55].mxu1  ;;  %v4186_v56 = vstv %s2399_s26 }
 0x168   : > { %v3208_v59 = vadd.f32 %v3207_v58, %v3206_v54  ;;  %vm2401_vm1 = vcmp.lt.s32.totalorder %v4183_v43, %v4186_v56 }
 0x169   : > { %v4165_v60 = vadd.f32 %v3205_v52, %v1940_v17  ;;  %v1943_v19 = vadd.f32 %v3144_v57, %v4120_v37  ;;  %v2383_v57 = vadd.s32 8, %v4183_v43 }
 0x16b   : > { %v4168_v30 = vadd.f32 %v3208_v59, %v1943_v19  ;;  %v3145_v61 = vpop.f32.mrb[56].mxu0  ;;  %vm2402_vm2 = vcmp.lt.s32.totalorder %v2383_v57, %v4186_v56 }
 0x16c   : > { %v3209_v63 = vpop.f32.mrb[56].mxu1  ;;  %v3146_v1 = vpop.f32.mrb[57].mxu0 }
 0x16d   : > { %v3147_v32 = vadd.f32 %v3146_v1, %v3145_v61  ;;  %v3210_v5 = vpop.f32.mrb[57].mxu1  ;;  %v3148_v6 = vpop.f32.mrb[58].mxu0 }
 0x16e   : > { %v3211_v7 = vadd.f32 %v3210_v5, %v3209_v63  ;;  %v3212_v9 = vpop.f32.mrb[58].mxu1  ;;  %v3149_v11 = vpop.f32.mrb[59].mxu0 }
 0x16f   : > { %v1948_v35 = vadd.f32 %v3147_v32, %v4123_v53  ;;  %v3150_v12 = vadd.f32 %v3149_v11, %v3148_v6  ;;  %v3213_v13 = vpop.f32.mrb[59].mxu1 }
 0x170   : > { %v3214_v15 = vadd.f32 %v3213_v13, %v3212_v9 }
 0x171   : > { %v4171_v18 = vadd.f32 %v3211_v7, %v1948_v35  ;;  %v1951_v37 = vadd.f32 %v3150_v12, %v4126_v55  ;;  %v2384_v35 = vadd.s32 16, %v4183_v43 }
 0x173   : > { %v4174_v46 = vadd.f32 %v3214_v15, %v1951_v37  ;;  %v3151_v20 = vpop.f32.mrb[60].mxu0  ;;  %vm2403_vm4 = vcmp.lt.s32.totalorder %v2384_v35, %v4186_v56 }
 0x174   : > { %v3215_v21 = vpop.f32.mrb[60].mxu1  ;;  %v3152_v22 = vpop.f32.mrb[61].mxu0 }
 0x175   : > { %v3153_v48 = vadd.f32 %v3152_v22, %v3151_v20  ;;  %v3216_v25 = vpop.f32.mrb[61].mxu1  ;;  %v3154_v26 = vpop.f32.mrb[62].mxu0  ;;  %v2385_v22 = vadd.s32 24, %v4183_v43 }
 0x176   : > { %v3217_v27 = vadd.f32 %v3216_v25, %v3215_v21  ;;  %v3218_v2 = vpop.f32.mrb[62].mxu1  ;;  %v3155_v31 = vpop.f32.mrb[63].mxu0 }
 0x177   : > { %v1956_v53 = vadd.f32 %v3153_v48, %v4129_v8  ;;  %v3156_v33 = vadd.f32 %v3155_v31, %v3154_v26  ;;  %v3219_v34 = vpop.f32.mrb[63].mxu1  ;;  %vm2404_vm6 = vcmp.lt.s32.totalorder %v2385_v22, %v4186_v56 }
 0x178   : > { %v3220_v36 = vadd.f32 %v3219_v34, %v3218_v2 }
 0x179   : > { %v4177_v62 = vadd.f32 %v3217_v27, %v1956_v53  ;;  %v1959_v55 = vadd.f32 %v3156_v33, %v4132_v10 }
 0x17b   : > { %v4181_v39 = vadd.f32 %v3220_v36, %v1959_v55  ;;  %v3237_v40 = vpop.f32.mrb[64].mxu0 }
 0x17c   : > { %v3301_v41 = vpop.f32.mrb[64].mxu1  ;;  %v3238_v0 = vpop.f32.mrb[65].mxu0 }
 0x17d   : > { %v3239_v44 = vadd.f32 %v3238_v0, %v3237_v40  ;;  %v3302_v45 = vpop.f32.mrb[65].mxu1  ;;  %v3240_v8 = vpop.f32.mrb[66].mxu0 }
 0x17e   : > { %v3303_v16 = vadd.f32 %v3302_v45, %v3301_v41  ;;  %v3304_v50 = vpop.f32.mrb[66].mxu1  ;;  %v3241_v51 = vpop.f32.mrb[67].mxu0 }
 0x17f   : > { %v2094_v52 = vadd.f32 %v3239_v44, %v4135_v28  ;;  %v3242_v54 = vadd.f32 %v3241_v51, %v3240_v8  ;;  %v3305_v10 = vpop.f32.mrb[67].mxu1 }
 0x180   : > { %v3306_v17 = vadd.f32 %v3305_v10, %v3304_v50  ;;  %v2386_v50 = vadd.s32 32, %v4183_v43 }
 0x181   : > { %v2191_v58 = vadd.f32 %v3303_v16, %v2094_v52  ;;  %v2097_v59 = vadd.f32 %v3242_v54, %v4138_v29  ;;  %v2387_v54 = vadd.s32 40, %v4183_v43 }
 0x182   : > { %vm2405_vm9 = vcmp.lt.s32.totalorder %v2386_v50, %v4186_v56 }
 0x183   : > { %vm2253_vm0 = vcmp.ge.f32.partialorder %v2191_v58, 0.0  ;;  %v2269_v19 = vmul.f32 0.01, %v2191_v58  ;;  %v2194_v61 = vadd.f32 %v3306_v17, %v2097_v59  ;;  %v3243_v63 = vpop.f32.mrb[68].mxu0  ;;  %vm2406_vm10 = vcmp.lt.s32.totalorder %v2387_v54, %v4186_v56 }
 0x184   : > { %v3307_v28 = vpop.f32.mrb[68].mxu1  ;;  %v3244_v1 = vpop.f32.mrb[69].mxu0 }
 0x185   : > { %v2285_v32 = vsel %vm2253_vm0, %v2191_v58, %v2269_v19  ;;  %vm2254_vm3 = vcmp.ge.f32.partialorder %v2194_v61, 0.0  ;;  %v2270_v5 = vmul.f32 0.01, %v2194_v61  ;;  %v3245_v6 = vadd.f32 %v3244_v1, %v3243_v63  ;;  %v3308_v7 = vpop.f32.mrb[69].mxu1  ;;  %v3246_v9 = vpop.f32.mrb[70].mxu0 }
 0x186   : > { %v2417_v11 = vsel %vm2401_vm1, %v2285_v32, 0.0  ;;  %v3309_v29 = vadd.f32 %v3308_v7, %v3307_v28  ;;  %v3310_v12 = vpop.f32.mrb[70].mxu1  ;;  %v3247_v13 = vpop.f32.mrb[71].mxu0 }
 0x187   : > { %v2286_v15 = vsel %vm2254_vm3, %v2194_v61, %v2270_v5  ;;  %v2102_v37 = vadd.f32 %v3245_v6, %v4141_v47  ;;  %v3248_v20 = vadd.f32 %v3247_v13, %v3246_v9  ;;  %v3311_v21 = vpop.f32.mrb[71].mxu1  ;;  %v2454_v48 = vmul.f32 %v2417_v11, %v2417_v11 }
 0x188   : > { %v2921_v25 = vpack.c.bf16 %v2286_v15, %v2285_v32  ;;  %v2418_v26 = vsel %vm2402_vm2, %v2286_v15, 0.0  ;;  %v3312_v27 = vadd.f32 %v3311_v21, %v3310_v12 }
 0x189   : > { %v2433_v2 = vadd.f32 %v2418_v26, %v2417_v11  ;;  %v2455_v31 = vmul.f32 %v2418_v26, %v2418_v26  ;;  %v2199_v53 = vadd.f32 %v3309_v29, %v2102_v37  ;;  %v2105_v33 = vadd.f32 %v3248_v20, %v4144_v49 }
 0x18a   : > { %2922 = vst [vmem:[%s4198_s6] sm:$0xff] %v2921_v25   ;;  %v2388_v20 = vadd.s32 48, %v4183_v43 }
 0x18b   : > { %v2470_v34 = vadd.f32 %v2455_v31, %v2454_v48  ;;  %vm2255_vm5 = vcmp.ge.f32.partialorder %v2199_v53, 0.0  ;;  %v2271_v47 = vmul.f32 0.01, %v2199_v53  ;;  %v2202_v36 = vadd.f32 %v3312_v27, %v2105_v33  ;;  %v3249_v38 = vpop.f32.mrb[72].mxu0 }
 0x18c   : > { %v3313_v55 = vpop.f32.mrb[72].mxu1  ;;  %v3250_v40 = vpop.f32.mrb[73].mxu0  ;;  %vm2407_vm13 = vcmp.lt.s32.totalorder %v2388_v20, %v4186_v56 }
 0x18d   : > { %v2287_v41 = vsel %vm2255_vm5, %v2199_v53, %v2271_v47  ;;  %vm2256_vm7 = vcmp.ge.f32.partialorder %v2202_v36, 0.0  ;;  %v2272_v0 = vmul.f32 0.01, %v2202_v36  ;;  %v3251_v44 = vadd.f32 %v3250_v40, %v3249_v38  ;;  %v3314_v45 = vpop.f32.mrb[73].mxu1  ;;  %v3252_v8 = vpop.f32.mrb[74].mxu0 }
 0x18e   : > { %v2419_v16 = vsel %vm2403_vm4, %v2287_v41, 0.0  ;;  %v3315_v49 = vadd.f32 %v3314_v45, %v3313_v55  ;;  %v3316_v51 = vpop.f32.mrb[74].mxu1  ;;  %v3253_v52 = vpop.f32.mrb[75].mxu0 }
 0x18f   : > { %v2434_v10 = vadd.f32 %v2433_v2, %v2419_v16  ;;  %v2456_v17 = vmul.f32 %v2419_v16, %v2419_v16  ;;  %v2288_v57 = vsel %vm2256_vm7, %v2202_v36, %v2272_v0  ;;  %v2110_v58 = vadd.f32 %v3251_v44, %v4147_v3  ;;  %v3317_v59 = vpop.f32.mrb[75].mxu1 }
 0x190   : > { %v2926_v19 = vpack.c.bf16 %v2288_v57, %v2287_v41  ;;  %v2420_v61 = vsel %vm2404_vm6, %v2288_v57, 0.0  ;;  %v3254_v63 = vadd.f32 %v3253_v52, %v3252_v8  ;;  %v3318_v28 = vadd.f32 %v3317_v59, %v3316_v51 }
 0x191   : > { %v2471_v1 = vadd.f32 %v2470_v34, %v2456_v17  ;;  %v2435_v32 = vadd.f32 %v2434_v10, %v2420_v61  ;;  %v2457_v5 = vmul.f32 %v2420_v61, %v2420_v61  ;;  %v2207_v6 = vadd.f32 %v3315_v49, %v2110_v58 }
 0x192   : > { %2958 = vst [vmem:[%s4198_s6 + $0x8] sm:$0xff] %v2926_v19   ;;  %v2113_v7 = vadd.f32 %v3254_v63, %v4150_v4  ;;  %v2389_v36 = vadd.s32 56, %v4183_v43  ;;  %v2390_v17 = vadd.s32 64, %v4183_v43 }
 0x193   : > { %v2472_v9 = vadd.f32 %v2471_v1, %v2457_v5  ;;  %vm2257_vm8 = vcmp.ge.f32.partialorder %v2207_v6, 0.0  ;;  %v2273_v11 = vmul.f32 0.01, %v2207_v6  ;;  %v3255_v3 = vpop.f32.mrb[76].mxu0 }
 0x194   : > { %v2210_v29 = vadd.f32 %v3318_v28, %v2113_v7  ;;  %v3319_v35 = vpop.f32.mrb[76].mxu1  ;;  %v3256_v12 = vpop.f32.mrb[77].mxu0  ;;  %vm2408_vm14 = vcmp.lt.s32.totalorder %v2389_v36, %v4186_v56  ;;  %vm2409_vm1 = vcmp.lt.s32.totalorder %v2390_v17, %v4186_v56 }
 0x195   : > { %v2289_v13 = vsel %vm2257_vm8, %v2207_v6, %v2273_v11  ;;  %v3257_v15 = vadd.f32 %v3256_v12, %v3255_v3  ;;  %v3320_v37 = vpop.f32.mrb[77].mxu1  ;;  %v3258_v21 = vpop.f32.mrb[78].mxu0 }
 0x196   : > { %v2421_v22 = vsel %vm2405_vm9, %v2289_v13, 0.0  ;;  %vm2258_vm11 = vcmp.ge.f32.partialorder %v2210_v29, 0.0  ;;  %v2274_v4 = vmul.f32 0.01, %v2210_v29  ;;  %v3321_v48 = vadd.f32 %v3320_v37, %v3319_v35  ;;  %v3322_v25 = vpop.f32.mrb[78].mxu1  ;;  %v3259_v26 = vpop.f32.mrb[79].mxu0 }
 0x197   : > { %v2436_v27 = vadd.f32 %v2435_v32, %v2421_v22  ;;  %v2458_v2 = vmul.f32 %v2421_v22, %v2421_v22  ;;  %v2118_v31 = vadd.f32 %v3257_v15, %v4153_v23  ;;  %v3260_v53 = vadd.f32 %v3259_v26, %v3258_v21  ;;  %v3323_v33 = vpop.f32.mrb[79].mxu1 }
 0x198   : > { %v2290_v34 = vsel %vm2258_vm11, %v2210_v29, %v2274_v4  ;;  %v3324_v47 = vadd.f32 %v3323_v33, %v3322_v25 }
 0x199   : > { %v2473_v38 = vadd.f32 %v2472_v9, %v2458_v2  ;;  %v2931_v55 = vpack.c.bf16 %v2290_v34, %v2289_v13  ;;  %v2422_v40 = vsel %vm2406_vm10, %v2290_v34, 0.0  ;;  %v2215_v41 = vadd.f32 %v3321_v48, %v2118_v31 }
 0x19a   : > { %v2437_v0 = vadd.f32 %v2436_v27, %v2422_v40  ;;  %v2459_v44 = vmul.f32 %v2422_v40, %v2422_v40  ;;  %v2121_v45 = vadd.f32 %v3260_v53, %v4156_v24  ;;  %v2391_v9 = vadd.s32 72, %v4183_v43 }
 0x19b   : > { %2959 = vst [vmem:[%s4198_s6 + $0x10] sm:$0xff] %v2931_v55   ;;  %vm2259_vm12 = vcmp.ge.f32.partialorder %v2215_v41, 0.0  ;;  %v2275_v8 = vmul.f32 0.01, %v2215_v41  ;;  %v3261_v23 = vpop.f32.mrb[80].mxu0  ;;  %v2392_v27 = vadd.s32 80, %v4183_v43 }
 0x19c   : > { %v2474_v16 = vadd.f32 %v2473_v38, %v2459_v44  ;;  %v2218_v49 = vadd.f32 %v3324_v47, %v2121_v45  ;;  %v3325_v50 = vpop.f32.mrb[80].mxu1  ;;  %v3262_v51 = vpop.f32.mrb[81].mxu0  ;;  %vm2410_vm2 = vcmp.lt.s32.totalorder %v2391_v9, %v4186_v56  ;;  %v2393_v44 = vadd.s32 88, %v4183_v43 }
 0x19d   : > { %v2291_v52 = vsel %vm2259_vm12, %v2215_v41, %v2275_v8  ;;  %v3263_v54 = vadd.f32 %v3262_v51, %v3261_v23  ;;  %v3326_v10 = vpop.f32.mrb[81].mxu1  ;;  %v3264_v57 = vpop.f32.mrb[82].mxu0  ;;  %vm2411_vm5 = vcmp.lt.s32.totalorder %v2392_v27, %v4186_v56 }
 0x19e   : > { %v2423_v58 = vsel %vm2407_vm13, %v2291_v52, 0.0  ;;  %vm2260_vm15 = vcmp.ge.f32.partialorder %v2218_v49, 0.0  ;;  %v2276_v24 = vmul.f32 0.01, %v2218_v49  ;;  %v3327_v59 = vadd.f32 %v3326_v10, %v3325_v50  ;;  %v3328_v19 = vpop.f32.mrb[82].mxu1  ;;  %v3265_v61 = vpop.f32.mrb[83].mxu0 }
 0x19f   : > { %v2438_v63 = vadd.f32 %v2437_v0, %v2423_v58  ;;  %v2460_v28 = vmul.f32 %v2423_v58, %v2423_v58  ;;  %v2126_v1 = vadd.f32 %v3263_v54, %v4159_v42  ;;  %v3266_v32 = vadd.f32 %v3265_v61, %v3264_v57  ;;  %v3329_v5 = vpop.f32.mrb[83].mxu1 }
 0x1a0   : > { %v2292_v6 = vsel %vm2260_vm15, %v2218_v49, %v2276_v24  ;;  %v3330_v7 = vadd.f32 %v3329_v5, %v3328_v19  ;;  %vm2412_vm6 = vcmp.lt.s32.totalorder %v2393_v44, %v4186_v56  ;;  %v2394_v19 = vadd.s32 96, %v4183_v43 }
 0x1a1   : > { %v2475_v11 = vadd.f32 %v2474_v16, %v2460_v28  ;;  %v2936_v3 = vpack.c.bf16 %v2292_v6, %v2291_v52  ;;  %v2424_v29 = vsel %vm2408_vm14, %v2292_v6, 0.0  ;;  %v2223_v35 = vadd.f32 %v3327_v59, %v2126_v1 }
 0x1a2   : > { %v2439_v12 = vadd.f32 %v2438_v63, %v2424_v29  ;;  %v2461_v13 = vmul.f32 %v2424_v29, %v2424_v29  ;;  %v2129_v15 = vadd.f32 %v3266_v32, %v4162_v14  ;;  %vm2413_vm9 = vcmp.lt.s32.totalorder %v2394_v19, %v4186_v56 }
 0x1a3   : > { %2960 = vst [vmem:[%s4198_s6 + $0x18] sm:$0xff] %v2936_v3   ;;  %vm2261_vm0 = vcmp.ge.f32.partialorder %v2223_v35, 0.0  ;;  %v2277_v37 = vmul.f32 0.01, %v2223_v35  ;;  %v3267_v42 = vpop.f32.mrb[84].mxu0 }
 0x1a4   : > { %v2476_v20 = vadd.f32 %v2475_v11, %v2461_v13  ;;  %v2226_v21 = vadd.f32 %v3330_v7, %v2129_v15  ;;  %v3331_v22 = vpop.f32.mrb[84].mxu1  ;;  %v3268_v4 = vpop.f32.mrb[85].mxu0 }
 0x1a5   : > { %v2293_v48 = vsel %vm2261_vm0, %v2223_v35, %v2277_v37  ;;  %v3269_v25 = vadd.f32 %v3268_v4, %v3267_v42  ;;  %v3332_v26 = vpop.f32.mrb[85].mxu1  ;;  %v3270_v2 = vpop.f32.mrb[86].mxu0  ;;  %v2395_v35 = vadd.s32 104, %v4183_v43 }
 0x1a6   : > { %v2425_v31 = vsel %vm2409_vm1, %v2293_v48, 0.0  ;;  %vm2262_vm3 = vcmp.ge.f32.partialorder %v2226_v21, 0.0  ;;  %v2278_v14 = vmul.f32 0.01, %v2226_v21  ;;  %v3333_v53 = vadd.f32 %v3332_v26, %v3331_v22  ;;  %v3334_v33 = vpop.f32.mrb[86].mxu1  ;;  %v3271_v34 = vpop.f32.mrb[87].mxu0 }
 0x1a7   : > { %v2440_v47 = vadd.f32 %v2439_v12, %v2425_v31  ;;  %v2462_v36 = vmul.f32 %v2425_v31, %v2425_v31  ;;  %v2134_v38 = vadd.f32 %v3269_v25, %v4165_v60  ;;  %v3272_v55 = vadd.f32 %v3271_v34, %v3270_v2  ;;  %v3335_v40 = vpop.f32.mrb[87].mxu1 }
 0x1a8   : > { %v2294_v41 = vsel %vm2262_vm3, %v2226_v21, %v2278_v14  ;;  %v3336_v0 = vadd.f32 %v3335_v40, %v3334_v33  ;;  %vm2414_vm10 = vcmp.lt.s32.totalorder %v2395_v35, %v4186_v56  ;;  %v2396_v14 = vadd.s32 112, %v4183_v43 }
 0x1a9   : > { %v2477_v45 = vadd.f32 %v2476_v20, %v2462_v36  ;;  %v2941_v8 = vpack.c.bf16 %v2294_v41, %v2293_v48  ;;  %v2426_v23 = vsel %vm2410_vm2, %v2294_v41, 0.0  ;;  %v2231_v16 = vadd.f32 %v3333_v53, %v2134_v38 }
 0x1aa   : > { %v2441_v49 = vadd.f32 %v2440_v47, %v2426_v23  ;;  %v2463_v50 = vmul.f32 %v2426_v23, %v2426_v23  ;;  %v2137_v51 = vadd.f32 %v3272_v55, %v4168_v30  ;;  %vm2415_vm13 = vcmp.lt.s32.totalorder %v2396_v14, %v4186_v56 }
 0x1ab   : > { %2961 = vst [vmem:[%s4198_s6 + $0x20] sm:$0xff] %v2941_v8   ;;  %vm2263_vm4 = vcmp.ge.f32.partialorder %v2231_v16, 0.0  ;;  %v2279_v52 = vmul.f32 0.01, %v2231_v16  ;;  %v3273_v60 = vpop.f32.mrb[88].mxu0 }
 0x1ac   : > { %v2478_v54 = vadd.f32 %v2477_v45, %v2463_v50  ;;  %v2234_v10 = vadd.f32 %v3336_v0, %v2137_v51  ;;  %v3337_v17 = vpop.f32.mrb[88].mxu1  ;;  %v3274_v57 = vpop.f32.mrb[89].mxu0 }
 0x1ad   : > { %v2295_v58 = vsel %vm2263_vm4, %v2231_v16, %v2279_v52  ;;  %v3275_v24 = vadd.f32 %v3274_v57, %v3273_v60  ;;  %v3338_v59 = vpop.f32.mrb[89].mxu1  ;;  %v3276_v61 = vpop.f32.mrb[90].mxu0  ;;  %v2397_v60 = vadd.s32 120, %v4183_v43 }
 0x1ae   : > { %v2427_v63 = vsel %vm2411_vm5, %v2295_v58, 0.0  ;;  %vm2264_vm7 = vcmp.ge.f32.partialorder %v2234_v10, 0.0  ;;  %v2280_v30 = vmul.f32 0.01, %v2234_v10  ;;  %v3339_v28 = vadd.f32 %v3338_v59, %v3337_v17  ;;  %v3340_v1 = vpop.f32.mrb[90].mxu1  ;;  %v3277_v32 = vpop.f32.mrb[91].mxu0 }
 0x1af   : > { %v2442_v5 = vadd.f32 %v2441_v49, %v2427_v63  ;;  %v2464_v6 = vmul.f32 %v2427_v63, %v2427_v63  ;;  %v2142_v7 = vadd.f32 %v3275_v24, %v4171_v18  ;;  %v3278_v9 = vadd.f32 %v3277_v32, %v3276_v61  ;;  %v3341_v11 = vpop.f32.mrb[91].mxu1 }
 0x1b0   : > { %v2296_v3 = vsel %vm2264_vm7, %v2234_v10, %v2280_v30  ;;  %v3342_v29 = vadd.f32 %v3341_v11, %v3340_v1  ;;  %vm2416_vm15 = vcmp.lt.s32.totalorder %v2397_v60, %v4186_v56 }
 0x1b1   : > { %v2479_v12 = vadd.f32 %v2478_v54, %v2464_v6  ;;  %v2946_v13 = vpack.c.bf16 %v2296_v3, %v2295_v58  ;;  %v2428_v15 = vsel %vm2412_vm6, %v2296_v3, 0.0  ;;  %v2239_v37 = vadd.f32 %v3339_v28, %v2142_v7 }
 0x1b2   : > { %v2443_v42 = vadd.f32 %v2442_v5, %v2428_v15  ;;  %v2465_v20 = vmul.f32 %v2428_v15, %v2428_v15  ;;  %v2145_v21 = vadd.f32 %v3278_v9, %v4174_v46 }
 0x1b3   : > { %2962 = vst [vmem:[%s4198_s6 + $0x28] sm:$0xff] %v2946_v13   ;;  %vm2265_vm8 = vcmp.ge.f32.partialorder %v2239_v37, 0.0  ;;  %v2281_v22 = vmul.f32 0.01, %v2239_v37  ;;  %v3279_v18 = vpop.f32.mrb[92].mxu0 }
 0x1b4   : > { %v2480_v4 = vadd.f32 %v2479_v12, %v2465_v20  ;;  %v2242_v48 = vadd.f32 %v3342_v29, %v2145_v21  ;;  %v3343_v25 = vpop.f32.mrb[92].mxu1  ;;  %v3280_v26 = vpop.f32.mrb[93].mxu0 }
 0x1b5   : > { %v2297_v27 = vsel %vm2265_vm8, %v2239_v37, %v2281_v22  ;;  %v3281_v2 = vadd.f32 %v3280_v26, %v3279_v18  ;;  %v3344_v31 = vpop.f32.mrb[93].mxu1  ;;  %v3282_v53 = vpop.f32.mrb[94].mxu0 }
 0x1b6   : > { %v2429_v33 = vsel %vm2413_vm9, %v2297_v27, 0.0  ;;  %vm2266_vm11 = vcmp.ge.f32.partialorder %v2242_v48, 0.0  ;;  %v2282_v46 = vmul.f32 0.01, %v2242_v48  ;;  %v3345_v34 = vadd.f32 %v3344_v31, %v3343_v25  ;;  %v3346_v47 = vpop.f32.mrb[94].mxu1  ;;  %v3283_v36 = vpop.f32.mrb[95].mxu0 }
 0x1b7   : > { %v2444_v38 = vadd.f32 %v2443_v42, %v2429_v33  ;;  %v2466_v55 = vmul.f32 %v2429_v33, %v2429_v33  ;;  %v2150_v40 = vadd.f32 %v3281_v2, %v4177_v62  ;;  %v3284_v41 = vadd.f32 %v3283_v36, %v3282_v53  ;;  %v3347_v0 = vpop.f32.mrb[95].mxu1 }
 0x1b8   : > { %v2298_v44 = vsel %vm2266_vm11, %v2242_v48, %v2282_v46  ;;  %v3348_v45 = vadd.f32 %v3347_v0, %v3346_v47 }
 0x1b9   : > { %v2481_v8 = vadd.f32 %v2480_v4, %v2466_v55  ;;  %v2951_v23 = vpack.c.bf16 %v2298_v44, %v2297_v27  ;;  %v2430_v16 = vsel %vm2414_vm10, %v2298_v44, 0.0  ;;  %v2247_v49 = vadd.f32 %v3345_v34, %v2150_v40 }
 0x1ba   : > { %v2445_v50 = vadd.f32 %v2444_v38, %v2430_v16  ;;  %v2467_v51 = vmul.f32 %v2430_v16, %v2430_v16  ;;  %v2153_v52 = vadd.f32 %v3284_v41, %v4181_v39 }
 0x1bb   : > { %2963 = vst [vmem:[%s4198_s6 + $0x30] sm:$0xff] %v2951_v23   ;;  %vm2267_vm12 = vcmp.ge.f32.partialorder %v2247_v49, 0.0  ;;  %v2283_v62 = vmul.f32 0.01, %v2247_v49 }
 0x1bc   : > { %v2482_v54 = vadd.f32 %v2481_v8, %v2467_v51  ;;  %v2250_v10 = vadd.f32 %v3348_v45, %v2153_v52 }
 0x1bd   : > { %v2299_v17 = vsel %vm2267_vm12, %v2247_v49, %v2283_v62 }
 0x1be   : > { %v2431_v57 = vsel %vm2415_vm13, %v2299_v17, 0.0  ;;  %vm2268_vm14 = vcmp.ge.f32.partialorder %v2250_v10, 0.0  ;;  %v2284_v58 = vmul.f32 0.01, %v2250_v10 }
 0x1bf   : > { %v2446_v24 = vadd.f32 %v2445_v50, %v2431_v57  ;;  %v2468_v39 = vmul.f32 %v2431_v57, %v2431_v57 }
 0x1c0   : > { %v2300_v59 = vsel %vm2268_vm14, %v2250_v10, %v2284_v58 }
 0x1c1   : > { %v2483_v43 = vadd.f32 %v2482_v54, %v2468_v39  ;;  %v2956_v19 = vpack.c.bf16 %v2300_v59, %v2299_v17  ;;  %v2432_v61 = vsel %vm2416_vm15, %v2300_v59, 0.0 }
 0x1c2   : > { %v2447_v63 = vadd.f32 %v2446_v24, %v2432_v61  ;;  %v2469_v30 = vmul.f32 %v2432_v61, %v2432_v61 }
 0x1c3   : > { %2964 = vst [vmem:[%s4198_s6 + $0x38] sm:$0xff] %v2956_v19  }
 0x1c4   : > { %v2448_v28 = vrot.slane %v2447_v63, 4  ;;  %v2484_v1 = vadd.f32 %v2483_v43, %v2469_v30 }
 0x1c6   : > { %v2449_v32 = vadd.f32 %v2448_v28, %v2447_v63  ;;  %v2485_v5 = vrot.slane %v2484_v1, 4 }
 0x1c8   : > { %v2450_v6 = vrot.slane %v2449_v32, 2  ;;  %v2486_v7 = vadd.f32 %v2485_v5, %v2484_v1 }
 0x1ca   : > { %v2451_v9 = vadd.f32 %v2450_v6, %v2449_v32  ;;  %v2487_v56 = vrot.slane %v2486_v7, 2 }
 0x1cc   : > { %v2452_v11 = vrot.slane %v2451_v9, 1  ;;  %v2488_v3 = vadd.f32 %v2487_v56, %v2486_v7 }
 0x1ce   : > { %v2453_v29 = vadd.f32 %v2452_v11, %v2451_v9  ;;  %v2489_v35 = vrot.slane %v2488_v3, 1 }
 0x1d0   : > { %v2490_v12 = vadd.f32 %v2489_v35, %v2488_v3  ;;  %2491 = vst [vmem:[%s311_s9] sm:$0xff] %v2453_v29 }
 0x1d2   : > { %2492 = vst [vmem:[%s318_s12] sm:$0xff] %v2490_v12 }
 0x1d3 PF: > { %s16_s20 = sadd.s32 1, %s3636_s20   ;;  %s4286_s18 = smov %s3632_s19 }
 0x1d4   : > { %p13_p6 = scmp.ge.s32.totalorder %s16_s20, 4   ;;  %s4287_s19 = smov %s4289_s21 }
 0x1d6   :  { %15 = sbr.rel (!%p13_p6) target bundleno = 2 (0x2), region = 92 }

// kernel: _lambda_.14
= control target key start
LH: loop header
LB: loop body
LE: loop exit
PB: predicated region body
PF: predicated region fallthrough
CT: control target
= control target key end

     0   :  { %s357_s12 = smov 0   ;;  %s380_s0 = inlined_call_operand.vmem [shape: bf16[64,128], index: 0, kind: input, shape index: {}]   ;;  %s381_s1 = inlined_call_operand.vmem [shape: f32[1,128], index: 1, kind: input, shape index: {}]   ;;  %s382_s2 = inlined_call_operand.vmem [shape: f32[1,128], index: 2, kind: input, shape index: {}]   ;;  %s383_s3 = inlined_call_operand.vmem [shape: bf16[64,128], index: 3, kind: output, shape index: {}]  }
   0x1 LB: > { %s280_s13 = sadd.s32 4294967295, %s335_s12   ;;  %p284_p0 = scmp.ge.s32.totalorder %s335_s12, 1  ;;  %s335_s12 = sphi %s357_s12, %s13_s12  }
   0x2   : > { %p138_p1 = scmp.lt.s32.totalorder %s335_s12, 3 }
   0x4   : > { %p139_p2 = pnand %p284_p0, %p138_p1 }
   0x5   : > { %s285_s14 = sshll.u32 (!%p139_p2), %s280_s13, 2  ;;  %v289_v2 = vld [vmem:[%s381_s1] ss:$0 sm:$0xff] (!%p139_p2) }
   0x6   : > { %142 = sbr.rel (%p139_p2) target bundleno = 26 (0x1a), region = 32  ;;  %p163_p3 = scmp.lt.s32.totalorder (!%p139_p2), %s285_s14, 7  ;;  %v290_v7 = vld [vmem:[%s382_s2] ss:$0 sm:$0xff] (!%p139_p2) }
   0xd   : > { %s385_s14 = smov (!%p163_p3, %s285_s14), 7 }
   0xe   : > { %s286_s15 = sshll.u32 %s385_s14, 2 }
   0xf   : > { %s166_s18 = scalar_lea.vmem %s380_s0, %s286_s15  ;;  %s172_s25 = scalar_lea.vmem %s383_s3, %s286_s15 }
  0x10   : > { %v302_v0 = vld [vmem:[%s166_s18] sm:$0xff]   ;;  %v319_v1 = vld [vmem:[%s166_s18 + $0x8] sm:$0xff]  }
  0x11   : > { %v303_v3 = vunpack.c.l.bf16 %v302_v0  ;;  %v304_v4 = vunpack.c.h.bf16 %v302_v0  ;;  %v307_v5 = vunpack.c.l.bf16 %v319_v1  ;;  %v308_v6 = vunpack.c.h.bf16 %v319_v1 }
  0x13   : > { %v189_v8 = vmul.f32 %v303_v3, %v289_v2  ;;  %v190_v9 = vmul.f32 %v304_v4, %v289_v2  ;;  %v191_v10 = vmul.f32 %v307_v5, %v289_v2  ;;  %v192_v11 = vmul.f32 %v308_v6, %v289_v2 }
  0x15   : > { %v200_v12 = vadd.f32 %v290_v7, %v189_v8  ;;  %v201_v13 = vadd.f32 %v290_v7, %v190_v9  ;;  %v202_v14 = vadd.f32 %v290_v7, %v191_v10  ;;  %v203_v15 = vadd.f32 %v290_v7, %v192_v11 }
  0x17   : > { %v312_v16 = vpack.c.bf16 %v201_v13, %v200_v12  ;;  %v317_v17 = vpack.c.bf16 %v203_v15, %v202_v14 }
  0x19   : > { %313 = vst [vmem:[%s172_s25] sm:$0xff] %v312_v16   ;;  %320 = vst [vmem:[%s172_s25 + $0x8] sm:$0xff] %v317_v17  }
  0x1a PF: > { %s13_s12 = sadd.s32 1, %s335_s12  }
  0x1b   : > { %p10_p4 = scmp.ge.s32.totalorder %s13_s12, 4  }
  0x1d   :  { %12 = sbr.rel (!%p10_p4) target bundleno = 1 (0x1), region = 62 }

// kernel: _lambda_.13
= control target key start
LH: loop header
LB: loop body
LE: loop exit
PB: predicated region body
PF: predicated region fallthrough
CT: control target
= control target key end

     0   :  { %s2171_s0 = inlined_call_operand.vmem [shape: bf16[64,3072], index: 0, kind: input, shape index: {}]   ;;  %s2172_s1 = inlined_call_operand.vmem [shape: bf16[3072,128], index: 1, kind: input, shape index: {}]   ;;  %s2173_s2 = inlined_call_operand.vmem [shape: f32[1,128], index: 2, kind: input, shape index: {}]   ;;  %s2174_s3 = inlined_call_operand.vmem [shape: bf16[64,128], index: 3, kind: output, shape index: {0}]   ;;  %s2175_s4 = inlined_call_operand.vmem [shape: f32[16,128], index: 4, kind: output, shape index: {1}]   ;;  %s2176_s5 = inlined_call_operand.vmem [shape: f32[16,128], index: 5, kind: output, shape index: {2}]  }
   0x1   :  { %2177 = sst [smem:[#allocation4_spill]] %s2171_s0 }
   0x2   :  { %s1953_s18 = smov 0   ;;  %s1955_s19 = smov 0  }
   0x3   :  { %s1957_s20 = smov 0   ;;  %s1959_s21 = smov 0  }
   0x4   :  { %s1961_s22 = smov 0   ;;  %s1963_s23 = smov 0  }
   0x5   :  { %s1965_s24 = smov 0  }
   0x6 LB: > { %s28_s25 = sadd.s32 1, %s1912_s22  ;;  %s35_s26 = sadd.s32 1, %s1916_s23  ;;  %s1920_s24 = sphi %s1965_s24, %s16_s24   ;;  %s1916_s23 = sphi %s1963_s23, %s2184_s23   ;;  %s1912_s22 = sphi %s1961_s22, %s2183_s22   ;;  %s1908_s21 = sphi %s1959_s21, %s2182_s21   ;;  %s1904_s20 = sphi %s1957_s20, %s2181_s20   ;;  %s1900_s19 = sphi %s1955_s19, %s2180_s19   ;;  %s1896_s18 = sphi %s1953_s18, %s2179_s18  }
   0x7   : > { %p29_p0 = scmp.ge.s32.totalorder %s28_s25, 3  ;;  %p51_p1 = scmp.ne.s32.totalorder %s1900_s19, %s1896_s18 }
   0x8   : > { %p52_p2 = scmp.eq.s32.totalorder %s1920_s24, 0  ;;  %s44_s30 = sadd.s32 1, %s1900_s19 }
   0x9   : > { %s2186_s25 = smov (%p29_p0, %s28_s25), 0  ;;  %s2188_s26 = smov (!%p29_p0, %s35_s26), %s1916_s23 }
   0xa   : > { %p53_p3 = por %p52_p2, %p51_p1  ;;  %p37_p4 = scmp.ge.s32.totalorder %s2188_s26, 2 }
   0xb   : > { %s40_s27 = ssub.s32 %s1912_s22, %s2186_s25  ;;  %p1513_p6 = scmp.ge.s32.totalorder %s1920_s24, 6 }
   0xc   : > { %s2190_s26 = smov (%p37_p4, %s2188_s26), 0 }
   0xd   : > { %s39_s28 = ssub.s32 %s1916_s23, %s2190_s26  ;;  %221 = sbr.rel (%p1513_p6) target bundleno = 38 (0x26), region = 20 }
   0xe   : > { %s41_s29 = sor.u32 %s40_s27, %s39_s28 }
   0xf   : > { %p42_p5 = scmp.eq.s32.totalorder %s41_s29, 0 }
  0x11   : > { %s2004_s6 = scalar_select %p42_p5, %s1900_s19, %s44_s30  }
  0x14   : > { %224 = sbr.rel (!%p53_p3) target bundleno = 38 (0x26), region = 24  ;;  %s226_s7 = sand.u32 (%p53_p3), 1, %s1900_s19  }
  0x15   : > { %s1516_s8 = sshll.u32 (%p53_p3), %s1912_s22, 3  ;;  %s1514_s9 = sshll.u32 (%p53_p3), %s226_s7, 7 }
  0x16   : > { %s1744_s10 = smul.u32 (%p53_p3), 96, %s1916_s23  ;;  %s2178_s0 = sld [smem:[#allocation4_spill]] (%p53_p3) }
  0x17   : > { %s228_s16 = scalar_lea.vmem (%p53_p3), [#allocation3], %s1514_s9 }
  0x18   : > { %s232_s11 = sadd.s32 (%p53_p3), %s1744_s10, %s1516_s8 }
  0x19   : > { %s1518_s12 = sshll.u32 (%p53_p3), %s232_s11, 2 }
  0x1c   : > { %s2013_s15 = scalar_lea.vmem %s2178_s0, %s1518_s12 }
  0x1d   : > { %v247_v0 = vld [vmem:[%s2013_s15] sm:$0xff]  ;;  %v249_v1 = vld [vmem:[%s2013_s15 + $0x8] sm:$0xff]  ;;  %v251_v2 = vld [vmem:[%s2013_s15 + $0x10] sm:$0xff] }
  0x1e   : > { %248 = vst [vmem:[%s228_s16] sm:$0xff] %v247_v0  ;;  %250 = vst [vmem:[%s228_s16 + $0x8] sm:$0xff] %v249_v1  ;;  %v253_v3 = vld [vmem:[%s2013_s15 + $0x18] sm:$0xff]  ;;  %v255_v4 = vld [vmem:[%s2013_s15 + $0x60] sm:$0xff] }
  0x1f   : > { %252 = vst [vmem:[%s228_s16 + $0x10] sm:$0xff] %v251_v2  ;;  %v257_v5 = vld [vmem:[%s2013_s15 + $0x68] sm:$0xff]  ;;  %254 = vst [vmem:[%s228_s16 + $0x18] sm:$0xff] %v253_v3  ;;  %v259_v6 = vld [vmem:[%s2013_s15 + $0x70] sm:$0xff] }
  0x20   : > { %256 = vst [vmem:[%s228_s16 + $0x20] sm:$0xff] %v255_v4  ;;  %258 = vst [vmem:[%s228_s16 + $0x28] sm:$0xff] %v257_v5  ;;  %v261_v7 = vld [vmem:[%s2013_s15 + $0x78] sm:$0xff]  ;;  %v263_v8 = vld [vmem:[%s2013_s15 + $0xc0] sm:$0xff] }
  0x21   : > { %260 = vst [vmem:[%s228_s16 + $0x30] sm:$0xff] %v259_v6  ;;  %262 = vst [vmem:[%s228_s16 + $0x38] sm:$0xff] %v261_v7  ;;  %v265_v9 = vld [vmem:[%s2013_s15 + $0xc8] sm:$0xff]  ;;  %v267_v10 = vld [vmem:[%s2013_s15 + $0xd0] sm:$0xff] }
  0x22   : > { %264 = vst [vmem:[%s228_s16 + $0x40] sm:$0xff] %v263_v8  ;;  %v269_v11 = vld [vmem:[%s2013_s15 + $0xd8] sm:$0xff]  ;;  %266 = vst [vmem:[%s228_s16 + $0x48] sm:$0xff] %v265_v9  ;;  %v271_v12 = vld [vmem:[%s2013_s15 + $0x120] sm:$0xff] }
  0x23   : > { %268 = vst [vmem:[%s228_s16 + $0x50] sm:$0xff] %v267_v10  ;;  %270 = vst [vmem:[%s228_s16 + $0x58] sm:$0xff] %v269_v11  ;;  %v273_v13 = vld [vmem:[%s2013_s15 + $0x128] sm:$0xff]  ;;  %v275_v14 = vld [vmem:[%s2013_s15 + $0x130] sm:$0xff] }
  0x24   : > { %272 = vst [vmem:[%s228_s16 + $0x60] sm:$0xff] %v271_v12  ;;  %274 = vst [vmem:[%s228_s16 + $0x68] sm:$0xff] %v273_v13  ;;  %v277_v15 = vld [vmem:[%s2013_s15 + $0x138] sm:$0xff] }
  0x25   : > { %276 = vst [vmem:[%s228_s16 + $0x70] sm:$0xff] %v275_v14  ;;  %278 = vst [vmem:[%s228_s16 + $0x78] sm:$0xff] %v277_v15 }
  0x26 PF: > { %p1519_p7 = scmp.ge.s32.totalorder %s1920_s24, 1  ;;  %p295_p8 = scmp.lt.s32.totalorder %s1920_s24, 7 }
  0x28   : > { %p296_p9 = pnand %p1519_p7, %p295_p8 }
  0x29   : > { %s302_s17 = sand.u32 (!%p296_p9), 1, %s1896_s18   ;;  %s1521_s27 = sshll.u32 (!%p296_p9), %s1904_s20, 7 }
  0x2a   : > { %299 = sbr.rel (%p296_p9) target bundleno = 388 (0x184), region = 51  ;;  %s1520_s28 = sshll.u32 (!%p296_p9), %s302_s17, 7 }
  0x2b   : > { %p360_p10 = scmp.lt.s32.totalorder (!%p296_p9), %s1521_s27, 383  ;;  %s1523_s29 = sshll.u32 (!%p296_p9), %s1908_s21, 2 }
  0x2c   : > { %p372_p11 = scmp.lt.s32.totalorder (!%p296_p9), %s1523_s29, 7  ;;  %p380_p12 = scmp.lt.s32.totalorder (!%p296_p9), %s1908_s21, 1 }
  0x2d   : > { %p1527_p13 = scmp.ne.s32.totalorder (!%p296_p9), %s1904_s20, 0 }
  0x31   : > { %s2192_s27 = smov (!%p360_p10, %s1521_s27), 383  ;;  %s2194_s29 = smov (!%p372_p11, %s1523_s29), 7 }
  0x32   : > { %s1522_s30 = sshll.u32 %s2192_s27, 2  ;;  %s1524_s11 = sshll.u32 %s2194_s29, 2  ;;  %v1922_v16 = vmov (!%p1527_p13), 0.0  }
  0x33   : > { %s2040_s9 = scalar_lea.vmem %s2172_s1, %s1522_s30  ;;  %s2046_s18 = scalar_lea.vmem %s2174_s3, %s1524_s11  ;;  %399 = vst [vmem:[#allocation2] sm:$0xff] (!%p1527_p13), %v1922_v16  ;;  %400 = vst [vmem:[#allocation2 + $0x8] sm:$0xff] (!%p1527_p13), %v1922_v16 }
  0x34   : > { %s381_s10 = scalar_select %p380_p12, %s1908_s21, 1 }
  0x35   : > { %s2058_s30 = scalar_lea.vmem [#allocation3], %s1520_s28  ;;  %398 = sbr.rel (%p1527_p13) target bundleno = 60 (0x3c), region = 59  ;;  %401 = vst [vmem:[#allocation2 + $0x10] sm:$0xff] (!%p1527_p13), %v1922_v16  ;;  %402 = vst [vmem:[#allocation2 + $0x18] sm:$0xff] (!%p1527_p13), %v1922_v16 }
  0x36   : > { %s1525_s14 = sshll.u32 %s381_s10, 3 }
  0x37   : > { %s2051_s17 = scalar_lea.vmem %s2175_s4, %s1525_s14  ;;  %s2056_s7 = scalar_lea.vmem %s2176_s5, %s1525_s14 }
  0x3c PF: > { %v1802_v17 = vld [vmem:[%s2040_s9 + $0x40] sm:$0xff]   ;;  %v1806_v21 = vld [vmem:[%s2040_s9 + $0x48] sm:$0xff]   ;;  %v1810_v25 = vld [vmem:[%s2040_s9 + $0x50] sm:$0xff]   ;;  %p1608_p0 = scmp.ne.s32.totalorder %s1904_s20, 2 }
  0x3d   : > { %v1803_v18 = vld [vmem:[%s2040_s9 + $0xc0] sm:$0xff]   ;;  %1632 = vmatprep.subr.bf16.mxu0 %v1802_v17  ;;  %v1807_v22 = vld [vmem:[%s2040_s9 + $0xc8] sm:$0xff]   ;;  %v1811_v26 = vld [vmem:[%s2040_s9 + $0xd0] sm:$0xff]   ;;  %s1614_s29 = sshll.u32 (!%p1608_p0), %s1908_s21, 5 }
  0x3e   : > { %v1804_v19 = vld [vmem:[%s2040_s9] sm:$0xff]   ;;  %1660 = vmatprep.subr.bf16.mxu1 %v1803_v18  ;;  %v1808_v23 = vld [vmem:[%s2040_s9 + $0x8] sm:$0xff]   ;;  %v1812_v27 = vld [vmem:[%s2040_s9 + $0x10] sm:$0xff]   ;;  %s1276_s8 = ssub.s32 (!%p1608_p0), 54, %s1614_s29 }
  0x3f   : > { %v1805_v20 = vld [vmem:[%s2040_s9 + $0x80] sm:$0xff]   ;;  %1633 = vmatpush3.bf16.msra.mxu0 %v1804_v19  ;;  %v1809_v24 = vld [vmem:[%s2040_s9 + $0x88] sm:$0xff]   ;;  %v1813_v28 = vld [vmem:[%s2040_s9 + $0x90] sm:$0xff]  }
  0x40   : > { %1661 = vmatpush3.bf16.msra.mxu1 %v1805_v20  ;;  %1634 = vmatprep.subr.bf16.mxu0 %v1806_v21  ;;  %v1814_v29 = vld [vmem:[%s2040_s9 + $0x58] sm:$0xff]   ;;  %v1818_v33 = vld [vmem:[%s2040_s9 + $0x60] sm:$0xff]   ;;  %v1822_v37 = vld [vmem:[%s2040_s9 + $0x68] sm:$0xff]  }
  0x41   : > { %1662 = vmatprep.subr.bf16.mxu1 %v1807_v22  ;;  %v1815_v30 = vld [vmem:[%s2040_s9 + $0xd8] sm:$0xff]   ;;  %v1819_v34 = vld [vmem:[%s2040_s9 + $0xe0] sm:$0xff]   ;;  %v1823_v38 = vld [vmem:[%s2040_s9 + $0xe8] sm:$0xff]  }
  0x42   : > { %v1816_v31 = vld [vmem:[%s2040_s9 + $0x18] sm:$0xff]   ;;  %v1820_v35 = vld [vmem:[%s2040_s9 + $0x20] sm:$0xff]   ;;  %v1824_v39 = vld [vmem:[%s2040_s9 + $0x28] sm:$0xff]  }
  0x43   : > { %1635 = vmatpush3.bf16.msra.mxu0 %v1808_v23  ;;  %v1817_v32 = vld [vmem:[%s2040_s9 + $0x98] sm:$0xff]   ;;  %v1821_v36 = vld [vmem:[%s2040_s9 + $0xa0] sm:$0xff]   ;;  %v1825_v40 = vld [vmem:[%s2040_s9 + $0xa8] sm:$0xff]  }
  0x44   : > { %1663 = vmatpush3.bf16.msra.mxu1 %v1809_v24  ;;  %1636 = vmatprep.subr.bf16.mxu0 %v1810_v25  ;;  %v1826_v41 = vld [vmem:[%s2040_s9 + $0x70] sm:$0xff]   ;;  %v1830_v45 = vld [vmem:[%s2040_s9 + $0x78] sm:$0xff]   ;;  %v407_v49 = vld [vmem:[%s2058_s30] sm:$0xff] }
  0x45   : > { %1664 = vmatprep.subr.bf16.mxu1 %v1811_v26  ;;  %v1827_v42 = vld [vmem:[%s2040_s9 + $0xf0] sm:$0xff]   ;;  %v1831_v46 = vld [vmem:[%s2040_s9 + $0xf8] sm:$0xff]   ;;  %v411_v50 = vld [vmem:[%s2058_s30 + $0x20] sm:$0xff] }
  0x46   : > { %v1828_v43 = vld [vmem:[%s2040_s9 + $0x30] sm:$0xff]   ;;  %v1832_v47 = vld [vmem:[%s2040_s9 + $0x38] sm:$0xff]   ;;  %v408_v51 = vld [vmem:[%s2058_s30 + $0x8] sm:$0xff]  ;;  %v1528_v52 = vcombine.low %v407_v49, %v411_v50  ;;  %v1529_v53 = vcombine.high %v407_v49, %v411_v50 }
  0x47   : > { %1637 = vmatpush3.bf16.msra.mxu0 %v1812_v27  ;;  %v1829_v44 = vld [vmem:[%s2040_s9 + $0xb0] sm:$0xff]   ;;  %v1833_v48 = vld [vmem:[%s2040_s9 + $0xb8] sm:$0xff]   ;;  %v412_v54 = vld [vmem:[%s2058_s30 + $0x28] sm:$0xff] }
  0x48   : > { %1665 = vmatpush3.bf16.msra.mxu1 %v1813_v28  ;;  %1638 = vmatprep.subr.bf16.mxu0 %v1814_v29  ;;  %v1530_v55 = vcombine.low %v408_v51, %v412_v54  ;;  %v1531_v56 = vcombine.high %v408_v51, %v412_v54  ;;  %v1834_v57 = vld [vmem:[%s2040_s9 + $0x140] sm:$0xff]   ;;  %v1838_v61 = vld [vmem:[%s2040_s9 + $0x148] sm:$0xff]   ;;  %v1842_v1 = vld [vmem:[%s2040_s9 + $0x150] sm:$0xff]  }
  0x49   : > { %1666 = vmatprep.subr.bf16.mxu1 %v1815_v30  ;;  %1047 = vmatprep.mubr.bf16.mxu0 %v1529_v53  ;;  %v1835_v58 = vld [vmem:[%s2040_s9 + $0x1c0] sm:$0xff]   ;;  %v1839_v62 = vld [vmem:[%s2040_s9 + $0x1c8] sm:$0xff]   ;;  %v1843_v2 = vld [vmem:[%s2040_s9 + $0x1d0] sm:$0xff]  }
  0x4a   : > { %1096 = vmatprep.mubr.bf16.mxu1 %v1531_v56  ;;  %v1836_v59 = vld [vmem:[%s2040_s9 + $0x100] sm:$0xff]   ;;  %v1840_v63 = vld [vmem:[%s2040_s9 + $0x108] sm:$0xff]   ;;  %v1844_v3 = vld [vmem:[%s2040_s9 + $0x110] sm:$0xff]  }
  0x4b   : > { %1639 = vmatpush3.bf16.msra.mxu0 %v1816_v31  ;;  %v1837_v60 = vld [vmem:[%s2040_s9 + $0x180] sm:$0xff]   ;;  %v1841_v0 = vld [vmem:[%s2040_s9 + $0x188] sm:$0xff]   ;;  %v1845_v4 = vld [vmem:[%s2040_s9 + $0x190] sm:$0xff]  }
  0x4c   : > { %1667 = vmatpush3.bf16.msra.mxu1 %v1817_v32  ;;  %1640 = vmatprep.subr.bf16.mxu0 %v1818_v33  ;;  %v1846_v5 = vld [vmem:[%s2040_s9 + $0x158] sm:$0xff]   ;;  %v1850_v9 = vld [vmem:[%s2040_s9 + $0x160] sm:$0xff]   ;;  %v416_v16 = vld [vmem:[%s2058_s30 + $0x48] sm:$0xff] }
  0x4d   : > { %1668 = vmatprep.subr.bf16.mxu1 %v1819_v34  ;;  %v1847_v6 = vld [vmem:[%s2040_s9 + $0x1d8] sm:$0xff]   ;;  %v1851_v10 = vld [vmem:[%s2040_s9 + $0x1e0] sm:$0xff]   ;;  %v420_v17 = vld [vmem:[%s2058_s30 + $0x68] sm:$0xff] }
  0x4e   : > { %v1848_v7 = vld [vmem:[%s2040_s9 + $0x118] sm:$0xff]   ;;  %v1852_v11 = vld [vmem:[%s2040_s9 + $0x120] sm:$0xff]   ;;  %v1539_v19 = vcombine.high %v416_v16, %v420_v17  ;;  %v1854_v20 = vld [vmem:[%s2040_s9 + $0x168] sm:$0xff]   ;;  %v1538_v21 = vcombine.low %v416_v16, %v420_v17 }
  0x4f   : > { %1641 = vmatpush3.bf16.msra.mxu0 %v1820_v35  ;;  %v1849_v8 = vld [vmem:[%s2040_s9 + $0x198] sm:$0xff]   ;;  %v1853_v12 = vld [vmem:[%s2040_s9 + $0x1a0] sm:$0xff]   ;;  %v1855_v22 = vld [vmem:[%s2040_s9 + $0x1e8] sm:$0xff]  }
  0x50   : > { %1669 = vmatpush3.bf16.msra.mxu1 %v1821_v36  ;;  %1642 = vmatprep.subr.bf16.mxu0 %v1822_v37  ;;  %v415_v13 = vld [vmem:[%s2058_s30 + $0x40] sm:$0xff]  ;;  %v1856_v23 = vld [vmem:[%s2040_s9 + $0x128] sm:$0xff]   ;;  %v1858_v25 = vld [vmem:[%s2040_s9 + $0x170] sm:$0xff]  }
  0x51   : > { %1670 = vmatprep.subr.bf16.mxu1 %v1823_v38  ;;  %v419_v14 = vld [vmem:[%s2058_s30 + $0x60] sm:$0xff]  ;;  %v1857_v24 = vld [vmem:[%s2040_s9 + $0x1a8] sm:$0xff]   ;;  %v1859_v26 = vld [vmem:[%s2040_s9 + $0x1f0] sm:$0xff]  }
  0x52   : > { %v1537_v15 = vcombine.high %v415_v13, %v419_v14  ;;  %v1536_v18 = vcombine.low %v415_v13, %v419_v14  ;;  %v1860_v27 = vld [vmem:[%s2040_s9 + $0x130] sm:$0xff]   ;;  %v1862_v29 = vld [vmem:[%s2040_s9 + $0x178] sm:$0xff]  }
  0x53   : > { %1643 = vmatpush3.bf16.msra.mxu0 %v1824_v39  ;;  %v1861_v28 = vld [vmem:[%s2040_s9 + $0x1b0] sm:$0xff]   ;;  %v1863_v30 = vld [vmem:[%s2040_s9 + $0x1f8] sm:$0xff]  }
  0x54   : > { %1671 = vmatpush3.bf16.msra.mxu1 %v1825_v40  ;;  %1644 = vmatprep.subr.bf16.mxu0 %v1826_v41  ;;  %v1864_v31 = vld [vmem:[%s2040_s9 + $0x138] sm:$0xff]   ;;  %v409_v33 = vld [vmem:[%s2058_s30 + $0x10] sm:$0xff] }
  0x55   : > { %1672 = vmatprep.subr.bf16.mxu1 %v1827_v42  ;;  %v1865_v32 = vld [vmem:[%s2040_s9 + $0x1b8] sm:$0xff]   ;;  %v413_v34 = vld [vmem:[%s2058_s30 + $0x30] sm:$0xff] }
  0x56   : > { %v410_v35 = vld [vmem:[%s2058_s30 + $0x18] sm:$0xff]  ;;  %v1532_v37 = vcombine.low %v409_v33, %v413_v34  ;;  %v1533_v38 = vcombine.high %v409_v33, %v413_v34  ;;  %v417_v41 = vld [vmem:[%s2058_s30 + $0x50] sm:$0xff] }
  0x57   : > { %1645 = vmatpush3.bf16.msra.mxu0 %v1828_v43  ;;  %v414_v36 = vld [vmem:[%s2058_s30 + $0x38] sm:$0xff]  ;;  %v421_v42 = vld [vmem:[%s2058_s30 + $0x70] sm:$0xff] }
  0x58   : > { %1673 = vmatpush3.bf16.msra.mxu1 %v1829_v44  ;;  %1646 = vmatprep.subr.bf16.mxu0 %v1830_v45  ;;  %v1534_v39 = vcombine.low %v410_v35, %v414_v36  ;;  %v1535_v40 = vcombine.high %v410_v35, %v414_v36  ;;  %v418_v43 = vld [vmem:[%s2058_s30 + $0x58] sm:$0xff]  ;;  %v1541_v44 = vcombine.high %v417_v41, %v421_v42 }
  0x59   : > { %1674 = vmatprep.subr.bf16.mxu1 %v1831_v46  ;;  %v422_v45 = vld [vmem:[%s2058_s30 + $0x78] sm:$0xff] }
  0x5a   : > { %v1543_v46 = vcombine.high %v418_v43, %v422_v45 }
  0x5b   : > { %1647 = vmatpush3.bf16.msra.mxu0 %v1832_v47  ;;  %v1540_v47 = vcombine.low %v417_v41, %v421_v42 }
  0x5c   : > { %1675 = vmatpush3.bf16.msra.mxu1 %v1833_v48  ;;  %1688 = vmatprep.subr.bf16.mxu0 %v1834_v57  ;;  %v1542_v48 = vcombine.low %v418_v43, %v422_v45 }
  0x5d   : > { %1716 = vmatprep.subr.bf16.mxu1 %v1835_v58 }
  0x5e   : > { %1048 = vmatmul.mubr.bf16.vlgmr.msra.gmra.mrb[0].mxu0 %v1528_v52 }
  0x5f   : > { %1097 = vmatmul.mubr.bf16.vlgmr.msra.gmra.mrb[0].mxu1 %v1530_v55  ;;  %1689 = vmatpush3.bf16.msra.mxu0 %v1836_v59 }
  0x60   : > { %1717 = vmatpush3.bf16.msra.mxu1 %v1837_v60  ;;  %1690 = vmatprep.subr.bf16.mxu0 %v1838_v61 }
  0x61   : > { %1718 = vmatprep.subr.bf16.mxu1 %v1839_v62  ;;  %1055 = vmatprep.mubr.bf16.mxu0 %v1537_v15 }
  0x62   : > { %1104 = vmatprep.mubr.bf16.mxu1 %v1539_v19 }
  0x63   : > { %1691 = vmatpush3.bf16.msra.mxu0 %v1840_v63 }
  0x64   : > { %1719 = vmatpush3.bf16.msra.mxu1 %v1841_v0  ;;  %1692 = vmatprep.subr.bf16.mxu0 %v1842_v1 }
  0x65   : > { %1720 = vmatprep.subr.bf16.mxu1 %v1843_v2 }
  0x66   : > { %1056 = vmatmul.mubr.bf16.gmra.mrb[4].mxu0 %v1536_v18 }
  0x67   : > { %1693 = vmatpush3.bf16.msra.mxu0 %v1844_v3  ;;  %1105 = vmatmul.mubr.bf16.gmra.mrb[4].mxu1 %v1538_v21 }
  0x68   : > { %1721 = vmatpush3.bf16.msra.mxu1 %v1845_v4  ;;  %1694 = vmatprep.subr.bf16.mxu0 %v1846_v5 }
  0x69   : > { %1722 = vmatprep.subr.bf16.mxu1 %v1847_v6  ;;  %1145 = vmatprep.mubr.bf16.mxu0 %v1533_v38 }
  0x6a   : > { %1194 = vmatprep.mubr.bf16.mxu1 %v1535_v40 }
  0x6b   : > { %1695 = vmatpush3.bf16.msra.mxu0 %v1848_v7 }
  0x6c   : > { %1723 = vmatpush3.bf16.msra.mxu1 %v1849_v8  ;;  %1696 = vmatprep.subr.bf16.mxu0 %v1850_v9 }
  0x6d   : > { %1724 = vmatprep.subr.bf16.mxu1 %v1851_v10 }
  0x6f   : > { %1697 = vmatpush3.bf16.msra.mxu0 %v1852_v11 }
  0x70   : > { %1725 = vmatpush3.bf16.msra.mxu1 %v1853_v12  ;;  %1698 = vmatprep.subr.bf16.mxu0 %v1854_v20 }
  0x71   : > { %1726 = vmatprep.subr.bf16.mxu1 %v1855_v22 }
  0x73   : > { %1699 = vmatpush3.bf16.msra.mxu0 %v1856_v23 }
  0x74   : > { %1727 = vmatpush3.bf16.msra.mxu1 %v1857_v24  ;;  %1700 = vmatprep.subr.bf16.mxu0 %v1858_v25 }
  0x75   : > { %1728 = vmatprep.subr.bf16.mxu1 %v1859_v26  ;;  %v403_v26 = vld [vmem:[#allocation2] sm:$0xff] }
  0x77   : > { %1701 = vmatpush3.bf16.msra.mxu0 %v1860_v27 }
  0x78   : > { %1729 = vmatpush3.bf16.msra.mxu1 %v1861_v28  ;;  %1702 = vmatprep.subr.bf16.mxu0 %v1862_v29  ;;  %v404_v29 = vld [vmem:[#allocation2 + $0x8] sm:$0xff] }
  0x79   : > { %1730 = vmatprep.subr.bf16.mxu1 %v1863_v30 }
  0x7b   : > { %1703 = vmatpush3.bf16.msra.mxu0 %v1864_v31 }
  0x7c   : > { %1731 = vmatpush3.bf16.msra.mxu1 %v1865_v32 }
  0x7e   : > { %1146 = vmatmul.mubr.bf16.vlgmr.msra.gmra.mrb[8].mxu0 %v1532_v37 }
  0x7f   : > { %1195 = vmatmul.mubr.bf16.vlgmr.msra.gmra.mrb[8].mxu1 %v1534_v39  ;;  %1153 = vmatprep.mubr.bf16.mxu0 %v1541_v44 }
  0x80   : > { %1202 = vmatprep.mubr.bf16.mxu1 %v1543_v46  ;;  %v405_v46 = vld [vmem:[#allocation2 + $0x10] sm:$0xff] }
  0x86   : > { %1154 = vmatmul.mubr.bf16.gmra.mrb[12].mxu0 %v1540_v47 }
  0x87   : > { %1203 = vmatmul.mubr.bf16.gmra.mrb[12].mxu1 %v1542_v48 }
 0x131   : > { %v1648_v49 = vpop.f32.mrb[0].mxu0 }
 0x132   : > { %v1676_v50 = vpop.f32.mrb[0].mxu1  ;;  %v1649_v51 = vpop.f32.mrb[1].mxu0 }
 0x133   : > { %v1650_v52 = vadd.f32 %v1649_v51, %v1648_v49  ;;  %v1677_v53 = vpop.f32.mrb[1].mxu1  ;;  %v1651_v54 = vpop.f32.mrb[2].mxu0  ;;  %v406_v49 = vld [vmem:[#allocation2 + $0x18] sm:$0xff] }
 0x134   : > { %v1678_v55 = vadd.f32 %v1677_v53, %v1676_v50  ;;  %v1679_v56 = vpop.f32.mrb[2].mxu1  ;;  %v1652_v57 = vpop.f32.mrb[3].mxu0 }
 0x135   : > { %v1653_v58 = vadd.f32 %v1652_v57, %v1651_v54  ;;  %v1680_v59 = vpop.f32.mrb[3].mxu1 }
 0x136   : > { %v1099_v60 = vadd.f32 %v1678_v55, %v1650_v52  ;;  %v1681_v61 = vadd.f32 %v1680_v59, %v1679_v56  ;;  %v1609_v55 = vld [vmem:[%s2173_s2] ss:$0 sm:$0xff] (!%p1608_p0)  ;;  %v1270_v56 = vlaneseq (!%p1608_p0) }
 0x138   : > { %v1102_v62 = vadd.f32 %v1681_v61, %v1653_v58  ;;  %v1271_v61 = vshrl.u32 (!%p1608_p0), %v1270_v56, 7 }
 0x139   : > { %v1654_v63 = vpop.f32.mrb[4].mxu0 }
 0x13a   : > { %v1682_v0 = vpop.f32.mrb[4].mxu1  ;;  %v1655_v1 = vpop.f32.mrb[5].mxu0 }
 0x13b   : > { %v1656_v2 = vadd.f32 %v1655_v1, %v1654_v63  ;;  %v1683_v3 = vpop.f32.mrb[5].mxu1  ;;  %v1657_v4 = vpop.f32.mrb[6].mxu0 }
 0x13c   : > { %v1684_v5 = vadd.f32 %v1683_v3, %v1682_v0  ;;  %v1685_v6 = vpop.f32.mrb[6].mxu1  ;;  %v1658_v7 = vpop.f32.mrb[7].mxu0  ;;  %v1272_v3 = vadd.s32 (!%p1608_p0), 8, %v1271_v61 }
 0x13d   : > { %v1659_v8 = vadd.f32 %v1658_v7, %v1657_v4  ;;  %v1686_v9 = vpop.f32.mrb[7].mxu1 }
 0x13e   : > { %v1107_v10 = vadd.f32 %v1684_v5, %v1656_v2  ;;  %v1687_v11 = vadd.f32 %v1686_v9, %v1685_v6 }
 0x140   : > { %v1110_v12 = vadd.f32 %v1687_v11, %v1659_v8 }
 0x151   : > { %v1704_v13 = vpop.f32.mrb[8].mxu0 }
 0x152   : > { %v1732_v14 = vpop.f32.mrb[8].mxu1  ;;  %v1705_v15 = vpop.f32.mrb[9].mxu0 }
 0x153   : > { %v1733_v16 = vpop.f32.mrb[9].mxu1  ;;  %v1706_v17 = vadd.f32 %v1705_v15, %v1704_v13  ;;  %v1707_v19 = vpop.f32.mrb[10].mxu0 }
 0x154   : > { %v1734_v18 = vadd.f32 %v1733_v16, %v1732_v14  ;;  %v1735_v20 = vpop.f32.mrb[10].mxu1  ;;  %v1708_v21 = vpop.f32.mrb[11].mxu0 }
 0x155   : > { %v1736_v22 = vpop.f32.mrb[11].mxu1  ;;  %v1148_v23 = vadd.f32 %v1706_v17, %v1099_v60  ;;  %v1709_v24 = vadd.f32 %v1708_v21, %v1707_v19 }
 0x156   : > { %v1737_v25 = vadd.f32 %v1736_v22, %v1735_v20 }
 0x157   : > { %v1197_v27 = vadd.f32 %v1734_v18, %v1148_v23  ;;  %v1151_v28 = vadd.f32 %v1709_v24, %v1102_v62  ;;  %v1277_v62 = vstv (!%p1608_p0), %s1276_s8  ;;  %v1274_v18 = vadd.s32 (!%p1608_p0), 24, %v1271_v61 }
 0x158   : > { %vm1278_vm2 = vcmp.lt.s32.totalorder (!%p1608_p0), %v1271_v61, %v1277_v62  ;;  %vm1279_vm5 = vcmp.lt.s32.totalorder (!%p1608_p0), %v1272_v3, %v1277_v62 }
 0x159   : > { %v1211_v30 = vadd.f32 %v1197_v27, %v403_v26  ;;  %v1200_v31 = vadd.f32 %v1737_v25, %v1151_v28  ;;  %v1710_v32 = vpop.f32.mrb[12].mxu0  ;;  %vm1281_vm7 = vcmp.lt.s32.totalorder (!%p1608_p0), %v1274_v18, %v1277_v62 }
 0x15a   : > { %v1738_v33 = vpop.f32.mrb[12].mxu1  ;;  %v1711_v34 = vpop.f32.mrb[13].mxu0 }
 0x15b   : > { %v1739_v35 = vpop.f32.mrb[13].mxu1  ;;  %1215 = vst [vmem:[#allocation2] sm:$0xff] %v1211_v30  ;;  %v1212_v36 = vadd.f32 %v1200_v31, %v404_v29  ;;  %v1712_v37 = vadd.f32 %v1711_v34, %v1710_v32  ;;  %v1713_v39 = vpop.f32.mrb[14].mxu0 }
 0x15c   : > { %v1740_v38 = vadd.f32 %v1739_v35, %v1738_v33  ;;  %v1741_v40 = vpop.f32.mrb[14].mxu1  ;;  %v1714_v41 = vpop.f32.mrb[15].mxu0 }
 0x15d   : > { %v1742_v42 = vpop.f32.mrb[15].mxu1  ;;  %1216 = vst [vmem:[#allocation2 + $0x8] sm:$0xff] %v1212_v36  ;;  %v1156_v43 = vadd.f32 %v1712_v37, %v1107_v10  ;;  %v1715_v44 = vadd.f32 %v1714_v41, %v1713_v39  ;;  %v1273_v10 = vadd.s32 (!%p1608_p0), 16, %v1271_v61 }
 0x15e   : > { %v1743_v45 = vadd.f32 %v1742_v42, %v1741_v40 }
 0x15f   : > { %v1205_v47 = vadd.f32 %v1740_v38, %v1156_v43  ;;  %v1159_v48 = vadd.f32 %v1715_v44, %v1110_v12  ;;  %1222 = sbr.rel (%p1608_p0) target bundleno = 388 (0x184), region = 63  ;;  %vm1280_vm6 = vcmp.lt.s32.totalorder (!%p1608_p0), %v1273_v10, %v1277_v62 }
 0x161   : > { %v1213_v50 = vadd.f32 %v1205_v47, %v405_v46  ;;  %v1208_v51 = vadd.f32 %v1743_v45, %v1159_v48 }
 0x162   : > { %v1223_v53 = vld [vmem:[#allocation2] sm:$0xff] (!%p1608_p0) }
 0x163   : > { %1217 = vst [vmem:[#allocation2 + $0x10] sm:$0xff] %v1213_v50  ;;  %v1214_v52 = vadd.f32 %v1208_v51, %v406_v49  ;;  %v1234_v57 = vadd.f32 (!%p1608_p0), %v1609_v55, %v1223_v53 }
 0x164   : > { %v1224_v54 = vld [vmem:[#allocation2 + $0x8] sm:$0xff] (!%p1608_p0) }
 0x165   : > { %1218 = vst [vmem:[#allocation2 + $0x18] sm:$0xff] %v1214_v52  ;;  %v1235_v58 = vadd.f32 (!%p1608_p0), %v1609_v55, %v1224_v54  ;;  %vm1238_vm0 = vcmp.ge.f32.partialorder (!%p1608_p0), %v1234_v57, 0.0  ;;  %v1242_v1 = vmul.f32 (!%p1608_p0), 0.01, %v1234_v57 }
 0x167   : > { %vm1239_vm1 = vcmp.ge.f32.partialorder %v1235_v58, 0.0  ;;  %v1243_v2 = vmul.f32 0.01, %v1235_v58  ;;  %v1246_v4 = vsel %vm1238_vm0, %v1234_v57, %v1242_v1 }
 0x168   : > { %v1282_v9 = vsel %vm1278_vm2, %v1246_v4, 0.0 }
 0x169   : > { %v1247_v5 = vsel %vm1239_vm1, %v1235_v58, %v1243_v2  ;;  %v1295_v12 = vmul.f32 %v1282_v9, %v1282_v9 }
 0x16a   : > { %v1225_v59 = vld [vmem:[#allocation2 + $0x10] sm:$0xff]  ;;  %v1624_v8 = vpack.c.bf16 %v1247_v5, %v1246_v4  ;;  %v1283_v11 = vsel %vm1279_vm5, %v1247_v5, 0.0 }
 0x16b   : > { %v1236_v63 = vadd.f32 %v1609_v55, %v1225_v59  ;;  %v1286_v15 = vadd.f32 %v1283_v11, %v1282_v9  ;;  %v1296_v16 = vmul.f32 %v1283_v11, %v1283_v11 }
 0x16c   : > { %v1226_v60 = vld [vmem:[#allocation2 + $0x18] sm:$0xff]  ;;  %1625 = vst [vmem:[%s2046_s18] sm:$0xff] %v1624_v8  }
 0x16d   : > { %v1237_v0 = vadd.f32 %v1609_v55, %v1226_v60  ;;  %vm1240_vm3 = vcmp.ge.f32.partialorder %v1236_v63, 0.0  ;;  %v1244_v6 = vmul.f32 0.01, %v1236_v63  ;;  %v1299_v19 = vadd.f32 %v1296_v16, %v1295_v12 }
 0x16f   : > { %vm1241_vm4 = vcmp.ge.f32.partialorder %v1237_v0, 0.0  ;;  %v1245_v7 = vmul.f32 0.01, %v1237_v0  ;;  %v1248_v13 = vsel %vm1240_vm3, %v1236_v63, %v1244_v6 }
 0x170   : > { %v1284_v20 = vsel %vm1280_vm6, %v1248_v13, 0.0 }
 0x171   : > { %v1249_v14 = vsel %vm1241_vm4, %v1237_v0, %v1245_v7  ;;  %v1287_v22 = vadd.f32 %v1286_v15, %v1284_v20  ;;  %v1297_v23 = vmul.f32 %v1284_v20, %v1284_v20 }
 0x172   : > { %v1629_v17 = vpack.c.bf16 %v1249_v14, %v1248_v13  ;;  %v1285_v21 = vsel %vm1281_vm7, %v1249_v14, 0.0 }
 0x173   : > { %v1298_v24 = vmul.f32 %v1285_v21, %v1285_v21  ;;  %v1288_v25 = vadd.f32 %v1287_v22, %v1285_v21  ;;  %v1300_v26 = vadd.f32 %v1299_v19, %v1297_v23 }
 0x174   : > { %1631 = vst [vmem:[%s2046_s18 + $0x8] sm:$0xff] %v1629_v17  }
 0x175   : > { %v1289_v27 = vrot.slane %v1288_v25, 4  ;;  %v1301_v28 = vadd.f32 %v1300_v26, %v1298_v24 }
 0x177   : > { %v1290_v29 = vadd.f32 %v1289_v27, %v1288_v25  ;;  %v1302_v30 = vrot.slane %v1301_v28, 4 }
 0x179   : > { %v1291_v31 = vrot.slane %v1290_v29, 2  ;;  %v1303_v32 = vadd.f32 %v1302_v30, %v1301_v28 }
 0x17b   : > { %v1292_v33 = vadd.f32 %v1291_v31, %v1290_v29  ;;  %v1304_v34 = vrot.slane %v1303_v32, 2 }
 0x17d   : > { %v1293_v35 = vrot.slane %v1292_v33, 1  ;;  %v1305_v36 = vadd.f32 %v1304_v34, %v1303_v32 }
 0x17f   : > { %v1294_v37 = vadd.f32 %v1293_v35, %v1292_v33  ;;  %v1306_v38 = vrot.slane %v1305_v36, 1 }
 0x181   : > { %1308 = vst [vmem:[%s2051_s17] sm:$0xff] %v1294_v37  ;;  %v1307_v39 = vadd.f32 %v1306_v38, %v1305_v36 }
 0x183   : > { %1309 = vst [vmem:[%s2056_s7] sm:$0xff] %v1307_v39 }
 0x184 PF: > { %s16_s24 = sadd.s32 1, %s1920_s24   ;;  %s2179_s18 = smov %s1900_s19 }
 0x185   : > { %p13_p1 = scmp.ge.s32.totalorder %s16_s24, 8   ;;  %s2180_s19 = smov %s2004_s6 }
 0x186   : > { %s2181_s20 = smov %s1912_s22  ;;  %s2182_s21 = smov %s1916_s23 }
 0x187   : > { %s2183_s22 = smov %s2186_s25  ;;  %s2184_s23 = smov %s2190_s26 }
 0x188   :  { %15 = sbr.rel (!%p13_p1) target bundleno = 6 (0x6), region = 128 }

// kernel: _lambda_.16
= control target key start
LH: loop header
LB: loop body
LE: loop exit
PB: predicated region body
PF: predicated region fallthrough
CT: control target
= control target key end

     0   :  { %v22_v0 = vlaneseq  ;;  %s112_s0 = inlined_call_operand.vmem [shape: bf16[16,256], index: 0, kind: input, shape index: {}]   ;;  %s113_s1 = inlined_call_operand.vmem [shape: f32[1,256], index: 1, kind: input, shape index: {}]   ;;  %s114_s2 = inlined_call_operand.vmem [shape: f32[1,256], index: 2, kind: input, shape index: {}]   ;;  %s115_s3 = inlined_call_operand.vmem [shape: bf16[16,256], index: 3, kind: output, shape index: {}]  }
   0x1   :  { %v14_v1 = vld [vmem:[%s112_s0] sm:$0xff]  ;;  %v15_v3 = vld [vmem:[%s112_s0 + $0x8] sm:$0xff] }
   0x2   :  { %v23_v2 = vshrl.u32 %v22_v0, 7  ;;  %v16_v4 = vunpack.c.l.bf16 %v14_v1  ;;  %v17_v5 = vunpack.c.h.bf16 %v14_v1  ;;  %v20_v6 = vld [vmem:[%s113_s1] sm:$0x3]  ;;  %v18_v10 = vunpack.c.l.bf16 %v15_v3 }
   0x3   :  { %v36_v7 = vld [vmem:[%s114_s2] sm:$0x3]  ;;  %v19_v11 = vunpack.c.h.bf16 %v15_v3 }
   0x4   :  { %v24_v8 = vsub.s32 0, %v23_v2  ;;  %v28_v9 = vsub.s32 1, %v23_v2 }
   0x6   :  { %v25_v12 = vrot.slane %v20_v6, %v24_v8  ;;  %v29_v13 = vrot.slane %v20_v6, %v28_v9  ;;  %v41_v14 = vrot.slane %v36_v7, %v24_v8  ;;  %v45_v15 = vrot.slane %v36_v7, %v28_v9 }
   0x8   :  { %v32_v16 = vmul.f32 %v25_v12, %v16_v4  ;;  %v33_v17 = vmul.f32 %v29_v13, %v17_v5  ;;  %v34_v18 = vmul.f32 %v25_v12, %v18_v10  ;;  %v35_v19 = vmul.f32 %v29_v13, %v19_v11 }
   0xa   :  { %v48_v20 = vadd.f32 %v41_v14, %v32_v16  ;;  %v49_v21 = vadd.f32 %v45_v15, %v33_v17  ;;  %v50_v22 = vadd.f32 %v41_v14, %v34_v18  ;;  %v51_v23 = vadd.f32 %v45_v15, %v35_v19 }
   0xc   :  { %v72_v24 = vpack.c.bf16 %v49_v21, %v48_v20  ;;  %v73_v25 = vpack.c.bf16 %v51_v23, %v50_v22 }
   0xe   :  { %64 = vst [vmem:[%s115_s3] sm:$0xff] %v72_v24  ;;  %65 = vst [vmem:[%s115_s3 + $0x8] sm:$0xff] %v73_v25 }

// kernel: _lambda_.15
= control target key start
LH: loop header
LB: loop body
LE: loop exit
PB: predicated region body
PF: predicated region fallthrough
CT: control target
= control target key end

     0   :  { %s4778_s0 = inlined_call_operand.vmem [shape: bf16[16,6144], index: 0, kind: input, shape index: {}]   ;;  %s4779_s1 = inlined_call_operand.vmem [shape: bf16[6144,256], index: 1, kind: input, shape index: {}]   ;;  %s4780_s2 = inlined_call_operand.vmem [shape: f32[1,256], index: 2, kind: input, shape index: {}]   ;;  %s4781_s3 = inlined_call_operand.vmem [shape: bf16[16,256], index: 3, kind: output, shape index: {0}]   ;;  %s4782_s4 = inlined_call_operand.vmem [shape: f32[8,256], index: 4, kind: output, shape index: {1}]   ;;  %s4783_s5 = inlined_call_operand.vmem [shape: f32[8,256], index: 5, kind: output, shape index: {2}]  }
   0x1   :  { %4788 = sst [smem:[#allocation10_spill]] %s4778_s0 }
   0x2   :  { %4789 = sst [smem:[#allocation11_spill]] %s4779_s1 }
   0x3   :  { %s3905_s18 = smov 0   ;;  %s3907_s19 = smov 0  }
   0x4   :  { %s3909_s20 = smov 0   ;;  %s3911_s21 = smov 0  }
   0x5   :  { %s3913_s22 = smov 0   ;;  %s3915_s23 = smov 0  }
   0x6   :  { %s3917_s24 = smov 0   ;;  %s3919_s25 = smov 0  }
   0x7   :  { %s3921_s26 = smov 0   ;;  %s3923_s27 = smov 0  }
   0x8   :  { %s3925_s28 = smov 0  }
   0x9 LB: > { %4790 = sst [smem:[#allocation6_spill]] %s3864_s26  ;;  %s3214_s29 = sadd.s32 4294967295, %s3872_s28   ;;  %s3872_s28 = sphi %s3925_s28, %s16_s28   ;;  %s3868_s27 = sphi %s3923_s27, %s4802_s27   ;;  %s3864_s26 = sphi %s3921_s26, %s4801_s26   ;;  %s3860_s25 = sphi %s3919_s25, %s4800_s25   ;;  %s3856_s24 = sphi %s3917_s24, %s4799_s24   ;;  %s3852_s23 = sphi %s3915_s23, %s4808_s23   ;;  %s3848_s22 = sphi %s3913_s22, %s4807_s22   ;;  %s3844_s21 = sphi %s3911_s21, %s4806_s21   ;;  %s3840_s20 = sphi %s3909_s20, %s4805_s20   ;;  %s3836_s19 = sphi %s3907_s19, %s4804_s19   ;;  %s3832_s18 = sphi %s3905_s18, %s4803_s18  }
   0xa   : > { %4791 = sst [smem:[#allocation7_spill]] %s3868_s27  ;;  %s28_s30 = sadd.s32 1, %s3864_s26 }
   0xb   : > { %p29_p0 = scmp.ge.s32.totalorder %s28_s30, 3  ;;  %s31_s6 = sadd.s32 1, %s3868_s27 }
   0xc   : > { %s44_s7 = sadd.s32 1, %s3852_s23  ;;  %p51_p1 = scmp.ne.s32.totalorder %s3852_s23, %s3848_s22 }
   0xd   : > { %s4810_s30 = smov (%p29_p0, %s28_s30), 0  ;;  %s4812_s6 = smov (!%p29_p0, %s31_s6), %s3868_s27 }
   0xe   : > { %4792 = sst [smem:[#allocation8_spill]] %s4810_s30  ;;  %s40_s8 = ssub.s32 %s3864_s26, %s4810_s30 }
   0xf   : > { %p52_p2 = scmp.eq.s32.totalorder %s3872_s28, 0  ;;  %p33_p3 = scmp.ge.s32.totalorder %s4812_s6, 2 }
  0x10   : > { %p42_p4 = scmp.eq.s32.totalorder %s40_s8, 0  ;;  %s72_s10 = sadd.s32 1, %s3844_s21 }
  0x11   : > { %p3972_p5 = por %p52_p2, %p51_p1  ;;  %s4814_s6 = smov (%p33_p3, %s4812_s6), 0 }
  0x12   : > { %4794 = sst [smem:[#allocation9_spill]] %s4814_s6  ;;  %s68_s12 = ssub.s32 %s3868_s27, %s4814_s6 }
  0x13   : > { %s3980_s11 = scalar_select %p42_p4, %s3852_s23, %s44_s7  }
  0x14   : > { %p79_p6 = scmp.ne.s32.totalorder %s3844_s21, %s3840_s20  ;;  %s69_s13 = sor.u32 %s68_s12, %s40_s8 }
  0x15   : > { %p124_p7 = scmp.eq.s32.totalorder %s68_s12, 0  ;;  %p70_p8 = scmp.eq.s32.totalorder %s69_s13, 0 }
  0x16   : > { %p3986_p9 = por %p79_p6, %p52_p2  ;;  %s126_s15 = sadd.s32 1, %s3836_s19 }
  0x17   : > { %p136_p10 = scmp.ne.s32.totalorder %s3836_s19, %s3832_s18  ;;  %p137_p11 = scmp.eq.s32.totalorder %s3214_s29, 5 }
  0x18   : > { %s3994_s16 = scalar_select %p70_p8, %s3844_s21, %s72_s10  }
  0x19   : > { %s3997_s17 = scalar_select %p124_p7, %s3836_s19, %s126_s15  }
  0x1a   : > { %p3999_p12 = por %p137_p11, %p136_p10  ;;  %p3217_p13 = scmp.ge.s32.totalorder %s3872_s28, 6 }
  0x1c   : > { %215 = sbr.rel (%p3217_p13) target bundleno = 233 (0xe9), region = 16 }
  0x23   : > { %218 = sbr.rel (!%p3972_p5) target bundleno = 53 (0x35), region = 20  ;;  %s220_s7 = sand.u32 (%p3972_p5), 1, %s3852_s23  }
  0x24   : > { %s3384_s8 = sshll.u32 (%p3972_p5), %s3864_s26, 6  ;;  %s3218_s12 = sshll.u32 (%p3972_p5), %s220_s7, 7 }
  0x25   : > { %s4797_s0 = sld [smem:[#allocation10_spill]] (%p3972_p5)  ;;  %s222_s29 = scalar_lea.vmem (%p3972_p5), [#allocation3], %s3218_s12 }
  0x2b   : > { %s4011_s15 = scalar_lea.vmem %s4797_s0, %s3384_s8 }
  0x2c   : > { %v241_v0 = vld [vmem:[%s4011_s15] sm:$0xff]  ;;  %v243_v1 = vld [vmem:[%s4011_s15 + $0x8] sm:$0xff]  ;;  %v245_v2 = vld [vmem:[%s4011_s15 + $0x10] sm:$0xff] }
  0x2d   : > { %242 = vst [vmem:[%s222_s29] sm:$0xff] %v241_v0  ;;  %244 = vst [vmem:[%s222_s29 + $0x8] sm:$0xff] %v243_v1  ;;  %v247_v3 = vld [vmem:[%s4011_s15 + $0x18] sm:$0xff]  ;;  %v249_v4 = vld [vmem:[%s4011_s15 + $0x20] sm:$0xff] }
  0x2e   : > { %246 = vst [vmem:[%s222_s29 + $0x10] sm:$0xff] %v245_v2  ;;  %v251_v5 = vld [vmem:[%s4011_s15 + $0x28] sm:$0xff]  ;;  %248 = vst [vmem:[%s222_s29 + $0x18] sm:$0xff] %v247_v3  ;;  %v253_v6 = vld [vmem:[%s4011_s15 + $0x30] sm:$0xff] }
  0x2f   : > { %250 = vst [vmem:[%s222_s29 + $0x20] sm:$0xff] %v249_v4  ;;  %252 = vst [vmem:[%s222_s29 + $0x28] sm:$0xff] %v251_v5  ;;  %v255_v7 = vld [vmem:[%s4011_s15 + $0x38] sm:$0xff]  ;;  %v257_v8 = vld [vmem:[%s4011_s15 + $0xc0] sm:$0xff] }
  0x30   : > { %254 = vst [vmem:[%s222_s29 + $0x30] sm:$0xff] %v253_v6  ;;  %256 = vst [vmem:[%s222_s29 + $0x38] sm:$0xff] %v255_v7  ;;  %v259_v9 = vld [vmem:[%s4011_s15 + $0xc8] sm:$0xff]  ;;  %v261_v10 = vld [vmem:[%s4011_s15 + $0xd0] sm:$0xff] }
  0x31   : > { %258 = vst [vmem:[%s222_s29 + $0x40] sm:$0xff] %v257_v8  ;;  %v263_v11 = vld [vmem:[%s4011_s15 + $0xd8] sm:$0xff]  ;;  %260 = vst [vmem:[%s222_s29 + $0x48] sm:$0xff] %v259_v9  ;;  %v265_v12 = vld [vmem:[%s4011_s15 + $0xe0] sm:$0xff] }
  0x32   : > { %262 = vst [vmem:[%s222_s29 + $0x50] sm:$0xff] %v261_v10  ;;  %264 = vst [vmem:[%s222_s29 + $0x58] sm:$0xff] %v263_v11  ;;  %v267_v13 = vld [vmem:[%s4011_s15 + $0xe8] sm:$0xff]  ;;  %v269_v14 = vld [vmem:[%s4011_s15 + $0xf0] sm:$0xff] }
  0x33   : > { %266 = vst [vmem:[%s222_s29 + $0x60] sm:$0xff] %v265_v12  ;;  %268 = vst [vmem:[%s222_s29 + $0x68] sm:$0xff] %v267_v13  ;;  %v271_v15 = vld [vmem:[%s4011_s15 + $0xf8] sm:$0xff] }
  0x34   : > { %270 = vst [vmem:[%s222_s29 + $0x70] sm:$0xff] %v269_v14  ;;  %272 = vst [vmem:[%s222_s29 + $0x78] sm:$0xff] %v271_v15 }
  0x35 PF: > { %278 = sbr.rel (!%p3986_p9) target bundleno = 233 (0xe9), region = 43  ;;  %s280_s9 = sand.u32 (%p3986_p9), 1, %s3844_s21  }
  0x36   : > { %s3385_s7 = sshll.u32 (%p3986_p9), %s3864_s26, 9  ;;  %s3221_s8 = sshll.u32 (%p3986_p9), %s280_s9, 10 }
  0x37   : > { %s285_s12 = sadd.s32 (%p3986_p9), %s3868_s27, %s3385_s7  ;;  %s4798_s1 = sld [smem:[#allocation11_spill]] (%p3986_p9) }
  0x38   : > { %s3224_s10 = sshll.u32 (%p3986_p9), %s285_s12, 2  ;;  %s4042_s14 = scalar_lea.vmem (%p3986_p9), [#allocation4], %s3221_s8 }
  0x3d   : > { %s4037_s6 = scalar_lea.vmem %s4798_s1, %s3224_s10 }
  0x3e   : > { %v303_v16 = vld [vmem:[%s4037_s6] sm:$0xf]  ;;  %v305_v17 = vld [vmem:[%s4037_s6 + $0x8] sm:$0xf]  ;;  %v307_v18 = vld [vmem:[%s4037_s6 + $0x10] sm:$0xf] }
  0x3f   : > { %304 = vst [vmem:[%s4042_s14] sm:$0xf] %v303_v16  ;;  %306 = vst [vmem:[%s4042_s14 + $0x4] sm:$0xf] %v305_v17  ;;  %v309_v19 = vld [vmem:[%s4037_s6 + $0x18] sm:$0xf] }
  0x40   : > { %308 = vst [vmem:[%s4042_s14 + $0x8] sm:$0xf] %v307_v18  ;;  %v311_v20 = vld [vmem:[%s4037_s6 + $0x20] sm:$0xf]  ;;  %v313_v21 = vld [vmem:[%s4037_s6 + $0x28] sm:$0xf] }
  0x41   : > { %310 = vst [vmem:[%s4042_s14 + $0xc] sm:$0xf] %v309_v19  ;;  %312 = vst [vmem:[%s4042_s14 + $0x10] sm:$0xf] %v311_v20  ;;  %v315_v22 = vld [vmem:[%s4037_s6 + $0x30] sm:$0xf] }
  0x42   : > { %314 = vst [vmem:[%s4042_s14 + $0x14] sm:$0xf] %v313_v21  ;;  %v317_v23 = vld [vmem:[%s4037_s6 + $0x38] sm:$0xf]  ;;  %v319_v24 = vld [vmem:[%s4037_s6 + $0x40] sm:$0xf] }
  0x43   : > { %316 = vst [vmem:[%s4042_s14 + $0x18] sm:$0xf] %v315_v22  ;;  %318 = vst [vmem:[%s4042_s14 + $0x1c] sm:$0xf] %v317_v23  ;;  %v321_v25 = vld [vmem:[%s4037_s6 + $0x48] sm:$0xf] }
  0x44   : > { %320 = vst [vmem:[%s4042_s14 + $0x20] sm:$0xf] %v319_v24  ;;  %v323_v26 = vld [vmem:[%s4037_s6 + $0x50] sm:$0xf]  ;;  %v325_v27 = vld [vmem:[%s4037_s6 + $0x58] sm:$0xf] }
  0x45   : > { %322 = vst [vmem:[%s4042_s14 + $0x24] sm:$0xf] %v321_v25  ;;  %324 = vst [vmem:[%s4042_s14 + $0x28] sm:$0xf] %v323_v26  ;;  %v327_v28 = vld [vmem:[%s4037_s6 + $0x60] sm:$0xf] }
  0x46   : > { %326 = vst [vmem:[%s4042_s14 + $0x2c] sm:$0xf] %v325_v27  ;;  %v329_v29 = vld [vmem:[%s4037_s6 + $0x68] sm:$0xf]  ;;  %v331_v30 = vld [vmem:[%s4037_s6 + $0x70] sm:$0xf] }
  0x47   : > { %328 = vst [vmem:[%s4042_s14 + $0x30] sm:$0xf] %v327_v28  ;;  %330 = vst [vmem:[%s4042_s14 + $0x34] sm:$0xf] %v329_v29  ;;  %v333_v31 = vld [vmem:[%s4037_s6 + $0x78] sm:$0xf] }
  0x48   : > { %332 = vst [vmem:[%s4042_s14 + $0x38] sm:$0xf] %v331_v30  ;;  %v335_v32 = vld [vmem:[%s4037_s6 + $0x80] sm:$0xf]  ;;  %v337_v33 = vld [vmem:[%s4037_s6 + $0x88] sm:$0xf] }
  0x49   : > { %334 = vst [vmem:[%s4042_s14 + $0x3c] sm:$0xf] %v333_v31  ;;  %336 = vst [vmem:[%s4042_s14 + $0x40] sm:$0xf] %v335_v32  ;;  %v339_v34 = vld [vmem:[%s4037_s6 + $0x90] sm:$0xf] }
  0x4a   : > { %338 = vst [vmem:[%s4042_s14 + $0x44] sm:$0xf] %v337_v33  ;;  %v341_v35 = vld [vmem:[%s4037_s6 + $0x98] sm:$0xf]  ;;  %v343_v36 = vld [vmem:[%s4037_s6 + $0xa0] sm:$0xf] }
  0x4b   : > { %340 = vst [vmem:[%s4042_s14 + $0x48] sm:$0xf] %v339_v34  ;;  %342 = vst [vmem:[%s4042_s14 + $0x4c] sm:$0xf] %v341_v35  ;;  %v345_v37 = vld [vmem:[%s4037_s6 + $0xa8] sm:$0xf] }
  0x4c   : > { %344 = vst [vmem:[%s4042_s14 + $0x50] sm:$0xf] %v343_v36  ;;  %v347_v38 = vld [vmem:[%s4037_s6 + $0xb0] sm:$0xf]  ;;  %v349_v39 = vld [vmem:[%s4037_s6 + $0xb8] sm:$0xf] }
  0x4d   : > { %346 = vst [vmem:[%s4042_s14 + $0x54] sm:$0xf] %v345_v37  ;;  %348 = vst [vmem:[%s4042_s14 + $0x58] sm:$0xf] %v347_v38  ;;  %v351_v40 = vld [vmem:[%s4037_s6 + $0xc0] sm:$0xf] }
  0x4e   : > { %350 = vst [vmem:[%s4042_s14 + $0x5c] sm:$0xf] %v349_v39  ;;  %v353_v41 = vld [vmem:[%s4037_s6 + $0xc8] sm:$0xf]  ;;  %v355_v42 = vld [vmem:[%s4037_s6 + $0xd0] sm:$0xf] }
  0x4f   : > { %352 = vst [vmem:[%s4042_s14 + $0x60] sm:$0xf] %v351_v40  ;;  %354 = vst [vmem:[%s4042_s14 + $0x64] sm:$0xf] %v353_v41  ;;  %v357_v43 = vld [vmem:[%s4037_s6 + $0xd8] sm:$0xf] }
  0x50   : > { %356 = vst [vmem:[%s4042_s14 + $0x68] sm:$0xf] %v355_v42  ;;  %v359_v44 = vld [vmem:[%s4037_s6 + $0xe0] sm:$0xf]  ;;  %v361_v45 = vld [vmem:[%s4037_s6 + $0xe8] sm:$0xf] }
  0x51   : > { %358 = vst [vmem:[%s4042_s14 + $0x6c] sm:$0xf] %v357_v43  ;;  %360 = vst [vmem:[%s4042_s14 + $0x70] sm:$0xf] %v359_v44  ;;  %v363_v46 = vld [vmem:[%s4037_s6 + $0xf0] sm:$0xf] }
  0x52   : > { %362 = vst [vmem:[%s4042_s14 + $0x74] sm:$0xf] %v361_v45  ;;  %v365_v47 = vld [vmem:[%s4037_s6 + $0xf8] sm:$0xf]  ;;  %v367_v48 = vld [vmem:[%s4037_s6 + $0x100] sm:$0xf] }
  0x53   : > { %364 = vst [vmem:[%s4042_s14 + $0x78] sm:$0xf] %v363_v46  ;;  %366 = vst [vmem:[%s4042_s14 + $0x7c] sm:$0xf] %v365_v47  ;;  %v369_v49 = vld [vmem:[%s4037_s6 + $0x108] sm:$0xf] }
  0x54   : > { %368 = vst [vmem:[%s4042_s14 + $0x80] sm:$0xf] %v367_v48  ;;  %v371_v50 = vld [vmem:[%s4037_s6 + $0x110] sm:$0xf]  ;;  %v373_v51 = vld [vmem:[%s4037_s6 + $0x118] sm:$0xf] }
  0x55   : > { %370 = vst [vmem:[%s4042_s14 + $0x84] sm:$0xf] %v369_v49  ;;  %372 = vst [vmem:[%s4042_s14 + $0x88] sm:$0xf] %v371_v50  ;;  %v375_v52 = vld [vmem:[%s4037_s6 + $0x120] sm:$0xf] }
  0x56   : > { %374 = vst [vmem:[%s4042_s14 + $0x8c] sm:$0xf] %v373_v51  ;;  %v377_v53 = vld [vmem:[%s4037_s6 + $0x128] sm:$0xf]  ;;  %v379_v54 = vld [vmem:[%s4037_s6 + $0x130] sm:$0xf] }
  0x57   : > { %376 = vst [vmem:[%s4042_s14 + $0x90] sm:$0xf] %v375_v52  ;;  %378 = vst [vmem:[%s4042_s14 + $0x94] sm:$0xf] %v377_v53  ;;  %v381_v55 = vld [vmem:[%s4037_s6 + $0x138] sm:$0xf] }
  0x58   : > { %380 = vst [vmem:[%s4042_s14 + $0x98] sm:$0xf] %v379_v54  ;;  %v383_v56 = vld [vmem:[%s4037_s6 + $0x140] sm:$0xf]  ;;  %v385_v57 = vld [vmem:[%s4037_s6 + $0x148] sm:$0xf] }
  0x59   : > { %382 = vst [vmem:[%s4042_s14 + $0x9c] sm:$0xf] %v381_v55  ;;  %384 = vst [vmem:[%s4042_s14 + $0xa0] sm:$0xf] %v383_v56  ;;  %v387_v58 = vld [vmem:[%s4037_s6 + $0x150] sm:$0xf] }
  0x5a   : > { %386 = vst [vmem:[%s4042_s14 + $0xa4] sm:$0xf] %v385_v57  ;;  %v389_v59 = vld [vmem:[%s4037_s6 + $0x158] sm:$0xf]  ;;  %v391_v60 = vld [vmem:[%s4037_s6 + $0x160] sm:$0xf] }
  0x5b   : > { %388 = vst [vmem:[%s4042_s14 + $0xa8] sm:$0xf] %v387_v58  ;;  %390 = vst [vmem:[%s4042_s14 + $0xac] sm:$0xf] %v389_v59  ;;  %v393_v61 = vld [vmem:[%s4037_s6 + $0x168] sm:$0xf] }
  0x5c   : > { %392 = vst [vmem:[%s4042_s14 + $0xb0] sm:$0xf] %v391_v60  ;;  %v395_v62 = vld [vmem:[%s4037_s6 + $0x170] sm:$0xf]  ;;  %v397_v63 = vld [vmem:[%s4037_s6 + $0x178] sm:$0xf] }
  0x5d   : > { %394 = vst [vmem:[%s4042_s14 + $0xb4] sm:$0xf] %v393_v61  ;;  %396 = vst [vmem:[%s4042_s14 + $0xb8] sm:$0xf] %v395_v62  ;;  %v399_v0 = vld [vmem:[%s4037_s6 + $0x180] sm:$0xf] }
  0x5e   : > { %398 = vst [vmem:[%s4042_s14 + $0xbc] sm:$0xf] %v397_v63  ;;  %v401_v1 = vld [vmem:[%s4037_s6 + $0x188] sm:$0xf]  ;;  %v403_v2 = vld [vmem:[%s4037_s6 + $0x190] sm:$0xf] }
  0x5f   : > { %400 = vst [vmem:[%s4042_s14 + $0xc0] sm:$0xf] %v399_v0  ;;  %402 = vst [vmem:[%s4042_s14 + $0xc4] sm:$0xf] %v401_v1  ;;  %v405_v3 = vld [vmem:[%s4037_s6 + $0x198] sm:$0xf] }
  0x60   : > { %404 = vst [vmem:[%s4042_s14 + $0xc8] sm:$0xf] %v403_v2  ;;  %v407_v4 = vld [vmem:[%s4037_s6 + $0x1a0] sm:$0xf]  ;;  %v409_v5 = vld [vmem:[%s4037_s6 + $0x1a8] sm:$0xf] }
  0x61   : > { %406 = vst [vmem:[%s4042_s14 + $0xcc] sm:$0xf] %v405_v3  ;;  %408 = vst [vmem:[%s4042_s14 + $0xd0] sm:$0xf] %v407_v4  ;;  %v411_v6 = vld [vmem:[%s4037_s6 + $0x1b0] sm:$0xf] }
  0x62   : > { %410 = vst [vmem:[%s4042_s14 + $0xd4] sm:$0xf] %v409_v5  ;;  %v413_v7 = vld [vmem:[%s4037_s6 + $0x1b8] sm:$0xf]  ;;  %v415_v8 = vld [vmem:[%s4037_s6 + $0x1c0] sm:$0xf] }
  0x63   : > { %412 = vst [vmem:[%s4042_s14 + $0xd8] sm:$0xf] %v411_v6  ;;  %414 = vst [vmem:[%s4042_s14 + $0xdc] sm:$0xf] %v413_v7  ;;  %v417_v9 = vld [vmem:[%s4037_s6 + $0x1c8] sm:$0xf] }
  0x64   : > { %416 = vst [vmem:[%s4042_s14 + $0xe0] sm:$0xf] %v415_v8  ;;  %v419_v10 = vld [vmem:[%s4037_s6 + $0x1d0] sm:$0xf]  ;;  %v421_v11 = vld [vmem:[%s4037_s6 + $0x1d8] sm:$0xf] }
  0x65   : > { %418 = vst [vmem:[%s4042_s14 + $0xe4] sm:$0xf] %v417_v9  ;;  %420 = vst [vmem:[%s4042_s14 + $0xe8] sm:$0xf] %v419_v10  ;;  %v423_v12 = vld [vmem:[%s4037_s6 + $0x1e0] sm:$0xf] }
  0x66   : > { %422 = vst [vmem:[%s4042_s14 + $0xec] sm:$0xf] %v421_v11  ;;  %v425_v13 = vld [vmem:[%s4037_s6 + $0x1e8] sm:$0xf]  ;;  %v427_v14 = vld [vmem:[%s4037_s6 + $0x1f0] sm:$0xf] }
  0x67   : > { %424 = vst [vmem:[%s4042_s14 + $0xf0] sm:$0xf] %v423_v12  ;;  %426 = vst [vmem:[%s4042_s14 + $0xf4] sm:$0xf] %v425_v13  ;;  %v429_v15 = vld [vmem:[%s4037_s6 + $0x1f8] sm:$0xf] }
  0x68   : > { %428 = vst [vmem:[%s4042_s14 + $0xf8] sm:$0xf] %v427_v14  ;;  %v431_v16 = vld [vmem:[%s4037_s6 + $0x200] sm:$0xf]  ;;  %v433_v17 = vld [vmem:[%s4037_s6 + $0x208] sm:$0xf] }
  0x69   : > { %430 = vst [vmem:[%s4042_s14 + $0xfc] sm:$0xf] %v429_v15  ;;  %432 = vst [vmem:[%s4042_s14 + $0x100] sm:$0xf] %v431_v16  ;;  %v435_v18 = vld [vmem:[%s4037_s6 + $0x210] sm:$0xf] }
  0x6a   : > { %434 = vst [vmem:[%s4042_s14 + $0x104] sm:$0xf] %v433_v17  ;;  %v437_v19 = vld [vmem:[%s4037_s6 + $0x218] sm:$0xf]  ;;  %v439_v20 = vld [vmem:[%s4037_s6 + $0x220] sm:$0xf] }
  0x6b   : > { %436 = vst [vmem:[%s4042_s14 + $0x108] sm:$0xf] %v435_v18  ;;  %438 = vst [vmem:[%s4042_s14 + $0x10c] sm:$0xf] %v437_v19  ;;  %v441_v21 = vld [vmem:[%s4037_s6 + $0x228] sm:$0xf] }
  0x6c   : > { %440 = vst [vmem:[%s4042_s14 + $0x110] sm:$0xf] %v439_v20  ;;  %v443_v22 = vld [vmem:[%s4037_s6 + $0x230] sm:$0xf]  ;;  %v445_v23 = vld [vmem:[%s4037_s6 + $0x238] sm:$0xf] }
  0x6d   : > { %442 = vst [vmem:[%s4042_s14 + $0x114] sm:$0xf] %v441_v21  ;;  %444 = vst [vmem:[%s4042_s14 + $0x118] sm:$0xf] %v443_v22  ;;  %v447_v24 = vld [vmem:[%s4037_s6 + $0x240] sm:$0xf] }
  0x6e   : > { %446 = vst [vmem:[%s4042_s14 + $0x11c] sm:$0xf] %v445_v23  ;;  %v449_v25 = vld [vmem:[%s4037_s6 + $0x248] sm:$0xf]  ;;  %v451_v26 = vld [vmem:[%s4037_s6 + $0x250] sm:$0xf] }
  0x6f   : > { %448 = vst [vmem:[%s4042_s14 + $0x120] sm:$0xf] %v447_v24  ;;  %450 = vst [vmem:[%s4042_s14 + $0x124] sm:$0xf] %v449_v25  ;;  %v453_v27 = vld [vmem:[%s4037_s6 + $0x258] sm:$0xf] }
  0x70   : > { %452 = vst [vmem:[%s4042_s14 + $0x128] sm:$0xf] %v451_v26  ;;  %v455_v28 = vld [vmem:[%s4037_s6 + $0x260] sm:$0xf]  ;;  %v457_v29 = vld [vmem:[%s4037_s6 + $0x268] sm:$0xf] }
  0x71   : > { %454 = vst [vmem:[%s4042_s14 + $0x12c] sm:$0xf] %v453_v27  ;;  %456 = vst [vmem:[%s4042_s14 + $0x130] sm:$0xf] %v455_v28  ;;  %v459_v30 = vld [vmem:[%s4037_s6 + $0x270] sm:$0xf] }
  0x72   : > { %458 = vst [vmem:[%s4042_s14 + $0x134] sm:$0xf] %v457_v29  ;;  %v461_v31 = vld [vmem:[%s4037_s6 + $0x278] sm:$0xf]  ;;  %v463_v32 = vld [vmem:[%s4037_s6 + $0x280] sm:$0xf] }
  0x73   : > { %460 = vst [vmem:[%s4042_s14 + $0x138] sm:$0xf] %v459_v30  ;;  %462 = vst [vmem:[%s4042_s14 + $0x13c] sm:$0xf] %v461_v31  ;;  %v465_v33 = vld [vmem:[%s4037_s6 + $0x288] sm:$0xf] }
  0x74   : > { %464 = vst [vmem:[%s4042_s14 + $0x140] sm:$0xf] %v463_v32  ;;  %v467_v34 = vld [vmem:[%s4037_s6 + $0x290] sm:$0xf]  ;;  %v469_v35 = vld [vmem:[%s4037_s6 + $0x298] sm:$0xf] }
  0x75   : > { %466 = vst [vmem:[%s4042_s14 + $0x144] sm:$0xf] %v465_v33  ;;  %468 = vst [vmem:[%s4042_s14 + $0x148] sm:$0xf] %v467_v34  ;;  %v471_v36 = vld [vmem:[%s4037_s6 + $0x2a0] sm:$0xf] }
  0x76   : > { %470 = vst [vmem:[%s4042_s14 + $0x14c] sm:$0xf] %v469_v35  ;;  %v473_v37 = vld [vmem:[%s4037_s6 + $0x2a8] sm:$0xf]  ;;  %v475_v38 = vld [vmem:[%s4037_s6 + $0x2b0] sm:$0xf] }
  0x77   : > { %472 = vst [vmem:[%s4042_s14 + $0x150] sm:$0xf] %v471_v36  ;;  %474 = vst [vmem:[%s4042_s14 + $0x154] sm:$0xf] %v473_v37  ;;  %v477_v39 = vld [vmem:[%s4037_s6 + $0x2b8] sm:$0xf] }
  0x78   : > { %476 = vst [vmem:[%s4042_s14 + $0x158] sm:$0xf] %v475_v38  ;;  %v479_v40 = vld [vmem:[%s4037_s6 + $0x2c0] sm:$0xf]  ;;  %v481_v41 = vld [vmem:[%s4037_s6 + $0x2c8] sm:$0xf] }
  0x79   : > { %478 = vst [vmem:[%s4042_s14 + $0x15c] sm:$0xf] %v477_v39  ;;  %480 = vst [vmem:[%s4042_s14 + $0x160] sm:$0xf] %v479_v40  ;;  %v483_v42 = vld [vmem:[%s4037_s6 + $0x2d0] sm:$0xf] }
  0x7a   : > { %482 = vst [vmem:[%s4042_s14 + $0x164] sm:$0xf] %v481_v41  ;;  %v485_v43 = vld [vmem:[%s4037_s6 + $0x2d8] sm:$0xf]  ;;  %v487_v44 = vld [vmem:[%s4037_s6 + $0x2e0] sm:$0xf] }
  0x7b   : > { %484 = vst [vmem:[%s4042_s14 + $0x168] sm:$0xf] %v483_v42  ;;  %486 = vst [vmem:[%s4042_s14 + $0x16c] sm:$0xf] %v485_v43  ;;  %v489_v45 = vld [vmem:[%s4037_s6 + $0x2e8] sm:$0xf] }
  0x7c   : > { %488 = vst [vmem:[%s4042_s14 + $0x170] sm:$0xf] %v487_v44  ;;  %v491_v46 = vld [vmem:[%s4037_s6 + $0x2f0] sm:$0xf]  ;;  %v493_v47 = vld [vmem:[%s4037_s6 + $0x2f8] sm:$0xf] }
  0x7d   : > { %490 = vst [vmem:[%s4042_s14 + $0x174] sm:$0xf] %v489_v45  ;;  %492 = vst [vmem:[%s4042_s14 + $0x178] sm:$0xf] %v491_v46  ;;  %v495_v48 = vld [vmem:[%s4037_s6 + $0x300] sm:$0xf] }
  0x7e   : > { %494 = vst [vmem:[%s4042_s14 + $0x17c] sm:$0xf] %v493_v47  ;;  %v497_v49 = vld [vmem:[%s4037_s6 + $0x308] sm:$0xf]  ;;  %v499_v50 = vld [vmem:[%s4037_s6 + $0x310] sm:$0xf] }
  0x7f   : > { %496 = vst [vmem:[%s4042_s14 + $0x180] sm:$0xf] %v495_v48  ;;  %498 = vst [vmem:[%s4042_s14 + $0x184] sm:$0xf] %v497_v49  ;;  %v501_v51 = vld [vmem:[%s4037_s6 + $0x318] sm:$0xf] }
  0x80   : > { %500 = vst [vmem:[%s4042_s14 + $0x188] sm:$0xf] %v499_v50  ;;  %v503_v52 = vld [vmem:[%s4037_s6 + $0x320] sm:$0xf]  ;;  %v505_v53 = vld [vmem:[%s4037_s6 + $0x328] sm:$0xf] }
  0x81   : > { %502 = vst [vmem:[%s4042_s14 + $0x18c] sm:$0xf] %v501_v51  ;;  %504 = vst [vmem:[%s4042_s14 + $0x190] sm:$0xf] %v503_v52  ;;  %v507_v54 = vld [vmem:[%s4037_s6 + $0x330] sm:$0xf] }
  0x82   : > { %506 = vst [vmem:[%s4042_s14 + $0x194] sm:$0xf] %v505_v53  ;;  %v509_v55 = vld [vmem:[%s4037_s6 + $0x338] sm:$0xf]  ;;  %v511_v56 = vld [vmem:[%s4037_s6 + $0x340] sm:$0xf] }
  0x83   : > { %508 = vst [vmem:[%s4042_s14 + $0x198] sm:$0xf] %v507_v54  ;;  %510 = vst [vmem:[%s4042_s14 + $0x19c] sm:$0xf] %v509_v55  ;;  %v513_v57 = vld [vmem:[%s4037_s6 + $0x348] sm:$0xf] }
  0x84   : > { %512 = vst [vmem:[%s4042_s14 + $0x1a0] sm:$0xf] %v511_v56  ;;  %v515_v58 = vld [vmem:[%s4037_s6 + $0x350] sm:$0xf]  ;;  %v517_v59 = vld [vmem:[%s4037_s6 + $0x358] sm:$0xf] }
  0x85   : > { %514 = vst [vmem:[%s4042_s14 + $0x1a4] sm:$0xf] %v513_v57  ;;  %516 = vst [vmem:[%s4042_s14 + $0x1a8] sm:$0xf] %v515_v58  ;;  %v519_v60 = vld [vmem:[%s4037_s6 + $0x360] sm:$0xf] }
  0x86   : > { %518 = vst [vmem:[%s4042_s14 + $0x1ac] sm:$0xf] %v517_v59  ;;  %v521_v61 = vld [vmem:[%s4037_s6 + $0x368] sm:$0xf]  ;;  %v523_v62 = vld [vmem:[%s4037_s6 + $0x370] sm:$0xf] }
  0x87   : > { %520 = vst [vmem:[%s4042_s14 + $0x1b0] sm:$0xf] %v519_v60  ;;  %522 = vst [vmem:[%s4042_s14 + $0x1b4] sm:$0xf] %v521_v61  ;;  %v525_v63 = vld [vmem:[%s4037_s6 + $0x378] sm:$0xf] }
  0x88   : > { %524 = vst [vmem:[%s4042_s14 + $0x1b8] sm:$0xf] %v523_v62  ;;  %v527_v0 = vld [vmem:[%s4037_s6 + $0x380] sm:$0xf]  ;;  %v529_v1 = vld [vmem:[%s4037_s6 + $0x388] sm:$0xf] }
  0x89   : > { %526 = vst [vmem:[%s4042_s14 + $0x1bc] sm:$0xf] %v525_v63  ;;  %528 = vst [vmem:[%s4042_s14 + $0x1c0] sm:$0xf] %v527_v0  ;;  %v531_v2 = vld [vmem:[%s4037_s6 + $0x390] sm:$0xf] }
  0x8a   : > { %530 = vst [vmem:[%s4042_s14 + $0x1c4] sm:$0xf] %v529_v1  ;;  %v533_v3 = vld [vmem:[%s4037_s6 + $0x398] sm:$0xf]  ;;  %v535_v4 = vld [vmem:[%s4037_s6 + $0x3a0] sm:$0xf] }
  0x8b   : > { %532 = vst [vmem:[%s4042_s14 + $0x1c8] sm:$0xf] %v531_v2  ;;  %534 = vst [vmem:[%s4042_s14 + $0x1cc] sm:$0xf] %v533_v3  ;;  %v537_v5 = vld [vmem:[%s4037_s6 + $0x3a8] sm:$0xf] }
  0x8c   : > { %536 = vst [vmem:[%s4042_s14 + $0x1d0] sm:$0xf] %v535_v4  ;;  %v539_v6 = vld [vmem:[%s4037_s6 + $0x3b0] sm:$0xf]  ;;  %v541_v7 = vld [vmem:[%s4037_s6 + $0x3b8] sm:$0xf] }
  0x8d   : > { %538 = vst [vmem:[%s4042_s14 + $0x1d4] sm:$0xf] %v537_v5  ;;  %540 = vst [vmem:[%s4042_s14 + $0x1d8] sm:$0xf] %v539_v6  ;;  %v543_v8 = vld [vmem:[%s4037_s6 + $0x3c0] sm:$0xf] }
  0x8e   : > { %542 = vst [vmem:[%s4042_s14 + $0x1dc] sm:$0xf] %v541_v7  ;;  %v545_v9 = vld [vmem:[%s4037_s6 + $0x3c8] sm:$0xf]  ;;  %v547_v10 = vld [vmem:[%s4037_s6 + $0x3d0] sm:$0xf] }
  0x8f   : > { %544 = vst [vmem:[%s4042_s14 + $0x1e0] sm:$0xf] %v543_v8  ;;  %546 = vst [vmem:[%s4042_s14 + $0x1e4] sm:$0xf] %v545_v9  ;;  %v549_v11 = vld [vmem:[%s4037_s6 + $0x3d8] sm:$0xf] }
  0x90   : > { %548 = vst [vmem:[%s4042_s14 + $0x1e8] sm:$0xf] %v547_v10  ;;  %v551_v12 = vld [vmem:[%s4037_s6 + $0x3e0] sm:$0xf]  ;;  %v553_v13 = vld [vmem:[%s4037_s6 + $0x3e8] sm:$0xf] }
  0x91   : > { %550 = vst [vmem:[%s4042_s14 + $0x1ec] sm:$0xf] %v549_v11  ;;  %552 = vst [vmem:[%s4042_s14 + $0x1f0] sm:$0xf] %v551_v12  ;;  %v555_v14 = vld [vmem:[%s4037_s6 + $0x3f0] sm:$0xf] }
  0x92   : > { %554 = vst [vmem:[%s4042_s14 + $0x1f4] sm:$0xf] %v553_v13  ;;  %v557_v15 = vld [vmem:[%s4037_s6 + $0x3f8] sm:$0xf]  ;;  %v559_v16 = vld [vmem:[%s4037_s6 + $0x400] sm:$0xf] }
  0x93   : > { %556 = vst [vmem:[%s4042_s14 + $0x1f8] sm:$0xf] %v555_v14  ;;  %558 = vst [vmem:[%s4042_s14 + $0x1fc] sm:$0xf] %v557_v15  ;;  %v561_v17 = vld [vmem:[%s4037_s6 + $0x408] sm:$0xf] }
  0x94   : > { %560 = vst [vmem:[%s4042_s14 + $0x200] sm:$0xf] %v559_v16  ;;  %v563_v18 = vld [vmem:[%s4037_s6 + $0x410] sm:$0xf]  ;;  %v565_v19 = vld [vmem:[%s4037_s6 + $0x418] sm:$0xf] }
  0x95   : > { %562 = vst [vmem:[%s4042_s14 + $0x204] sm:$0xf] %v561_v17  ;;  %564 = vst [vmem:[%s4042_s14 + $0x208] sm:$0xf] %v563_v18  ;;  %v567_v20 = vld [vmem:[%s4037_s6 + $0x420] sm:$0xf] }
  0x96   : > { %566 = vst [vmem:[%s4042_s14 + $0x20c] sm:$0xf] %v565_v19  ;;  %v569_v21 = vld [vmem:[%s4037_s6 + $0x428] sm:$0xf]  ;;  %v571_v22 = vld [vmem:[%s4037_s6 + $0x430] sm:$0xf] }
  0x97   : > { %568 = vst [vmem:[%s4042_s14 + $0x210] sm:$0xf] %v567_v20  ;;  %570 = vst [vmem:[%s4042_s14 + $0x214] sm:$0xf] %v569_v21  ;;  %v573_v23 = vld [vmem:[%s4037_s6 + $0x438] sm:$0xf] }
  0x98   : > { %572 = vst [vmem:[%s4042_s14 + $0x218] sm:$0xf] %v571_v22  ;;  %v575_v24 = vld [vmem:[%s4037_s6 + $0x440] sm:$0xf]  ;;  %v577_v25 = vld [vmem:[%s4037_s6 + $0x448] sm:$0xf] }
  0x99   : > { %574 = vst [vmem:[%s4042_s14 + $0x21c] sm:$0xf] %v573_v23  ;;  %576 = vst [vmem:[%s4042_s14 + $0x220] sm:$0xf] %v575_v24  ;;  %v579_v26 = vld [vmem:[%s4037_s6 + $0x450] sm:$0xf] }
  0x9a   : > { %578 = vst [vmem:[%s4042_s14 + $0x224] sm:$0xf] %v577_v25  ;;  %v581_v27 = vld [vmem:[%s4037_s6 + $0x458] sm:$0xf]  ;;  %v583_v28 = vld [vmem:[%s4037_s6 + $0x460] sm:$0xf] }
  0x9b   : > { %580 = vst [vmem:[%s4042_s14 + $0x228] sm:$0xf] %v579_v26  ;;  %582 = vst [vmem:[%s4042_s14 + $0x22c] sm:$0xf] %v581_v27  ;;  %v585_v29 = vld [vmem:[%s4037_s6 + $0x468] sm:$0xf] }
  0x9c   : > { %584 = vst [vmem:[%s4042_s14 + $0x230] sm:$0xf] %v583_v28  ;;  %v587_v30 = vld [vmem:[%s4037_s6 + $0x470] sm:$0xf]  ;;  %v589_v31 = vld [vmem:[%s4037_s6 + $0x478] sm:$0xf] }
  0x9d   : > { %586 = vst [vmem:[%s4042_s14 + $0x234] sm:$0xf] %v585_v29  ;;  %588 = vst [vmem:[%s4042_s14 + $0x238] sm:$0xf] %v587_v30  ;;  %v591_v32 = vld [vmem:[%s4037_s6 + $0x480] sm:$0xf] }
  0x9e   : > { %590 = vst [vmem:[%s4042_s14 + $0x23c] sm:$0xf] %v589_v31  ;;  %v593_v33 = vld [vmem:[%s4037_s6 + $0x488] sm:$0xf]  ;;  %v595_v34 = vld [vmem:[%s4037_s6 + $0x490] sm:$0xf] }
  0x9f   : > { %592 = vst [vmem:[%s4042_s14 + $0x240] sm:$0xf] %v591_v32  ;;  %594 = vst [vmem:[%s4042_s14 + $0x244] sm:$0xf] %v593_v33  ;;  %v597_v35 = vld [vmem:[%s4037_s6 + $0x498] sm:$0xf] }
  0xa0   : > { %596 = vst [vmem:[%s4042_s14 + $0x248] sm:$0xf] %v595_v34  ;;  %v599_v36 = vld [vmem:[%s4037_s6 + $0x4a0] sm:$0xf]  ;;  %v601_v37 = vld [vmem:[%s4037_s6 + $0x4a8] sm:$0xf] }
  0xa1   : > { %598 = vst [vmem:[%s4042_s14 + $0x24c] sm:$0xf] %v597_v35  ;;  %600 = vst [vmem:[%s4042_s14 + $0x250] sm:$0xf] %v599_v36  ;;  %v603_v38 = vld [vmem:[%s4037_s6 + $0x4b0] sm:$0xf] }
  0xa2   : > { %602 = vst [vmem:[%s4042_s14 + $0x254] sm:$0xf] %v601_v37  ;;  %v605_v39 = vld [vmem:[%s4037_s6 + $0x4b8] sm:$0xf]  ;;  %v607_v40 = vld [vmem:[%s4037_s6 + $0x4c0] sm:$0xf] }
  0xa3   : > { %604 = vst [vmem:[%s4042_s14 + $0x258] sm:$0xf] %v603_v38  ;;  %606 = vst [vmem:[%s4042_s14 + $0x25c] sm:$0xf] %v605_v39  ;;  %v609_v41 = vld [vmem:[%s4037_s6 + $0x4c8] sm:$0xf] }
  0xa4   : > { %608 = vst [vmem:[%s4042_s14 + $0x260] sm:$0xf] %v607_v40  ;;  %v611_v42 = vld [vmem:[%s4037_s6 + $0x4d0] sm:$0xf]  ;;  %v613_v43 = vld [vmem:[%s4037_s6 + $0x4d8] sm:$0xf] }
  0xa5   : > { %610 = vst [vmem:[%s4042_s14 + $0x264] sm:$0xf] %v609_v41  ;;  %612 = vst [vmem:[%s4042_s14 + $0x268] sm:$0xf] %v611_v42  ;;  %v615_v44 = vld [vmem:[%s4037_s6 + $0x4e0] sm:$0xf] }
  0xa6   : > { %614 = vst [vmem:[%s4042_s14 + $0x26c] sm:$0xf] %v613_v43  ;;  %v617_v45 = vld [vmem:[%s4037_s6 + $0x4e8] sm:$0xf]  ;;  %v619_v46 = vld [vmem:[%s4037_s6 + $0x4f0] sm:$0xf] }
  0xa7   : > { %616 = vst [vmem:[%s4042_s14 + $0x270] sm:$0xf] %v615_v44  ;;  %618 = vst [vmem:[%s4042_s14 + $0x274] sm:$0xf] %v617_v45  ;;  %v621_v47 = vld [vmem:[%s4037_s6 + $0x4f8] sm:$0xf] }
  0xa8   : > { %620 = vst [vmem:[%s4042_s14 + $0x278] sm:$0xf] %v619_v46  ;;  %v623_v48 = vld [vmem:[%s4037_s6 + $0x500] sm:$0xf]  ;;  %v625_v49 = vld [vmem:[%s4037_s6 + $0x508] sm:$0xf] }
  0xa9   : > { %622 = vst [vmem:[%s4042_s14 + $0x27c] sm:$0xf] %v621_v47  ;;  %624 = vst [vmem:[%s4042_s14 + $0x280] sm:$0xf] %v623_v48  ;;  %v627_v50 = vld [vmem:[%s4037_s6 + $0x510] sm:$0xf] }
  0xaa   : > { %626 = vst [vmem:[%s4042_s14 + $0x284] sm:$0xf] %v625_v49  ;;  %v629_v51 = vld [vmem:[%s4037_s6 + $0x518] sm:$0xf]  ;;  %v631_v52 = vld [vmem:[%s4037_s6 + $0x520] sm:$0xf] }
  0xab   : > { %628 = vst [vmem:[%s4042_s14 + $0x288] sm:$0xf] %v627_v50  ;;  %630 = vst [vmem:[%s4042_s14 + $0x28c] sm:$0xf] %v629_v51  ;;  %v633_v53 = vld [vmem:[%s4037_s6 + $0x528] sm:$0xf] }
  0xac   : > { %632 = vst [vmem:[%s4042_s14 + $0x290] sm:$0xf] %v631_v52  ;;  %v635_v54 = vld [vmem:[%s4037_s6 + $0x530] sm:$0xf]  ;;  %v637_v55 = vld [vmem:[%s4037_s6 + $0x538] sm:$0xf] }
  0xad   : > { %634 = vst [vmem:[%s4042_s14 + $0x294] sm:$0xf] %v633_v53  ;;  %636 = vst [vmem:[%s4042_s14 + $0x298] sm:$0xf] %v635_v54  ;;  %v639_v56 = vld [vmem:[%s4037_s6 + $0x540] sm:$0xf] }
  0xae   : > { %638 = vst [vmem:[%s4042_s14 + $0x29c] sm:$0xf] %v637_v55  ;;  %v641_v57 = vld [vmem:[%s4037_s6 + $0x548] sm:$0xf]  ;;  %v643_v58 = vld [vmem:[%s4037_s6 + $0x550] sm:$0xf] }
  0xaf   : > { %640 = vst [vmem:[%s4042_s14 + $0x2a0] sm:$0xf] %v639_v56  ;;  %642 = vst [vmem:[%s4042_s14 + $0x2a4] sm:$0xf] %v641_v57  ;;  %v645_v59 = vld [vmem:[%s4037_s6 + $0x558] sm:$0xf] }
  0xb0   : > { %644 = vst [vmem:[%s4042_s14 + $0x2a8] sm:$0xf] %v643_v58  ;;  %v647_v60 = vld [vmem:[%s4037_s6 + $0x560] sm:$0xf]  ;;  %v649_v61 = vld [vmem:[%s4037_s6 + $0x568] sm:$0xf] }
  0xb1   : > { %646 = vst [vmem:[%s4042_s14 + $0x2ac] sm:$0xf] %v645_v59  ;;  %648 = vst [vmem:[%s4042_s14 + $0x2b0] sm:$0xf] %v647_v60  ;;  %v651_v62 = vld [vmem:[%s4037_s6 + $0x570] sm:$0xf] }
  0xb2   : > { %650 = vst [vmem:[%s4042_s14 + $0x2b4] sm:$0xf] %v649_v61  ;;  %v653_v63 = vld [vmem:[%s4037_s6 + $0x578] sm:$0xf]  ;;  %v655_v0 = vld [vmem:[%s4037_s6 + $0x580] sm:$0xf] }
  0xb3   : > { %652 = vst [vmem:[%s4042_s14 + $0x2b8] sm:$0xf] %v651_v62  ;;  %654 = vst [vmem:[%s4042_s14 + $0x2bc] sm:$0xf] %v653_v63  ;;  %v657_v1 = vld [vmem:[%s4037_s6 + $0x588] sm:$0xf] }
  0xb4   : > { %656 = vst [vmem:[%s4042_s14 + $0x2c0] sm:$0xf] %v655_v0  ;;  %v659_v2 = vld [vmem:[%s4037_s6 + $0x590] sm:$0xf]  ;;  %v661_v3 = vld [vmem:[%s4037_s6 + $0x598] sm:$0xf] }
  0xb5   : > { %658 = vst [vmem:[%s4042_s14 + $0x2c4] sm:$0xf] %v657_v1  ;;  %660 = vst [vmem:[%s4042_s14 + $0x2c8] sm:$0xf] %v659_v2  ;;  %v663_v4 = vld [vmem:[%s4037_s6 + $0x5a0] sm:$0xf] }
  0xb6   : > { %662 = vst [vmem:[%s4042_s14 + $0x2cc] sm:$0xf] %v661_v3  ;;  %v665_v5 = vld [vmem:[%s4037_s6 + $0x5a8] sm:$0xf]  ;;  %v667_v6 = vld [vmem:[%s4037_s6 + $0x5b0] sm:$0xf] }
  0xb7   : > { %664 = vst [vmem:[%s4042_s14 + $0x2d0] sm:$0xf] %v663_v4  ;;  %666 = vst [vmem:[%s4042_s14 + $0x2d4] sm:$0xf] %v665_v5  ;;  %v669_v7 = vld [vmem:[%s4037_s6 + $0x5b8] sm:$0xf] }
  0xb8   : > { %668 = vst [vmem:[%s4042_s14 + $0x2d8] sm:$0xf] %v667_v6  ;;  %v671_v8 = vld [vmem:[%s4037_s6 + $0x5c0] sm:$0xf]  ;;  %v673_v9 = vld [vmem:[%s4037_s6 + $0x5c8] sm:$0xf] }
  0xb9   : > { %670 = vst [vmem:[%s4042_s14 + $0x2dc] sm:$0xf] %v669_v7  ;;  %672 = vst [vmem:[%s4042_s14 + $0x2e0] sm:$0xf] %v671_v8  ;;  %v675_v10 = vld [vmem:[%s4037_s6 + $0x5d0] sm:$0xf] }
  0xba   : > { %674 = vst [vmem:[%s4042_s14 + $0x2e4] sm:$0xf] %v673_v9  ;;  %v677_v11 = vld [vmem:[%s4037_s6 + $0x5d8] sm:$0xf]  ;;  %v679_v12 = vld [vmem:[%s4037_s6 + $0x5e0] sm:$0xf] }
  0xbb   : > { %676 = vst [vmem:[%s4042_s14 + $0x2e8] sm:$0xf] %v675_v10  ;;  %678 = vst [vmem:[%s4042_s14 + $0x2ec] sm:$0xf] %v677_v11  ;;  %v681_v13 = vld [vmem:[%s4037_s6 + $0x5e8] sm:$0xf] }
  0xbc   : > { %680 = vst [vmem:[%s4042_s14 + $0x2f0] sm:$0xf] %v679_v12  ;;  %v683_v14 = vld [vmem:[%s4037_s6 + $0x5f0] sm:$0xf]  ;;  %v685_v15 = vld [vmem:[%s4037_s6 + $0x5f8] sm:$0xf] }
  0xbd   : > { %682 = vst [vmem:[%s4042_s14 + $0x2f4] sm:$0xf] %v681_v13  ;;  %684 = vst [vmem:[%s4042_s14 + $0x2f8] sm:$0xf] %v683_v14  ;;  %v687_v16 = vld [vmem:[%s4037_s6 + $0x600] sm:$0xf] }
  0xbe   : > { %686 = vst [vmem:[%s4042_s14 + $0x2fc] sm:$0xf] %v685_v15  ;;  %v689_v17 = vld [vmem:[%s4037_s6 + $0x608] sm:$0xf]  ;;  %v691_v18 = vld [vmem:[%s4037_s6 + $0x610] sm:$0xf] }
  0xbf   : > { %688 = vst [vmem:[%s4042_s14 + $0x300] sm:$0xf] %v687_v16  ;;  %690 = vst [vmem:[%s4042_s14 + $0x304] sm:$0xf] %v689_v17  ;;  %v693_v19 = vld [vmem:[%s4037_s6 + $0x618] sm:$0xf] }
  0xc0   : > { %692 = vst [vmem:[%s4042_s14 + $0x308] sm:$0xf] %v691_v18  ;;  %v695_v20 = vld [vmem:[%s4037_s6 + $0x620] sm:$0xf]  ;;  %v697_v21 = vld [vmem:[%s4037_s6 + $0x628] sm:$0xf] }
  0xc1   : > { %694 = vst [vmem:[%s4042_s14 + $0x30c] sm:$0xf] %v693_v19  ;;  %696 = vst [vmem:[%s4042_s14 + $0x310] sm:$0xf] %v695_v20  ;;  %v699_v22 = vld [vmem:[%s4037_s6 + $0x630] sm:$0xf] }
  0xc2   : > { %698 = vst [vmem:[%s4042_s14 + $0x314] sm:$0xf] %v697_v21  ;;  %v701_v23 = vld [vmem:[%s4037_s6 + $0x638] sm:$0xf]  ;;  %v703_v24 = vld [vmem:[%s4037_s6 + $0x640] sm:$0xf] }
  0xc3   : > { %700 = vst [vmem:[%s4042_s14 + $0x318] sm:$0xf] %v699_v22  ;;  %702 = vst [vmem:[%s4042_s14 + $0x31c] sm:$0xf] %v701_v23  ;;  %v705_v25 = vld [vmem:[%s4037_s6 + $0x648] sm:$0xf] }
  0xc4   : > { %704 = vst [vmem:[%s4042_s14 + $0x320] sm:$0xf] %v703_v24  ;;  %v707_v26 = vld [vmem:[%s4037_s6 + $0x650] sm:$0xf]  ;;  %v709_v27 = vld [vmem:[%s4037_s6 + $0x658] sm:$0xf] }
  0xc5   : > { %706 = vst [vmem:[%s4042_s14 + $0x324] sm:$0xf] %v705_v25  ;;  %708 = vst [vmem:[%s4042_s14 + $0x328] sm:$0xf] %v707_v26  ;;  %v711_v28 = vld [vmem:[%s4037_s6 + $0x660] sm:$0xf] }
  0xc6   : > { %710 = vst [vmem:[%s4042_s14 + $0x32c] sm:$0xf] %v709_v27  ;;  %v713_v29 = vld [vmem:[%s4037_s6 + $0x668] sm:$0xf]  ;;  %v715_v30 = vld [vmem:[%s4037_s6 + $0x670] sm:$0xf] }
  0xc7   : > { %712 = vst [vmem:[%s4042_s14 + $0x330] sm:$0xf] %v711_v28  ;;  %714 = vst [vmem:[%s4042_s14 + $0x334] sm:$0xf] %v713_v29  ;;  %v717_v31 = vld [vmem:[%s4037_s6 + $0x678] sm:$0xf] }
  0xc8   : > { %716 = vst [vmem:[%s4042_s14 + $0x338] sm:$0xf] %v715_v30  ;;  %v719_v32 = vld [vmem:[%s4037_s6 + $0x680] sm:$0xf]  ;;  %v721_v33 = vld [vmem:[%s4037_s6 + $0x688] sm:$0xf] }
  0xc9   : > { %718 = vst [vmem:[%s4042_s14 + $0x33c] sm:$0xf] %v717_v31  ;;  %720 = vst [vmem:[%s4042_s14 + $0x340] sm:$0xf] %v719_v32  ;;  %v723_v34 = vld [vmem:[%s4037_s6 + $0x690] sm:$0xf] }
  0xca   : > { %722 = vst [vmem:[%s4042_s14 + $0x344] sm:$0xf] %v721_v33  ;;  %v725_v35 = vld [vmem:[%s4037_s6 + $0x698] sm:$0xf]  ;;  %v727_v36 = vld [vmem:[%s4037_s6 + $0x6a0] sm:$0xf] }
  0xcb   : > { %724 = vst [vmem:[%s4042_s14 + $0x348] sm:$0xf] %v723_v34  ;;  %726 = vst [vmem:[%s4042_s14 + $0x34c] sm:$0xf] %v725_v35  ;;  %v729_v37 = vld [vmem:[%s4037_s6 + $0x6a8] sm:$0xf] }
  0xcc   : > { %728 = vst [vmem:[%s4042_s14 + $0x350] sm:$0xf] %v727_v36  ;;  %v731_v38 = vld [vmem:[%s4037_s6 + $0x6b0] sm:$0xf]  ;;  %v733_v39 = vld [vmem:[%s4037_s6 + $0x6b8] sm:$0xf] }
  0xcd   : > { %730 = vst [vmem:[%s4042_s14 + $0x354] sm:$0xf] %v729_v37  ;;  %732 = vst [vmem:[%s4042_s14 + $0x358] sm:$0xf] %v731_v38  ;;  %v735_v40 = vld [vmem:[%s4037_s6 + $0x6c0] sm:$0xf] }
  0xce   : > { %734 = vst [vmem:[%s4042_s14 + $0x35c] sm:$0xf] %v733_v39  ;;  %v737_v41 = vld [vmem:[%s4037_s6 + $0x6c8] sm:$0xf]  ;;  %v739_v42 = vld [vmem:[%s4037_s6 + $0x6d0] sm:$0xf] }
  0xcf   : > { %736 = vst [vmem:[%s4042_s14 + $0x360] sm:$0xf] %v735_v40  ;;  %738 = vst [vmem:[%s4042_s14 + $0x364] sm:$0xf] %v737_v41  ;;  %v741_v43 = vld [vmem:[%s4037_s6 + $0x6d8] sm:$0xf] }
  0xd0   : > { %740 = vst [vmem:[%s4042_s14 + $0x368] sm:$0xf] %v739_v42  ;;  %v743_v44 = vld [vmem:[%s4037_s6 + $0x6e0] sm:$0xf]  ;;  %v745_v45 = vld [vmem:[%s4037_s6 + $0x6e8] sm:$0xf] }
  0xd1   : > { %742 = vst [vmem:[%s4042_s14 + $0x36c] sm:$0xf] %v741_v43  ;;  %744 = vst [vmem:[%s4042_s14 + $0x370] sm:$0xf] %v743_v44  ;;  %v747_v46 = vld [vmem:[%s4037_s6 + $0x6f0] sm:$0xf] }
  0xd2   : > { %746 = vst [vmem:[%s4042_s14 + $0x374] sm:$0xf] %v745_v45  ;;  %v749_v47 = vld [vmem:[%s4037_s6 + $0x6f8] sm:$0xf]  ;;  %v751_v48 = vld [vmem:[%s4037_s6 + $0x700] sm:$0xf] }
  0xd3   : > { %748 = vst [vmem:[%s4042_s14 + $0x378] sm:$0xf] %v747_v46  ;;  %750 = vst [vmem:[%s4042_s14 + $0x37c] sm:$0xf] %v749_v47  ;;  %v753_v49 = vld [vmem:[%s4037_s6 + $0x708] sm:$0xf] }
  0xd4   : > { %752 = vst [vmem:[%s4042_s14 + $0x380] sm:$0xf] %v751_v48  ;;  %v755_v50 = vld [vmem:[%s4037_s6 + $0x710] sm:$0xf]  ;;  %v757_v51 = vld [vmem:[%s4037_s6 + $0x718] sm:$0xf] }
  0xd5   : > { %754 = vst [vmem:[%s4042_s14 + $0x384] sm:$0xf] %v753_v49  ;;  %756 = vst [vmem:[%s4042_s14 + $0x388] sm:$0xf] %v755_v50  ;;  %v759_v52 = vld [vmem:[%s4037_s6 + $0x720] sm:$0xf] }
  0xd6   : > { %758 = vst [vmem:[%s4042_s14 + $0x38c] sm:$0xf] %v757_v51  ;;  %v761_v53 = vld [vmem:[%s4037_s6 + $0x728] sm:$0xf]  ;;  %v763_v54 = vld [vmem:[%s4037_s6 + $0x730] sm:$0xf] }
  0xd7   : > { %760 = vst [vmem:[%s4042_s14 + $0x390] sm:$0xf] %v759_v52  ;;  %762 = vst [vmem:[%s4042_s14 + $0x394] sm:$0xf] %v761_v53  ;;  %v765_v55 = vld [vmem:[%s4037_s6 + $0x738] sm:$0xf] }
  0xd8   : > { %764 = vst [vmem:[%s4042_s14 + $0x398] sm:$0xf] %v763_v54  ;;  %v767_v56 = vld [vmem:[%s4037_s6 + $0x740] sm:$0xf]  ;;  %v769_v57 = vld [vmem:[%s4037_s6 + $0x748] sm:$0xf] }
  0xd9   : > { %766 = vst [vmem:[%s4042_s14 + $0x39c] sm:$0xf] %v765_v55  ;;  %768 = vst [vmem:[%s4042_s14 + $0x3a0] sm:$0xf] %v767_v56  ;;  %v771_v58 = vld [vmem:[%s4037_s6 + $0x750] sm:$0xf] }
  0xda   : > { %770 = vst [vmem:[%s4042_s14 + $0x3a4] sm:$0xf] %v769_v57  ;;  %v773_v59 = vld [vmem:[%s4037_s6 + $0x758] sm:$0xf]  ;;  %v775_v60 = vld [vmem:[%s4037_s6 + $0x760] sm:$0xf] }
  0xdb   : > { %772 = vst [vmem:[%s4042_s14 + $0x3a8] sm:$0xf] %v771_v58  ;;  %774 = vst [vmem:[%s4042_s14 + $0x3ac] sm:$0xf] %v773_v59  ;;  %v777_v61 = vld [vmem:[%s4037_s6 + $0x768] sm:$0xf] }
  0xdc   : > { %776 = vst [vmem:[%s4042_s14 + $0x3b0] sm:$0xf] %v775_v60  ;;  %v779_v62 = vld [vmem:[%s4037_s6 + $0x770] sm:$0xf]  ;;  %v781_v63 = vld [vmem:[%s4037_s6 + $0x778] sm:$0xf] }
  0xdd   : > { %778 = vst [vmem:[%s4042_s14 + $0x3b4] sm:$0xf] %v777_v61  ;;  %780 = vst [vmem:[%s4042_s14 + $0x3b8] sm:$0xf] %v779_v62  ;;  %v783_v0 = vld [vmem:[%s4037_s6 + $0x780] sm:$0xf] }
  0xde   : > { %782 = vst [vmem:[%s4042_s14 + $0x3bc] sm:$0xf] %v781_v63  ;;  %v785_v1 = vld [vmem:[%s4037_s6 + $0x788] sm:$0xf]  ;;  %v787_v2 = vld [vmem:[%s4037_s6 + $0x790] sm:$0xf] }
  0xdf   : > { %784 = vst [vmem:[%s4042_s14 + $0x3c0] sm:$0xf] %v783_v0  ;;  %786 = vst [vmem:[%s4042_s14 + $0x3c4] sm:$0xf] %v785_v1  ;;  %v789_v3 = vld [vmem:[%s4037_s6 + $0x798] sm:$0xf] }
  0xe0   : > { %788 = vst [vmem:[%s4042_s14 + $0x3c8] sm:$0xf] %v787_v2  ;;  %v791_v4 = vld [vmem:[%s4037_s6 + $0x7a0] sm:$0xf]  ;;  %v793_v5 = vld [vmem:[%s4037_s6 + $0x7a8] sm:$0xf] }
  0xe1   : > { %790 = vst [vmem:[%s4042_s14 + $0x3cc] sm:$0xf] %v789_v3  ;;  %792 = vst [vmem:[%s4042_s14 + $0x3d0] sm:$0xf] %v791_v4  ;;  %v795_v6 = vld [vmem:[%s4037_s6 + $0x7b0] sm:$0xf] }
  0xe2   : > { %794 = vst [vmem:[%s4042_s14 + $0x3d4] sm:$0xf] %v793_v5  ;;  %v797_v7 = vld [vmem:[%s4037_s6 + $0x7b8] sm:$0xf]  ;;  %v799_v8 = vld [vmem:[%s4037_s6 + $0x7c0] sm:$0xf] }
  0xe3   : > { %796 = vst [vmem:[%s4042_s14 + $0x3d8] sm:$0xf] %v795_v6  ;;  %798 = vst [vmem:[%s4042_s14 + $0x3dc] sm:$0xf] %v797_v7  ;;  %v801_v9 = vld [vmem:[%s4037_s6 + $0x7c8] sm:$0xf] }
  0xe4   : > { %800 = vst [vmem:[%s4042_s14 + $0x3e0] sm:$0xf] %v799_v8  ;;  %v803_v10 = vld [vmem:[%s4037_s6 + $0x7d0] sm:$0xf]  ;;  %v805_v11 = vld [vmem:[%s4037_s6 + $0x7d8] sm:$0xf] }
  0xe5   : > { %802 = vst [vmem:[%s4042_s14 + $0x3e4] sm:$0xf] %v801_v9  ;;  %804 = vst [vmem:[%s4042_s14 + $0x3e8] sm:$0xf] %v803_v10  ;;  %v807_v12 = vld [vmem:[%s4037_s6 + $0x7e0] sm:$0xf] }
  0xe6   : > { %806 = vst [vmem:[%s4042_s14 + $0x3ec] sm:$0xf] %v805_v11  ;;  %v809_v13 = vld [vmem:[%s4037_s6 + $0x7e8] sm:$0xf]  ;;  %v811_v14 = vld [vmem:[%s4037_s6 + $0x7f0] sm:$0xf] }
  0xe7   : > { %808 = vst [vmem:[%s4042_s14 + $0x3f0] sm:$0xf] %v807_v12  ;;  %810 = vst [vmem:[%s4042_s14 + $0x3f4] sm:$0xf] %v809_v13  ;;  %v813_v15 = vld [vmem:[%s4037_s6 + $0x7f8] sm:$0xf] }
  0xe8   : > { %812 = vst [vmem:[%s4042_s14 + $0x3f8] sm:$0xf] %v811_v14  ;;  %814 = vst [vmem:[%s4042_s14 + $0x3fc] sm:$0xf] %v813_v15 }
  0xe9 PF: > { %p3225_p0 = scmp.ge.s32.totalorder %s3872_s28, 1  ;;  %p1354_p1 = scmp.lt.s32.totalorder %s3872_s28, 7 }
  0xeb   : > { %p1355_p2 = pnand %p3225_p0, %p1354_p1 }
  0xec   : > { %s1361_s0 = sand.u32 (!%p1355_p2), 1, %s3848_s22   ;;  %s1368_s15 = sand.u32 (!%p1355_p2), 1, %s3840_s20  }
  0xed   : > { %1358 = sbr.rel (%p1355_p2) target bundleno = 642 (0x282), region = 88  ;;  %s3226_s29 = sshll.u32 (!%p1355_p2), %s1361_s0, 7 }
  0xee   : > { %s3227_s9 = sshll.u32 (!%p1355_p2), %s1368_s15, 10  ;;  %s1394_s7 = sand.u32 (!%p1355_p2), 1, %s3832_s18  }
  0xef   : > { %p1420_p3 = scmp.lt.s32.totalorder (!%p1355_p2), %s3860_s25, 1  ;;  %s3228_s6 = sshll.u32 (!%p1355_p2), %s1394_s7, 3 }
  0xf0   : > { %s4577_s0 = scalar_lea.vmem (!%p1355_p2), [#allocation3], %s3226_s29  ;;  %s4579_s15 = scalar_lea.vmem (!%p1355_p2), [#allocation4], %s3227_s9 }
  0xf1   : > { %s4581_s7 = scalar_lea.vmem (!%p1355_p2), [#allocation5], %s3228_s6  ;;  %p3231_p4 = scmp.ne.s32.totalorder (!%p1355_p2), %s3856_s24, 0 }
  0xf4   : > { %s4560_s8 = scalar_select %p1420_p3, %s3860_s25, 1 }
  0xf5   : > { %1444 = sbr.rel (%p3231_p4) target bundleno = 252 (0xfc), region = 100  ;;  %v3874_v16 = vmov (!%p3231_p4), 0.0  }
  0xf6   : > { %s1422_s13 = scalar_lea.vmem %s4780_s2, %s4560_s8  ;;  %s3229_s14 = sshll.u32 %s4560_s8, 3  ;;  %1445 = vst [vmem:[#allocation2] sm:$0xff] (!%p3231_p4), %v3874_v16  ;;  %1446 = vst [vmem:[#allocation2 + $0x8] sm:$0xff] (!%p3231_p4), %v3874_v16 }
  0xf7   : > { %s4570_s26 = scalar_lea.vmem %s4782_s4, %s3229_s14  ;;  %s4575_s18 = scalar_lea.vmem %s4783_s5, %s3229_s14 }
  0xfc PF: > { %v3658_v17 = vld [vmem:[%s4579_s15 + $0x40] sm:$0xff]   ;;  %v3662_v21 = vld [vmem:[%s4579_s15 + $0x48] sm:$0xff]   ;;  %v3666_v25 = vld [vmem:[%s4579_s15 + $0x50] sm:$0xff]   ;;  %p3376_p5 = scmp.ne.s32.totalorder %s3856_s24, 2 }
  0xfd   : > { %v3659_v18 = vld [vmem:[%s4579_s15 + $0xc0] sm:$0xff]   ;;  %3393 = vmatprep.subr.bf16.mxu0 %v3658_v17  ;;  %v3663_v22 = vld [vmem:[%s4579_s15 + $0xc8] sm:$0xff]   ;;  %v3667_v26 = vld [vmem:[%s4579_s15 + $0xd0] sm:$0xff]  }
  0xfe   : > { %v3660_v19 = vld [vmem:[%s4579_s15] sm:$0xff]   ;;  %3415 = vmatprep.subr.bf16.mxu1 %v3659_v18  ;;  %v3664_v23 = vld [vmem:[%s4579_s15 + $0x8] sm:$0xff]   ;;  %v3668_v27 = vld [vmem:[%s4579_s15 + $0x10] sm:$0xff]  }
  0xff   : > { %v3661_v20 = vld [vmem:[%s4579_s15 + $0x80] sm:$0xff]   ;;  %3394 = vmatpush3.bf16.msra.mxu0 %v3660_v19  ;;  %v3665_v24 = vld [vmem:[%s4579_s15 + $0x88] sm:$0xff]   ;;  %v3669_v28 = vld [vmem:[%s4579_s15 + $0x90] sm:$0xff]  }
 0x100   : > { %3416 = vmatpush3.bf16.msra.mxu1 %v3661_v20  ;;  %3395 = vmatprep.subr.bf16.mxu0 %v3662_v21  ;;  %v3670_v29 = vld [vmem:[%s4579_s15 + $0x58] sm:$0xff]   ;;  %v3674_v33 = vld [vmem:[%s4579_s15 + $0x60] sm:$0xff]   ;;  %v3678_v37 = vld [vmem:[%s4579_s15 + $0x68] sm:$0xff]  }
 0x101   : > { %3417 = vmatprep.subr.bf16.mxu1 %v3663_v22  ;;  %v3671_v30 = vld [vmem:[%s4579_s15 + $0xd8] sm:$0xff]   ;;  %v3675_v34 = vld [vmem:[%s4579_s15 + $0xe0] sm:$0xff]   ;;  %v3679_v38 = vld [vmem:[%s4579_s15 + $0xe8] sm:$0xff]  }
 0x102   : > { %v3672_v31 = vld [vmem:[%s4579_s15 + $0x18] sm:$0xff]   ;;  %v3676_v35 = vld [vmem:[%s4579_s15 + $0x20] sm:$0xff]   ;;  %v3680_v39 = vld [vmem:[%s4579_s15 + $0x28] sm:$0xff]  }
 0x103   : > { %3396 = vmatpush3.bf16.msra.mxu0 %v3664_v23  ;;  %v3673_v32 = vld [vmem:[%s4579_s15 + $0x98] sm:$0xff]   ;;  %v3677_v36 = vld [vmem:[%s4579_s15 + $0xa0] sm:$0xff]   ;;  %v3681_v40 = vld [vmem:[%s4579_s15 + $0xa8] sm:$0xff]  }
 0x104   : > { %3418 = vmatpush3.bf16.msra.mxu1 %v3665_v24  ;;  %3397 = vmatprep.subr.bf16.mxu0 %v3666_v25  ;;  %v3682_v41 = vld [vmem:[%s4579_s15 + $0x70] sm:$0xff]   ;;  %v3686_v45 = vld [vmem:[%s4579_s15 + $0x78] sm:$0xff]   ;;  %v1449_v49 = vld [vmem:[%s4577_s0] sm:$0xff] }
 0x105   : > { %3419 = vmatprep.subr.bf16.mxu1 %v3667_v26  ;;  %v3683_v42 = vld [vmem:[%s4579_s15 + $0xf0] sm:$0xff]   ;;  %v3687_v46 = vld [vmem:[%s4579_s15 + $0xf8] sm:$0xff]   ;;  %v1457_v50 = vld [vmem:[%s4577_s0 + $0x40] sm:$0xff] }
 0x106   : > { %v3684_v43 = vld [vmem:[%s4579_s15 + $0x30] sm:$0xff]   ;;  %v3688_v47 = vld [vmem:[%s4579_s15 + $0x38] sm:$0xff]   ;;  %v1450_v51 = vld [vmem:[%s4577_s0 + $0x8] sm:$0xff]  ;;  %v3232_v52 = vcombine.low %v1449_v49, %v1457_v50  ;;  %v3233_v53 = vcombine.high %v1449_v49, %v1457_v50 }
 0x107   : > { %3398 = vmatpush3.bf16.msra.mxu0 %v3668_v27  ;;  %v3685_v44 = vld [vmem:[%s4579_s15 + $0xb0] sm:$0xff]   ;;  %v3689_v48 = vld [vmem:[%s4579_s15 + $0xb8] sm:$0xff]   ;;  %v1458_v54 = vld [vmem:[%s4577_s0 + $0x48] sm:$0xff] }
 0x108   : > { %3420 = vmatpush3.bf16.msra.mxu1 %v3669_v28  ;;  %3399 = vmatprep.subr.bf16.mxu0 %v3670_v29  ;;  %v3234_v55 = vcombine.low %v1450_v51, %v1458_v54  ;;  %v3235_v56 = vcombine.high %v1450_v51, %v1458_v54  ;;  %v3690_v57 = vld [vmem:[%s4579_s15 + $0x140] sm:$0xff]   ;;  %v3694_v61 = vld [vmem:[%s4579_s15 + $0x148] sm:$0xff]   ;;  %v3698_v1 = vld [vmem:[%s4579_s15 + $0x150] sm:$0xff]  }
 0x109   : > { %3421 = vmatprep.subr.bf16.mxu1 %v3671_v30  ;;  %2601 = vmatprep.mubr.bf16.mxu0 %v3233_v53  ;;  %v3691_v58 = vld [vmem:[%s4579_s15 + $0x1c0] sm:$0xff]   ;;  %v3695_v62 = vld [vmem:[%s4579_s15 + $0x1c8] sm:$0xff]   ;;  %v3699_v2 = vld [vmem:[%s4579_s15 + $0x1d0] sm:$0xff]  }
 0x10a   : > { %2642 = vmatprep.mubr.bf16.mxu1 %v3235_v56  ;;  %v3692_v59 = vld [vmem:[%s4579_s15 + $0x100] sm:$0xff]   ;;  %v3696_v63 = vld [vmem:[%s4579_s15 + $0x108] sm:$0xff]   ;;  %v3700_v3 = vld [vmem:[%s4579_s15 + $0x110] sm:$0xff]  }
 0x10b   : > { %3400 = vmatpush3.bf16.msra.mxu0 %v3672_v31  ;;  %v3693_v60 = vld [vmem:[%s4579_s15 + $0x180] sm:$0xff]   ;;  %v3697_v0 = vld [vmem:[%s4579_s15 + $0x188] sm:$0xff]   ;;  %v3701_v4 = vld [vmem:[%s4579_s15 + $0x190] sm:$0xff]  }
 0x10c   : > { %3422 = vmatpush3.bf16.msra.mxu1 %v3673_v32  ;;  %3401 = vmatprep.subr.bf16.mxu0 %v3674_v33  ;;  %v3702_v5 = vld [vmem:[%s4579_s15 + $0x158] sm:$0xff]   ;;  %v3706_v9 = vld [vmem:[%s4579_s15 + $0x160] sm:$0xff]   ;;  %v3710_v13 = vld [vmem:[%s4579_s15 + $0x168] sm:$0xff]  }
 0x10d   : > { %3423 = vmatprep.subr.bf16.mxu1 %v3675_v34  ;;  %v3703_v6 = vld [vmem:[%s4579_s15 + $0x1d8] sm:$0xff]   ;;  %v3707_v10 = vld [vmem:[%s4579_s15 + $0x1e0] sm:$0xff]   ;;  %v3711_v14 = vld [vmem:[%s4579_s15 + $0x1e8] sm:$0xff]  }
 0x10e   : > { %v3704_v7 = vld [vmem:[%s4579_s15 + $0x118] sm:$0xff]   ;;  %v3708_v11 = vld [vmem:[%s4579_s15 + $0x120] sm:$0xff]   ;;  %v3712_v15 = vld [vmem:[%s4579_s15 + $0x128] sm:$0xff]  }
 0x10f   : > { %3402 = vmatpush3.bf16.msra.mxu0 %v3676_v35  ;;  %v3705_v8 = vld [vmem:[%s4579_s15 + $0x198] sm:$0xff]   ;;  %v3709_v12 = vld [vmem:[%s4579_s15 + $0x1a0] sm:$0xff]   ;;  %v3713_v16 = vld [vmem:[%s4579_s15 + $0x1a8] sm:$0xff]  }
 0x110   : > { %3424 = vmatpush3.bf16.msra.mxu1 %v3677_v36  ;;  %3403 = vmatprep.subr.bf16.mxu0 %v3678_v37  ;;  %v3714_v17 = vld [vmem:[%s4579_s15 + $0x170] sm:$0xff]   ;;  %v3718_v21 = vld [vmem:[%s4579_s15 + $0x178] sm:$0xff]   ;;  %v3722_v33 = vld [vmem:[%s4579_s15 + $0x240] sm:$0xff]  }
 0x111   : > { %3425 = vmatprep.subr.bf16.mxu1 %v3679_v38  ;;  %v3715_v18 = vld [vmem:[%s4579_s15 + $0x1f0] sm:$0xff]   ;;  %v3719_v22 = vld [vmem:[%s4579_s15 + $0x1f8] sm:$0xff]   ;;  %v3723_v34 = vld [vmem:[%s4579_s15 + $0x2c0] sm:$0xff]  }
 0x112   : > { %v3716_v19 = vld [vmem:[%s4579_s15 + $0x130] sm:$0xff]   ;;  %v3720_v23 = vld [vmem:[%s4579_s15 + $0x138] sm:$0xff]   ;;  %v3724_v35 = vld [vmem:[%s4579_s15 + $0x200] sm:$0xff]  }
 0x113   : > { %3404 = vmatpush3.bf16.msra.mxu0 %v3680_v39  ;;  %v3717_v20 = vld [vmem:[%s4579_s15 + $0x1b0] sm:$0xff]   ;;  %v3721_v24 = vld [vmem:[%s4579_s15 + $0x1b8] sm:$0xff]   ;;  %v3725_v36 = vld [vmem:[%s4579_s15 + $0x280] sm:$0xff]  }
 0x114   : > { %3426 = vmatpush3.bf16.msra.mxu1 %v3681_v40  ;;  %3405 = vmatprep.subr.bf16.mxu0 %v3682_v41  ;;  %v1451_v25 = vld [vmem:[%s4577_s0 + $0x10] sm:$0xff]  ;;  %v1452_v29 = vld [vmem:[%s4577_s0 + $0x18] sm:$0xff]  ;;  %v3726_v37 = vld [vmem:[%s4579_s15 + $0x248] sm:$0xff]  }
 0x115   : > { %3427 = vmatprep.subr.bf16.mxu1 %v3683_v42  ;;  %v1459_v26 = vld [vmem:[%s4577_s0 + $0x50] sm:$0xff]  ;;  %v1460_v30 = vld [vmem:[%s4577_s0 + $0x58] sm:$0xff]  ;;  %v3727_v38 = vld [vmem:[%s4579_s15 + $0x2c8] sm:$0xff]  }
 0x116   : > { %v3236_v27 = vcombine.low %v1451_v25, %v1459_v26  ;;  %v3237_v28 = vcombine.high %v1451_v25, %v1459_v26  ;;  %v3238_v31 = vcombine.low %v1452_v29, %v1460_v30  ;;  %v3239_v32 = vcombine.high %v1452_v29, %v1460_v30  ;;  %v3728_v39 = vld [vmem:[%s4579_s15 + $0x208] sm:$0xff]   ;;  %v3730_v41 = vld [vmem:[%s4579_s15 + $0x250] sm:$0xff]   ;;  %v3738_v49 = vld [vmem:[%s4579_s15 + $0x260] sm:$0xff]  }
 0x117   : > { %3406 = vmatpush3.bf16.msra.mxu0 %v3684_v43  ;;  %v3729_v40 = vld [vmem:[%s4579_s15 + $0x288] sm:$0xff]   ;;  %v3731_v42 = vld [vmem:[%s4579_s15 + $0x2d0] sm:$0xff]   ;;  %v3739_v50 = vld [vmem:[%s4579_s15 + $0x2e0] sm:$0xff]  }
 0x118   : > { %3428 = vmatpush3.bf16.msra.mxu1 %v3685_v44  ;;  %3407 = vmatprep.subr.bf16.mxu0 %v3686_v45  ;;  %v3732_v43 = vld [vmem:[%s4579_s15 + $0x210] sm:$0xff]   ;;  %v3734_v45 = vld [vmem:[%s4579_s15 + $0x258] sm:$0xff]   ;;  %v3740_v51 = vld [vmem:[%s4579_s15 + $0x220] sm:$0xff]  }
 0x119   : > { %3429 = vmatprep.subr.bf16.mxu1 %v3687_v46  ;;  %v3733_v44 = vld [vmem:[%s4579_s15 + $0x290] sm:$0xff]   ;;  %v3735_v46 = vld [vmem:[%s4579_s15 + $0x2d8] sm:$0xff]   ;;  %v3742_v53 = vld [vmem:[%s4579_s15 + $0x268] sm:$0xff]  }
 0x11a   : > { %v3743_v54 = vld [vmem:[%s4579_s15 + $0x2e8] sm:$0xff]   ;;  %v3770_v25 = vld [vmem:[%s4579_s15 + $0x360] sm:$0xff]  }
 0x11b   : > { %3408 = vmatpush3.bf16.msra.mxu0 %v3688_v47  ;;  %v3736_v47 = vld [vmem:[%s4579_s15 + $0x218] sm:$0xff]   ;;  %v3745_v56 = vld [vmem:[%s4579_s15 + $0x2a8] sm:$0xff]   ;;  %v3771_v26 = vld [vmem:[%s4579_s15 + $0x3e0] sm:$0xff]  }
 0x11c   : > { %3430 = vmatpush3.bf16.msra.mxu1 %v3689_v48  ;;  %3437 = vmatprep.subr.bf16.mxu0 %v3690_v57  ;;  %v3737_v48 = vld [vmem:[%s4579_s15 + $0x298] sm:$0xff]   ;;  %v3746_v57 = vld [vmem:[%s4579_s15 + $0x270] sm:$0xff]   ;;  %v3774_v29 = vld [vmem:[%s4579_s15 + $0x368] sm:$0xff]  }
 0x11d   : > { %3459 = vmatprep.subr.bf16.mxu1 %v3691_v58  ;;  %v3747_v58 = vld [vmem:[%s4579_s15 + $0x2f0] sm:$0xff]   ;;  %v3775_v30 = vld [vmem:[%s4579_s15 + $0x3e8] sm:$0xff]  }
 0x11e   : > { %2602 = vmatmul.mubr.bf16.vlgmr.msra.gmra.mrb[0].mxu0 %v3232_v52  ;;  %v3741_v52 = vld [vmem:[%s4579_s15 + $0x2a0] sm:$0xff]  }
 0x11f   : > { %2643 = vmatmul.mubr.bf16.vlgmr.msra.gmra.mrb[0].mxu1 %v3234_v55  ;;  %3438 = vmatpush3.bf16.msra.mxu0 %v3692_v59  ;;  %v3744_v55 = vld [vmem:[%s4579_s15 + $0x228] sm:$0xff]   ;;  %v3748_v59 = vld [vmem:[%s4579_s15 + $0x230] sm:$0xff]  }
 0x120   : > { %3460 = vmatpush3.bf16.msra.mxu1 %v3693_v60  ;;  %3439 = vmatprep.subr.bf16.mxu0 %v3694_v61  ;;  %v3749_v60 = vld [vmem:[%s4579_s15 + $0x2b0] sm:$0xff]   ;;  %v3750_v61 = vld [vmem:[%s4579_s15 + $0x278] sm:$0xff]  }
 0x121   : > { %3461 = vmatprep.subr.bf16.mxu1 %v3695_v62  ;;  %2683 = vmatprep.mubr.bf16.mxu0 %v3237_v28  ;;  %v3751_v62 = vld [vmem:[%s4579_s15 + $0x2f8] sm:$0xff]   ;;  %v3773_v28 = vld [vmem:[%s4579_s15 + $0x3a0] sm:$0xff]  }
 0x122   : > { %2724 = vmatprep.mubr.bf16.mxu1 %v3239_v32  ;;  %v3777_v32 = vld [vmem:[%s4579_s15 + $0x3a8] sm:$0xff]  }
 0x123   : > { %3440 = vmatpush3.bf16.msra.mxu0 %v3696_v63  ;;  %v3752_v63 = vld [vmem:[%s4579_s15 + $0x238] sm:$0xff]  }
 0x124   : > { %3462 = vmatpush3.bf16.msra.mxu1 %v3697_v0  ;;  %3441 = vmatprep.subr.bf16.mxu0 %v3698_v1  ;;  %v3753_v0 = vld [vmem:[%s4579_s15 + $0x2b8] sm:$0xff]   ;;  %v1453_v1 = vld [vmem:[%s4577_s0 + $0x20] sm:$0xff] }
 0x125   : > { %3463 = vmatprep.subr.bf16.mxu1 %v3699_v2  ;;  %v1461_v2 = vld [vmem:[%s4577_s0 + $0x60] sm:$0xff] }
 0x127   : > { %3442 = vmatpush3.bf16.msra.mxu0 %v3700_v3  ;;  %v1454_v3 = vld [vmem:[%s4577_s0 + $0x28] sm:$0xff] }
 0x128   : > { %3464 = vmatpush3.bf16.msra.mxu1 %v3701_v4  ;;  %3443 = vmatprep.subr.bf16.mxu0 %v3702_v5  ;;  %v1462_v4 = vld [vmem:[%s4577_s0 + $0x68] sm:$0xff]  ;;  %v3240_v5 = vcombine.low %v1453_v1, %v1461_v2 }
 0x129   : > { %3465 = vmatprep.subr.bf16.mxu1 %v3703_v6  ;;  %v3241_v6 = vcombine.high %v1453_v1, %v1461_v2 }
 0x12b   : > { %3444 = vmatpush3.bf16.msra.mxu0 %v3704_v7  ;;  %v3242_v7 = vcombine.low %v1454_v3, %v1462_v4 }
 0x12c   : > { %3466 = vmatpush3.bf16.msra.mxu1 %v3705_v8  ;;  %3445 = vmatprep.subr.bf16.mxu0 %v3706_v9  ;;  %v3243_v8 = vcombine.high %v1454_v3, %v1462_v4  ;;  %v3754_v9 = vld [vmem:[%s4579_s15 + $0x340] sm:$0xff]  }
 0x12d   : > { %3467 = vmatprep.subr.bf16.mxu1 %v3707_v10  ;;  %v3755_v10 = vld [vmem:[%s4579_s15 + $0x3c0] sm:$0xff]  }
 0x12f   : > { %3446 = vmatpush3.bf16.msra.mxu0 %v3708_v11  ;;  %v3756_v11 = vld [vmem:[%s4579_s15 + $0x300] sm:$0xff]  }
 0x130   : > { %3468 = vmatpush3.bf16.msra.mxu1 %v3709_v12  ;;  %3447 = vmatprep.subr.bf16.mxu0 %v3710_v13  ;;  %v3757_v12 = vld [vmem:[%s4579_s15 + $0x380] sm:$0xff]   ;;  %v3758_v13 = vld [vmem:[%s4579_s15 + $0x348] sm:$0xff]  }
 0x131   : > { %3469 = vmatprep.subr.bf16.mxu1 %v3711_v14  ;;  %v3759_v14 = vld [vmem:[%s4579_s15 + $0x3c8] sm:$0xff]  }
 0x133   : > { %3448 = vmatpush3.bf16.msra.mxu0 %v3712_v15  ;;  %v3760_v15 = vld [vmem:[%s4579_s15 + $0x308] sm:$0xff]  }
 0x134   : > { %3470 = vmatpush3.bf16.msra.mxu1 %v3713_v16  ;;  %3449 = vmatprep.subr.bf16.mxu0 %v3714_v17  ;;  %v3761_v16 = vld [vmem:[%s4579_s15 + $0x388] sm:$0xff]   ;;  %v3762_v17 = vld [vmem:[%s4579_s15 + $0x350] sm:$0xff]  }
 0x135   : > { %3471 = vmatprep.subr.bf16.mxu1 %v3715_v18  ;;  %v3763_v18 = vld [vmem:[%s4579_s15 + $0x3d0] sm:$0xff]  }
 0x137   : > { %3450 = vmatpush3.bf16.msra.mxu0 %v3716_v19  ;;  %v3764_v19 = vld [vmem:[%s4579_s15 + $0x310] sm:$0xff]  }
 0x138   : > { %3472 = vmatpush3.bf16.msra.mxu1 %v3717_v20  ;;  %3451 = vmatprep.subr.bf16.mxu0 %v3718_v21  ;;  %v3765_v20 = vld [vmem:[%s4579_s15 + $0x390] sm:$0xff]   ;;  %v3766_v21 = vld [vmem:[%s4579_s15 + $0x358] sm:$0xff]  }
 0x139   : > { %3473 = vmatprep.subr.bf16.mxu1 %v3719_v22  ;;  %v3767_v22 = vld [vmem:[%s4579_s15 + $0x3d8] sm:$0xff]  }
 0x13b   : > { %3452 = vmatpush3.bf16.msra.mxu0 %v3720_v23  ;;  %v3768_v23 = vld [vmem:[%s4579_s15 + $0x318] sm:$0xff]  }
 0x13c   : > { %3474 = vmatpush3.bf16.msra.mxu1 %v3721_v24  ;;  %3481 = vmatprep.subr.bf16.mxu0 %v3722_v33  ;;  %v3769_v24 = vld [vmem:[%s4579_s15 + $0x398] sm:$0xff]   ;;  %v3778_v33 = vld [vmem:[%s4579_s15 + $0x370] sm:$0xff]  }
 0x13d   : > { %3503 = vmatprep.subr.bf16.mxu1 %v3723_v34  ;;  %v3779_v34 = vld [vmem:[%s4579_s15 + $0x3f0] sm:$0xff]  }
 0x13e   : > { %2684 = vmatmul.mubr.bf16.vlgmr.msra.gmra.mrb[4].mxu0 %v3236_v27  ;;  %v3772_v27 = vld [vmem:[%s4579_s15 + $0x320] sm:$0xff]  }
 0x13f   : > { %2725 = vmatmul.mubr.bf16.vlgmr.msra.gmra.mrb[4].mxu1 %v3238_v31  ;;  %3482 = vmatpush3.bf16.msra.mxu0 %v3724_v35  ;;  %v3776_v31 = vld [vmem:[%s4579_s15 + $0x328] sm:$0xff]   ;;  %v3780_v35 = vld [vmem:[%s4579_s15 + $0x330] sm:$0xff]  }
 0x140   : > { %3504 = vmatpush3.bf16.msra.mxu1 %v3725_v36  ;;  %3483 = vmatprep.subr.bf16.mxu0 %v3726_v37  ;;  %v3781_v36 = vld [vmem:[%s4579_s15 + $0x3b0] sm:$0xff]   ;;  %v3782_v37 = vld [vmem:[%s4579_s15 + $0x378] sm:$0xff]  }
 0x141   : > { %3505 = vmatprep.subr.bf16.mxu1 %v3727_v38  ;;  %2765 = vmatprep.mubr.bf16.mxu0 %v3241_v6  ;;  %v3783_v38 = vld [vmem:[%s4579_s15 + $0x3f8] sm:$0xff]  }
 0x142   : > { %2806 = vmatprep.mubr.bf16.mxu1 %v3243_v8 }
 0x143   : > { %3484 = vmatpush3.bf16.msra.mxu0 %v3728_v39  ;;  %v3784_v39 = vld [vmem:[%s4579_s15 + $0x338] sm:$0xff]  }
 0x144   : > { %3506 = vmatpush3.bf16.msra.mxu1 %v3729_v40  ;;  %3485 = vmatprep.subr.bf16.mxu0 %v3730_v41  ;;  %v3785_v40 = vld [vmem:[%s4579_s15 + $0x3b8] sm:$0xff]   ;;  %v1455_v41 = vld [vmem:[%s4577_s0 + $0x30] sm:$0xff] }
 0x145   : > { %3507 = vmatprep.subr.bf16.mxu1 %v3731_v42  ;;  %v1463_v42 = vld [vmem:[%s4577_s0 + $0x70] sm:$0xff] }
 0x147   : > { %3486 = vmatpush3.bf16.msra.mxu0 %v3732_v43  ;;  %v1456_v43 = vld [vmem:[%s4577_s0 + $0x38] sm:$0xff] }
 0x148   : > { %3508 = vmatpush3.bf16.msra.mxu1 %v3733_v44  ;;  %3487 = vmatprep.subr.bf16.mxu0 %v3734_v45  ;;  %v3244_v44 = vcombine.low %v1455_v41, %v1463_v42  ;;  %v3245_v45 = vcombine.high %v1455_v41, %v1463_v42 }
 0x149   : > { %3509 = vmatprep.subr.bf16.mxu1 %v3735_v46  ;;  %v1464_v46 = vld [vmem:[%s4577_s0 + $0x78] sm:$0xff] }
 0x14b   : > { %3488 = vmatpush3.bf16.msra.mxu0 %v3736_v47  ;;  %v3246_v47 = vcombine.low %v1456_v43, %v1464_v46 }
 0x14c   : > { %3510 = vmatpush3.bf16.msra.mxu1 %v3737_v48  ;;  %3489 = vmatprep.subr.bf16.mxu0 %v3738_v49  ;;  %v3247_v48 = vcombine.high %v1456_v43, %v1464_v46  ;;  %v1447_v43 = vld [vmem:[#allocation2] sm:$0xff] }
 0x14d   : > { %3511 = vmatprep.subr.bf16.mxu1 %v3739_v50 }
 0x14f   : > { %3490 = vmatpush3.bf16.msra.mxu0 %v3740_v51 }
 0x150   : > { %3512 = vmatpush3.bf16.msra.mxu1 %v3741_v52  ;;  %3491 = vmatprep.subr.bf16.mxu0 %v3742_v53 }
 0x151   : > { %3513 = vmatprep.subr.bf16.mxu1 %v3743_v54 }
 0x153   : > { %3492 = vmatpush3.bf16.msra.mxu0 %v3744_v55 }
 0x154   : > { %3514 = vmatpush3.bf16.msra.mxu1 %v3745_v56  ;;  %3493 = vmatprep.subr.bf16.mxu0 %v3746_v57 }
 0x155   : > { %3515 = vmatprep.subr.bf16.mxu1 %v3747_v58 }
 0x157   : > { %3494 = vmatpush3.bf16.msra.mxu0 %v3748_v59 }
 0x158   : > { %3516 = vmatpush3.bf16.msra.mxu1 %v3749_v60  ;;  %3495 = vmatprep.subr.bf16.mxu0 %v3750_v61 }
 0x159   : > { %3517 = vmatprep.subr.bf16.mxu1 %v3751_v62 }
 0x15b   : > { %3496 = vmatpush3.bf16.msra.mxu0 %v3752_v63 }
 0x15c   : > { %3518 = vmatpush3.bf16.msra.mxu1 %v3753_v0  ;;  %3525 = vmatprep.subr.bf16.mxu0 %v3754_v9 }
 0x15d   : > { %3547 = vmatprep.subr.bf16.mxu1 %v3755_v10 }
 0x15e   : > { %2766 = vmatmul.mubr.bf16.vlgmr.msra.gmra.mrb[8].mxu0 %v3240_v5 }
 0x15f   : > { %2807 = vmatmul.mubr.bf16.vlgmr.msra.gmra.mrb[8].mxu1 %v3242_v7  ;;  %3526 = vmatpush3.bf16.msra.mxu0 %v3756_v11 }
 0x160   : > { %3548 = vmatpush3.bf16.msra.mxu1 %v3757_v12  ;;  %3527 = vmatprep.subr.bf16.mxu0 %v3758_v13 }
 0x161   : > { %3549 = vmatprep.subr.bf16.mxu1 %v3759_v14  ;;  %2847 = vmatprep.mubr.bf16.mxu0 %v3245_v45 }
 0x162   : > { %2888 = vmatprep.mubr.bf16.mxu1 %v3247_v48 }
 0x163   : > { %3528 = vmatpush3.bf16.msra.mxu0 %v3760_v15 }
 0x164   : > { %3550 = vmatpush3.bf16.msra.mxu1 %v3761_v16  ;;  %3529 = vmatprep.subr.bf16.mxu0 %v3762_v17 }
 0x165   : > { %3551 = vmatprep.subr.bf16.mxu1 %v3763_v18 }
 0x167   : > { %3530 = vmatpush3.bf16.msra.mxu0 %v3764_v19 }
 0x168   : > { %3552 = vmatpush3.bf16.msra.mxu1 %v3765_v20  ;;  %3531 = vmatprep.subr.bf16.mxu0 %v3766_v21 }
 0x169   : > { %3553 = vmatprep.subr.bf16.mxu1 %v3767_v22 }
 0x16b   : > { %3532 = vmatpush3.bf16.msra.mxu0 %v3768_v23 }
 0x16c   : > { %3554 = vmatpush3.bf16.msra.mxu1 %v3769_v24  ;;  %3533 = vmatprep.subr.bf16.mxu0 %v3770_v25 }
 0x16d   : > { %3555 = vmatprep.subr.bf16.mxu1 %v3771_v26 }
 0x16f   : > { %3534 = vmatpush3.bf16.msra.mxu0 %v3772_v27 }
 0x170   : > { %3556 = vmatpush3.bf16.msra.mxu1 %v3773_v28  ;;  %3535 = vmatprep.subr.bf16.mxu0 %v3774_v29 }
 0x171   : > { %3557 = vmatprep.subr.bf16.mxu1 %v3775_v30 }
 0x173   : > { %3536 = vmatpush3.bf16.msra.mxu0 %v3776_v31 }
 0x174   : > { %3558 = vmatpush3.bf16.msra.mxu1 %v3777_v32  ;;  %3537 = vmatprep.subr.bf16.mxu0 %v3778_v33 }
 0x175   : > { %3559 = vmatprep.subr.bf16.mxu1 %v3779_v34 }
 0x177   : > { %3538 = vmatpush3.bf16.msra.mxu0 %v3780_v35 }
 0x178   : > { %3560 = vmatpush3.bf16.msra.mxu1 %v3781_v36  ;;  %3539 = vmatprep.subr.bf16.mxu0 %v3782_v37 }
 0x179   : > { %3561 = vmatprep.subr.bf16.mxu1 %v3783_v38 }
 0x17b   : > { %3540 = vmatpush3.bf16.msra.mxu0 %v3784_v39 }
 0x17c   : > { %3562 = vmatpush3.bf16.msra.mxu1 %v3785_v40 }
 0x17e   : > { %2848 = vmatmul.mubr.bf16.vlgmr.msra.gmra.mrb[12].mxu0 %v3244_v44 }
 0x17f   : > { %2889 = vmatmul.mubr.bf16.vlgmr.msra.gmra.mrb[12].mxu1 %v3246_v47  ;;  %v1448_v47 = vld [vmem:[#allocation2 + $0x8] sm:$0xff] }
 0x1f1   : > { %v3409_v49 = vpop.f32.mrb[0].mxu0 }
 0x1f2   : > { %v3431_v50 = vpop.f32.mrb[0].mxu1  ;;  %v3410_v51 = vpop.f32.mrb[1].mxu0 }
 0x1f3   : > { %v3411_v52 = vadd.f32 %v3410_v51, %v3409_v49  ;;  %v3432_v53 = vpop.f32.mrb[1].mxu1  ;;  %v3412_v54 = vpop.f32.mrb[2].mxu0 }
 0x1f4   : > { %v3433_v55 = vadd.f32 %v3432_v53, %v3431_v50  ;;  %v3434_v56 = vpop.f32.mrb[2].mxu1  ;;  %v3413_v57 = vpop.f32.mrb[3].mxu0  ;;  %v3377_v53 = vld [vmem:[%s1422_s13] ss:$0 sm:$0xff] (!%p3376_p5) }
 0x1f5   : > { %v3414_v58 = vadd.f32 %v3413_v57, %v3412_v54  ;;  %v3435_v59 = vpop.f32.mrb[3].mxu1 }
 0x1f6   : > { %v2645_v60 = vadd.f32 %v3433_v55, %v3411_v52  ;;  %v3436_v61 = vadd.f32 %v3435_v59, %v3434_v56 }
 0x1f8   : > { %v2648_v62 = vadd.f32 %v3436_v61, %v3414_v58 }
 0x211   : > { %v3453_v63 = vpop.f32.mrb[4].mxu0 }
 0x212   : > { %v3475_v0 = vpop.f32.mrb[4].mxu1  ;;  %v3454_v1 = vpop.f32.mrb[5].mxu0 }
 0x213   : > { %v3455_v2 = vadd.f32 %v3454_v1, %v3453_v63  ;;  %v3476_v3 = vpop.f32.mrb[5].mxu1  ;;  %v3456_v4 = vpop.f32.mrb[6].mxu0 }
 0x214   : > { %v3477_v5 = vadd.f32 %v3476_v3, %v3475_v0  ;;  %v3478_v6 = vpop.f32.mrb[6].mxu1  ;;  %v3457_v7 = vpop.f32.mrb[7].mxu0 }
 0x215   : > { %v2686_v8 = vadd.f32 %v3455_v2, %v2645_v60  ;;  %v3458_v9 = vadd.f32 %v3457_v7, %v3456_v4  ;;  %v3479_v10 = vpop.f32.mrb[7].mxu1 }
 0x216   : > { %v3480_v11 = vadd.f32 %v3479_v10, %v3478_v6 }
 0x217   : > { %v2727_v12 = vadd.f32 %v3477_v5, %v2686_v8  ;;  %v2689_v13 = vadd.f32 %v3458_v9, %v2648_v62 }
 0x219   : > { %v2730_v14 = vadd.f32 %v3480_v11, %v2689_v13 }
 0x231   : > { %v3497_v15 = vpop.f32.mrb[8].mxu0 }
 0x232   : > { %v3519_v16 = vpop.f32.mrb[8].mxu1  ;;  %v3498_v17 = vpop.f32.mrb[9].mxu0 }
 0x233   : > { %v3520_v18 = vpop.f32.mrb[9].mxu1  ;;  %v3499_v19 = vadd.f32 %v3498_v17, %v3497_v15  ;;  %v3500_v21 = vpop.f32.mrb[10].mxu0 }
 0x234   : > { %v3521_v20 = vadd.f32 %v3520_v18, %v3519_v16  ;;  %v3522_v22 = vpop.f32.mrb[10].mxu1  ;;  %v3501_v23 = vpop.f32.mrb[11].mxu0 }
 0x235   : > { %v3523_v24 = vpop.f32.mrb[11].mxu1  ;;  %v2768_v25 = vadd.f32 %v3499_v19, %v2727_v12  ;;  %v3502_v26 = vadd.f32 %v3501_v23, %v3500_v21 }
 0x236   : > { %v3524_v27 = vadd.f32 %v3523_v24, %v3522_v22 }
 0x237   : > { %v2809_v28 = vadd.f32 %v3521_v20, %v2768_v25  ;;  %v2771_v29 = vadd.f32 %v3502_v26, %v2730_v14 }
 0x239   : > { %v2812_v30 = vadd.f32 %v3524_v27, %v2771_v29 }
 0x251   : > { %v3541_v31 = vpop.f32.mrb[12].mxu0 }
 0x252   : > { %v3563_v32 = vpop.f32.mrb[12].mxu1  ;;  %v3542_v33 = vpop.f32.mrb[13].mxu0 }
 0x253   : > { %v3543_v34 = vadd.f32 %v3542_v33, %v3541_v31  ;;  %v3564_v35 = vpop.f32.mrb[13].mxu1  ;;  %v3544_v36 = vpop.f32.mrb[14].mxu0 }
 0x254   : > { %v3565_v37 = vadd.f32 %v3564_v35, %v3563_v32  ;;  %v3566_v38 = vpop.f32.mrb[14].mxu1  ;;  %v3545_v39 = vpop.f32.mrb[15].mxu0 }
 0x255   : > { %v2850_v40 = vadd.f32 %v3543_v34, %v2809_v28  ;;  %v3546_v41 = vadd.f32 %v3545_v39, %v3544_v36  ;;  %v3567_v42 = vpop.f32.mrb[15].mxu1 }
 0x256   : > { %v3568_v44 = vadd.f32 %v3567_v42, %v3566_v38 }
 0x257   : > { %v2891_v45 = vadd.f32 %v3565_v37, %v2850_v40  ;;  %v2853_v46 = vadd.f32 %v3546_v41, %v2812_v30  ;;  %2904 = sbr.rel (%p3376_p5) target bundleno = 635 (0x27b), region = 104 }
 0x259   : > { %v2897_v48 = vadd.f32 %v2891_v45, %v1447_v43  ;;  %v2894_v49 = vadd.f32 %v3568_v44, %v2853_v46 }
 0x25b   : > { %2899 = vst [vmem:[#allocation2] sm:$0xff] %v2897_v48  ;;  %v2898_v50 = vadd.f32 %v2894_v49, %v1448_v47 }
 0x25d   : > { %2900 = vst [vmem:[#allocation2 + $0x8] sm:$0xff] %v2898_v50 }
 0x262   : > { %v2905_v51 = vld [vmem:[#allocation2] sm:$0xff] }
 0x263   : > { %v2914_v54 = vadd.f32 %v3377_v53, %v2905_v51 }
 0x264   : > { %v2906_v52 = vld [vmem:[#allocation2 + $0x8] sm:$0xff] }
 0x265   : > { %v2915_v55 = vadd.f32 %v3377_v53, %v2906_v52  ;;  %vm2916_vm0 = vcmp.ge.f32.partialorder %v2914_v54, 0.0  ;;  %v2918_v56 = vmul.f32 0.01, %v2914_v54 }
 0x267   : > { %vm2917_vm1 = vcmp.ge.f32.partialorder %v2915_v55, 0.0  ;;  %v2919_v57 = vmul.f32 0.01, %v2915_v55  ;;  %v2920_v58 = vsel %vm2916_vm0, %v2914_v54, %v2918_v56 }
 0x268   : > { %v2949_v62 = vmul.f32 %v2920_v58, %v2920_v58 }
 0x269   : > { %v2921_v59 = vsel %vm2917_vm1, %v2915_v55, %v2919_v57 }
 0x26a   : > { %v3391_v60 = vpack.c.bf16 %v2921_v59, %v2920_v58  ;;  %v2942_v61 = vadd.f32 %v2921_v59, %v2920_v58  ;;  %v2950_v63 = vmul.f32 %v2921_v59, %v2921_v59 }
 0x26c   : > { %3392 = vst [vmem:[%s4581_s7] sm:$0xff] %v3391_v60   ;;  %v2943_v0 = vrot.slane %v2942_v61, 4  ;;  %v2951_v1 = vadd.f32 %v2950_v63, %v2949_v62 }
 0x26e   : > { %v2944_v2 = vadd.f32 %v2943_v0, %v2942_v61  ;;  %v2952_v3 = vrot.slane %v2951_v1, 4 }
 0x270   : > { %v2945_v4 = vrot.slane %v2944_v2, 2  ;;  %v2953_v5 = vadd.f32 %v2952_v3, %v2951_v1 }
 0x272   : > { %v2946_v6 = vadd.f32 %v2945_v4, %v2944_v2  ;;  %v2954_v7 = vrot.slane %v2953_v5, 2 }
 0x274   : > { %v2947_v8 = vrot.slane %v2946_v6, 1  ;;  %v2955_v9 = vadd.f32 %v2954_v7, %v2953_v5 }
 0x276   : > { %v2948_v10 = vadd.f32 %v2947_v8, %v2946_v6  ;;  %v2956_v11 = vrot.slane %v2955_v9, 1 }
 0x278   : > { %2958 = vst [vmem:[%s4570_s26] sm:$0xff] %v2948_v10  ;;  %v2957_v12 = vadd.f32 %v2956_v11, %v2955_v9 }
 0x27a   : > { %2959 = vst [vmem:[%s4575_s18] sm:$0xff] %v2957_v12 }
 0x27b PF: > { %2982 = sbr.rel (!%p3999_p12) target bundleno = 642 (0x282), region = 108  ;;  %s3381_s24 = sshll.u32 (%p3999_p12), %s3860_s25, 2  ;;  %v3003_v13 = vld [vmem:[%s4581_s7] sm:$0xf] (%p3999_p12)  ;;  %v3005_v14 = vld [vmem:[%s4581_s7 + $0x4] sm:$0xf] (%p3999_p12) }
 0x27c   : > { %s2987_s6 = scalar_lea.vmem (%p3999_p12), %s4781_s3, %s3381_s24 }
 0x27d   : > { %3004 = vst [vmem:[%s2987_s6] sm:$0xf] (%p3999_p12), %v3003_v13  ;;  %3006 = vst [vmem:[%s2987_s6 + $0x8] sm:$0xf] (%p3999_p12), %v3005_v14 }
 0x282 PF: > { %s16_s28 = sadd.s32 1, %s3872_s28   ;;  %s4799_s24 = sld [smem:[#allocation6_spill]] }
 0x283   : > { %p13_p6 = scmp.ge.s32.totalorder %s16_s28, 8   ;;  %s4800_s25 = sld [smem:[#allocation7_spill]] }
 0x284   : > { %s4801_s26 = sld [smem:[#allocation8_spill]]  ;;  %s4802_s27 = sld [smem:[#allocation9_spill]] }
 0x285   : > { %s4803_s18 = smov %s3836_s19  ;;  %s4804_s19 = smov %s3997_s17 }
 0x286   : > { %s4805_s20 = smov %s3844_s21  ;;  %s4806_s21 = smov %s3994_s16 }
 0x287   : > { %s4807_s22 = smov %s3852_s23  ;;  %s4808_s23 = smov %s3980_s11 }
 0x288   :  { %15 = sbr.rel (!%p13_p6) target bundleno = 9 (0x9), region = 215 }

// kernel: _lambda_.17
= control target key start
LH: loop header
LB: loop body
LE: loop exit
PB: predicated region body
PF: predicated region fallthrough
CT: control target
= control target key end

     0   :  { %s2158_s18 = smov 0   ;;  %s2160_s19 = smov 0   ;;  %s2508_s0 = inlined_call_operand.vmem [shape: bf16[16,1664], index: 0, kind: input, shape index: {}]   ;;  %s2509_s1 = inlined_call_operand.vmem [shape: bf16[1664,1024], index: 1, kind: input, shape index: {}]   ;;  %s2510_s2 = inlined_call_operand.vmem [shape: f32[1,1024], index: 2, kind: input, shape index: {}]   ;;  %s2511_s3 = inlined_call_operand.vmem [shape: bf16[1024,128], index: 3, kind: input, shape index: {}]   ;;  %s2512_s4 = inlined_call_operand.vmem [shape: f32[1,128], index: 4, kind: input, shape index: {}]   ;;  %s2513_s5 = inlined_call_operand.vmem [shape: f32[16,128], index: 5, kind: output, shape index: {}]  }
   0x1   :  { %s2162_s20 = smov 0  }
   0x2 LB: > { %s2171_s21 = sadd.s32 4294967295, %s2124_s20   ;;  %s2173_s22 = sadd.s32 1, %s2124_s20   ;;  %s2124_s20 = sphi %s2162_s20, %s2516_s20   ;;  %s2120_s19 = sphi %s2160_s19, %s2515_s19   ;;  %s2116_s18 = sphi %s2158_s18, %s2514_s18  }
   0x3   : > { %s19_s23 = ssub.s32 %s2124_s20, %s2173_s22  ;;  %s22_s24 = sadd.s32 1, %s2120_s19 }
   0x4   : > { %p20_p0 = scmp.eq.s32.totalorder %s19_s23, 0  ;;  %p29_p1 = scmp.ne.s32.totalorder %s2120_s19, %s2116_s18 }
   0x5   : > { %p30_p2 = scmp.eq.s32.totalorder %s2124_s20, 0  ;;  %p1780_p4 = scmp.ge.s32.totalorder %s2124_s20, 13 }
   0x6   : > { %s2180_s25 = scalar_select %p20_p0, %s2120_s19, %s22_s24  }
   0x7   : > { %p31_p3 = por %p30_p2, %p29_p1  ;;  %174 = sbr.rel (%p1780_p4) target bundleno = 21 (0x15), region = 28 }
   0xe   : > { %177 = sbr.rel (!%p31_p3) target bundleno = 21 (0x15), region = 32  ;;  %s179_s26 = sand.u32 (%p31_p3), 1, %s2120_s19  }
   0xf   : > { %s1782_s27 = sshll.u32 (%p31_p3), %s2124_s20, 2  ;;  %s1781_s28 = sshll.u32 (%p31_p3), %s179_s26, 3 }
  0x10   : > { %s183_s6 = scalar_lea.vmem (%p31_p3), %s2508_s0, %s1782_s27  ;;  %s181_s7 = scalar_lea.vmem (%p31_p3), [#allocation3], %s1781_s28 }
  0x11   : > { %v199_v0 = vld [vmem:[%s183_s6] sm:$0xf] (%p31_p3)  ;;  %v201_v1 = vld [vmem:[%s183_s6 + $0x34] sm:$0xf] (%p31_p3) }
  0x12   : > { %200 = vst [vmem:[%s181_s7] sm:$0xf] (%p31_p3), %v199_v0  ;;  %202 = vst [vmem:[%s181_s7 + $0x4] sm:$0xf] (%p31_p3), %v201_v1 }
  0x15 PF: > { %p1783_p5 = scmp.ge.s32.totalorder %s2124_s20, 1  ;;  %p238_p6 = scmp.lt.s32.totalorder %s2124_s20, 14 }
  0x17   : > { %p239_p7 = pnand %p1783_p5, %p238_p6 }
  0x18   : > { %s245_s8 = sand.u32 (!%p239_p7), 1, %s2116_s18   ;;  %s1785_s9 = sshll.u32 (!%p239_p7), %s2171_s21, 4 }
  0x19   : > { %242 = sbr.rel (%p239_p7) target bundleno = 591 (0x24f), region = 77  ;;  %s2188_s10 = sshll.u32 (!%p239_p7), %s245_s8, 3 }
  0x1a   : > { %p274_p8 = scmp.lt.s32.totalorder (!%p239_p7), %s1785_s9, 207  ;;  %s247_s15 = scalar_lea.vmem (!%p239_p7), [#allocation3], %s2188_s10 }
  0x1b   : > { %p1788_p9 = scmp.ne.s32.totalorder (!%p239_p7), %s2171_s21, 0 }
  0x20   : > { %s2518_s9 = smov (!%p274_p8, %s1785_s9), 207  ;;  %284 = sbr.rel (%p1788_p9) target bundleno = 42 (0x2a), region = 85 }
  0x21   : > { %s1922_s11 = sshll.u32 %s2518_s9, 5  ;;  %v2126_v2 = vmov (!%p1788_p9), 0.0  }
  0x22   : > { %s2193_s14 = scalar_lea.vmem %s2509_s1, %s1922_s11  ;;  %285 = vst [vmem:[#allocation2] sm:$0xff] (!%p1788_p9), %v2126_v2  ;;  %286 = vst [vmem:[#allocation2 + $0x8] sm:$0xff] (!%p1788_p9), %v2126_v2 }
  0x23   : > { %287 = vst [vmem:[#allocation2 + $0x10] sm:$0xff] (!%p1788_p9), %v2126_v2  ;;  %288 = vst [vmem:[#allocation2 + $0x18] sm:$0xff] (!%p1788_p9), %v2126_v2 }
  0x24   : > { %289 = vst [vmem:[#allocation2 + $0x20] sm:$0xff] (!%p1788_p9), %v2126_v2  ;;  %290 = vst [vmem:[#allocation2 + $0x28] sm:$0xff] (!%p1788_p9), %v2126_v2 }
  0x25   : > { %291 = vst [vmem:[#allocation2 + $0x30] sm:$0xff] (!%p1788_p9), %v2126_v2  ;;  %292 = vst [vmem:[#allocation2 + $0x38] sm:$0xff] (!%p1788_p9), %v2126_v2 }
  0x26   : > { %293 = vst [vmem:[#allocation2 + $0x40] sm:$0xff] (!%p1788_p9), %v2126_v2  ;;  %294 = vst [vmem:[#allocation2 + $0x48] sm:$0xff] (!%p1788_p9), %v2126_v2 }
  0x27   : > { %295 = vst [vmem:[#allocation2 + $0x50] sm:$0xff] %v2126_v2  ;;  %296 = vst [vmem:[#allocation2 + $0x58] sm:$0xff] %v2126_v2 }
  0x28   : > { %297 = vst [vmem:[#allocation2 + $0x60] sm:$0xff] %v2126_v2  ;;  %298 = vst [vmem:[#allocation2 + $0x68] sm:$0xff] %v2126_v2 }
  0x29   : > { %299 = vst [vmem:[#allocation2 + $0x70] sm:$0xff] %v2126_v2  ;;  %300 = vst [vmem:[#allocation2 + $0x78] sm:$0xff] %v2126_v2 }
  0x2a PF: > { %v319_v3 = vld [vmem:[%s2193_s14] sm:$0xff]  ;;  %v320_v5 = vld [vmem:[%s2193_s14 + $0x8] sm:$0xff]  ;;  %v2127_v11 = vmov 0   ;;  %v321_v2 = vld [vmem:[%s2193_s14 + $0x10] sm:$0xff]  ;;  %p1854_p10 = scmp.ne.s32.totalorder %s2171_s21, 12 }
  0x2b   : > { %v323_v4 = vld [vmem:[%s2193_s14 + $0x20] sm:$0xff]  ;;  %v324_v7 = vld [vmem:[%s2193_s14 + $0x28] sm:$0xff]  ;;  %741 = vmatprep.mubr.bf16.mxu0 %v2127_v11  ;;  %784 = vmatprep.mubr.bf16.mxu1 %v2127_v11 }
  0x2c   : > { %v1791_v6 = vcombine.high %v319_v3, %v323_v4  ;;  %v1790_v8 = vcombine.low %v319_v3, %v323_v4  ;;  %v327_v9 = vld [vmem:[%s2193_s14 + $0x40] sm:$0xff]  ;;  %v1793_v12 = vcombine.high %v320_v5, %v324_v7  ;;  %v1792_v13 = vcombine.low %v320_v5, %v324_v7  ;;  %v328_v15 = vld [vmem:[%s2193_s14 + $0x48] sm:$0xff]  ;;  %v325_v3 = vld [vmem:[%s2193_s14 + $0x30] sm:$0xff] }
  0x2d   : > { %v331_v10 = vld [vmem:[%s2193_s14 + $0x60] sm:$0xff]  ;;  %v332_v16 = vld [vmem:[%s2193_s14 + $0x68] sm:$0xff]  ;;  %v322_v4 = vld [vmem:[%s2193_s14 + $0x18] sm:$0xff] }
  0x2e   : > { %v1799_v14 = vcombine.high %v327_v9, %v331_v10  ;;  %v335_v17 = vld [vmem:[%s2193_s14 + $0x80] sm:$0xff]  ;;  %709 = vmatprep.subr.bf16.mxu0 %v1791_v6  ;;  %v1801_v18 = vcombine.high %v328_v15, %v332_v16  ;;  %v336_v20 = vld [vmem:[%s2193_s14 + $0x88] sm:$0xff]  ;;  %752 = vmatprep.subr.bf16.mxu1 %v1793_v12  ;;  %v1798_v22 = vcombine.low %v327_v9, %v331_v10  ;;  %v326_v5 = vld [vmem:[%s2193_s14 + $0x38] sm:$0xff] }
  0x2f   : > { %v339_v19 = vld [vmem:[%s2193_s14 + $0xa0] sm:$0xff]  ;;  %v340_v21 = vld [vmem:[%s2193_s14 + $0xa8] sm:$0xff]  ;;  %710 = vmatpush1.bf16.msra.mxu0 %v1790_v8  ;;  %753 = vmatpush1.bf16.msra.mxu1 %v1792_v13  ;;  %v1800_v23 = vcombine.low %v328_v15, %v332_v16  ;;  %v1795_v8 = vcombine.high %v321_v2, %v325_v3  ;;  %v1797_v9 = vcombine.high %v322_v4, %v326_v5  ;;  %v329_v10 = vld [vmem:[%s2193_s14 + $0x50] sm:$0xff] }
  0x30   : > { %711 = vmatprep.subr.bf16.mxu0 %v1799_v14  ;;  %v1807_v24 = vcombine.high %v335_v17, %v339_v19  ;;  %754 = vmatprep.subr.bf16.mxu1 %v1801_v18  ;;  %v1809_v25 = vcombine.high %v336_v20, %v340_v21  ;;  %v343_v26 = vld [vmem:[%s2193_s14 + $0xc0] sm:$0xff]  ;;  %v344_v28 = vld [vmem:[%s2193_s14 + $0xc8] sm:$0xff]  ;;  %v1806_v30 = vcombine.low %v335_v17, %v339_v19  ;;  %v333_v12 = vld [vmem:[%s2193_s14 + $0x70] sm:$0xff] }
  0x31   : > { %v347_v27 = vld [vmem:[%s2193_s14 + $0xe0] sm:$0xff]  ;;  %v348_v29 = vld [vmem:[%s2193_s14 + $0xe8] sm:$0xff]  ;;  %v1808_v31 = vcombine.low %v336_v20, %v340_v21  ;;  %v330_v14 = vld [vmem:[%s2193_s14 + $0x58] sm:$0xff]  ;;  %v1794_v16 = vcombine.low %v321_v2, %v325_v3  ;;  %v1796_v17 = vcombine.low %v322_v4, %v326_v5  ;;  %v1803_v18 = vcombine.high %v329_v10, %v333_v12 }
  0x32   : > { %v1815_v32 = vcombine.high %v343_v26, %v347_v27  ;;  %v1817_v33 = vcombine.high %v344_v28, %v348_v29  ;;  %v351_v34 = vld [vmem:[%s2193_s14 + $0x100] sm:$0xff]  ;;  %v352_v36 = vld [vmem:[%s2193_s14 + $0x108] sm:$0xff]  ;;  %v1814_v38 = vcombine.low %v343_v26, %v347_v27  ;;  %v1816_v39 = vcombine.low %v344_v28, %v348_v29  ;;  %v334_v15 = vld [vmem:[%s2193_s14 + $0x78] sm:$0xff] }
  0x33   : > { %712 = vmatpush1.bf16.msra.mxu0 %v1798_v22  ;;  %755 = vmatpush1.bf16.msra.mxu1 %v1800_v23  ;;  %v355_v35 = vld [vmem:[%s2193_s14 + $0x120] sm:$0xff]  ;;  %v356_v37 = vld [vmem:[%s2193_s14 + $0x128] sm:$0xff]  ;;  %v1805_v19 = vcombine.high %v330_v14, %v334_v15  ;;  %v337_v20 = vld [vmem:[%s2193_s14 + $0x90] sm:$0xff] }
  0x34   : > { %713 = vmatprep.subr.bf16.mxu0 %v1807_v24  ;;  %756 = vmatprep.subr.bf16.mxu1 %v1809_v25  ;;  %v1823_v40 = vcombine.high %v351_v34, %v355_v35  ;;  %v1825_v41 = vcombine.high %v352_v36, %v356_v37  ;;  %v359_v42 = vld [vmem:[%s2193_s14 + $0x140] sm:$0xff]  ;;  %v360_v44 = vld [vmem:[%s2193_s14 + $0x148] sm:$0xff]  ;;  %v1822_v46 = vcombine.low %v351_v34, %v355_v35  ;;  %v341_v21 = vld [vmem:[%s2193_s14 + $0xb0] sm:$0xff] }
  0x35   : > { %v363_v43 = vld [vmem:[%s2193_s14 + $0x160] sm:$0xff]  ;;  %v364_v45 = vld [vmem:[%s2193_s14 + $0x168] sm:$0xff]  ;;  %v1824_v47 = vcombine.low %v352_v36, %v356_v37  ;;  %v338_v22 = vld [vmem:[%s2193_s14 + $0x98] sm:$0xff]  ;;  %v1802_v24 = vcombine.low %v329_v10, %v333_v12  ;;  %v1804_v25 = vcombine.low %v330_v14, %v334_v15  ;;  %v1811_v26 = vcombine.high %v337_v20, %v341_v21 }
  0x36   : > { %v1831_v48 = vcombine.high %v359_v42, %v363_v43  ;;  %v1833_v49 = vcombine.high %v360_v44, %v364_v45  ;;  %v367_v50 = vld [vmem:[%s2193_s14 + $0x180] sm:$0xff]  ;;  %v368_v52 = vld [vmem:[%s2193_s14 + $0x188] sm:$0xff]  ;;  %v1830_v54 = vcombine.low %v359_v42, %v363_v43  ;;  %v1832_v55 = vcombine.low %v360_v44, %v364_v45  ;;  %v342_v23 = vld [vmem:[%s2193_s14 + $0xb8] sm:$0xff] }
  0x37   : > { %714 = vmatpush1.bf16.msra.mxu0 %v1806_v30  ;;  %757 = vmatpush1.bf16.msra.mxu1 %v1808_v31  ;;  %v371_v51 = vld [vmem:[%s2193_s14 + $0x1a0] sm:$0xff]  ;;  %v372_v53 = vld [vmem:[%s2193_s14 + $0x1a8] sm:$0xff]  ;;  %v1813_v27 = vcombine.high %v338_v22, %v342_v23  ;;  %v345_v28 = vld [vmem:[%s2193_s14 + $0xd0] sm:$0xff] }
  0x38   : > { %715 = vmatprep.subr.bf16.mxu0 %v1815_v32  ;;  %758 = vmatprep.subr.bf16.mxu1 %v1817_v33  ;;  %v1839_v56 = vcombine.high %v367_v50, %v371_v51  ;;  %v1841_v57 = vcombine.high %v368_v52, %v372_v53  ;;  %v375_v58 = vld [vmem:[%s2193_s14 + $0x1c0] sm:$0xff]  ;;  %v376_v60 = vld [vmem:[%s2193_s14 + $0x1c8] sm:$0xff]  ;;  %v1838_v62 = vcombine.low %v367_v50, %v371_v51  ;;  %v349_v29 = vld [vmem:[%s2193_s14 + $0xf0] sm:$0xff] }
  0x39   : > { %v379_v59 = vld [vmem:[%s2193_s14 + $0x1e0] sm:$0xff]  ;;  %v380_v61 = vld [vmem:[%s2193_s14 + $0x1e8] sm:$0xff]  ;;  %v1840_v63 = vcombine.low %v368_v52, %v372_v53  ;;  %v346_v30 = vld [vmem:[%s2193_s14 + $0xd8] sm:$0xff]  ;;  %v1810_v32 = vcombine.low %v337_v20, %v341_v21  ;;  %v1812_v33 = vcombine.low %v338_v22, %v342_v23  ;;  %v1819_v34 = vcombine.high %v345_v28, %v349_v29 }
  0x3a   : > { %v1847_v0 = vcombine.high %v375_v58, %v379_v59  ;;  %v1849_v1 = vcombine.high %v376_v60, %v380_v61  ;;  %v1846_v6 = vcombine.low %v375_v58, %v379_v59  ;;  %v1848_v7 = vcombine.low %v376_v60, %v380_v61  ;;  %v2239_v13 = vld [vmem:[%s247_s15] sm:$0xff]   ;;  %v350_v31 = vld [vmem:[%s2193_s14 + $0xf8] sm:$0xff]  ;;  %v353_v36 = vld [vmem:[%s2193_s14 + $0x110] sm:$0xff] }
  0x3b   : > { %716 = vmatpush1.bf16.msra.mxu0 %v1814_v38  ;;  %759 = vmatpush1.bf16.msra.mxu1 %v1816_v39  ;;  %v1821_v35 = vcombine.high %v346_v30, %v350_v31  ;;  %v357_v37 = vld [vmem:[%s2193_s14 + $0x130] sm:$0xff]  ;;  %v354_v38 = vld [vmem:[%s2193_s14 + $0x118] sm:$0xff]  ;;  %v301_v5 = vld [vmem:[#allocation2] sm:$0xff] }
  0x3c   : > { %717 = vmatprep.subr.bf16.mxu0 %v1823_v40  ;;  %760 = vmatprep.subr.bf16.mxu1 %v1825_v41  ;;  %v358_v39 = vld [vmem:[%s2193_s14 + $0x138] sm:$0xff]  ;;  %v1818_v40 = vcombine.low %v345_v28, %v349_v29  ;;  %v1827_v41 = vcombine.high %v353_v36, %v357_v37  ;;  %v361_v43 = vld [vmem:[%s2193_s14 + $0x150] sm:$0xff]  ;;  %v309_v10 = vld [vmem:[#allocation2 + $0x40] sm:$0xff] }
  0x3d   : > { %v1829_v42 = vcombine.high %v354_v38, %v358_v39  ;;  %v365_v44 = vld [vmem:[%s2193_s14 + $0x170] sm:$0xff]  ;;  %v362_v45 = vld [vmem:[%s2193_s14 + $0x158] sm:$0xff] }
  0x3e   : > { %v369_v51 = vld [vmem:[%s2193_s14 + $0x190] sm:$0xff]  ;;  %v370_v53 = vld [vmem:[%s2193_s14 + $0x198] sm:$0xff] }
  0x3f   : > { %718 = vmatpush1.bf16.msra.mxu0 %v1822_v46  ;;  %761 = vmatpush1.bf16.msra.mxu1 %v1824_v47  ;;  %v366_v46 = vld [vmem:[%s2193_s14 + $0x178] sm:$0xff]  ;;  %v1826_v47 = vcombine.low %v353_v36, %v357_v37  ;;  %v373_v52 = vld [vmem:[%s2193_s14 + $0x1b0] sm:$0xff] }
  0x40   : > { %719 = vmatprep.subr.bf16.mxu0 %v1831_v48  ;;  %762 = vmatprep.subr.bf16.mxu1 %v1833_v49  ;;  %v1828_v48 = vcombine.low %v354_v38, %v358_v39  ;;  %v1835_v49 = vcombine.high %v361_v43, %v365_v44  ;;  %v1837_v50 = vcombine.high %v362_v45, %v366_v46  ;;  %v377_v59 = vld [vmem:[%s2193_s14 + $0x1d0] sm:$0xff]  ;;  %v378_v61 = vld [vmem:[%s2193_s14 + $0x1d8] sm:$0xff] }
  0x41   : > { %v381_v60 = vld [vmem:[%s2193_s14 + $0x1f0] sm:$0xff]  ;;  %v312_v22 = vld [vmem:[#allocation2 + $0x58] sm:$0xff] }
  0x42   : > { %v1850_v3 = vcombine.low %v377_v59, %v381_v60  ;;  %v315_v39 = vld [vmem:[#allocation2 + $0x70] sm:$0xff] }
  0x43   : > { %720 = vmatpush1.bf16.msra.mxu0 %v1830_v54  ;;  %763 = vmatpush1.bf16.msra.mxu1 %v1832_v55  ;;  %v374_v54 = vld [vmem:[%s2193_s14 + $0x1b8] sm:$0xff]  ;;  %v1834_v55 = vcombine.low %v361_v43, %v365_v44 }
  0x44   : > { %721 = vmatprep.subr.bf16.mxu0 %v1839_v56  ;;  %764 = vmatprep.subr.bf16.mxu1 %v1841_v57  ;;  %v1836_v56 = vcombine.low %v362_v45, %v366_v46  ;;  %v1843_v57 = vcombine.high %v369_v51, %v373_v52  ;;  %v1845_v58 = vcombine.high %v370_v53, %v374_v54  ;;  %v316_v44 = vld [vmem:[#allocation2 + $0x78] sm:$0xff] }
  0x47   : > { %722 = vmatpush1.bf16.msra.mxu0 %v1838_v62  ;;  %765 = vmatpush1.bf16.msra.mxu1 %v1840_v63  ;;  %v382_v62 = vld [vmem:[%s2193_s14 + $0x1f8] sm:$0xff]  ;;  %v1842_v63 = vcombine.low %v369_v51, %v373_v52 }
  0x48   : > { %723 = vmatprep.subr.bf16.mxu0 %v1847_v0  ;;  %766 = vmatprep.subr.bf16.mxu1 %v1849_v1  ;;  %v1844_v0 = vcombine.low %v370_v53, %v374_v54  ;;  %v1851_v1 = vcombine.high %v377_v59, %v381_v60  ;;  %v1853_v2 = vcombine.high %v378_v61, %v382_v62  ;;  %v2038_v53 = vld [vmem:[%s2511_s3 + $0x40] sm:$0xff] (!%p1854_p10)   ;;  %v2044_v59 = vld [vmem:[%s2511_s3 + $0x8] sm:$0xff] (!%p1854_p10)  }
  0x49   : > { %v1852_v4 = vcombine.low %v378_v61, %v382_v62  ;;  %v2039_v54 = vld [vmem:[%s2511_s3 + $0xc0] sm:$0xff] (!%p1854_p10)   ;;  %v2045_v60 = vld [vmem:[%s2511_s3 + $0x88] sm:$0xff] (!%p1854_p10)   ;;  %v2046_v61 = vld [vmem:[%s2511_s3 + $0x50] sm:$0xff] (!%p1854_p10)  }
  0x4a   : > { %v2047_v62 = vld [vmem:[%s2511_s3 + $0xd0] sm:$0xff] (!%p1854_p10)  }
  0x4b   : > { %724 = vmatpush1.bf16.msra.mxu0 %v1846_v6  ;;  %767 = vmatpush1.bf16.msra.mxu1 %v1848_v7  ;;  %v303_v6 = vld [vmem:[#allocation2 + $0x10] sm:$0xff]  ;;  %v302_v7 = vld [vmem:[#allocation2 + $0x8] sm:$0xff] }
  0x4c   : > { %795 = vmatprep.subr.bf16.mxu0 %v1795_v8  ;;  %838 = vmatprep.subr.bf16.mxu1 %v1797_v9  ;;  %v304_v9 = vld [vmem:[#allocation2 + $0x18] sm:$0xff] }
  0x4e   : > { %742 = vmatmul.mubr.bf16.vlgmr.msra.gmra.mrb[0].mxu0 %v2239_v13  ;;  %785 = vmatmul.mubr.bf16.vlgmr.msra.gmra.mrb[0].mxu1 %v2239_v13 }
  0x4f   : > { %796 = vmatpush1.bf16.msra.mxu0 %v1794_v16  ;;  %839 = vmatpush1.bf16.msra.mxu1 %v1796_v17  ;;  %v311_v16 = vld [vmem:[#allocation2 + $0x50] sm:$0xff]  ;;  %v310_v17 = vld [vmem:[#allocation2 + $0x48] sm:$0xff] }
  0x50   : > { %797 = vmatprep.subr.bf16.mxu0 %v1803_v18  ;;  %840 = vmatprep.subr.bf16.mxu1 %v1805_v19 }
  0x51   : > { %827 = vmatprep.mubr.bf16.mxu0 %v2127_v11  ;;  %870 = vmatprep.mubr.bf16.mxu1 %v2127_v11  ;;  %v1820_v11 = vcombine.low %v346_v30, %v350_v31  ;;  %v305_v30 = vld [vmem:[#allocation2 + $0x20] sm:$0xff]  ;;  %v307_v31 = vld [vmem:[#allocation2 + $0x30] sm:$0xff] }
  0x53   : > { %798 = vmatpush1.bf16.msra.mxu0 %v1802_v24  ;;  %841 = vmatpush1.bf16.msra.mxu1 %v1804_v25 }
  0x54   : > { %799 = vmatprep.subr.bf16.mxu0 %v1811_v26  ;;  %842 = vmatprep.subr.bf16.mxu1 %v1813_v27 }
  0x57   : > { %800 = vmatpush1.bf16.msra.mxu0 %v1810_v32  ;;  %843 = vmatpush1.bf16.msra.mxu1 %v1812_v33  ;;  %v306_v32 = vld [vmem:[#allocation2 + $0x28] sm:$0xff] }
  0x58   : > { %801 = vmatprep.subr.bf16.mxu0 %v1819_v34  ;;  %844 = vmatprep.subr.bf16.mxu1 %v1821_v35  ;;  %v308_v34 = vld [vmem:[#allocation2 + $0x38] sm:$0xff]  ;;  %v313_v35 = vld [vmem:[#allocation2 + $0x60] sm:$0xff] }
  0x5b   : > { %802 = vmatpush1.bf16.msra.mxu0 %v1818_v40  ;;  %845 = vmatpush1.bf16.msra.mxu1 %v1820_v11  ;;  %v314_v40 = vld [vmem:[#allocation2 + $0x68] sm:$0xff] }
  0x5c   : > { %803 = vmatprep.subr.bf16.mxu0 %v1827_v41  ;;  %846 = vmatprep.subr.bf16.mxu1 %v1829_v42 }
  0x5f   : > { %804 = vmatpush1.bf16.msra.mxu0 %v1826_v47  ;;  %847 = vmatpush1.bf16.msra.mxu1 %v1828_v48 }
  0x60   : > { %805 = vmatprep.subr.bf16.mxu0 %v1835_v49  ;;  %848 = vmatprep.subr.bf16.mxu1 %v1837_v50 }
  0x63   : > { %806 = vmatpush1.bf16.msra.mxu0 %v1834_v55  ;;  %849 = vmatpush1.bf16.msra.mxu1 %v1836_v56  ;;  %v2040_v55 = vld [vmem:[%s2511_s3] sm:$0xff] (!%p1854_p10)  }
  0x64   : > { %807 = vmatprep.subr.bf16.mxu0 %v1843_v57  ;;  %850 = vmatprep.subr.bf16.mxu1 %v1845_v58  ;;  %v2041_v56 = vld [vmem:[%s2511_s3 + $0x80] sm:$0xff] (!%p1854_p10)   ;;  %v2042_v57 = vld [vmem:[%s2511_s3 + $0x48] sm:$0xff] (!%p1854_p10)  }
  0x65   : > { %v2043_v58 = vld [vmem:[%s2511_s3 + $0xc8] sm:$0xff] (!%p1854_p10)  }
  0x67   : > { %808 = vmatpush1.bf16.msra.mxu0 %v1842_v63  ;;  %851 = vmatpush1.bf16.msra.mxu1 %v1844_v0  ;;  %v2048_v63 = vld [vmem:[%s2511_s3 + $0x10] sm:$0xff] (!%p1854_p10)  }
  0x68   : > { %809 = vmatprep.subr.bf16.mxu0 %v1851_v1  ;;  %852 = vmatprep.subr.bf16.mxu1 %v1853_v2  ;;  %v2049_v0 = vld [vmem:[%s2511_s3 + $0x90] sm:$0xff] (!%p1854_p10)   ;;  %v2050_v1 = vld [vmem:[%s2511_s3 + $0x58] sm:$0xff] (!%p1854_p10)  }
  0x69   : > { %v2051_v2 = vld [vmem:[%s2511_s3 + $0xd8] sm:$0xff] (!%p1854_p10)  }
  0x6b   : > { %810 = vmatpush1.bf16.msra.mxu0 %v1850_v3  ;;  %853 = vmatpush1.bf16.msra.mxu1 %v1852_v4  ;;  %v2052_v3 = vld [vmem:[%s2511_s3 + $0x18] sm:$0xff] (!%p1854_p10)  }
  0x6c   : > { %1923 = vmatprep.subr.bf16.mxu0 (!%p1854_p10), %v2038_v53  ;;  %1945 = vmatprep.subr.bf16.mxu1 (!%p1854_p10), %v2039_v54  ;;  %v2053_v4 = vld [vmem:[%s2511_s3 + $0x98] sm:$0xff] (!%p1854_p10)  }
  0x6e   : > { %828 = vmatmul.mubr.bf16.vlgmr.msra.gmra.mrb[4].mxu0 %v2239_v13  ;;  %871 = vmatmul.mubr.bf16.vlgmr.msra.gmra.mrb[4].mxu1 %v2239_v13 }
  0x6f   : > { %1924 = vmatpush3.bf16.msra.mxu0 (!%p1854_p10), %v2040_v55  ;;  %1946 = vmatpush3.bf16.msra.mxu1 (!%p1854_p10), %v2041_v56 }
  0x70   : > { %1925 = vmatprep.subr.bf16.mxu0 (!%p1854_p10), %v2042_v57  ;;  %1947 = vmatprep.subr.bf16.mxu1 (!%p1854_p10), %v2043_v58 }
  0x73   : > { %1926 = vmatpush3.bf16.msra.mxu0 (!%p1854_p10), %v2044_v59  ;;  %1948 = vmatpush3.bf16.msra.mxu1 (!%p1854_p10), %v2045_v60 }
  0x74   : > { %1927 = vmatprep.subr.bf16.mxu0 (!%p1854_p10), %v2046_v61  ;;  %1949 = vmatprep.subr.bf16.mxu1 (!%p1854_p10), %v2047_v62  ;;  %v2072_v62 = vld [vmem:[%s2511_s3 + $0x100] sm:$0xff] (!%p1854_p10)  }
  0x77   : > { %1928 = vmatpush3.bf16.msra.mxu0 (!%p1854_p10), %v2048_v63  ;;  %1950 = vmatpush3.bf16.msra.mxu1 (!%p1854_p10), %v2049_v0 }
  0x78   : > { %1929 = vmatprep.subr.bf16.mxu0 (!%p1854_p10), %v2050_v1  ;;  %1951 = vmatprep.subr.bf16.mxu1 (!%p1854_p10), %v2051_v2 }
  0x7b   : > { %1930 = vmatpush3.bf16.msra.mxu0 (!%p1854_p10), %v2052_v3  ;;  %1952 = vmatpush3.bf16.msra.mxu1 (!%p1854_p10), %v2053_v4  ;;  %v2073_v3 = vld [vmem:[%s2511_s3 + $0x180] sm:$0xff] (!%p1854_p10)  }
 0x121   : > { %v743_v8 = vpop.f32.mrb[0].mxu0  ;;  %v786_v14 = vpop.f32.mrb[0].mxu1 }
 0x122   : > { %v881_v12 = vadd.f32 %v743_v8, %v301_v5  ;;  %v745_v15 = vpop.f32.mrb[1].mxu0  ;;  %v883_v18 = vadd.f32 %v786_v14, %v303_v6  ;;  %v788_v20 = vpop.f32.mrb[1].mxu1  ;;  %v2054_v5 = vld [vmem:[%s2511_s3 + $0x60] sm:$0xff] (!%p1854_p10)   ;;  %v935_v8 = vlaneseq (!%p1854_p10)  ;;  %v2060_v14 = vld [vmem:[%s2511_s3 + $0x28] sm:$0xff] (!%p1854_p10)  }
 0x123   : > { %v882_v19 = vadd.f32 %v745_v15, %v302_v7  ;;  %v747_v21 = vpop.f32.mrb[2].mxu0  ;;  %v884_v23 = vadd.f32 %v788_v20, %v304_v9  ;;  %v790_v13 = vpop.f32.mrb[2].mxu1  ;;  %v2055_v6 = vld [vmem:[%s2511_s3 + $0xe0] sm:$0xff] (!%p1854_p10)   ;;  %1931 = vmatprep.subr.bf16.mxu0 (!%p1854_p10), %v2054_v5 }
 0x124   : > { %897 = vst [vmem:[#allocation2] sm:$0xff] %v881_v12  ;;  %v889_v24 = vadd.f32 %v747_v21, %v309_v10  ;;  %v749_v25 = vpop.f32.mrb[3].mxu0  ;;  %899 = vst [vmem:[#allocation2 + $0x10] sm:$0xff] %v883_v18  ;;  %v891_v26 = vadd.f32 %v790_v13, %v311_v16  ;;  %v792_v28 = vpop.f32.mrb[3].mxu1  ;;  %v2056_v7 = vld [vmem:[%s2511_s3 + $0x20] sm:$0xff] (!%p1854_p10)   ;;  %1953 = vmatprep.subr.bf16.mxu1 (!%p1854_p10), %v2055_v6  ;;  %v2058_v10 = vld [vmem:[%s2511_s3 + $0x68] sm:$0xff] (!%p1854_p10)  }
 0x125   : > { %898 = vst [vmem:[#allocation2 + $0x8] sm:$0xff] %v882_v19  ;;  %v890_v27 = vadd.f32 %v749_v25, %v310_v17  ;;  %900 = vst [vmem:[#allocation2 + $0x18] sm:$0xff] %v884_v23  ;;  %v892_v29 = vadd.f32 %v792_v28, %v312_v22  ;;  %v2057_v9 = vld [vmem:[%s2511_s3 + $0xa0] sm:$0xff] (!%p1854_p10)   ;;  %1932 = vmatpush3.bf16.msra.mxu0 (!%p1854_p10), %v2056_v7  ;;  %v2059_v12 = vld [vmem:[%s2511_s3 + $0xe8] sm:$0xff] (!%p1854_p10)   ;;  %v2343_v15 = vshrl.u32 (!%p1854_p10), %v935_v8, 7 }
 0x126   : > { %905 = vst [vmem:[#allocation2 + $0x40] sm:$0xff] %v889_v24  ;;  %907 = vst [vmem:[#allocation2 + $0x50] sm:$0xff] %v891_v26  ;;  %1954 = vmatpush3.bf16.msra.mxu1 (!%p1854_p10), %v2057_v9  ;;  %1933 = vmatprep.subr.bf16.mxu0 (!%p1854_p10), %v2058_v10  ;;  %v2061_v16 = vld [vmem:[%s2511_s3 + $0xa8] sm:$0xff] (!%p1854_p10)   ;;  %v2062_v17 = vld [vmem:[%s2511_s3 + $0x70] sm:$0xff] (!%p1854_p10)  }
 0x127   : > { %906 = vst [vmem:[#allocation2 + $0x48] sm:$0xff] %v890_v27  ;;  %908 = vst [vmem:[#allocation2 + $0x58] sm:$0xff] %v892_v29  ;;  %1955 = vmatprep.subr.bf16.mxu1 (!%p1854_p10), %v2059_v12  ;;  %v2063_v18 = vld [vmem:[%s2511_s3 + $0xf0] sm:$0xff] (!%p1854_p10)   ;;  %v941_v20 = vsub.s32 (!%p1854_p10), 1, %v2343_v15  ;;  %v949_v22 = vsub.s32 (!%p1854_p10), 3, %v2343_v15  ;;  %v2066_v23 = vld [vmem:[%s2511_s3 + $0x78] sm:$0xff] (!%p1854_p10)  }
 0x128   : > { %v2064_v19 = vld [vmem:[%s2511_s3 + $0x30] sm:$0xff] (!%p1854_p10)   ;;  %v937_v24 = vsub.s32 (!%p1854_p10), 0, %v2343_v15  ;;  %v2067_v13 = vld [vmem:[%s2511_s3 + $0xf8] sm:$0xff] (!%p1854_p10)   ;;  %v945_v25 = vsub.s32 (!%p1854_p10), 2, %v2343_v15  ;;  %v2074_v7 = vld [vmem:[%s2511_s3 + $0x148] sm:$0xff] (!%p1854_p10)  }
 0x129   : > { %1934 = vmatpush3.bf16.msra.mxu0 (!%p1854_p10), %v2060_v14  ;;  %v2065_v21 = vld [vmem:[%s2511_s3 + $0xb0] sm:$0xff] (!%p1854_p10)   ;;  %v2068_v26 = vld [vmem:[%s2511_s3 + $0x38] sm:$0xff] (!%p1854_p10)   ;;  %v2075_v9 = vld [vmem:[%s2511_s3 + $0x1c8] sm:$0xff] (!%p1854_p10)  }
 0x12a   : > { %1956 = vmatpush3.bf16.msra.mxu1 (!%p1854_p10), %v2061_v16  ;;  %1935 = vmatprep.subr.bf16.mxu0 (!%p1854_p10), %v2062_v17  ;;  %v2069_v27 = vld [vmem:[%s2511_s3 + $0xb8] sm:$0xff] (!%p1854_p10)   ;;  %v2076_v10 = vld [vmem:[%s2511_s3 + $0x108] sm:$0xff] (!%p1854_p10)   ;;  %v2078_v14 = vld [vmem:[%s2511_s3 + $0x150] sm:$0xff] (!%p1854_p10)  }
 0x12b   : > { %1957 = vmatprep.subr.bf16.mxu1 (!%p1854_p10), %v2063_v18  ;;  %v2077_v12 = vld [vmem:[%s2511_s3 + $0x188] sm:$0xff] (!%p1854_p10)   ;;  %v2079_v16 = vld [vmem:[%s2511_s3 + $0x1d0] sm:$0xff] (!%p1854_p10)  }
 0x12c   : > { %v918_v28 = vld [vmem:[#allocation2 + $0x8] sm:$0xff] (!%p1854_p10)  ;;  %v2080_v17 = vld [vmem:[%s2511_s3 + $0x110] sm:$0xff] (!%p1854_p10)  }
 0x12d   : > { %1936 = vmatpush3.bf16.msra.mxu0 (!%p1854_p10), %v2064_v19  ;;  %v2081_v18 = vld [vmem:[%s2511_s3 + $0x190] sm:$0xff] (!%p1854_p10)   ;;  %v2082_v19 = vld [vmem:[%s2511_s3 + $0x158] sm:$0xff] (!%p1854_p10)  }
 0x12e   : > { %1958 = vmatpush3.bf16.msra.mxu1 (!%p1854_p10), %v2065_v21  ;;  %1937 = vmatprep.subr.bf16.mxu0 (!%p1854_p10), %v2066_v23  ;;  %v926_v29 = vld [vmem:[#allocation2 + $0x48] sm:$0xff] (!%p1854_p10)  ;;  %v2084_v21 = vld [vmem:[%s2511_s3 + $0x118] sm:$0xff] (!%p1854_p10)   ;;  %v2086_v23 = vld [vmem:[%s2511_s3 + $0x160] sm:$0xff] (!%p1854_p10)  }
 0x12f   : > { %1959 = vmatprep.subr.bf16.mxu1 (!%p1854_p10), %v2067_v13  ;;  %v2088_v13 = vld [vmem:[%s2511_s3 + $0x120] sm:$0xff] (!%p1854_p10)  }
 0x131   : > { %1938 = vmatpush3.bf16.msra.mxu0 (!%p1854_p10), %v2068_v26  ;;  %v2090_v26 = vld [vmem:[%s2511_s3 + $0x168] sm:$0xff] (!%p1854_p10)  }
 0x132   : > { %1960 = vmatpush3.bf16.msra.mxu1 (!%p1854_p10), %v2069_v27  ;;  %v2091_v27 = vld [vmem:[%s2511_s3 + $0x1e8] sm:$0xff] (!%p1854_p10)  }
 0x141   : > { %v829_v33 = vpop.f32.mrb[4].mxu0  ;;  %v872_v37 = vpop.f32.mrb[4].mxu1  ;;  %916 = sbr.rel (%p1854_p10) target bundleno = 591 (0x24f), region = 89 }
 0x142   : > { %v885_v36 = vadd.f32 %v829_v33, %v305_v30  ;;  %v831_v38 = vpop.f32.mrb[5].mxu0  ;;  %v887_v11 = vadd.f32 %v872_v37, %v307_v31  ;;  %v874_v42 = vpop.f32.mrb[5].mxu1  ;;  %v2379_v30 = vld [vmem:[%s2510_s2] sm:$0xff] (!%p1854_p10)  ;;  %v928_v33 = vld [vmem:[#allocation2 + $0x58] sm:$0xff] (!%p1854_p10) }
 0x143   : > { %v886_v41 = vadd.f32 %v831_v38, %v306_v32  ;;  %v833_v43 = vpop.f32.mrb[6].mxu0  ;;  %v888_v45 = vadd.f32 %v874_v42, %v308_v34  ;;  %v876_v47 = vpop.f32.mrb[6].mxu1  ;;  %v942_v31 = vrot.slane (!%p1854_p10), %v2379_v30, %v941_v20  ;;  %v920_v32 = vld [vmem:[#allocation2 + $0x18] sm:$0xff] (!%p1854_p10)  ;;  %v950_v34 = vrot.slane (!%p1854_p10), %v2379_v30, %v949_v22  ;;  %v925_v38 = vld [vmem:[#allocation2 + $0x40] sm:$0xff] (!%p1854_p10) }
 0x144   : > { %901 = vst [vmem:[#allocation2 + $0x20] sm:$0xff] %v885_v36  ;;  %v893_v46 = vadd.f32 %v833_v43, %v313_v35  ;;  %v835_v48 = vpop.f32.mrb[7].mxu0  ;;  %903 = vst [vmem:[#allocation2 + $0x30] sm:$0xff] %v887_v11  ;;  %v895_v49 = vadd.f32 %v876_v47, %v315_v39  ;;  %v878_v51 = vpop.f32.mrb[7].mxu1  ;;  %v917_v35 = vld [vmem:[#allocation2] sm:$0xff] (!%p1854_p10)  ;;  %v938_v36 = vrot.slane (!%p1854_p10), %v2379_v30, %v937_v24  ;;  %v919_v39 = vld [vmem:[#allocation2 + $0x10] sm:$0xff] (!%p1854_p10) }
 0x145   : > { %902 = vst [vmem:[#allocation2 + $0x28] sm:$0xff] %v886_v41  ;;  %v894_v50 = vadd.f32 %v835_v48, %v314_v40  ;;  %904 = vst [vmem:[#allocation2 + $0x38] sm:$0xff] %v888_v45  ;;  %v896_v52 = vadd.f32 %v878_v51, %v316_v44  ;;  %v946_v37 = vrot.slane (!%p1854_p10), %v2379_v30, %v945_v25  ;;  %v927_v40 = vld [vmem:[#allocation2 + $0x50] sm:$0xff] (!%p1854_p10)  ;;  %v2070_v44 = vld [vmem:[%s2511_s3 + $0x140] sm:$0xff] (!%p1854_p10)  }
 0x146   : > { %909 = vst [vmem:[#allocation2 + $0x60] sm:$0xff] %v893_v46  ;;  %911 = vst [vmem:[#allocation2 + $0x70] sm:$0xff] %v895_v49  ;;  %v976_v11 = vadd.f32 (!%p1854_p10), %v942_v31, %v918_v28  ;;  %v984_v41 = vadd.f32 (!%p1854_p10), %v942_v31, %v926_v29  ;;  %v978_v42 = vadd.f32 (!%p1854_p10), %v950_v34, %v920_v32  ;;  %v2071_v49 = vld [vmem:[%s2511_s3 + $0x1c0] sm:$0xff] (!%p1854_p10)   ;;  %1967 = vmatprep.subr.bf16.mxu0 (!%p1854_p10), %v2070_v44  ;;  %v2083_v20 = vld [vmem:[%s2511_s3 + $0x1d8] sm:$0xff] (!%p1854_p10)  }
 0x147   : > { %910 = vst [vmem:[#allocation2 + $0x68] sm:$0xff] %v894_v50  ;;  %912 = vst [vmem:[#allocation2 + $0x78] sm:$0xff] %v896_v52  ;;  %v986_v43 = vadd.f32 (!%p1854_p10), %v950_v34, %v928_v33  ;;  %v975_v45 = vadd.f32 (!%p1854_p10), %v938_v36, %v917_v35  ;;  %v983_v46 = vadd.f32 (!%p1854_p10), %v938_v36, %v925_v38  ;;  %1989 = vmatprep.subr.bf16.mxu1 (!%p1854_p10), %v2071_v49  ;;  %v2085_v22 = vld [vmem:[%s2511_s3 + $0x198] sm:$0xff] (!%p1854_p10)   ;;  %v2087_v24 = vld [vmem:[%s2511_s3 + $0x1e0] sm:$0xff] (!%p1854_p10)  }
 0x148   : > { %v977_v47 = vadd.f32 %v946_v37, %v919_v39  ;;  %v985_v48 = vadd.f32 %v946_v37, %v927_v40  ;;  %vm992_vm0 = vcmp.ge.f32.partialorder %v976_v11, 0.0  ;;  %vm1000_vm1 = vcmp.ge.f32.partialorder %v984_v41, 0.0  ;;  %v2089_v25 = vld [vmem:[%s2511_s3 + $0x1a0] sm:$0xff]   ;;  %v2092_v28 = vld [vmem:[%s2511_s3 + $0x128] sm:$0xff]   ;;  %v2094_v32 = vld [vmem:[%s2511_s3 + $0x170] sm:$0xff]  }
 0x149   : > { %v1008_v50 = vmul.f32 0.01, %v976_v11  ;;  %v1016_v51 = vmul.f32 0.01, %v984_v41  ;;  %vm994_vm2 = vcmp.ge.f32.partialorder %v978_v42, 0.0  ;;  %vm1002_vm3 = vcmp.ge.f32.partialorder %v986_v43, 0.0 }
 0x14a   : > { %v1010_v52 = vmul.f32 0.01, %v978_v42  ;;  %v1018_v53 = vmul.f32 0.01, %v986_v43  ;;  %vm991_vm4 = vcmp.ge.f32.partialorder %v975_v45, 0.0  ;;  %vm999_vm5 = vcmp.ge.f32.partialorder %v983_v46, 0.0 }
 0x14b   : > { %v1024_v54 = vsel %vm992_vm0, %v976_v11, %v1008_v50  ;;  %v1032_v55 = vsel %vm1000_vm1, %v984_v41, %v1016_v51  ;;  %v1007_v59 = vmul.f32 0.01, %v975_v45  ;;  %v1015_v61 = vmul.f32 0.01, %v983_v46  ;;  %v2093_v29 = vld [vmem:[%s2511_s3 + $0x1a8] sm:$0xff]   ;;  %v2095_v34 = vld [vmem:[%s2511_s3 + $0x1f0] sm:$0xff]  }
 0x14c   : > { %v1040_v56 = vpack.c.bf16 %v1032_v55, %v1024_v54  ;;  %v1026_v57 = vsel %vm994_vm2, %v978_v42, %v1010_v52  ;;  %v1034_v58 = vsel %vm1002_vm3, %v986_v43, %v1018_v53  ;;  %vm993_vm6 = vcmp.ge.f32.partialorder %v977_v47, 0.0  ;;  %v2096_v36 = vld [vmem:[%s2511_s3 + $0x130] sm:$0xff]   ;;  %v2098_v40 = vld [vmem:[%s2511_s3 + $0x178] sm:$0xff]   ;;  %v921_v53 = vld [vmem:[#allocation2 + $0x20] sm:$0xff] }
 0x14d   : > { %v1042_v60 = vpack.c.bf16 %v1034_v58, %v1026_v57  ;;  %vm1001_vm7 = vcmp.ge.f32.partialorder %v985_v48, 0.0  ;;  %v1023_v63 = vsel %vm991_vm4, %v975_v45, %v1007_v59  ;;  %v1009_v0 = vmul.f32 0.01, %v977_v47  ;;  %v2097_v37 = vld [vmem:[%s2511_s3 + $0x1b0] sm:$0xff]   ;;  %v2099_v41 = vld [vmem:[%s2511_s3 + $0x1f8] sm:$0xff]   ;;  %v929_v54 = vld [vmem:[#allocation2 + $0x60] sm:$0xff] }
 0x14e   : > { %1598 = vmatprep.mubr.bf16.mxu0 %v1040_v56  ;;  %v1017_v1 = vmul.f32 0.01, %v985_v48  ;;  %v1031_v2 = vsel %vm999_vm5, %v983_v46, %v1015_v61  ;;  %v957_v31 = vsub.s32 5, %v2343_v15  ;;  %v965_v33 = vsub.s32 7, %v2343_v15  ;;  %v2100_v43 = vld [vmem:[%s2511_s3 + $0x138] sm:$0xff]   ;;  %v930_v44 = vld [vmem:[#allocation2 + $0x68] sm:$0xff] }
 0x14f   : > { %1639 = vmatprep.mubr.bf16.mxu1 %v1042_v60  ;;  %v1039_v4 = vpack.c.bf16 %v1031_v2, %v1023_v63  ;;  %v1025_v5 = vsel %vm993_vm6, %v977_v47, %v1009_v0  ;;  %v953_v35 = vsub.s32 4, %v2343_v15  ;;  %v961_v39 = vsub.s32 6, %v2343_v15  ;;  %v922_v15 = vld [vmem:[#allocation2 + $0x28] sm:$0xff]  ;;  %v924_v46 = vld [vmem:[#allocation2 + $0x38] sm:$0xff] }
 0x150   : > { %v1033_v6 = vsel %vm1001_vm7, %v985_v48, %v1017_v1  ;;  %v958_v38 = vrot.slane %v2379_v30, %v957_v31  ;;  %v966_v11 = vrot.slane %v2379_v30, %v965_v33  ;;  %v932_v47 = vld [vmem:[#allocation2 + $0x78] sm:$0xff] }
 0x151   : > { %v1041_v8 = vpack.c.bf16 %v1033_v6, %v1025_v5  ;;  %1599 = vmatmul.mubr.bf16.vlgmr.msra.gmra.mrb[0].mxu0 %v1039_v4  ;;  %v954_v42 = vrot.slane %v2379_v30, %v953_v35  ;;  %v962_v48 = vrot.slane %v2379_v30, %v961_v39  ;;  %v2101_v49 = vld [vmem:[%s2511_s3 + $0x1b8] sm:$0xff]   ;;  %v923_v30 = vld [vmem:[#allocation2 + $0x30] sm:$0xff] }
 0x152   : > { %1968 = vmatpush3.bf16.msra.mxu0 %v2072_v62  ;;  %v980_v45 = vadd.f32 %v958_v38, %v922_v15  ;;  %v988_v50 = vadd.f32 %v958_v38, %v930_v44  ;;  %v982_v51 = vadd.f32 %v966_v11, %v924_v46  ;;  %v990_v52 = vadd.f32 %v966_v11, %v932_v47  ;;  %v931_v62 = vld [vmem:[#allocation2 + $0x70] sm:$0xff] }
 0x153   : > { %1640 = vmatmul.mubr.bf16.vlgmr.msra.gmra.mrb[0].mxu1 %v1041_v8  ;;  %1969 = vmatprep.subr.bf16.mxu0 %v2074_v7  ;;  %v979_v56 = vadd.f32 %v954_v42, %v921_v53  ;;  %v987_v57 = vadd.f32 %v954_v42, %v929_v54  ;;  %v981_v5 = vadd.f32 %v962_v48, %v923_v30 }
 0x154   : > { %1990 = vmatpush3.bf16.msra.mxu1 %v2073_v3  ;;  %vm996_vm8 = vcmp.ge.f32.partialorder %v980_v45, 0.0  ;;  %v1012_v55 = vmul.f32 0.01, %v980_v45  ;;  %vm1004_vm9 = vcmp.ge.f32.partialorder %v988_v50, 0.0  ;;  %v1020_v58 = vmul.f32 0.01, %v988_v50 }
 0x155   : > { %1991 = vmatprep.subr.bf16.mxu1 %v2075_v9  ;;  %vm998_vm10 = vcmp.ge.f32.partialorder %v982_v51, 0.0  ;;  %vm1006_vm11 = vcmp.ge.f32.partialorder %v990_v52, 0.0  ;;  %v1014_v60 = vmul.f32 0.01, %v982_v51  ;;  %v1022_v61 = vmul.f32 0.01, %v990_v52 }
 0x156   : > { %1970 = vmatpush3.bf16.msra.mxu0 %v2076_v10  ;;  %v1028_v59 = vsel %vm996_vm8, %v980_v45, %v1012_v55  ;;  %vm995_vm12 = vcmp.ge.f32.partialorder %v979_v56, 0.0  ;;  %v1036_v63 = vsel %vm1004_vm9, %v988_v50, %v1020_v58  ;;  %vm1003_vm13 = vcmp.ge.f32.partialorder %v987_v57, 0.0 }
 0x157   : > { %1971 = vmatprep.subr.bf16.mxu0 %v2078_v14  ;;  %v1011_v0 = vmul.f32 0.01, %v979_v56  ;;  %v1019_v1 = vmul.f32 0.01, %v987_v57  ;;  %v1044_v2 = vpack.c.bf16 %v1036_v63, %v1028_v59  ;;  %v1030_v3 = vsel %vm998_vm10, %v982_v51, %v1014_v60 }
 0x158   : > { %1992 = vmatpush3.bf16.msra.mxu1 %v2077_v12  ;;  %v1038_v4 = vsel %vm1006_vm11, %v990_v52, %v1022_v61  ;;  %v989_v9 = vadd.f32 %v962_v48, %v931_v62  ;;  %vm997_vm14 = vcmp.ge.f32.partialorder %v981_v5, 0.0  ;;  %v1013_v12 = vmul.f32 0.01, %v981_v5 }
 0x159   : > { %1993 = vmatprep.subr.bf16.mxu1 %v2079_v16  ;;  %v1046_v6 = vpack.c.bf16 %v1038_v4, %v1030_v3  ;;  %v1027_v7 = vsel %vm995_vm12, %v979_v56, %v1011_v0  ;;  %v1035_v8 = vsel %vm1003_vm13, %v987_v57, %v1019_v1  ;;  %1680 = vmatprep.mubr.bf16.mxu0 %v1044_v2 }
 0x15a   : > { %1972 = vmatpush3.bf16.msra.mxu0 %v2080_v17  ;;  %v1043_v10 = vpack.c.bf16 %v1035_v8, %v1027_v7  ;;  %vm1005_vm15 = vcmp.ge.f32.partialorder %v989_v9, 0.0  ;;  %v1021_v14 = vmul.f32 0.01, %v989_v9  ;;  %v1029_v16 = vsel %vm997_vm14, %v981_v5, %v1013_v12 }
 0x15b   : > { %1973 = vmatprep.subr.bf16.mxu0 %v2082_v19  ;;  %1721 = vmatprep.mubr.bf16.mxu1 %v1046_v6 }
 0x15c   : > { %1994 = vmatpush3.bf16.msra.mxu1 %v2081_v18  ;;  %v1037_v17 = vsel %vm1005_vm15, %v989_v9, %v1021_v14 }
 0x15d   : > { %1995 = vmatprep.subr.bf16.mxu1 %v2083_v20  ;;  %v1045_v18 = vpack.c.bf16 %v1037_v17, %v1029_v16 }
 0x15e   : > { %1974 = vmatpush3.bf16.msra.mxu0 %v2084_v21  ;;  %v1855_v21 = vld [vmem:[%s2512_s4] ss:$0 sm:$0xff] }
 0x15f   : > { %1975 = vmatprep.subr.bf16.mxu0 %v2086_v23 }
 0x160   : > { %1996 = vmatpush3.bf16.msra.mxu1 %v2085_v22 }
 0x161   : > { %1997 = vmatprep.subr.bf16.mxu1 %v2087_v24 }
 0x162   : > { %1976 = vmatpush3.bf16.msra.mxu0 %v2088_v13 }
 0x163   : > { %1977 = vmatprep.subr.bf16.mxu0 %v2090_v26 }
 0x164   : > { %1998 = vmatpush3.bf16.msra.mxu1 %v2089_v25 }
 0x165   : > { %1999 = vmatprep.subr.bf16.mxu1 %v2091_v27 }
 0x166   : > { %1978 = vmatpush3.bf16.msra.mxu0 %v2092_v28 }
 0x167   : > { %1979 = vmatprep.subr.bf16.mxu0 %v2094_v32 }
 0x168   : > { %2000 = vmatpush3.bf16.msra.mxu1 %v2093_v29 }
 0x169   : > { %2001 = vmatprep.subr.bf16.mxu1 %v2095_v34 }
 0x16a   : > { %1980 = vmatpush3.bf16.msra.mxu0 %v2096_v36 }
 0x16b   : > { %1981 = vmatprep.subr.bf16.mxu0 %v2098_v40 }
 0x16c   : > { %2002 = vmatpush3.bf16.msra.mxu1 %v2097_v37 }
 0x16d   : > { %2003 = vmatprep.subr.bf16.mxu1 %v2099_v41 }
 0x16e   : > { %1982 = vmatpush3.bf16.msra.mxu0 %v2100_v43 }
 0x170   : > { %2004 = vmatpush3.bf16.msra.mxu1 %v2101_v49 }
 0x171   : > { %1681 = vmatmul.mubr.bf16.vlgmr.msra.gmra.mrb[4].mxu0 %v1043_v10 }
 0x173   : > { %1722 = vmatmul.mubr.bf16.vlgmr.msra.gmra.mrb[4].mxu1 %v1045_v18 }
 0x224   : > { %v1939_v19 = vpop.f32.mrb[0].mxu0 }
 0x225   : > { %v1940_v22 = vpop.f32.mrb[1].mxu0 }
 0x226   : > { %v1961_v20 = vpop.f32.mrb[0].mxu1  ;;  %v1941_v23 = vadd.f32 %v1940_v22, %v1939_v19  ;;  %v1942_v13 = vpop.f32.mrb[2].mxu0 }
 0x227   : > { %v1962_v24 = vpop.f32.mrb[1].mxu1  ;;  %v1943_v27 = vpop.f32.mrb[3].mxu0 }
 0x228   : > { %v1963_v25 = vadd.f32 %v1962_v24, %v1961_v20  ;;  %v1964_v26 = vpop.f32.mrb[2].mxu1  ;;  %v1601_v28 = vadd.f32 %v1941_v23, %v1855_v21  ;;  %v1944_v29 = vadd.f32 %v1943_v27, %v1942_v13 }
 0x229   : > { %v1965_v31 = vpop.f32.mrb[3].mxu1 }
 0x22a   : > { %v1966_v32 = vadd.f32 %v1965_v31, %v1964_v26  ;;  %v1642_v33 = vadd.f32 %v1963_v25, %v1601_v28  ;;  %v1604_v34 = vadd.f32 %v1944_v29, %v1855_v21 }
 0x22c   : > { %v1645_v35 = vadd.f32 %v1966_v32, %v1604_v34 }
 0x244   : > { %v1983_v36 = vpop.f32.mrb[4].mxu0 }
 0x245   : > { %v1984_v37 = vpop.f32.mrb[5].mxu0 }
 0x246   : > { %v1985_v38 = vadd.f32 %v1984_v37, %v1983_v36  ;;  %v1986_v39 = vpop.f32.mrb[6].mxu0  ;;  %v2005_v11 = vpop.f32.mrb[4].mxu1 }
 0x247   : > { %v1987_v40 = vpop.f32.mrb[7].mxu0  ;;  %v2006_v43 = vpop.f32.mrb[5].mxu1 }
 0x248   : > { %v1683_v41 = vadd.f32 %v1985_v38, %v1642_v33  ;;  %v1988_v42 = vadd.f32 %v1987_v40, %v1986_v39  ;;  %v2007_v15 = vadd.f32 %v2006_v43, %v2005_v11  ;;  %v2008_v44 = vpop.f32.mrb[6].mxu1 }
 0x249   : > { %v2009_v46 = vpop.f32.mrb[7].mxu1 }
 0x24a   : > { %v1686_v45 = vadd.f32 %v1988_v42, %v1645_v35  ;;  %v1724_v47 = vadd.f32 %v2007_v15, %v1683_v41  ;;  %v2010_v48 = vadd.f32 %v2009_v46, %v2008_v44 }
 0x24c   : > { %1730 = vst [vmem:[%s2513_s5] sm:$0xff] %v1724_v47  ;;  %v1727_v49 = vadd.f32 %v2010_v48, %v1686_v45 }
 0x24e   : > { %1731 = vst [vmem:[%s2513_s5 + $0x8] sm:$0xff] %v1727_v49 }
 0x24f PF: > { %p12_p11 = scmp.ge.s32.totalorder %s2173_s22, 15   ;;  %s2514_s18 = smov %s2120_s19 }
 0x250   : > { %s2515_s19 = smov %s2180_s25  ;;  %s2516_s20 = smov %s2173_s22 }
 0x251   :  { %14 = sbr.rel (!%p12_p11) target bundleno = 2 (0x2), region = 123 }

</bundles_post_ra>
